<compile_context>
chip_gen: v7x
topology: tpu7x:2x2x1
jax: 0.10.0
libtpu: 0.0.40
codegen_flags: <defaults>
</compile_context>

<pallas_src>
import functools
import numpy as np

import jax
import jax.numpy as jnp
from jax import lax
from jax.experimental import pallas as pl
from jax.experimental.pallas import tpu as pltpu

_MM_DTYPE = jnp.bfloat16       # MXU input dtype (accumulation stays float32)
_RES_DTYPE = jnp.bfloat16      # residual stream dtype between sub-layer kernels
_LN_EPS = 1e-5
_NEG_INF = -1e30


# --------------------------- compiler / tiling utils -------------------------

@functools.lru_cache(maxsize=None)
def _vmem_limit_bytes():
    """Generation-aware scoped-VMEM limit: 3/4 of physical, capped at 96 MiB."""
    try:
        cap = int(getattr(pltpu.get_tpu_info(), "vmem_capacity_bytes"))
        return int(min(96 << 20, (cap * 3) // 4))
    except Exception:
        return 48 << 20          # safe on every generation (v7x has 64 MiB physical)


def _cparams(dimension_semantics):
    return pltpu.CompilerParams(
        dimension_semantics=dimension_semantics,
        vmem_limit_bytes=_vmem_limit_bytes(),
    )


@functools.lru_cache(maxsize=None)
def _single_buffer_ok():
    """Probe (eagerly, once) whether pipeline_mode=pl.Buffered(1) is supported."""
    try:
        def k(x_ref, w_ref, o_ref):
            o_ref[...] = x_ref[...] + w_ref[...]

        f = pl.pallas_call(
            k,
            out_shape=jax.ShapeDtypeStruct((8, 128), jnp.float32),
            grid=(1,),
            in_specs=[
                pl.BlockSpec((8, 128), lambda i: (0, 0)),
                pl.BlockSpec((8, 128), lambda i: (0, 0), pipeline_mode=pl.Buffered(1)),
            ],
            out_specs=pl.BlockSpec((8, 128), lambda i: (0, 0)),
        )
        x = jnp.zeros((8, 128), jnp.float32)
        jax.block_until_ready(f(x, x))
        return True
    except Exception:
        return False


def _const_spec(block_shape, index_map):
    """BlockSpec for weights whose block index never changes: single-buffer them."""
    if _single_buffer_ok():
        return pl.BlockSpec(block_shape, index_map, pipeline_mode=pl.Buffered(1))
    return pl.BlockSpec(block_shape, index_map)


def _seq_tile(L, target=512):
    """Largest tile <= target that tiles L exactly, else the whole axis."""
    if L <= target:
        return L
    for t in (512, 256, 128, 64, 32, 16, 8):
        if t <= target and L % t == 0:
            return t
    return L   # TODO(synk): pad ragged sequence lengths instead of full-slab fallback.


def _row_tile(M, target=512):
    """Row tile for flattened (M, D) kernels; callers pad M up to a multiple of it."""
    t = min(target, M)
    return -(-t // 8) * 8


def _layernorm(y, g, b):
    mean = jnp.mean(y, axis=-1, keepdims=True)
    var = jnp.mean(jnp.square(y - mean), axis=-1, keepdims=True)
    return (y - mean) * lax.rsqrt(var + _LN_EPS) * g + b


# ------------------------ encoder front-end kernel ---------------------------
# linear_in -> LayerNorm (no residual) -> + positional encoding.

def _frontend_kernel(x_ref, w_ref, b_ref, g_ref, be_ref, pe_ref, o_ref):
    x = x_ref[0].astype(_MM_DTYPE)                               # (tl, d_input)
    y = jnp.dot(x, w_ref[...], preferred_element_type=jnp.float32) + b_ref[...]
    y = _layernorm(y, g_ref[...], be_ref[...])
    o_ref[0] = (y + pe_ref[...]).astype(o_ref.dtype)


def encoder_frontend(x, w, b, g, beta, pe):
    B, T, Di = x.shape
    D = w.shape[1]
    tl = _seq_tile(T)
    return pl.pallas_call(
        _frontend_kernel,
        out_shape=jax.ShapeDtypeStruct((B, T, D), _RES_DTYPE),
        grid=(B, T // tl),
        in_specs=[
            pl.BlockSpec((1, tl, Di), lambda bi, ti: (bi, ti, 0)),
            _const_spec((Di, D), lambda bi, ti: (0, 0)),
            _const_spec((1, D), lambda bi, ti: (0, 0)),
            _const_spec((1, D), lambda bi, ti: (0, 0)),
            _const_spec((1, D), lambda bi, ti: (0, 0)),
            pl.BlockSpec((tl, D), lambda bi, ti: (ti, 0)),
        ],
        out_specs=pl.BlockSpec((1, tl, D), lambda bi, ti: (bi, ti, 0)),
        compiler_params=_cparams(("parallel", "parallel")),
    )(x, w, b, g, beta, pe)


# ------------------- fused flash multi-head attention layer ------------------
# Per (batch, q-tile, k-tile) grid step: Q projection (k-tile 0 only), per-head
# K/V projection of the k-tile, online-softmax update, and at the last k-tile the
# output projection + residual + LayerNorm + non-pad query masking.

def _mha_kernel(qlen_ref, klen_ref,
                xq_ref, xkv_ref,
                wq_ref, bq_ref, wk_ref, bk_ref, wv_ref, bv_ref,
                wfc_ref, bfc_ref, g_ref, be_ref,
                o_ref,
                q_scr, m_scr, l_scr, acc_scr,
                *, n_head, d_k, causal):
    b = pl.program_id(0)
    qi = pl.program_id(1)
    ki = pl.program_id(2)
    nk = pl.num_programs(2)
    tq = xq_ref.shape[1]
    tk = xkv_ref.shape[1]

    @pl.when(ki == 0)
    def _init():
        xq = xq_ref[0]                                           # (tq, D) bf16
        inv_temp = jnp.float32(1.0 / np.sqrt(d_k))               # folded into q
        for h in range(n_head):
            qh = jnp.dot(xq, wq_ref[h],
                         preferred_element_type=jnp.float32) + bq_ref[h]
            q_scr[h] = (qh * inv_temp).astype(q_scr.dtype)
        m_scr[...] = jnp.full_like(m_scr, -jnp.inf)
        l_scr[...] = jnp.zeros_like(l_scr)
        acc_scr[...] = jnp.zeros_like(acc_scr)

    # Additive mask bias built once per tile pair (hoisted out of the head loop)
    # from O(1) scalar lengths in SMEM.
    qpos = qi * tq + lax.broadcasted_iota(jnp.int32, (tq, tk), 0)
    kpos = ki * tk + lax.broadcasted_iota(jnp.int32, (tq, tk), 1)
    invalid = kpos >= klen_ref[b]
    if causal:
        invalid = jnp.logical_or(invalid, kpos > qpos)
    bias = jnp.where(invalid, jnp.float32(_NEG_INF), jnp.float32(0.0))

    xkv = xkv_ref[0]                                             # (tk, D) bf16
    for h in range(n_head):                                      # static unroll
        kh = (jnp.dot(xkv, wk_ref[h], preferred_element_type=jnp.float32)
              + bk_ref[h]).astype(_MM_DTYPE)                     # (tk, dk)
        vh = (jnp.dot(xkv, wv_ref[h], preferred_element_type=jnp.float32)
              + bv_ref[h]).astype(_MM_DTYPE)                     # (tk, dv)
        s = lax.dot_general(q_scr[h], kh, (((1,), (1,)), ((), ())),
                            preferred_element_type=jnp.float32) + bias   # (tq, tk)
        m_prev = m_scr[h]
        m_new = jnp.maximum(m_prev, jnp.max(s, axis=-1, keepdims=True))
        alpha = jnp.exp(m_prev - m_new)
        p = jnp.exp(s - m_new)
        l_scr[h] = alpha * l_scr[h] + jnp.sum(p, axis=-1, keepdims=True)
        acc_scr[h] = alpha * acc_scr[h] + jnp.dot(
            p.astype(_MM_DTYPE), vh, preferred_element_type=jnp.float32)
        m_scr[h] = m_new

    @pl.when(ki == nk - 1)
    def _finalize():
        out = bfc_ref[...].astype(jnp.float32)                   # (1, D), broadcasts
        for h in range(n_head):
            # approx reciprocal (~1e-3 rel. err) is fine for inference; use exact
            # division when bit-comparing against the PyTorch reference.
            ctx_h = (acc_scr[h] * pl.reciprocal(l_scr[h], approx=True)
                     ).astype(_MM_DTYPE)                          # (tq, dv)
            out = out + jnp.dot(ctx_h, wfc_ref[h],
                                preferred_element_type=jnp.float32)  # (tq, D)
        residual = xq_ref[0].astype(jnp.float32)
        y = _layernorm(out + residual, g_ref[...], be_ref[...])
        qvalid = (qi * tq + lax.broadcasted_iota(jnp.int32, (tq, 1), 0)
                  ) < qlen_ref[b]
        o_ref[0] = (y * qvalid.astype(jnp.float32)).astype(o_ref.dtype)


def multi_head_attention(p, x_q, x_kv, q_len, k_len, cfg, causal=False):
    """x_q:(B,Lq,D) x_kv:(B,Lk,D) q_len/k_len:(B,) int32 -> (B,Lq,D) bf16."""
    B, Lq, D = x_q.shape
    Lk = x_kv.shape[1]
    H, dk, dv = cfg["n_head"], cfg["d_k"], cfg["d_v"]
    tq = _seq_tile(Lq)
    tk = _seq_tile(Lk)
    grid = (B, Lq // tq, Lk // tk)

    kernel = functools.partial(_mha_kernel, n_head=H, d_k=dk, causal=causal)
    return pl.pallas_call(
        kernel,
        out_shape=jax.ShapeDtypeStruct((B, Lq, D), _RES_DTYPE),
        grid_spec=pltpu.PrefetchScalarGridSpec(
            num_scalar_prefetch=2,
            grid=grid,
            in_specs=[
                pl.BlockSpec((1, tq, D), lambda b, qi, ki, ql, kl: (b, qi, 0)),
                pl.BlockSpec((1, tk, D), lambda b, qi, ki, ql, kl: (b, ki, 0)),
                _const_spec((H, D, dk), lambda b, qi, ki, ql, kl: (0, 0, 0)),
                _const_spec((H, 1, dk), lambda b, qi, ki, ql, kl: (0, 0, 0)),
                _const_spec((H, D, dk), lambda b, qi, ki, ql, kl: (0, 0, 0)),
                _const_spec((H, 1, dk), lambda b, qi, ki, ql, kl: (0, 0, 0)),
                _const_spec((H, D, dv), lambda b, qi, ki, ql, kl: (0, 0, 0)),
                _const_spec((H, 1, dv), lambda b, qi, ki, ql, kl: (0, 0, 0)),
                _const_spec((H, dv, D), lambda b, qi, ki, ql, kl: (0, 0, 0)),
                _const_spec((1, D), lambda b, qi, ki, ql, kl: (0, 0)),
                _const_spec((1, D), lambda b, qi, ki, ql, kl: (0, 0)),
                _const_spec((1, D), lambda b, qi, ki, ql, kl: (0, 0)),
            ],
            out_specs=pl.BlockSpec((1, tq, D), lambda b, qi, ki, ql, kl: (b, qi, 0)),
            scratch_shapes=[
                pltpu.VMEM((H, tq, dk), _MM_DTYPE),      # scaled Q, per head
                pltpu.VMEM((H, tq, 1), jnp.float32),     # running max
                pltpu.VMEM((H, tq, 1), jnp.float32),     # running denom
                pltpu.VMEM((H, tq, dv), jnp.float32),    # running context
            ],
        ),
        compiler_params=_cparams(("parallel", "parallel", "arbitrary")),
    )(q_len, k_len, x_q, x_kv,
      p["w_q"], p["b_q"], p["w_k"], p["b_k"], p["w_v"], p["b_v"],
      p["w_fc"], p["b_fc"], p["ln_g"], p["ln_b"])


# ------------------------- fused feed-forward layer --------------------------
# relu(x@w1+b1)@w2+b2 -> residual + LayerNorm -> non-pad mask (from SMEM length).

def _ffn_kernel(qlen_ref, x_ref, w1_ref, b1_ref, w2_ref, b2_ref, g_ref, be_ref,
                o_ref):
    b = pl.program_id(0)
    ti = pl.program_id(1)
    tl = x_ref.shape[1]
    x = x_ref[0]                                                 # (tl, D) bf16
    x_f = x.astype(jnp.float32)
    hid = jnp.dot(x, w1_ref[...], preferred_element_type=jnp.float32) + b1_ref[...]
    hid = jnp.maximum(hid, 0.0)
    y = jnp.dot(hid.astype(_MM_DTYPE), w2_ref[...],
                preferred_element_type=jnp.float32) + b2_ref[...]
    y = _layernorm(y + x_f, g_ref[...], be_ref[...])
    valid = (ti * tl + lax.broadcasted_iota(jnp.int32, (tl, 1), 0)) < qlen_ref[b]
    o_ref[0] = (y * valid.astype(jnp.float32)).astype(o_ref.dtype)


def positionwise_ffn(p, x, q_len, cfg):
    B, L, D = x.shape
    Di = cfg["d_inner"]
    tl = _seq_tile(L)
    return pl.pallas_call(
        _ffn_kernel,
        out_shape=jax.ShapeDtypeStruct((B, L, D), _RES_DTYPE),
        grid_spec=pltpu.PrefetchScalarGridSpec(
            num_scalar_prefetch=1,
            grid=(B, L // tl),
            in_specs=[
                pl.BlockSpec((1, tl, D), lambda b, t, ql: (b, t, 0)),
                _const_spec((D, Di), lambda b, t, ql: (0, 0)),
                _const_spec((1, Di), lambda b, t, ql: (0, 0)),
                _const_spec((Di, D), lambda b, t, ql: (0, 0)),
                _const_spec((1, D), lambda b, t, ql: (0, 0)),
                _const_spec((1, D), lambda b, t, ql: (0, 0)),
                _const_spec((1, D), lambda b, t, ql: (0, 0)),
            ],
            out_specs=pl.BlockSpec((1, tl, D), lambda b, t, ql: (b, t, 0)),
        ),
        compiler_params=_cparams(("parallel", "parallel")),
    )(q_len, x, p["w1"], p["b1"], p["w2"], p["b2"], p["ln_g"], p["ln_b"])


# -------------------- lane-dense, vocab-tiled logits projection --------------

def _proj_kernel(x_ref, w_ref, o_ref):
    o_ref[...] = jnp.dot(x_ref[...], w_ref[...], preferred_element_type=jnp.float32)


def output_projection(x2, w_padded, vocab):
    """x2:(M,D) @ w_padded:(D, vocab_pad) (bias-free); vocab axis tiled / streamed."""
    M, D = x2.shape
    Np = w_padded.shape[1]
    tm = _row_tile(M)
    Mp = -(-M // tm) * tm
    if Mp != M:
        x2 = jnp.pad(x2, ((0, Mp - M), (0, 0)))
    tn = 512 if Np % 512 == 0 else (256 if Np % 256 == 0 else 128)
    out = pl.pallas_call(
        _proj_kernel,
        out_shape=jax.ShapeDtypeStruct((Mp, Np), jnp.float32),
        grid=(Mp // tm, Np // tn),
        in_specs=[
            pl.BlockSpec((tm, D), lambda i, j: (i, 0)),
            pl.BlockSpec((D, tn), lambda i, j: (0, j)),   # vocab tiles stream vs compute
        ],
        out_specs=pl.BlockSpec((tm, tn), lambda i, j: (i, j)),
        compiler_params=_cparams(("parallel", "parallel")),
    )(x2, w_padded)
    return out[:M, :vocab]


# ------------------------------ model glue -----------------------------------

def positional_encoding_table(max_len, d_model):
    pos = np.arange(max_len, dtype=np.float32)[:, None]
    div = np.exp(np.arange(0, d_model, 2, dtype=np.float32)
                 * -(np.log(10000.0) / d_model))
    pe = np.zeros((max_len, d_model), np.float32)
    pe[:, 0::2] = np.sin(pos * div)
    pe[:, 1::2] = np.cos(pos * div)
    return jnp.asarray(pe)


def encoder_forward(params, padded_input, input_lengths, cfg):
    B, T, _ = padded_input.shape
    D = cfg["d_model"]
    lens = input_lengths.astype(jnp.int32)

    pe = positional_encoding_table(cfg["pe_maxlen"], D)[:T]
    out = encoder_frontend(padded_input, params["w_in"], params["b_in"],
                           params["ln_in_g"], params["ln_in_b"], pe)

    for lp in params["layers"]:
        a = multi_head_attention(lp["slf"], out, out, lens, lens, cfg, causal=False)
        out = positionwise_ffn(lp["ffn"], a, lens, cfg)
    return out


def decoder_forward(params, padded_target, enc_out, input_lengths, cfg):
    B, To = padded_target.shape
    D = cfg["d_model"]
    sos, eos = cfg["sos_id"], cfg["eos_id"]

    # preprocess: prepend <sos>, append <eos> (target preprocessing kept in JAX)
    ys_in = jnp.concatenate(
        [jnp.full((B, 1), sos, padded_target.dtype), padded_target], axis=1)
    ys_out = jnp.concatenate(
        [padded_target, jnp.full((B, 1), eos, padded_target.dtype)], axis=1)
    Lo = To + 1

    # Non-pad length inferred from ys_in != eos (eos is the pad filler in the
    # reference preprocessing; assumes suffix padding).
    tgt_lens = jnp.sum((ys_in != eos).astype(jnp.int32), axis=1)
    in_lens = input_lengths.astype(jnp.int32)

    pe = positional_encoding_table(cfg["pe_maxlen"], D)[:Lo]
    # embedding gather + scale + positional encoding kept in plain JAX (glue)
    out = (params["emb"][ys_in] * cfg["x_logit_scale"] + pe[None]).astype(_RES_DTYPE)

    for lp in params["layers"]:
        a = multi_head_attention(lp["slf"], out, out, tgt_lens, tgt_lens, cfg,
                                 causal=True)
        c = multi_head_attention(lp["enc"], a, enc_out, tgt_lens, in_lens, cfg,
                                 causal=False)
        out = positionwise_ffn(lp["ffn"], c, tgt_lens, cfg)

    logits = output_projection(out.reshape(B * Lo, D), params["w_prj"], cfg["vocab"])
    return logits.reshape(B, Lo, cfg["vocab"]), ys_out


def transformer_forward(params, padded_input, input_lengths, padded_target, cfg):
    enc_out = encoder_forward(params["encoder"], padded_input, input_lengths, cfg)
    pred, gold = decoder_forward(params["decoder"], padded_target, enc_out,
                                 input_lengths, cfg)
    return pred, gold


# ------------------------------- param init ----------------------------------

def _xavier(key, shape):
    a = float(np.sqrt(6.0 / (shape[0] + shape[1])))
    return jax.random.uniform(key, shape, jnp.float32, -a, a)


def _init_mha(key, n_head, d_model, d_k, d_v):
    ks = jax.random.split(key, 4)

    def head_major(k, d_out):
        w = _xavier(k, (d_model, n_head * d_out))                 # Linear(D, H*d_out)
        return jnp.transpose(w.reshape(d_model, n_head, d_out), (1, 0, 2)
                             ).astype(_MM_DTYPE)                  # (H, D, d_out)

    w_fc = _xavier(ks[3], (n_head * d_v, d_model))
    return {
        "w_q": head_major(ks[0], d_k),
        "b_q": jnp.zeros((n_head, 1, d_k), jnp.float32),
        "w_k": head_major(ks[1], d_k),
        "b_k": jnp.zeros((n_head, 1, d_k), jnp.float32),
        "w_v": head_major(ks[2], d_v),
        "b_v": jnp.zeros((n_head, 1, d_v), jnp.float32),
        "w_fc": w_fc.reshape(n_head, d_v, d_model).astype(_MM_DTYPE),   # (H, dv, D)
        "b_fc": jnp.zeros((1, d_model), jnp.float32),
        "ln_g": jnp.ones((1, d_model), jnp.float32),
        "ln_b": jnp.zeros((1, d_model), jnp.float32),
    }


def _init_ffn(key, d_model, d_inner):
    ks = jax.random.split(key, 2)
    return {
        "w1": _xavier(ks[0], (d_model, d_inner)).astype(_MM_DTYPE),
        "b1": jnp.zeros((1, d_inner), jnp.float32),
        "w2": _xavier(ks[1], (d_inner, d_model)).astype(_MM_DTYPE),
        "b2": jnp.zeros((1, d_model), jnp.float32),
        "ln_g": jnp.ones((1, d_model), jnp.float32),
        "ln_b": jnp.zeros((1, d_model), jnp.float32),
    }


def init_params(key, cfg):
    k_enc, k_dec = jax.random.split(key, 2)

    # encoder
    ks = jax.random.split(k_enc, 1 + cfg["n_layers_enc"])
    enc = {
        "w_in": _xavier(ks[0], (cfg["d_input"], cfg["d_model"])).astype(_MM_DTYPE),
        "b_in": jnp.zeros((1, cfg["d_model"]), jnp.float32),
        "ln_in_g": jnp.ones((1, cfg["d_model"]), jnp.float32),
        "ln_in_b": jnp.zeros((1, cfg["d_model"]), jnp.float32),
        "layers": [],
    }
    for i in range(cfg["n_layers_enc"]):
        ka, kf = jax.random.split(ks[1 + i], 2)
        enc["layers"].append({
            "slf": _init_mha(ka, cfg["n_head"], cfg["d_model"], cfg["d_k"], cfg["d_v"]),
            "ffn": _init_ffn(kf, cfg["d_model"], cfg["d_inner"]),
        })

    # decoder
    ks = jax.random.split(k_dec, 2 + cfg["n_layers_dec"])
    vocab_pad = ((cfg["vocab"] + 127) // 128) * 128              # lane-dense logits
    w_prj = _xavier(ks[1], (cfg["d_model"], cfg["vocab"]))
    w_prj_padded = jnp.zeros((cfg["d_model"], vocab_pad), jnp.float32)
    w_prj_padded = w_prj_padded.at[:, :cfg["vocab"]].set(w_prj).astype(_MM_DTYPE)
    dec = {
        "emb": _xavier(ks[0], (cfg["vocab"], cfg["d_model"])),
        "w_prj": w_prj_padded,                                   # tgt_word_prj: no bias
        "layers": [],
    }
    for i in range(cfg["n_layers_dec"]):
        ka, kc, kf = jax.random.split(ks[2 + i], 3)
        dec["layers"].append({
            "slf": _init_mha(ka, cfg["n_head"], cfg["d_model"], cfg["d_k"], cfg["d_v"]),
            "enc": _init_mha(kc, cfg["n_head"], cfg["d_model"], cfg["d_k"], cfg["d_v"]),
            "ffn": _init_ffn(kf, cfg["d_model"], cfg["d_inner"]),
        })

    return {"encoder": enc, "decoder": dec}


# ---------------------------------- main -------------------------------------

if __name__ == "__main__":
    # Small but lane-dense config (d_model and H*d_k multiples of 128).
    cfg = dict(
        d_input=12, d_model=128, d_inner=256,
        n_head=4, d_k=32, d_v=32,
        n_layers_enc=2, n_layers_dec=2,
        vocab=40, sos_id=38, eos_id=39,
        pe_maxlen=128,
        x_logit_scale=1.0,          # tgt_emb_prj_weight_sharing = False
    )

    # Probe Buffered(1) support eagerly (before tracing the model).
    _single_buffer_ok()

    root = jax.random.PRNGKey(0)
    k_params, k_x, k_t = jax.random.split(root, 3)
    params = init_params(k_params, cfg)

    B, T, To = 2, 16, 8
    padded_input = jax.random.normal(k_x, (B, T, cfg["d_input"]), jnp.float32)
    input_lengths = jnp.array([16, 11], jnp.int32)
    padded_target = jax.random.randint(k_t, (B, To), 0, cfg["vocab"] - 2, jnp.int32)

    fwd = jax.jit(lambda p, x, xl, t: transformer_forward(p, x, xl, t, cfg))
    pred, gold = fwd(params, padded_input, input_lengths, padded_target)
    jax.block_until_ready((pred, gold))

    assert pred.shape == (B, To + 1, cfg["vocab"]) and gold.shape == (B, To + 1)
    assert bool(jnp.all(jnp.isfinite(pred)))
    print("KERNEL_OK")
</pallas_src>

<mosaic_0001>
module attributes {stable_mosaic.version = 11 : i64} {
  func.func @k(%arg0: i32, %arg1: memref<8x128xf32, #tpu.memory_space<vmem>>, %arg2: memref<8x128xf32, #tpu.memory_space<vmem>>, %arg3: memref<8x128xf32, #tpu.memory_space<vmem>>) attributes {dimension_semantics = [#tpu.dimension_semantics<arbitrary>], iteration_bounds = array<i64: 1>, scalar_prefetch = 0 : i64, scratch_operands = 0 : i64, tpu.core_type = #tpu.core_type<tc>, window_params = [{pipeline_mode = #tpu.pipeline_mode<synchronous>, transform_indices = @transform_0, window_bounds = array<i64: 8, 128>}, {pipeline_mode = #tpu.pipeline_mode<synchronous>, transform_indices = @transform_1, window_bounds = array<i64: 8, 128>}, {pipeline_mode = #tpu.pipeline_mode<synchronous>, transform_indices = @transform_2, window_bounds = array<i64: 8, 128>}]} {
    %c0 = arith.constant 0 : index
    %c0_0 = arith.constant 0 : index
    %0 = vector.load %arg1[%c0, %c0_0] : memref<8x128xf32, #tpu.memory_space<vmem>>, vector<8x128xf32>
    %c0_1 = arith.constant 0 : index
    %c0_2 = arith.constant 0 : index
    %1 = vector.load %arg2[%c0_1, %c0_2] : memref<8x128xf32, #tpu.memory_space<vmem>>, vector<8x128xf32>
    %2 = arith.addf %0, %1 : vector<8x128xf32>
    %c0_3 = arith.constant 0 : index
    %c0_4 = arith.constant 0 : index
    %3 = vector.load %arg3[%c0_3, %c0_4] : memref<8x128xf32, #tpu.memory_space<vmem>>, vector<8x128xf32>
    tpu.vector_store %arg3[%c0_3, %c0_4], %2 {strides = array<i32>} : memref<8x128xf32, #tpu.memory_space<vmem>>, vector<8x128xf32>,
    return
  }
  func.func @transform_0(%arg0: i32) -> (i32, i32) {
    %c0_i32 = arith.constant 0 : i32
    %c0_i32_0 = arith.constant 0 : i32
    %c0_i32_1 = arith.constant 0 : i32
    return %c0_i32, %c0_i32_0 : i32, i32
  }
  func.func @transform_1(%arg0: i32) -> (i32, i32) {
    %c0_i32 = arith.constant 0 : i32
    %c0_i32_0 = arith.constant 0 : i32
    %c0_i32_1 = arith.constant 0 : i32
    return %c0_i32, %c0_i32_0 : i32, i32
  }
  func.func @transform_2(%arg0: i32) -> (i32, i32) {
    %c0_i32 = arith.constant 0 : i32
    %c0_i32_0 = arith.constant 0 : i32
    %c0_i32_1 = arith.constant 0 : i32
    return %c0_i32, %c0_i32_0 : i32, i32
  }
}

module attributes {stable_mosaic.version = 11 : i64} {
  func.func @_frontend_kernel(%arg0: i32, %arg1: i32, %arg2: memref<1x16x12xf32, #tpu.memory_space<vmem>>, %arg3: memref<12x128xbf16, #tpu.memory_space<vmem>>, %arg4: memref<1x128xf32, #tpu.memory_space<vmem>>, %arg5: memref<1x128xf32, #tpu.memory_space<vmem>>, %arg6: memref<1x128xf32, #tpu.memory_space<vmem>>, %arg7: memref<16x128xf32, #tpu.memory_space<vmem>>, %arg8: memref<1x16x128xbf16, #tpu.memory_space<vmem>>) attributes {dimension_semantics = [#tpu.dimension_semantics<parallel>, #tpu.dimension_semantics<parallel>], iteration_bounds = array<i64: 2, 1>, scalar_prefetch = 0 : i64, scratch_operands = 0 : i64, tpu.core_type = #tpu.core_type<tc>, window_params = [{transform_indices = @transform_0, window_bounds = array<i64: 1, 16, 12>}, {pipeline_mode = #tpu.pipeline_mode<synchronous>, transform_indices = @transform_1, window_bounds = array<i64: 12, 128>}, {pipeline_mode = #tpu.pipeline_mode<synchronous>, transform_indices = @transform_2, window_bounds = array<i64: 1, 128>}, {pipeline_mode = #tpu.pipeline_mode<synchronous>, transform_indices = @transform_3, window_bounds = array<i64: 1, 128>}, {pipeline_mode = #tpu.pipeline_mode<synchronous>, transform_indices = @transform_4, window_bounds = array<i64: 1, 128>}, {transform_indices = @transform_5, window_bounds = array<i64: 16, 128>}, {transform_indices = @transform_6, window_bounds = array<i64: 1, 16, 128>}]} {
    %c0 = arith.constant 0 : index
    %c0_0 = arith.constant 0 : index
    %c0_1 = arith.constant 0 : index
    %0 = vector.load %arg2[%c0, %c0_0, %c0_1] : memref<1x16x12xf32, #tpu.memory_space<vmem>>, vector<1x16x12xf32>
    %1 = vector.shape_cast %0 : vector<1x16x12xf32> to vector<16x12xf32>
    %2 = arith.truncf %1 : vector<16x12xf32> to vector<16x12xbf16>
    %c0_2 = arith.constant 0 : index
    %c0_3 = arith.constant 0 : index
    %3 = vector.load %arg3[%c0_2, %c0_3] : memref<12x128xbf16, #tpu.memory_space<vmem>>, vector<12x128xbf16>
    %cst = arith.constant dense<0.000000e+00> : vector<16x128xf32>
    %4 = tpu.matmul %2, %3, %cst {dimension_numbers = #tpu.dot_dimension_numbers<[1], [0], [0], [1], [0, 0, 1, 1], [], []>} : vector<16x12xbf16>, vector<12x128xbf16>, vector<16x128xf32> -> vector<16x128xf32>
    %c0_4 = arith.constant 0 : index
    %c0_5 = arith.constant 0 : index
    %5 = vector.load %arg4[%c0_4, %c0_5] : memref<1x128xf32, #tpu.memory_space<vmem>>, vector<1x128xf32>
    %6 = vector.broadcast %5 : vector<1x128xf32> to vector<16x128xf32>
    %7 = arith.addf %4, %6 : vector<16x128xf32>
    %c0_6 = arith.constant 0 : index
    %c0_7 = arith.constant 0 : index
    %8 = vector.load %arg5[%c0_6, %c0_7] : memref<1x128xf32, #tpu.memory_space<vmem>>, vector<1x128xf32>
    %c0_8 = arith.constant 0 : index
    %c0_9 = arith.constant 0 : index
    %9 = vector.load %arg6[%c0_8, %c0_9] : memref<1x128xf32, #tpu.memory_space<vmem>>, vector<1x128xf32>
    %cst_10 = arith.constant dense<0.000000e+00> : vector<16xf32>
    %10 = vector.multi_reduction <add>, %7, %cst_10 [1] : vector<16x128xf32> to vector<16xf32>
    %11 = vector.shape_cast %10 : vector<16xf32> to vector<16x1xf32>
    %cst_11 = arith.constant 1.280000e+02 : f32
    %12 = vector.broadcast %cst_11 : f32 to vector<16x1xf32>
    %13 = arith.divf %11, %12 : vector<16x1xf32>
    %14 = vector.broadcast %13 : vector<16x1xf32> to vector<16x128xf32>
    %15 = arith.subf %7, %14 : vector<16x128xf32>
    %16 = arith.mulf %15, %15 : vector<16x128xf32>
    %cst_12 = arith.constant dense<0.000000e+00> : vector<16xf32>
    %17 = vector.multi_reduction <add>, %16, %cst_12 [1] : vector<16x128xf32> to vector<16xf32>
    %18 = vector.shape_cast %17 : vector<16xf32> to vector<16x1xf32>
    %cst_13 = arith.constant 1.280000e+02 : f32
    %19 = vector.broadcast %cst_13 : f32 to vector<16x1xf32>
    %20 = arith.divf %18, %19 : vector<16x1xf32>
    %21 = vector.broadcast %13 : vector<16x1xf32> to vector<16x128xf32>
    %22 = arith.subf %7, %21 : vector<16x128xf32>
    %cst_14 = arith.constant 9.99999974E-6 : f32
    %23 = vector.broadcast %cst_14 : f32 to vector<16x1xf32>
    %24 = arith.addf %20, %23 : vector<16x1xf32>
    %25 = math.rsqrt %24 : vector<16x1xf32>
    %26 = vector.broadcast %25 : vector<16x1xf32> to vector<16x128xf32>
    %27 = arith.mulf %22, %26 : vector<16x128xf32>
    %28 = vector.broadcast %8 : vector<1x128xf32> to vector<16x128xf32>
    %29 = arith.mulf %27, %28 : vector<16x128xf32>
    %30 = vector.broadcast %9 : vector<1x128xf32> to vector<16x128xf32>
    %31 = arith.addf %29, %30 : vector<16x128xf32>
    %c0_15 = arith.constant 0 : index
    %c0_16 = arith.constant 0 : index
    %32 = vector.load %arg7[%c0_15, %c0_16] : memref<16x128xf32, #tpu.memory_space<vmem>>, vector<16x128xf32>
    %33 = arith.addf %31, %32 : vector<16x128xf32>
    %34 = arith.truncf %33 : vector<16x128xf32> to vector<16x128xbf16>
    %c0_17 = arith.constant 0 : index
    %c0_18 = arith.constant 0 : index
    %c0_19 = arith.constant 0 : index
    %35 = vector.load %arg8[%c0_17, %c0_18, %c0_19] : memref<1x16x128xbf16, #tpu.memory_space<vmem>>, vector<1x16x128xbf16>
    %36 = vector.shape_cast %35 : vector<1x16x128xbf16> to vector<16x128xbf16>
    %37 = vector.shape_cast %34 : vector<16x128xbf16> to vector<1x16x128xbf16>
    tpu.vector_store %arg8[%c0_17, %c0_18, %c0_19], %37 {strides = array<i32>} : memref<1x16x128xbf16, #tpu.memory_space<vmem>>, vector<1x16x128xbf16>,
    return
  }
  func.func @transform_0(%arg0: i32, %arg1: i32) -> (i32, i32, i32) {
    %c0_i32 = arith.constant 0 : i32
    %c0_i32_0 = arith.constant 0 : i32
    return %arg0, %arg1, %c0_i32 : i32, i32, i32
  }
  func.func @transform_1(%arg0: i32, %arg1: i32) -> (i32, i32) {
    %c0_i32 = arith.constant 0 : i32
    %c0_i32_0 = arith.constant 0 : i32
    %c0_i32_1 = arith.constant 0 : i32
    return %c0_i32, %c0_i32_0 : i32, i32
  }
  func.func @transform_2(%arg0: i32, %arg1: i32) -> (i32, i32) {
    %c0_i32 = arith.constant 0 : i32
    %c0_i32_0 = arith.constant 0 : i32
    %c0_i32_1 = arith.constant 0 : i32
    return %c0_i32, %c0_i32_0 : i32, i32
  }
  func.func @transform_3(%arg0: i32, %arg1: i32) -> (i32, i32) {
    %c0_i32 = arith.constant 0 : i32
    %c0_i32_0 = arith.constant 0 : i32
    %c0_i32_1 = arith.constant 0 : i32
    return %c0_i32, %c0_i32_0 : i32, i32
  }
  func.func @transform_4(%arg0: i32, %arg1: i32) -> (i32, i32) {
    %c0_i32 = arith.constant 0 : i32
    %c0_i32_0 = arith.constant 0 : i32
    %c0_i32_1 = arith.constant 0 : i32
    return %c0_i32, %c0_i32_0 : i32, i32
  }
  func.func @transform_5(%arg0: i32, %arg1: i32) -> (i32, i32) {
    %c0_i32 = arith.constant 0 : i32
    %c0_i32_0 = arith.constant 0 : i32
    return %arg1, %c0_i32 : i32, i32
  }
  func.func @transform_6(%arg0: i32, %arg1: i32) -> (i32, i32, i32) {
    %c0_i32 = arith.constant 0 : i32
    %c0_i32_0 = arith.constant 0 : i32
    return %arg0, %arg1, %c0_i32 : i32, i32, i32
  }
}

module attributes {stable_mosaic.version = 11 : i64} {
  func.func @_ffn_kernel(%arg0: i32, %arg1: i32, %arg2: memref<2xi32, #tpu.memory_space<smem>>, %arg3: memref<1x16x128xbf16, #tpu.memory_space<vmem>>, %arg4: memref<128x256xbf16, #tpu.memory_space<vmem>>, %arg5: memref<1x256xf32, #tpu.memory_space<vmem>>, %arg6: memref<256x128xbf16, #tpu.memory_space<vmem>>, %arg7: memref<1x128xf32, #tpu.memory_space<vmem>>, %arg8: memref<1x128xf32, #tpu.memory_space<vmem>>, %arg9: memref<1x128xf32, #tpu.memory_space<vmem>>, %arg10: memref<1x16x128xbf16, #tpu.memory_space<vmem>>) attributes {dimension_semantics = [#tpu.dimension_semantics<parallel>, #tpu.dimension_semantics<parallel>], iteration_bounds = array<i64: 2, 1>, scalar_prefetch = 1 : i64, scratch_operands = 0 : i64, tpu.core_type = #tpu.core_type<tc>, window_params = [{transform_indices = @transform_0, window_bounds = array<i64: 1, 16, 128>}, {pipeline_mode = #tpu.pipeline_mode<synchronous>, transform_indices = @transform_1, window_bounds = array<i64: 128, 256>}, {pipeline_mode = #tpu.pipeline_mode<synchronous>, transform_indices = @transform_2, window_bounds = array<i64: 1, 256>}, {pipeline_mode = #tpu.pipeline_mode<synchronous>, transform_indices = @transform_3, window_bounds = array<i64: 256, 128>}, {pipeline_mode = #tpu.pipeline_mode<synchronous>, transform_indices = @transform_4, window_bounds = array<i64: 1, 128>}, {pipeline_mode = #tpu.pipeline_mode<synchronous>, transform_indices = @transform_5, window_bounds = array<i64: 1, 128>}, {pipeline_mode = #tpu.pipeline_mode<synchronous>, transform_indices = @transform_6, window_bounds = array<i64: 1, 128>}, {transform_indices = @transform_7, window_bounds = array<i64: 1, 16, 128>}]} {
    %c0 = arith.constant 0 : index
    %c0_0 = arith.constant 0 : index
    %c0_1 = arith.constant 0 : index
    %0 = vector.load %arg3[%c0, %c0_0, %c0_1] : memref<1x16x128xbf16, #tpu.memory_space<vmem>>, vector<1x16x128xbf16>
    %1 = vector.shape_cast %0 : vector<1x16x128xbf16> to vector<16x128xbf16>
    %2 = arith.extf %1 : vector<16x128xbf16> to vector<16x128xf32>
    %c0_2 = arith.constant 0 : index
    %c0_3 = arith.constant 0 : index
    %3 = vector.load %arg4[%c0_2, %c0_3] : memref<128x256xbf16, #tpu.memory_space<vmem>>, vector<128x256xbf16>
    %cst = arith.constant dense<0.000000e+00> : vector<16x256xf32>
    %4 = tpu.matmul %1, %3, %cst {dimension_numbers = #tpu.dot_dimension_numbers<[1], [0], [0], [1], [0, 0, 1, 1], [], []>} : vector<16x128xbf16>, vector<128x256xbf16>, vector<16x256xf32> -> vector<16x256xf32>
    %c0_4 = arith.constant 0 : index
    %c0_5 = arith.constant 0 : index
    %5 = vector.load %arg5[%c0_4, %c0_5] : memref<1x256xf32, #tpu.memory_space<vmem>>, vector<1x256xf32>
    %6 = vector.broadcast %5 : vector<1x256xf32> to vector<16x256xf32>
    %7 = arith.addf %4, %6 : vector<16x256xf32>
    %cst_6 = arith.constant 0.000000e+00 : f32
    %8 = vector.broadcast %cst_6 : f32 to vector<16x256xf32>
    %9 = arith.maximumf %7, %8 : vector<16x256xf32>
    %10 = arith.truncf %9 : vector<16x256xf32> to vector<16x256xbf16>
    %c0_7 = arith.constant 0 : index
    %c0_8 = arith.constant 0 : index
    %11 = vector.load %arg6[%c0_7, %c0_8] : memref<256x128xbf16, #tpu.memory_space<vmem>>, vector<256x128xbf16>
    %cst_9 = arith.constant dense<0.000000e+00> : vector<16x128xf32>
    %12 = tpu.matmul %10, %11, %cst_9 {dimension_numbers = #tpu.dot_dimension_numbers<[1], [0], [0], [1], [0, 0, 1, 1], [], []>} : vector<16x256xbf16>, vector<256x128xbf16>, vector<16x128xf32> -> vector<16x128xf32>
    %c0_10 = arith.constant 0 : index
    %c0_11 = arith.constant 0 : index
    %13 = vector.load %arg7[%c0_10, %c0_11] : memref<1x128xf32, #tpu.memory_space<vmem>>, vector<1x128xf32>
    %14 = vector.broadcast %13 : vector<1x128xf32> to vector<16x128xf32>
    %15 = arith.addf %12, %14 : vector<16x128xf32>
    %16 = arith.addf %15, %2 : vector<16x128xf32>
    %c0_12 = arith.constant 0 : index
    %c0_13 = arith.constant 0 : index
    %17 = vector.load %arg8[%c0_12, %c0_13] : memref<1x128xf32, #tpu.memory_space<vmem>>, vector<1x128xf32>
    %c0_14 = arith.constant 0 : index
    %c0_15 = arith.constant 0 : index
    %18 = vector.load %arg9[%c0_14, %c0_15] : memref<1x128xf32, #tpu.memory_space<vmem>>, vector<1x128xf32>
    %cst_16 = arith.constant dense<0.000000e+00> : vector<16xf32>
    %19 = vector.multi_reduction <add>, %16, %cst_16 [1] : vector<16x128xf32> to vector<16xf32>
    %20 = vector.shape_cast %19 : vector<16xf32> to vector<16x1xf32>
    %cst_17 = arith.constant 1.280000e+02 : f32
    %21 = vector.broadcast %cst_17 : f32 to vector<16x1xf32>
    %22 = arith.divf %20, %21 : vector<16x1xf32>
    %23 = vector.broadcast %22 : vector<16x1xf32> to vector<16x128xf32>
    %24 = arith.subf %16, %23 : vector<16x128xf32>
    %25 = arith.mulf %24, %24 : vector<16x128xf32>
    %cst_18 = arith.constant dense<0.000000e+00> : vector<16xf32>
    %26 = vector.multi_reduction <add>, %25, %cst_18 [1] : vector<16x128xf32> to vector<16xf32>
    %27 = vector.shape_cast %26 : vector<16xf32> to vector<16x1xf32>
    %cst_19 = arith.constant 1.280000e+02 : f32
    %28 = vector.broadcast %cst_19 : f32 to vector<16x1xf32>
    %29 = arith.divf %27, %28 : vector<16x1xf32>
    %30 = vector.broadcast %22 : vector<16x1xf32> to vector<16x128xf32>
    %31 = arith.subf %16, %30 : vector<16x128xf32>
    %cst_20 = arith.constant 9.99999974E-6 : f32
    %32 = vector.broadcast %cst_20 : f32 to vector<16x1xf32>
    %33 = arith.addf %29, %32 : vector<16x1xf32>
    %34 = math.rsqrt %33 : vector<16x1xf32>
    %35 = vector.broadcast %34 : vector<16x1xf32> to vector<16x128xf32>
    %36 = arith.mulf %31, %35 : vector<16x128xf32>
    %37 = vector.broadcast %17 : vector<1x128xf32> to vector<16x128xf32>
    %38 = arith.mulf %36, %37 : vector<16x128xf32>
    %39 = vector.broadcast %18 : vector<1x128xf32> to vector<16x128xf32>
    %40 = arith.addf %38, %39 : vector<16x128xf32>
    %c16_i32 = arith.constant 16 : i32
    %41 = arith.muli %arg1, %c16_i32 : i32
    %42 = tpu.iota {dimensions = array<i32: 0>} : vector<16x1xi32>
    %43 = vector.broadcast %41 : i32 to vector<16x1xi32>
    %44 = arith.addi %43, %42 : vector<16x1xi32>
    %45 = arith.index_cast %arg0 : i32 to index
    %46 = memref.load %arg2[%45] : memref<2xi32, #tpu.memory_space<smem>>
    %47 = vector.broadcast %46 : i32 to vector<16x1xi32>
    %48 = arith.cmpi slt, %44, %47 : vector<16x1xi32>
    %49 = arith.extui %48 : vector<16x1xi1> to vector<16x1xi32>
    %50 = arith.sitofp %49 : vector<16x1xi32> to vector<16x1xf32>
    %51 = vector.broadcast %50 : vector<16x1xf32> to vector<16x128xf32>
    %52 = arith.mulf %40, %51 : vector<16x128xf32>
    %53 = arith.truncf %52 : vector<16x128xf32> to vector<16x128xbf16>
    %c0_21 = arith.constant 0 : index
    %c0_22 = arith.constant 0 : index
    %c0_23 = arith.constant 0 : index
    %54 = vector.load %arg10[%c0_21, %c0_22, %c0_23] : memref<1x16x128xbf16, #tpu.memory_space<vmem>>, vector<1x16x128xbf16>
    %55 = vector.shape_cast %54 : vector<1x16x128xbf16> to vector<16x128xbf16>
    %56 = vector.shape_cast %53 : vector<16x128xbf16> to vector<1x16x128xbf16>
    tpu.vector_store %arg10[%c0_21, %c0_22, %c0_23], %56 {strides = array<i32>} : memref<1x16x128xbf16, #tpu.memory_space<vmem>>, vector<1x16x128xbf16>,
    return
  }
  func.func @transform_0(%arg0: i32, %arg1: i32, %arg2: memref<2xi32, #tpu.memory_space<smem>>) -> (i32, i32, i32) {
    %c0_i32 = arith.constant 0 : i32
    %c0_i32_0 = arith.constant 0 : i32
    return %arg0, %arg1, %c0_i32 : i32, i32, i32
  }
  func.func @transform_1(%arg0: i32, %arg1: i32, %arg2: memref<2xi32, #tpu.memory_space<smem>>) -> (i32, i32) {
    %c0_i32 = arith.constant 0 : i32
    %c0_i32_0 = arith.constant 0 : i32
    %c0_i32_1 = arith.constant 0 : i32
    return %c0_i32, %c0_i32_0 : i32, i32
  }
  func.func @transform_2(%arg0: i32, %arg1: i32, %arg2: memref<2xi32, #tpu.memory_space<smem>>) -> (i32, i32) {
    %c0_i32 = arith.constant 0 : i32
    %c0_i32_0 = arith.constant 0 : i32
    %c0_i32_1 = arith.constant 0 : i32
    return %c0_i32, %c0_i32_0 : i32, i32
  }
  func.func @transform_3(%arg0: i32, %arg1: i32, %arg2: memref<2xi32, #tpu.memory_space<smem>>) -> (i32, i32) {
    %c0_i32 = arith.constant 0 : i32
    %c0_i32_0 = arith.constant 0 : i32
    %c0_i32_1 = arith.constant 0 : i32
    return %c0_i32, %c0_i32_0 : i32, i32
  }
  func.func @transform_4(%arg0: i32, %arg1: i32, %arg2: memref<2xi32, #tpu.memory_space<smem>>) -> (i32, i32) {
    %c0_i32 = arith.constant 0 : i32
    %c0_i32_0 = arith.constant 0 : i32
    %c0_i32_1 = arith.constant 0 : i32
    return %c0_i32, %c0_i32_0 : i32, i32
  }
  func.func @transform_5(%arg0: i32, %arg1: i32, %arg2: memref<2xi32, #tpu.memory_space<smem>>) -> (i32, i32) {
    %c0_i32 = arith.constant 0 : i32
    %c0_i32_0 = arith.constant 0 : i32
    %c0_i32_1 = arith.constant 0 : i32
    return %c0_i32, %c0_i32_0 : i32, i32
  }
  func.func @transform_6(%arg0: i32, %arg1: i32, %arg2: memref<2xi32, #tpu.memory_space<smem>>) -> (i32, i32) {
    %c0_i32 = arith.constant 0 : i32
    %c0_i32_0 = arith.constant 0 : i32
    %c0_i32_1 = arith.constant 0 : i32
    return %c0_i32, %c0_i32_0 : i32, i32
  }
  func.func @transform_7(%arg0: i32, %arg1: i32, %arg2: memref<2xi32, #tpu.memory_space<smem>>) -> (i32, i32, i32) {
    %c0_i32 = arith.constant 0 : i32
    %c0_i32_0 = arith.constant 0 : i32
    return %arg0, %arg1, %c0_i32 : i32, i32, i32
  }
}

module attributes {stable_mosaic.version = 11 : i64} {
  func.func @_mha_kernel(%arg0: i32, %arg1: i32, %arg2: i32, %arg3: memref<2xi32, #tpu.memory_space<smem>>, %arg4: memref<2xi32, #tpu.memory_space<smem>>, %arg5: memref<1x9x128xbf16, #tpu.memory_space<vmem>>, %arg6: memref<1x9x128xbf16, #tpu.memory_space<vmem>>, %arg7: memref<4x128x32xbf16, #tpu.memory_space<vmem>>, %arg8: memref<4x1x32xf32, #tpu.memory_space<vmem>>, %arg9: memref<4x128x32xbf16, #tpu.memory_space<vmem>>, %arg10: memref<4x1x32xf32, #tpu.memory_space<vmem>>, %arg11: memref<4x128x32xbf16, #tpu.memory_space<vmem>>, %arg12: memref<4x1x32xf32, #tpu.memory_space<vmem>>, %arg13: memref<4x32x128xbf16, #tpu.memory_space<vmem>>, %arg14: memref<1x128xf32, #tpu.memory_space<vmem>>, %arg15: memref<1x128xf32, #tpu.memory_space<vmem>>, %arg16: memref<1x128xf32, #tpu.memory_space<vmem>>, %arg17: memref<1x9x128xbf16, #tpu.memory_space<vmem>>, %arg18: memref<4x9x32xbf16, #tpu.memory_space<vmem>>, %arg19: memref<4x9x1xf32, #tpu.memory_space<vmem>>, %arg20: memref<4x9x1xf32, #tpu.memory_space<vmem>>, %arg21: memref<4x9x32xf32, #tpu.memory_space<vmem>>) attributes {dimension_semantics = [#tpu.dimension_semantics<parallel>, #tpu.dimension_semantics<parallel>, #tpu.dimension_semantics<arbitrary>], iteration_bounds = array<i64: 2, 1, 1>, scalar_prefetch = 2 : i64, scratch_operands = 4 : i64, tpu.core_type = #tpu.core_type<tc>, window_params = [{transform_indices = @transform_0, window_bounds = array<i64: 1, 9, 128>}, {transform_indices = @transform_1, window_bounds = array<i64: 1, 9, 128>}, {pipeline_mode = #tpu.pipeline_mode<synchronous>, transform_indices = @transform_2, window_bounds = array<i64: 4, 128, 32>}, {pipeline_mode = #tpu.pipeline_mode<synchronous>, transform_indices = @transform_3, window_bounds = array<i64: 4, 1, 32>}, {pipeline_mode = #tpu.pipeline_mode<synchronous>, transform_indices = @transform_4, window_bounds = array<i64: 4, 128, 32>}, {pipeline_mode = #tpu.pipeline_mode<synchronous>, transform_indices = @transform_5, window_bounds = array<i64: 4, 1, 32>}, {pipeline_mode = #tpu.pipeline_mode<synchronous>, transform_indices = @transform_6, window_bounds = array<i64: 4, 128, 32>}, {pipeline_mode = #tpu.pipeline_mode<synchronous>, transform_indices = @transform_7, window_bounds = array<i64: 4, 1, 32>}, {pipeline_mode = #tpu.pipeline_mode<synchronous>, transform_indices = @transform_8, window_bounds = array<i64: 4, 32, 128>}, {pipeline_mode = #tpu.pipeline_mode<synchronous>, transform_indices = @transform_9, window_bounds = array<i64: 1, 128>}, {pipeline_mode = #tpu.pipeline_mode<synchronous>, transform_indices = @transform_10, window_bounds = array<i64: 1, 128>}, {pipeline_mode = #tpu.pipeline_mode<synchronous>, transform_indices = @transform_11, window_bounds = array<i64: 1, 128>}, {transform_indices = @transform_12, window_bounds = array<i64: 1, 9, 128>}]} {
    %c0_i32 = arith.constant 0 : i32
    %0 = arith.cmpi eq, %arg2, %c0_i32 : i32
    %1 = arith.extui %0 : i1 to i32
    %c0_i32_0 = arith.constant 0 : i32
    %2 = arith.cmpi ne, %1, %c0_i32_0 : i32
    scf.if %2 {
      %c0_160 = arith.constant 0 : index
      %c0_161 = arith.constant 0 : index
      %c0_162 = arith.constant 0 : index
      %233 = vector.load %arg5[%c0_160, %c0_161, %c0_162] : memref<1x9x128xbf16, #tpu.memory_space<vmem>>, vector<1x9x128xbf16>
      %234 = vector.shape_cast %233 : vector<1x9x128xbf16> to vector<9x128xbf16>
      %c0_163 = arith.constant 0 : index
      %c0_164 = arith.constant 0 : index
      %c0_165 = arith.constant 0 : index
      %235 = vector.load %arg7[%c0_163, %c0_164, %c0_165] : memref<4x128x32xbf16, #tpu.memory_space<vmem>>, vector<1x128x32xbf16>
      %236 = vector.shape_cast %235 : vector<1x128x32xbf16> to vector<128x32xbf16>
      %cst_166 = arith.constant dense<0.000000e+00> : vector<9x32xf32>
      %237 = tpu.matmul %234, %236, %cst_166 {dimension_numbers = #tpu.dot_dimension_numbers<[1], [0], [0], [1], [0, 0, 1, 1], [], []>} : vector<9x128xbf16>, vector<128x32xbf16>, vector<9x32xf32> -> vector<9x32xf32>
      %c0_167 = arith.constant 0 : index
      %c0_168 = arith.constant 0 : index
      %c0_169 = arith.constant 0 : index
      %238 = vector.load %arg8[%c0_167, %c0_168, %c0_169] : memref<4x1x32xf32, #tpu.memory_space<vmem>>, vector<1x1x32xf32>
      %239 = vector.shape_cast %238 : vector<1x1x32xf32> to vector<1x32xf32>
      %240 = vector.broadcast %239 : vector<1x32xf32> to vector<9x32xf32>
      %241 = arith.addf %237, %240 : vector<9x32xf32>
      %cst_170 = arith.constant 0.176776692 : f32
      %242 = vector.broadcast %cst_170 : f32 to vector<9x32xf32>
      %243 = arith.mulf %241, %242 : vector<9x32xf32>
      %244 = arith.truncf %243 : vector<9x32xf32> to vector<9x32xbf16>
      %c0_171 = arith.constant 0 : index
      %c0_172 = arith.constant 0 : index
      %c0_173 = arith.constant 0 : index
      %245 = vector.load %arg18[%c0_171, %c0_172, %c0_173] : memref<4x9x32xbf16, #tpu.memory_space<vmem>>, vector<1x9x32xbf16>
      %246 = vector.shape_cast %245 : vector<1x9x32xbf16> to vector<9x32xbf16>
      %247 = vector.shape_cast %244 : vector<9x32xbf16> to vector<1x9x32xbf16>
      tpu.vector_store %arg18[%c0_171, %c0_172, %c0_173], %247 {strides = array<i32>} : memref<4x9x32xbf16, #tpu.memory_space<vmem>>, vector<1x9x32xbf16>,
      %c1_174 = arith.constant 1 : index
      %c0_175 = arith.constant 0 : index
      %c0_176 = arith.constant 0 : index
      %248 = vector.load %arg7[%c1_174, %c0_175, %c0_176] : memref<4x128x32xbf16, #tpu.memory_space<vmem>>, vector<1x128x32xbf16>
      %249 = vector.shape_cast %248 : vector<1x128x32xbf16> to vector<128x32xbf16>
      %cst_177 = arith.constant dense<0.000000e+00> : vector<9x32xf32>
      %250 = tpu.matmul %234, %249, %cst_177 {dimension_numbers = #tpu.dot_dimension_numbers<[1], [0], [0], [1], [0, 0, 1, 1], [], []>} : vector<9x128xbf16>, vector<128x32xbf16>, vector<9x32xf32> -> vector<9x32xf32>
      %c1_178 = arith.constant 1 : index
      %c0_179 = arith.constant 0 : index
      %c0_180 = arith.constant 0 : index
      %251 = vector.load %arg8[%c1_178, %c0_179, %c0_180] : memref<4x1x32xf32, #tpu.memory_space<vmem>>, vector<1x1x32xf32>
      %252 = vector.shape_cast %251 : vector<1x1x32xf32> to vector<1x32xf32>
      %253 = vector.broadcast %252 : vector<1x32xf32> to vector<9x32xf32>
      %254 = arith.addf %250, %253 : vector<9x32xf32>
      %cst_181 = arith.constant 0.176776692 : f32
      %255 = vector.broadcast %cst_181 : f32 to vector<9x32xf32>
      %256 = arith.mulf %254, %255 : vector<9x32xf32>
      %257 = arith.truncf %256 : vector<9x32xf32> to vector<9x32xbf16>
      %c1_182 = arith.constant 1 : index
      %c0_183 = arith.constant 0 : index
      %c0_184 = arith.constant 0 : index
      %258 = vector.load %arg18[%c1_182, %c0_183, %c0_184] : memref<4x9x32xbf16, #tpu.memory_space<vmem>>, vector<1x9x32xbf16>
      %259 = vector.shape_cast %258 : vector<1x9x32xbf16> to vector<9x32xbf16>
      %260 = vector.shape_cast %257 : vector<9x32xbf16> to vector<1x9x32xbf16>
      tpu.vector_store %arg18[%c1_182, %c0_183, %c0_184], %260 {strides = array<i32>} : memref<4x9x32xbf16, #tpu.memory_space<vmem>>, vector<1x9x32xbf16>,
      %c2_185 = arith.constant 2 : index
      %c0_186 = arith.constant 0 : index
      %c0_187 = arith.constant 0 : index
      %261 = vector.load %arg7[%c2_185, %c0_186, %c0_187] : memref<4x128x32xbf16, #tpu.memory_space<vmem>>, vector<1x128x32xbf16>
      %262 = vector.shape_cast %261 : vector<1x128x32xbf16> to vector<128x32xbf16>
      %cst_188 = arith.constant dense<0.000000e+00> : vector<9x32xf32>
      %263 = tpu.matmul %234, %262, %cst_188 {dimension_numbers = #tpu.dot_dimension_numbers<[1], [0], [0], [1], [0, 0, 1, 1], [], []>} : vector<9x128xbf16>, vector<128x32xbf16>, vector<9x32xf32> -> vector<9x32xf32>
      %c2_189 = arith.constant 2 : index
      %c0_190 = arith.constant 0 : index
      %c0_191 = arith.constant 0 : index
      %264 = vector.load %arg8[%c2_189, %c0_190, %c0_191] : memref<4x1x32xf32, #tpu.memory_space<vmem>>, vector<1x1x32xf32>
      %265 = vector.shape_cast %264 : vector<1x1x32xf32> to vector<1x32xf32>
      %266 = vector.broadcast %265 : vector<1x32xf32> to vector<9x32xf32>
      %267 = arith.addf %263, %266 : vector<9x32xf32>
      %cst_192 = arith.constant 0.176776692 : f32
      %268 = vector.broadcast %cst_192 : f32 to vector<9x32xf32>
      %269 = arith.mulf %267, %268 : vector<9x32xf32>
      %270 = arith.truncf %269 : vector<9x32xf32> to vector<9x32xbf16>
      %c2_193 = arith.constant 2 : index
      %c0_194 = arith.constant 0 : index
      %c0_195 = arith.constant 0 : index
      %271 = vector.load %arg18[%c2_193, %c0_194, %c0_195] : memref<4x9x32xbf16, #tpu.memory_space<vmem>>, vector<1x9x32xbf16>
      %272 = vector.shape_cast %271 : vector<1x9x32xbf16> to vector<9x32xbf16>
      %273 = vector.shape_cast %270 : vector<9x32xbf16> to vector<1x9x32xbf16>
      tpu.vector_store %arg18[%c2_193, %c0_194, %c0_195], %273 {strides = array<i32>} : memref<4x9x32xbf16, #tpu.memory_space<vmem>>, vector<1x9x32xbf16>,
      %c3_196 = arith.constant 3 : index
      %c0_197 = arith.constant 0 : index
      %c0_198 = arith.constant 0 : index
      %274 = vector.load %arg7[%c3_196, %c0_197, %c0_198] : memref<4x128x32xbf16, #tpu.memory_space<vmem>>, vector<1x128x32xbf16>
      %275 = vector.shape_cast %274 : vector<1x128x32xbf16> to vector<128x32xbf16>
      %cst_199 = arith.constant dense<0.000000e+00> : vector<9x32xf32>
      %276 = tpu.matmul %234, %275, %cst_199 {dimension_numbers = #tpu.dot_dimension_numbers<[1], [0], [0], [1], [0, 0, 1, 1], [], []>} : vector<9x128xbf16>, vector<128x32xbf16>, vector<9x32xf32> -> vector<9x32xf32>
      %c3_200 = arith.constant 3 : index
      %c0_201 = arith.constant 0 : index
      %c0_202 = arith.constant 0 : index
      %277 = vector.load %arg8[%c3_200, %c0_201, %c0_202] : memref<4x1x32xf32, #tpu.memory_space<vmem>>, vector<1x1x32xf32>
      %278 = vector.shape_cast %277 : vector<1x1x32xf32> to vector<1x32xf32>
      %279 = vector.broadcast %278 : vector<1x32xf32> to vector<9x32xf32>
      %280 = arith.addf %276, %279 : vector<9x32xf32>
      %cst_203 = arith.constant 0.176776692 : f32
      %281 = vector.broadcast %cst_203 : f32 to vector<9x32xf32>
      %282 = arith.mulf %280, %281 : vector<9x32xf32>
      %283 = arith.truncf %282 : vector<9x32xf32> to vector<9x32xbf16>
      %c3_204 = arith.constant 3 : index
      %c0_205 = arith.constant 0 : index
      %c0_206 = arith.constant 0 : index
      %284 = vector.load %arg18[%c3_204, %c0_205, %c0_206] : memref<4x9x32xbf16, #tpu.memory_space<vmem>>, vector<1x9x32xbf16>
      %285 = vector.shape_cast %284 : vector<1x9x32xbf16> to vector<9x32xbf16>
      %286 = vector.shape_cast %283 : vector<9x32xbf16> to vector<1x9x32xbf16>
      tpu.vector_store %arg18[%c3_204, %c0_205, %c0_206], %286 {strides = array<i32>} : memref<4x9x32xbf16, #tpu.memory_space<vmem>>, vector<1x9x32xbf16>,
      %cst_207 = arith.constant 0xFF800000 : f32
      %287 = vector.broadcast %cst_207 : f32 to vector<4x9x1xf32>
      %c0_208 = arith.constant 0 : index
      %c0_209 = arith.constant 0 : index
      %c0_210 = arith.constant 0 : index
      %288 = vector.load %arg19[%c0_208, %c0_209, %c0_210] : memref<4x9x1xf32, #tpu.memory_space<vmem>>, vector<4x9x1xf32>
      tpu.vector_store %arg19[%c0_208, %c0_209, %c0_210], %287 {strides = array<i32>} : memref<4x9x1xf32, #tpu.memory_space<vmem>>, vector<4x9x1xf32>,
      %cst_211 = arith.constant 0.000000e+00 : f32
      %289 = vector.broadcast %cst_211 : f32 to vector<4x9x1xf32>
      %c0_212 = arith.constant 0 : index
      %c0_213 = arith.constant 0 : index
      %c0_214 = arith.constant 0 : index
      %290 = vector.load %arg20[%c0_212, %c0_213, %c0_214] : memref<4x9x1xf32, #tpu.memory_space<vmem>>, vector<4x9x1xf32>
      tpu.vector_store %arg20[%c0_212, %c0_213, %c0_214], %289 {strides = array<i32>} : memref<4x9x1xf32, #tpu.memory_space<vmem>>, vector<4x9x1xf32>,
      %cst_215 = arith.constant 0.000000e+00 : f32
      %291 = vector.broadcast %cst_215 : f32 to vector<4x9x32xf32>
      %c0_216 = arith.constant 0 : index
      %c0_217 = arith.constant 0 : index
      %c0_218 = arith.constant 0 : index
      %292 = vector.load %arg21[%c0_216, %c0_217, %c0_218] : memref<4x9x32xf32, #tpu.memory_space<vmem>>, vector<4x9x32xf32>
      tpu.vector_store %arg21[%c0_216, %c0_217, %c0_218], %291 {strides = array<i32>} : memref<4x9x32xf32, #tpu.memory_space<vmem>>, vector<4x9x32xf32>,
    } else {
    }
    %c9_i32 = arith.constant 9 : i32
    %3 = arith.muli %arg1, %c9_i32 : i32
    %4 = tpu.iota {dimensions = array<i32: 0>} : vector<9x9xi32>
    %5 = vector.broadcast %3 : i32 to vector<9x9xi32>
    %6 = arith.addi %5, %4 : vector<9x9xi32>
    %c9_i32_1 = arith.constant 9 : i32
    %7 = arith.muli %arg2, %c9_i32_1 : i32
    %8 = tpu.iota {dimensions = array<i32: 1>} : vector<9x9xi32>
    %9 = vector.broadcast %7 : i32 to vector<9x9xi32>
    %10 = arith.addi %9, %8 : vector<9x9xi32>
    %11 = arith.index_cast %arg0 : i32 to index
    %12 = memref.load %arg4[%11] : memref<2xi32, #tpu.memory_space<smem>>
    %13 = vector.broadcast %12 : i32 to vector<9x9xi32>
    %14 = arith.cmpi sge, %10, %13 : vector<9x9xi32>
    %15 = arith.cmpi sgt, %10, %6 : vector<9x9xi32>
    %16 = arith.ori %14, %15 : vector<9x9xi1>
    %cst = arith.constant -1.000000e+30 : f32
    %cst_2 = arith.constant 0.000000e+00 : f32
    %17 = vector.broadcast %cst : f32 to vector<9x9xf32>
    %18 = vector.broadcast %cst_2 : f32 to vector<9x9xf32>
    %19 = arith.select %16, %17, %18 : vector<9x9xi1>, vector<9x9xf32>
    %c0 = arith.constant 0 : index
    %c0_3 = arith.constant 0 : index
    %c0_4 = arith.constant 0 : index
    %20 = vector.load %arg6[%c0, %c0_3, %c0_4] : memref<1x9x128xbf16, #tpu.memory_space<vmem>>, vector<1x9x128xbf16>
    %21 = vector.shape_cast %20 : vector<1x9x128xbf16> to vector<9x128xbf16>
    %c0_5 = arith.constant 0 : index
    %c0_6 = arith.constant 0 : index
    %c0_7 = arith.constant 0 : index
    %22 = vector.load %arg9[%c0_5, %c0_6, %c0_7] : memref<4x128x32xbf16, #tpu.memory_space<vmem>>, vector<1x128x32xbf16>
    %23 = vector.shape_cast %22 : vector<1x128x32xbf16> to vector<128x32xbf16>
    %cst_8 = arith.constant dense<0.000000e+00> : vector<9x32xf32>
    %24 = tpu.matmul %21, %23, %cst_8 {dimension_numbers = #tpu.dot_dimension_numbers<[1], [0], [0], [1], [0, 0, 1, 1], [], []>} : vector<9x128xbf16>, vector<128x32xbf16>, vector<9x32xf32> -> vector<9x32xf32>
    %c0_9 = arith.constant 0 : index
    %c0_10 = arith.constant 0 : index
    %c0_11 = arith.constant 0 : index
    %25 = vector.load %arg10[%c0_9, %c0_10, %c0_11] : memref<4x1x32xf32, #tpu.memory_space<vmem>>, vector<1x1x32xf32>
    %26 = vector.shape_cast %25 : vector<1x1x32xf32> to vector<1x32xf32>
    %27 = vector.broadcast %26 : vector<1x32xf32> to vector<9x32xf32>
    %28 = arith.addf %24, %27 : vector<9x32xf32>
    %29 = arith.truncf %28 : vector<9x32xf32> to vector<9x32xbf16>
    %c0_12 = arith.constant 0 : index
    %c0_13 = arith.constant 0 : index
    %c0_14 = arith.constant 0 : index
    %30 = vector.load %arg11[%c0_12, %c0_13, %c0_14] : memref<4x128x32xbf16, #tpu.memory_space<vmem>>, vector<1x128x32xbf16>
    %31 = vector.shape_cast %30 : vector<1x128x32xbf16> to vector<128x32xbf16>
    %cst_15 = arith.constant dense<0.000000e+00> : vector<9x32xf32>
    %32 = tpu.matmul %21, %31, %cst_15 {dimension_numbers = #tpu.dot_dimension_numbers<[1], [0], [0], [1], [0, 0, 1, 1], [], []>} : vector<9x128xbf16>, vector<128x32xbf16>, vector<9x32xf32> -> vector<9x32xf32>
    %c0_16 = arith.constant 0 : index
    %c0_17 = arith.constant 0 : index
    %c0_18 = arith.constant 0 : index
    %33 = vector.load %arg12[%c0_16, %c0_17, %c0_18] : memref<4x1x32xf32, #tpu.memory_space<vmem>>, vector<1x1x32xf32>
    %34 = vector.shape_cast %33 : vector<1x1x32xf32> to vector<1x32xf32>
    %35 = vector.broadcast %34 : vector<1x32xf32> to vector<9x32xf32>
    %36 = arith.addf %32, %35 : vector<9x32xf32>
    %37 = arith.truncf %36 : vector<9x32xf32> to vector<9x32xbf16>
    %c0_19 = arith.constant 0 : index
    %c0_20 = arith.constant 0 : index
    %c0_21 = arith.constant 0 : index
    %38 = vector.load %arg18[%c0_19, %c0_20, %c0_21] : memref<4x9x32xbf16, #tpu.memory_space<vmem>>, vector<1x9x32xbf16>
    %39 = vector.shape_cast %38 : vector<1x9x32xbf16> to vector<9x32xbf16>
    %cst_22 = arith.constant dense<0.000000e+00> : vector<9x9xf32>
    %40 = tpu.matmul %39, %29, %cst_22 {dimension_numbers = #tpu.dot_dimension_numbers<[1], [1], [0], [0], [0, 0, 1, 0], [], []>} : vector<9x32xbf16>, vector<9x32xbf16>, vector<9x9xf32> -> vector<9x9xf32>
    %41 = arith.addf %40, %19 : vector<9x9xf32>
    %c0_23 = arith.constant 0 : index
    %c0_24 = arith.constant 0 : index
    %c0_25 = arith.constant 0 : index
    %42 = vector.load %arg19[%c0_23, %c0_24, %c0_25] : memref<4x9x1xf32, #tpu.memory_space<vmem>>, vector<1x9x1xf32>
    %43 = vector.shape_cast %42 : vector<1x9x1xf32> to vector<9x1xf32>
    %cst_26 = arith.constant dense<0xFF800000> : vector<9xf32>
    %44 = vector.multi_reduction <maximumf>, %41, %cst_26 [1] : vector<9x9xf32> to vector<9xf32>
    %45 = vector.shape_cast %44 : vector<9xf32> to vector<9x1xf32>
    %46 = arith.maximumf %43, %45 : vector<9x1xf32>
    %47 = arith.subf %43, %46 : vector<9x1xf32>
    %48 = math.exp %47 : vector<9x1xf32>
    %49 = vector.broadcast %46 : vector<9x1xf32> to vector<9x9xf32>
    %50 = arith.subf %41, %49 : vector<9x9xf32>
    %51 = math.exp %50 : vector<9x9xf32>
    %c0_27 = arith.constant 0 : index
    %c0_28 = arith.constant 0 : index
    %c0_29 = arith.constant 0 : index
    %52 = vector.load %arg20[%c0_27, %c0_28, %c0_29] : memref<4x9x1xf32, #tpu.memory_space<vmem>>, vector<1x9x1xf32>
    %53 = vector.shape_cast %52 : vector<1x9x1xf32> to vector<9x1xf32>
    %54 = arith.mulf %48, %53 : vector<9x1xf32>
    %cst_30 = arith.constant dense<0.000000e+00> : vector<9xf32>
    %55 = vector.multi_reduction <add>, %51, %cst_30 [1] : vector<9x9xf32> to vector<9xf32>
    %56 = vector.shape_cast %55 : vector<9xf32> to vector<9x1xf32>
    %57 = arith.addf %54, %56 : vector<9x1xf32>
    %c0_31 = arith.constant 0 : index
    %c0_32 = arith.constant 0 : index
    %c0_33 = arith.constant 0 : index
    %58 = vector.load %arg20[%c0_31, %c0_32, %c0_33] : memref<4x9x1xf32, #tpu.memory_space<vmem>>, vector<1x9x1xf32>
    %59 = vector.shape_cast %58 : vector<1x9x1xf32> to vector<9x1xf32>
    %60 = vector.shape_cast %57 : vector<9x1xf32> to vector<1x9x1xf32>
    tpu.vector_store %arg20[%c0_31, %c0_32, %c0_33], %60 {strides = array<i32>} : memref<4x9x1xf32, #tpu.memory_space<vmem>>, vector<1x9x1xf32>,
    %c0_34 = arith.constant 0 : index
    %c0_35 = arith.constant 0 : index
    %c0_36 = arith.constant 0 : index
    %61 = vector.load %arg21[%c0_34, %c0_35, %c0_36] : memref<4x9x32xf32, #tpu.memory_space<vmem>>, vector<1x9x32xf32>
    %62 = vector.shape_cast %61 : vector<1x9x32xf32> to vector<9x32xf32>
    %63 = vector.broadcast %48 : vector<9x1xf32> to vector<9x32xf32>
    %64 = arith.mulf %63, %62 : vector<9x32xf32>
    %65 = arith.truncf %51 : vector<9x9xf32> to vector<9x9xbf16>
    %cst_37 = arith.constant dense<0.000000e+00> : vector<9x32xf32>
    %66 = tpu.matmul %65, %37, %cst_37 {dimension_numbers = #tpu.dot_dimension_numbers<[1], [0], [0], [1], [0, 0, 1, 1], [], []>} : vector<9x9xbf16>, vector<9x32xbf16>, vector<9x32xf32> -> vector<9x32xf32>
    %67 = arith.addf %64, %66 : vector<9x32xf32>
    %c0_38 = arith.constant 0 : index
    %c0_39 = arith.constant 0 : index
    %c0_40 = arith.constant 0 : index
    %68 = vector.load %arg21[%c0_38, %c0_39, %c0_40] : memref<4x9x32xf32, #tpu.memory_space<vmem>>, vector<1x9x32xf32>
    %69 = vector.shape_cast %68 : vector<1x9x32xf32> to vector<9x32xf32>
    %70 = vector.shape_cast %67 : vector<9x32xf32> to vector<1x9x32xf32>
    tpu.vector_store %arg21[%c0_38, %c0_39, %c0_40], %70 {strides = array<i32>} : memref<4x9x32xf32, #tpu.memory_space<vmem>>, vector<1x9x32xf32>,
    %c0_41 = arith.constant 0 : index
    %c0_42 = arith.constant 0 : index
    %c0_43 = arith.constant 0 : index
    %71 = vector.load %arg19[%c0_41, %c0_42, %c0_43] : memref<4x9x1xf32, #tpu.memory_space<vmem>>, vector<1x9x1xf32>
    %72 = vector.shape_cast %71 : vector<1x9x1xf32> to vector<9x1xf32>
    %73 = vector.shape_cast %46 : vector<9x1xf32> to vector<1x9x1xf32>
    tpu.vector_store %arg19[%c0_41, %c0_42, %c0_43], %73 {strides = array<i32>} : memref<4x9x1xf32, #tpu.memory_space<vmem>>, vector<1x9x1xf32>,
    %c1 = arith.constant 1 : index
    %c0_44 = arith.constant 0 : index
    %c0_45 = arith.constant 0 : index
    %74 = vector.load %arg9[%c1, %c0_44, %c0_45] : memref<4x128x32xbf16, #tpu.memory_space<vmem>>, vector<1x128x32xbf16>
    %75 = vector.shape_cast %74 : vector<1x128x32xbf16> to vector<128x32xbf16>
    %cst_46 = arith.constant dense<0.000000e+00> : vector<9x32xf32>
    %76 = tpu.matmul %21, %75, %cst_46 {dimension_numbers = #tpu.dot_dimension_numbers<[1], [0], [0], [1], [0, 0, 1, 1], [], []>} : vector<9x128xbf16>, vector<128x32xbf16>, vector<9x32xf32> -> vector<9x32xf32>
    %c1_47 = arith.constant 1 : index
    %c0_48 = arith.constant 0 : index
    %c0_49 = arith.constant 0 : index
    %77 = vector.load %arg10[%c1_47, %c0_48, %c0_49] : memref<4x1x32xf32, #tpu.memory_space<vmem>>, vector<1x1x32xf32>
    %78 = vector.shape_cast %77 : vector<1x1x32xf32> to vector<1x32xf32>
    %79 = vector.broadcast %78 : vector<1x32xf32> to vector<9x32xf32>
    %80 = arith.addf %76, %79 : vector<9x32xf32>
    %81 = arith.truncf %80 : vector<9x32xf32> to vector<9x32xbf16>
    %c1_50 = arith.constant 1 : index
    %c0_51 = arith.constant 0 : index
    %c0_52 = arith.constant 0 : index
    %82 = vector.load %arg11[%c1_50, %c0_51, %c0_52] : memref<4x128x32xbf16, #tpu.memory_space<vmem>>, vector<1x128x32xbf16>
    %83 = vector.shape_cast %82 : vector<1x128x32xbf16> to vector<128x32xbf16>
    %cst_53 = arith.constant dense<0.000000e+00> : vector<9x32xf32>
    %84 = tpu.matmul %21, %83, %cst_53 {dimension_numbers = #tpu.dot_dimension_numbers<[1], [0], [0], [1], [0, 0, 1, 1], [], []>} : vector<9x128xbf16>, vector<128x32xbf16>, vector<9x32xf32> -> vector<9x32xf32>
    %c1_54 = arith.constant 1 : index
    %c0_55 = arith.constant 0 : index
    %c0_56 = arith.constant 0 : index
    %85 = vector.load %arg12[%c1_54, %c0_55, %c0_56] : memref<4x1x32xf32, #tpu.memory_space<vmem>>, vector<1x1x32xf32>
    %86 = vector.shape_cast %85 : vector<1x1x32xf32> to vector<1x32xf32>
    %87 = vector.broadcast %86 : vector<1x32xf32> to vector<9x32xf32>
    %88 = arith.addf %84, %87 : vector<9x32xf32>
    %89 = arith.truncf %88 : vector<9x32xf32> to vector<9x32xbf16>
    %c1_57 = arith.constant 1 : index
    %c0_58 = arith.constant 0 : index
    %c0_59 = arith.constant 0 : index
    %90 = vector.load %arg18[%c1_57, %c0_58, %c0_59] : memref<4x9x32xbf16, #tpu.memory_space<vmem>>, vector<1x9x32xbf16>
    %91 = vector.shape_cast %90 : vector<1x9x32xbf16> to vector<9x32xbf16>
    %cst_60 = arith.constant dense<0.000000e+00> : vector<9x9xf32>
    %92 = tpu.matmul %91, %81, %cst_60 {dimension_numbers = #tpu.dot_dimension_numbers<[1], [1], [0], [0], [0, 0, 1, 0], [], []>} : vector<9x32xbf16>, vector<9x32xbf16>, vector<9x9xf32> -> vector<9x9xf32>
    %93 = arith.addf %92, %19 : vector<9x9xf32>
    %c1_61 = arith.constant 1 : index
    %c0_62 = arith.constant 0 : index
    %c0_63 = arith.constant 0 : index
    %94 = vector.load %arg19[%c1_61, %c0_62, %c0_63] : memref<4x9x1xf32, #tpu.memory_space<vmem>>, vector<1x9x1xf32>
    %95 = vector.shape_cast %94 : vector<1x9x1xf32> to vector<9x1xf32>
    %cst_64 = arith.constant dense<0xFF800000> : vector<9xf32>
    %96 = vector.multi_reduction <maximumf>, %93, %cst_64 [1] : vector<9x9xf32> to vector<9xf32>
    %97 = vector.shape_cast %96 : vector<9xf32> to vector<9x1xf32>
    %98 = arith.maximumf %95, %97 : vector<9x1xf32>
    %99 = arith.subf %95, %98 : vector<9x1xf32>
    %100 = math.exp %99 : vector<9x1xf32>
    %101 = vector.broadcast %98 : vector<9x1xf32> to vector<9x9xf32>
    %102 = arith.subf %93, %101 : vector<9x9xf32>
    %103 = math.exp %102 : vector<9x9xf32>
    %c1_65 = arith.constant 1 : index
    %c0_66 = arith.constant 0 : index
    %c0_67 = arith.constant 0 : index
    %104 = vector.load %arg20[%c1_65, %c0_66, %c0_67] : memref<4x9x1xf32, #tpu.memory_space<vmem>>, vector<1x9x1xf32>
    %105 = vector.shape_cast %104 : vector<1x9x1xf32> to vector<9x1xf32>
    %106 = arith.mulf %100, %105 : vector<9x1xf32>
    %cst_68 = arith.constant dense<0.000000e+00> : vector<9xf32>
    %107 = vector.multi_reduction <add>, %103, %cst_68 [1] : vector<9x9xf32> to vector<9xf32>
    %108 = vector.shape_cast %107 : vector<9xf32> to vector<9x1xf32>
    %109 = arith.addf %106, %108 : vector<9x1xf32>
    %c1_69 = arith.constant 1 : index
    %c0_70 = arith.constant 0 : index
    %c0_71 = arith.constant 0 : index
    %110 = vector.load %arg20[%c1_69, %c0_70, %c0_71] : memref<4x9x1xf32, #tpu.memory_space<vmem>>, vector<1x9x1xf32>
    %111 = vector.shape_cast %110 : vector<1x9x1xf32> to vector<9x1xf32>
    %112 = vector.shape_cast %109 : vector<9x1xf32> to vector<1x9x1xf32>
    tpu.vector_store %arg20[%c1_69, %c0_70, %c0_71], %112 {strides = array<i32>} : memref<4x9x1xf32, #tpu.memory_space<vmem>>, vector<1x9x1xf32>,
    %c1_72 = arith.constant 1 : index
    %c0_73 = arith.constant 0 : index
    %c0_74 = arith.constant 0 : index
    %113 = vector.load %arg21[%c1_72, %c0_73, %c0_74] : memref<4x9x32xf32, #tpu.memory_space<vmem>>, vector<1x9x32xf32>
    %114 = vector.shape_cast %113 : vector<1x9x32xf32> to vector<9x32xf32>
    %115 = vector.broadcast %100 : vector<9x1xf32> to vector<9x32xf32>
    %116 = arith.mulf %115, %114 : vector<9x32xf32>
    %117 = arith.truncf %103 : vector<9x9xf32> to vector<9x9xbf16>
    %cst_75 = arith.constant dense<0.000000e+00> : vector<9x32xf32>
    %118 = tpu.matmul %117, %89, %cst_75 {dimension_numbers = #tpu.dot_dimension_numbers<[1], [0], [0], [1], [0, 0, 1, 1], [], []>} : vector<9x9xbf16>, vector<9x32xbf16>, vector<9x32xf32> -> vector<9x32xf32>
    %119 = arith.addf %116, %118 : vector<9x32xf32>
    %c1_76 = arith.constant 1 : index
    %c0_77 = arith.constant 0 : index
    %c0_78 = arith.constant 0 : index
    %120 = vector.load %arg21[%c1_76, %c0_77, %c0_78] : memref<4x9x32xf32, #tpu.memory_space<vmem>>, vector<1x9x32xf32>
    %121 = vector.shape_cast %120 : vector<1x9x32xf32> to vector<9x32xf32>
    %122 = vector.shape_cast %119 : vector<9x32xf32> to vector<1x9x32xf32>
    tpu.vector_store %arg21[%c1_76, %c0_77, %c0_78], %122 {strides = array<i32>} : memref<4x9x32xf32, #tpu.memory_space<vmem>>, vector<1x9x32xf32>,
    %c1_79 = arith.constant 1 : index
    %c0_80 = arith.constant 0 : index
    %c0_81 = arith.constant 0 : index
    %123 = vector.load %arg19[%c1_79, %c0_80, %c0_81] : memref<4x9x1xf32, #tpu.memory_space<vmem>>, vector<1x9x1xf32>
    %124 = vector.shape_cast %123 : vector<1x9x1xf32> to vector<9x1xf32>
    %125 = vector.shape_cast %98 : vector<9x1xf32> to vector<1x9x1xf32>
    tpu.vector_store %arg19[%c1_79, %c0_80, %c0_81], %125 {strides = array<i32>} : memref<4x9x1xf32, #tpu.memory_space<vmem>>, vector<1x9x1xf32>,
    %c2 = arith.constant 2 : index
    %c0_82 = arith.constant 0 : index
    %c0_83 = arith.constant 0 : index
    %126 = vector.load %arg9[%c2, %c0_82, %c0_83] : memref<4x128x32xbf16, #tpu.memory_space<vmem>>, vector<1x128x32xbf16>
    %127 = vector.shape_cast %126 : vector<1x128x32xbf16> to vector<128x32xbf16>
    %cst_84 = arith.constant dense<0.000000e+00> : vector<9x32xf32>
    %128 = tpu.matmul %21, %127, %cst_84 {dimension_numbers = #tpu.dot_dimension_numbers<[1], [0], [0], [1], [0, 0, 1, 1], [], []>} : vector<9x128xbf16>, vector<128x32xbf16>, vector<9x32xf32> -> vector<9x32xf32>
    %c2_85 = arith.constant 2 : index
    %c0_86 = arith.constant 0 : index
    %c0_87 = arith.constant 0 : index
    %129 = vector.load %arg10[%c2_85, %c0_86, %c0_87] : memref<4x1x32xf32, #tpu.memory_space<vmem>>, vector<1x1x32xf32>
    %130 = vector.shape_cast %129 : vector<1x1x32xf32> to vector<1x32xf32>
    %131 = vector.broadcast %130 : vector<1x32xf32> to vector<9x32xf32>
    %132 = arith.addf %128, %131 : vector<9x32xf32>
    %133 = arith.truncf %132 : vector<9x32xf32> to vector<9x32xbf16>
    %c2_88 = arith.constant 2 : index
    %c0_89 = arith.constant 0 : index
    %c0_90 = arith.constant 0 : index
    %134 = vector.load %arg11[%c2_88, %c0_89, %c0_90] : memref<4x128x32xbf16, #tpu.memory_space<vmem>>, vector<1x128x32xbf16>
    %135 = vector.shape_cast %134 : vector<1x128x32xbf16> to vector<128x32xbf16>
    %cst_91 = arith.constant dense<0.000000e+00> : vector<9x32xf32>
    %136 = tpu.matmul %21, %135, %cst_91 {dimension_numbers = #tpu.dot_dimension_numbers<[1], [0], [0], [1], [0, 0, 1, 1], [], []>} : vector<9x128xbf16>, vector<128x32xbf16>, vector<9x32xf32> -> vector<9x32xf32>
    %c2_92 = arith.constant 2 : index
    %c0_93 = arith.constant 0 : index
    %c0_94 = arith.constant 0 : index
    %137 = vector.load %arg12[%c2_92, %c0_93, %c0_94] : memref<4x1x32xf32, #tpu.memory_space<vmem>>, vector<1x1x32xf32>
    %138 = vector.shape_cast %137 : vector<1x1x32xf32> to vector<1x32xf32>
    %139 = vector.broadcast %138 : vector<1x32xf32> to vector<9x32xf32>
    %140 = arith.addf %136, %139 : vector<9x32xf32>
    %141 = arith.truncf %140 : vector<9x32xf32> to vector<9x32xbf16>
    %c2_95 = arith.constant 2 : index
    %c0_96 = arith.constant 0 : index
    %c0_97 = arith.constant 0 : index
    %142 = vector.load %arg18[%c2_95, %c0_96, %c0_97] : memref<4x9x32xbf16, #tpu.memory_space<vmem>>, vector<1x9x32xbf16>
    %143 = vector.shape_cast %142 : vector<1x9x32xbf16> to vector<9x32xbf16>
    %cst_98 = arith.constant dense<0.000000e+00> : vector<9x9xf32>
    %144 = tpu.matmul %143, %133, %cst_98 {dimension_numbers = #tpu.dot_dimension_numbers<[1], [1], [0], [0], [0, 0, 1, 0], [], []>} : vector<9x32xbf16>, vector<9x32xbf16>, vector<9x9xf32> -> vector<9x9xf32>
    %145 = arith.addf %144, %19 : vector<9x9xf32>
    %c2_99 = arith.constant 2 : index
    %c0_100 = arith.constant 0 : index
    %c0_101 = arith.constant 0 : index
    %146 = vector.load %arg19[%c2_99, %c0_100, %c0_101] : memref<4x9x1xf32, #tpu.memory_space<vmem>>, vector<1x9x1xf32>
    %147 = vector.shape_cast %146 : vector<1x9x1xf32> to vector<9x1xf32>
    %cst_102 = arith.constant dense<0xFF800000> : vector<9xf32>
    %148 = vector.multi_reduction <maximumf>, %145, %cst_102 [1] : vector<9x9xf32> to vector<9xf32>
    %149 = vector.shape_cast %148 : vector<9xf32> to vector<9x1xf32>
    %150 = arith.maximumf %147, %149 : vector<9x1xf32>
    %151 = arith.subf %147, %150 : vector<9x1xf32>
    %152 = math.exp %151 : vector<9x1xf32>
    %153 = vector.broadcast %150 : vector<9x1xf32> to vector<9x9xf32>
    %154 = arith.subf %145, %153 : vector<9x9xf32>
    %155 = math.exp %154 : vector<9x9xf32>
    %c2_103 = arith.constant 2 : index
    %c0_104 = arith.constant 0 : index
    %c0_105 = arith.constant 0 : index
    %156 = vector.load %arg20[%c2_103, %c0_104, %c0_105] : memref<4x9x1xf32, #tpu.memory_space<vmem>>, vector<1x9x1xf32>
    %157 = vector.shape_cast %156 : vector<1x9x1xf32> to vector<9x1xf32>
    %158 = arith.mulf %152, %157 : vector<9x1xf32>
    %cst_106 = arith.constant dense<0.000000e+00> : vector<9xf32>
    %159 = vector.multi_reduction <add>, %155, %cst_106 [1] : vector<9x9xf32> to vector<9xf32>
    %160 = vector.shape_cast %159 : vector<9xf32> to vector<9x1xf32>
    %161 = arith.addf %158, %160 : vector<9x1xf32>
    %c2_107 = arith.constant 2 : index
    %c0_108 = arith.constant 0 : index
    %c0_109 = arith.constant 0 : index
    %162 = vector.load %arg20[%c2_107, %c0_108, %c0_109] : memref<4x9x1xf32, #tpu.memory_space<vmem>>, vector<1x9x1xf32>
    %163 = vector.shape_cast %162 : vector<1x9x1xf32> to vector<9x1xf32>
    %164 = vector.shape_cast %161 : vector<9x1xf32> to vector<1x9x1xf32>
    tpu.vector_store %arg20[%c2_107, %c0_108, %c0_109], %164 {strides = array<i32>} : memref<4x9x1xf32, #tpu.memory_space<vmem>>, vector<1x9x1xf32>,
    %c2_110 = arith.constant 2 : index
    %c0_111 = arith.constant 0 : index
    %c0_112 = arith.constant 0 : index
    %165 = vector.load %arg21[%c2_110, %c0_111, %c0_112] : memref<4x9x32xf32, #tpu.memory_space<vmem>>, vector<1x9x32xf32>
    %166 = vector.shape_cast %165 : vector<1x9x32xf32> to vector<9x32xf32>
    %167 = vector.broadcast %152 : vector<9x1xf32> to vector<9x32xf32>
    %168 = arith.mulf %167, %166 : vector<9x32xf32>
    %169 = arith.truncf %155 : vector<9x9xf32> to vector<9x9xbf16>
    %cst_113 = arith.constant dense<0.000000e+00> : vector<9x32xf32>
    %170 = tpu.matmul %169, %141, %cst_113 {dimension_numbers = #tpu.dot_dimension_numbers<[1], [0], [0], [1], [0, 0, 1, 1], [], []>} : vector<9x9xbf16>, vector<9x32xbf16>, vector<9x32xf32> -> vector<9x32xf32>
    %171 = arith.addf %168, %170 : vector<9x32xf32>
    %c2_114 = arith.constant 2 : index
    %c0_115 = arith.constant 0 : index
    %c0_116 = arith.constant 0 : index
    %172 = vector.load %arg21[%c2_114, %c0_115, %c0_116] : memref<4x9x32xf32, #tpu.memory_space<vmem>>, vector<1x9x32xf32>
    %173 = vector.shape_cast %172 : vector<1x9x32xf32> to vector<9x32xf32>
    %174 = vector.shape_cast %171 : vector<9x32xf32> to vector<1x9x32xf32>
    tpu.vector_store %arg21[%c2_114, %c0_115, %c0_116], %174 {strides = array<i32>} : memref<4x9x32xf32, #tpu.memory_space<vmem>>, vector<1x9x32xf32>,
    %c2_117 = arith.constant 2 : index
    %c0_118 = arith.constant 0 : index
    %c0_119 = arith.constant 0 : index
    %175 = vector.load %arg19[%c2_117, %c0_118, %c0_119] : memref<4x9x1xf32, #tpu.memory_space<vmem>>, vector<1x9x1xf32>
    %176 = vector.shape_cast %175 : vector<1x9x1xf32> to vector<9x1xf32>
    %177 = vector.shape_cast %150 : vector<9x1xf32> to vector<1x9x1xf32>
    tpu.vector_store %arg19[%c2_117, %c0_118, %c0_119], %177 {strides = array<i32>} : memref<4x9x1xf32, #tpu.memory_space<vmem>>, vector<1x9x1xf32>,
    %c3 = arith.constant 3 : index
    %c0_120 = arith.constant 0 : index
    %c0_121 = arith.constant 0 : index
    %178 = vector.load %arg9[%c3, %c0_120, %c0_121] : memref<4x128x32xbf16, #tpu.memory_space<vmem>>, vector<1x128x32xbf16>
    %179 = vector.shape_cast %178 : vector<1x128x32xbf16> to vector<128x32xbf16>
    %cst_122 = arith.constant dense<0.000000e+00> : vector<9x32xf32>
    %180 = tpu.matmul %21, %179, %cst_122 {dimension_numbers = #tpu.dot_dimension_numbers<[1], [0], [0], [1], [0, 0, 1, 1], [], []>} : vector<9x128xbf16>, vector<128x32xbf16>, vector<9x32xf32> -> vector<9x32xf32>
    %c3_123 = arith.constant 3 : index
    %c0_124 = arith.constant 0 : index
    %c0_125 = arith.constant 0 : index
    %181 = vector.load %arg10[%c3_123, %c0_124, %c0_125] : memref<4x1x32xf32, #tpu.memory_space<vmem>>, vector<1x1x32xf32>
    %182 = vector.shape_cast %181 : vector<1x1x32xf32> to vector<1x32xf32>
    %183 = vector.broadcast %182 : vector<1x32xf32> to vector<9x32xf32>
    %184 = arith.addf %180, %183 : vector<9x32xf32>
    %185 = arith.truncf %184 : vector<9x32xf32> to vector<9x32xbf16>
    %c3_126 = arith.constant 3 : index
    %c0_127 = arith.constant 0 : index
    %c0_128 = arith.constant 0 : index
    %186 = vector.load %arg11[%c3_126, %c0_127, %c0_128] : memref<4x128x32xbf16, #tpu.memory_space<vmem>>, vector<1x128x32xbf16>
    %187 = vector.shape_cast %186 : vector<1x128x32xbf16> to vector<128x32xbf16>
    %cst_129 = arith.constant dense<0.000000e+00> : vector<9x32xf32>
    %188 = tpu.matmul %21, %187, %cst_129 {dimension_numbers = #tpu.dot_dimension_numbers<[1], [0], [0], [1], [0, 0, 1, 1], [], []>} : vector<9x128xbf16>, vector<128x32xbf16>, vector<9x32xf32> -> vector<9x32xf32>
    %c3_130 = arith.constant 3 : index
    %c0_131 = arith.constant 0 : index
    %c0_132 = arith.constant 0 : index
    %189 = vector.load %arg12[%c3_130, %c0_131, %c0_132] : memref<4x1x32xf32, #tpu.memory_space<vmem>>, vector<1x1x32xf32>
    %190 = vector.shape_cast %189 : vector<1x1x32xf32> to vector<1x32xf32>
    %191 = vector.broadcast %190 : vector<1x32xf32> to vector<9x32xf32>
    %192 = arith.addf %188, %191 : vector<9x32xf32>
    %193 = arith.truncf %192 : vector<9x32xf32> to vector<9x32xbf16>
    %c3_133 = arith.constant 3 : index
    %c0_134 = arith.constant 0 : index
    %c0_135 = arith.constant 0 : index
    %194 = vector.load %arg18[%c3_133, %c0_134, %c0_135] : memref<4x9x32xbf16, #tpu.memory_space<vmem>>, vector<1x9x32xbf16>
    %195 = vector.shape_cast %194 : vector<1x9x32xbf16> to vector<9x32xbf16>
    %cst_136 = arith.constant dense<0.000000e+00> : vector<9x9xf32>
    %196 = tpu.matmul %195, %185, %cst_136 {dimension_numbers = #tpu.dot_dimension_numbers<[1], [1], [0], [0], [0, 0, 1, 0], [], []>} : vector<9x32xbf16>, vector<9x32xbf16>, vector<9x9xf32> -> vector<9x9xf32>
    %197 = arith.addf %196, %19 : vector<9x9xf32>
    %c3_137 = arith.constant 3 : index
    %c0_138 = arith.constant 0 : index
    %c0_139 = arith.constant 0 : index
    %198 = vector.load %arg19[%c3_137, %c0_138, %c0_139] : memref<4x9x1xf32, #tpu.memory_space<vmem>>, vector<1x9x1xf32>
    %199 = vector.shape_cast %198 : vector<1x9x1xf32> to vector<9x1xf32>
    %cst_140 = arith.constant dense<0xFF800000> : vector<9xf32>
    %200 = vector.multi_reduction <maximumf>, %197, %cst_140 [1] : vector<9x9xf32> to vector<9xf32>
    %201 = vector.shape_cast %200 : vector<9xf32> to vector<9x1xf32>
    %202 = arith.maximumf %199, %201 : vector<9x1xf32>
    %203 = arith.subf %199, %202 : vector<9x1xf32>
    %204 = math.exp %203 : vector<9x1xf32>
    %205 = vector.broadcast %202 : vector<9x1xf32> to vector<9x9xf32>
    %206 = arith.subf %197, %205 : vector<9x9xf32>
    %207 = math.exp %206 : vector<9x9xf32>
    %c3_141 = arith.constant 3 : index
    %c0_142 = arith.constant 0 : index
    %c0_143 = arith.constant 0 : index
    %208 = vector.load %arg20[%c3_141, %c0_142, %c0_143] : memref<4x9x1xf32, #tpu.memory_space<vmem>>, vector<1x9x1xf32>
    %209 = vector.shape_cast %208 : vector<1x9x1xf32> to vector<9x1xf32>
    %210 = arith.mulf %204, %209 : vector<9x1xf32>
    %cst_144 = arith.constant dense<0.000000e+00> : vector<9xf32>
    %211 = vector.multi_reduction <add>, %207, %cst_144 [1] : vector<9x9xf32> to vector<9xf32>
    %212 = vector.shape_cast %211 : vector<9xf32> to vector<9x1xf32>
    %213 = arith.addf %210, %212 : vector<9x1xf32>
    %c3_145 = arith.constant 3 : index
    %c0_146 = arith.constant 0 : index
    %c0_147 = arith.constant 0 : index
    %214 = vector.load %arg20[%c3_145, %c0_146, %c0_147] : memref<4x9x1xf32, #tpu.memory_space<vmem>>, vector<1x9x1xf32>
    %215 = vector.shape_cast %214 : vector<1x9x1xf32> to vector<9x1xf32>
    %216 = vector.shape_cast %213 : vector<9x1xf32> to vector<1x9x1xf32>
    tpu.vector_store %arg20[%c3_145, %c0_146, %c0_147], %216 {strides = array<i32>} : memref<4x9x1xf32, #tpu.memory_space<vmem>>, vector<1x9x1xf32>,
    %c3_148 = arith.constant 3 : index
    %c0_149 = arith.constant 0 : index
    %c0_150 = arith.constant 0 : index
    %217 = vector.load %arg21[%c3_148, %c0_149, %c0_150] : memref<4x9x32xf32, #tpu.memory_space<vmem>>, vector<1x9x32xf32>
    %218 = vector.shape_cast %217 : vector<1x9x32xf32> to vector<9x32xf32>
    %219 = vector.broadcast %204 : vector<9x1xf32> to vector<9x32xf32>
    %220 = arith.mulf %219, %218 : vector<9x32xf32>
    %221 = arith.truncf %207 : vector<9x9xf32> to vector<9x9xbf16>
    %cst_151 = arith.constant dense<0.000000e+00> : vector<9x32xf32>
    %222 = tpu.matmul %221, %193, %cst_151 {dimension_numbers = #tpu.dot_dimension_numbers<[1], [0], [0], [1], [0, 0, 1, 1], [], []>} : vector<9x9xbf16>, vector<9x32xbf16>, vector<9x32xf32> -> vector<9x32xf32>
    %223 = arith.addf %220, %222 : vector<9x32xf32>
    %c3_152 = arith.constant 3 : index
    %c0_153 = arith.constant 0 : index
    %c0_154 = arith.constant 0 : index
    %224 = vector.load %arg21[%c3_152, %c0_153, %c0_154] : memref<4x9x32xf32, #tpu.memory_space<vmem>>, vector<1x9x32xf32>
    %225 = vector.shape_cast %224 : vector<1x9x32xf32> to vector<9x32xf32>
    %226 = vector.shape_cast %223 : vector<9x32xf32> to vector<1x9x32xf32>
    tpu.vector_store %arg21[%c3_152, %c0_153, %c0_154], %226 {strides = array<i32>} : memref<4x9x32xf32, #tpu.memory_space<vmem>>, vector<1x9x32xf32>,
    %c3_155 = arith.constant 3 : index
    %c0_156 = arith.constant 0 : index
    %c0_157 = arith.constant 0 : index
    %227 = vector.load %arg19[%c3_155, %c0_156, %c0_157] : memref<4x9x1xf32, #tpu.memory_space<vmem>>, vector<1x9x1xf32>
    %228 = vector.shape_cast %227 : vector<1x9x1xf32> to vector<9x1xf32>
    %229 = vector.shape_cast %202 : vector<9x1xf32> to vector<1x9x1xf32>
    tpu.vector_store %arg19[%c3_155, %c0_156, %c0_157], %229 {strides = array<i32>} : memref<4x9x1xf32, #tpu.memory_space<vmem>>, vector<1x9x1xf32>,
    %c0_i32_158 = arith.constant 0 : i32
    %230 = arith.cmpi eq, %arg2, %c0_i32_158 : i32
    %231 = arith.extui %230 : i1 to i32
    %c0_i32_159 = arith.constant 0 : i32
    %232 = arith.cmpi ne, %231, %c0_i32_159 : i32
    scf.if %232 {
      %c0_160 = arith.constant 0 : index
      %c0_161 = arith.constant 0 : index
      %233 = vector.load %arg14[%c0_160, %c0_161] : memref<1x128xf32, #tpu.memory_space<vmem>>, vector<1x128xf32>
      %c0_162 = arith.constant 0 : index
      %c0_163 = arith.constant 0 : index
      %c0_164 = arith.constant 0 : index
      %234 = vector.load %arg21[%c0_162, %c0_163, %c0_164] : memref<4x9x32xf32, #tpu.memory_space<vmem>>, vector<1x9x32xf32>
      %235 = vector.shape_cast %234 : vector<1x9x32xf32> to vector<9x32xf32>
      %c0_165 = arith.constant 0 : index
      %c0_166 = arith.constant 0 : index
      %c0_167 = arith.constant 0 : index
      %236 = vector.load %arg20[%c0_165, %c0_166, %c0_167] : memref<4x9x1xf32, #tpu.memory_space<vmem>>, vector<1x9x1xf32>
      %237 = vector.shape_cast %236 : vector<1x9x1xf32> to vector<9x1xf32>
      %238 = tpu.reciprocal %237 {approx = true} : vector<9x1xf32> -> vector<9x1xf32>
      %239 = vector.broadcast %238 : vector<9x1xf32> to vector<9x32xf32>
      %240 = arith.mulf %235, %239 : vector<9x32xf32>
      %241 = arith.truncf %240 : vector<9x32xf32> to vector<9x32xbf16>
      %c0_168 = arith.constant 0 : index
      %c0_169 = arith.constant 0 : index
      %c0_170 = arith.constant 0 : index
      %242 = vector.load %arg13[%c0_168, %c0_169, %c0_170] : memref<4x32x128xbf16, #tpu.memory_space<vmem>>, vector<1x32x128xbf16>
      %243 = vector.shape_cast %242 : vector<1x32x128xbf16> to vector<32x128xbf16>
      %cst_171 = arith.constant dense<0.000000e+00> : vector<9x128xf32>
      %244 = tpu.matmul %241, %243, %cst_171 {dimension_numbers = #tpu.dot_dimension_numbers<[1], [0], [0], [1], [0, 0, 1, 1], [], []>} : vector<9x32xbf16>, vector<32x128xbf16>, vector<9x128xf32> -> vector<9x128xf32>
      %245 = vector.broadcast %233 : vector<1x128xf32> to vector<9x128xf32>
      %246 = arith.addf %245, %244 : vector<9x128xf32>
      %c1_172 = arith.constant 1 : index
      %c0_173 = arith.constant 0 : index
      %c0_174 = arith.constant 0 : index
      %247 = vector.load %arg21[%c1_172, %c0_173, %c0_174] : memref<4x9x32xf32, #tpu.memory_space<vmem>>, vector<1x9x32xf32>
      %248 = vector.shape_cast %247 : vector<1x9x32xf32> to vector<9x32xf32>
      %c1_175 = arith.constant 1 : index
      %c0_176 = arith.constant 0 : index
      %c0_177 = arith.constant 0 : index
      %249 = vector.load %arg20[%c1_175, %c0_176, %c0_177] : memref<4x9x1xf32, #tpu.memory_space<vmem>>, vector<1x9x1xf32>
      %250 = vector.shape_cast %249 : vector<1x9x1xf32> to vector<9x1xf32>
      %251 = tpu.reciprocal %250 {approx = true} : vector<9x1xf32> -> vector<9x1xf32>
      %252 = vector.broadcast %251 : vector<9x1xf32> to vector<9x32xf32>
      %253 = arith.mulf %248, %252 : vector<9x32xf32>
      %254 = arith.truncf %253 : vector<9x32xf32> to vector<9x32xbf16>
      %c1_178 = arith.constant 1 : index
      %c0_179 = arith.constant 0 : index
      %c0_180 = arith.constant 0 : index
      %255 = vector.load %arg13[%c1_178, %c0_179, %c0_180] : memref<4x32x128xbf16, #tpu.memory_space<vmem>>, vector<1x32x128xbf16>
      %256 = vector.shape_cast %255 : vector<1x32x128xbf16> to vector<32x128xbf16>
      %cst_181 = arith.constant dense<0.000000e+00> : vector<9x128xf32>
      %257 = tpu.matmul %254, %256, %cst_181 {dimension_numbers = #tpu.dot_dimension_numbers<[1], [0], [0], [1], [0, 0, 1, 1], [], []>} : vector<9x32xbf16>, vector<32x128xbf16>, vector<9x128xf32> -> vector<9x128xf32>
      %258 = arith.addf %246, %257 : vector<9x128xf32>
      %c2_182 = arith.constant 2 : index
      %c0_183 = arith.constant 0 : index
      %c0_184 = arith.constant 0 : index
      %259 = vector.load %arg21[%c2_182, %c0_183, %c0_184] : memref<4x9x32xf32, #tpu.memory_space<vmem>>, vector<1x9x32xf32>
      %260 = vector.shape_cast %259 : vector<1x9x32xf32> to vector<9x32xf32>
      %c2_185 = arith.constant 2 : index
      %c0_186 = arith.constant 0 : index
      %c0_187 = arith.constant 0 : index
      %261 = vector.load %arg20[%c2_185, %c0_186, %c0_187] : memref<4x9x1xf32, #tpu.memory_space<vmem>>, vector<1x9x1xf32>
      %262 = vector.shape_cast %261 : vector<1x9x1xf32> to vector<9x1xf32>
      %263 = tpu.reciprocal %262 {approx = true} : vector<9x1xf32> -> vector<9x1xf32>
      %264 = vector.broadcast %263 : vector<9x1xf32> to vector<9x32xf32>
      %265 = arith.mulf %260, %264 : vector<9x32xf32>
      %266 = arith.truncf %265 : vector<9x32xf32> to vector<9x32xbf16>
      %c2_188 = arith.constant 2 : index
      %c0_189 = arith.constant 0 : index
      %c0_190 = arith.constant 0 : index
      %267 = vector.load %arg13[%c2_188, %c0_189, %c0_190] : memref<4x32x128xbf16, #tpu.memory_space<vmem>>, vector<1x32x128xbf16>
      %268 = vector.shape_cast %267 : vector<1x32x128xbf16> to vector<32x128xbf16>
      %cst_191 = arith.constant dense<0.000000e+00> : vector<9x128xf32>
      %269 = tpu.matmul %266, %268, %cst_191 {dimension_numbers = #tpu.dot_dimension_numbers<[1], [0], [0], [1], [0, 0, 1, 1], [], []>} : vector<9x32xbf16>, vector<32x128xbf16>, vector<9x128xf32> -> vector<9x128xf32>
      %270 = arith.addf %258, %269 : vector<9x128xf32>
      %c3_192 = arith.constant 3 : index
      %c0_193 = arith.constant 0 : index
      %c0_194 = arith.constant 0 : index
      %271 = vector.load %arg21[%c3_192, %c0_193, %c0_194] : memref<4x9x32xf32, #tpu.memory_space<vmem>>, vector<1x9x32xf32>
      %272 = vector.shape_cast %271 : vector<1x9x32xf32> to vector<9x32xf32>
      %c3_195 = arith.constant 3 : index
      %c0_196 = arith.constant 0 : index
      %c0_197 = arith.constant 0 : index
      %273 = vector.load %arg20[%c3_195, %c0_196, %c0_197] : memref<4x9x1xf32, #tpu.memory_space<vmem>>, vector<1x9x1xf32>
      %274 = vector.shape_cast %273 : vector<1x9x1xf32> to vector<9x1xf32>
      %275 = tpu.reciprocal %274 {approx = true} : vector<9x1xf32> -> vector<9x1xf32>
      %276 = vector.broadcast %275 : vector<9x1xf32> to vector<9x32xf32>
      %277 = arith.mulf %272, %276 : vector<9x32xf32>
      %278 = arith.truncf %277 : vector<9x32xf32> to vector<9x32xbf16>
      %c3_198 = arith.constant 3 : index
      %c0_199 = arith.constant 0 : index
      %c0_200 = arith.constant 0 : index
      %279 = vector.load %arg13[%c3_198, %c0_199, %c0_200] : memref<4x32x128xbf16, #tpu.memory_space<vmem>>, vector<1x32x128xbf16>
      %280 = vector.shape_cast %279 : vector<1x32x128xbf16> to vector<32x128xbf16>
      %cst_201 = arith.constant dense<0.000000e+00> : vector<9x128xf32>
      %281 = tpu.matmul %278, %280, %cst_201 {dimension_numbers = #tpu.dot_dimension_numbers<[1], [0], [0], [1], [0, 0, 1, 1], [], []>} : vector<9x32xbf16>, vector<32x128xbf16>, vector<9x128xf32> -> vector<9x128xf32>
      %282 = arith.addf %270, %281 : vector<9x128xf32>
      %c0_202 = arith.constant 0 : index
      %c0_203 = arith.constant 0 : index
      %c0_204 = arith.constant 0 : index
      %283 = vector.load %arg5[%c0_202, %c0_203, %c0_204] : memref<1x9x128xbf16, #tpu.memory_space<vmem>>, vector<1x9x128xbf16>
      %284 = vector.shape_cast %283 : vector<1x9x128xbf16> to vector<9x128xbf16>
      %285 = arith.extf %284 : vector<9x128xbf16> to vector<9x128xf32>
      %286 = arith.addf %282, %285 : vector<9x128xf32>
      %c0_205 = arith.constant 0 : index
      %c0_206 = arith.constant 0 : index
      %287 = vector.load %arg15[%c0_205, %c0_206] : memref<1x128xf32, #tpu.memory_space<vmem>>, vector<1x128xf32>
      %c0_207 = arith.constant 0 : index
      %c0_208 = arith.constant 0 : index
      %288 = vector.load %arg16[%c0_207, %c0_208] : memref<1x128xf32, #tpu.memory_space<vmem>>, vector<1x128xf32>
      %cst_209 = arith.constant dense<0.000000e+00> : vector<9xf32>
      %289 = vector.multi_reduction <add>, %286, %cst_209 [1] : vector<9x128xf32> to vector<9xf32>
      %290 = vector.shape_cast %289 : vector<9xf32> to vector<9x1xf32>
      %cst_210 = arith.constant 1.280000e+02 : f32
      %291 = vector.broadcast %cst_210 : f32 to vector<9x1xf32>
      %292 = arith.divf %290, %291 : vector<9x1xf32>
      %293 = vector.broadcast %292 : vector<9x1xf32> to vector<9x128xf32>
      %294 = arith.subf %286, %293 : vector<9x128xf32>
      %295 = arith.mulf %294, %294 : vector<9x128xf32>
      %cst_211 = arith.constant dense<0.000000e+00> : vector<9xf32>
      %296 = vector.multi_reduction <add>, %295, %cst_211 [1] : vector<9x128xf32> to vector<9xf32>
      %297 = vector.shape_cast %296 : vector<9xf32> to vector<9x1xf32>
      %cst_212 = arith.constant 1.280000e+02 : f32
      %298 = vector.broadcast %cst_212 : f32 to vector<9x1xf32>
      %299 = arith.divf %297, %298 : vector<9x1xf32>
      %300 = vector.broadcast %292 : vector<9x1xf32> to vector<9x128xf32>
      %301 = arith.subf %286, %300 : vector<9x128xf32>
      %cst_213 = arith.constant 9.99999974E-6 : f32
      %302 = vector.broadcast %cst_213 : f32 to vector<9x1xf32>
      %303 = arith.addf %299, %302 : vector<9x1xf32>
      %304 = math.rsqrt %303 : vector<9x1xf32>
      %305 = vector.broadcast %304 : vector<9x1xf32> to vector<9x128xf32>
      %306 = arith.mulf %301, %305 : vector<9x128xf32>
      %307 = vector.broadcast %287 : vector<1x128xf32> to vector<9x128xf32>
      %308 = arith.mulf %306, %307 : vector<9x128xf32>
      %309 = vector.broadcast %288 : vector<1x128xf32> to vector<9x128xf32>
      %310 = arith.addf %308, %309 : vector<9x128xf32>
      %c9_i32_214 = arith.constant 9 : i32
      %311 = arith.muli %arg1, %c9_i32_214 : i32
      %312 = tpu.iota {dimensions = array<i32: 0>} : vector<9x1xi32>
      %313 = vector.broadcast %311 : i32 to vector<9x1xi32>
      %314 = arith.addi %313, %312 : vector<9x1xi32>
      %315 = arith.index_cast %arg0 : i32 to index
      %316 = memref.load %arg3[%315] : memref<2xi32, #tpu.memory_space<smem>>
      %317 = vector.broadcast %316 : i32 to vector<9x1xi32>
      %318 = arith.cmpi slt, %314, %317 : vector<9x1xi32>
      %319 = arith.extui %318 : vector<9x1xi1> to vector<9x1xi32>
      %320 = arith.sitofp %319 : vector<9x1xi32> to vector<9x1xf32>
      %321 = vector.broadcast %320 : vector<9x1xf32> to vector<9x128xf32>
      %322 = arith.mulf %310, %321 : vector<9x128xf32>
      %323 = arith.truncf %322 : vector<9x128xf32> to vector<9x128xbf16>
      %c0_215 = arith.constant 0 : index
      %c0_216 = arith.constant 0 : index
      %c0_217 = arith.constant 0 : index
      %324 = vector.load %arg17[%c0_215, %c0_216, %c0_217] : memref<1x9x128xbf16, #tpu.memory_space<vmem>>, vector<1x9x128xbf16>
      %325 = vector.shape_cast %324 : vector<1x9x128xbf16> to vector<9x128xbf16>
      %326 = vector.shape_cast %323 : vector<9x128xbf16> to vector<1x9x128xbf16>
      tpu.vector_store %arg17[%c0_215, %c0_216, %c0_217], %326 {strides = array<i32>} : memref<1x9x128xbf16, #tpu.memory_space<vmem>>, vector<1x9x128xbf16>,
    } else {
    }
    return
  }
  func.func @transform_0(%arg0: i32, %arg1: i32, %arg2: i32, %arg3: memref<2xi32, #tpu.memory_space<smem>>, %arg4: memref<2xi32, #tpu.memory_space<smem>>) -> (i32, i32, i32) {
    %c0_i32 = arith.constant 0 : i32
    %c0_i32_0 = arith.constant 0 : i32
    return %arg0, %arg1, %c0_i32 : i32, i32, i32
  }
  func.func @transform_1(%arg0: i32, %arg1: i32, %arg2: i32, %arg3: memref<2xi32, #tpu.memory_space<smem>>, %arg4: memref<2xi32, #tpu.memory_space<smem>>) -> (i32, i32, i32) {
    %c0_i32 = arith.constant 0 : i32
    %c0_i32_0 = arith.constant 0 : i32
    return %arg0, %arg2, %c0_i32 : i32, i32, i32
  }
  func.func @transform_2(%arg0: i32, %arg1: i32, %arg2: i32, %arg3: memref<2xi32, #tpu.memory_space<smem>>, %arg4: memref<2xi32, #tpu.memory_space<smem>>) -> (i32, i32, i32) {
    %c0_i32 = arith.constant 0 : i32
    %c0_i32_0 = arith.constant 0 : i32
    %c0_i32_1 = arith.constant 0 : i32
    %c0_i32_2 = arith.constant 0 : i32
    return %c0_i32, %c0_i32_0, %c0_i32_1 : i32, i32, i32
  }
  func.func @transform_3(%arg0: i32, %arg1: i32, %arg2: i32, %arg3: memref<2xi32, #tpu.memory_space<smem>>, %arg4: memref<2xi32, #tpu.memory_space<smem>>) -> (i32, i32, i32) {
    %c0_i32 = arith.constant 0 : i32
    %c0_i32_0 = arith.constant 0 : i32
    %c0_i32_1 = arith.constant 0 : i32
    %c0_i32_2 = arith.constant 0 : i32
    return %c0_i32, %c0_i32_0, %c0_i32_1 : i32, i32, i32
  }
  func.func @transform_4(%arg0: i32, %arg1: i32, %arg2: i32, %arg3: memref<2xi32, #tpu.memory_space<smem>>, %arg4: memref<2xi32, #tpu.memory_space<smem>>) -> (i32, i32, i32) {
    %c0_i32 = arith.constant 0 : i32
    %c0_i32_0 = arith.constant 0 : i32
    %c0_i32_1 = arith.constant 0 : i32
    %c0_i32_2 = arith.constant 0 : i32
    return %c0_i32, %c0_i32_0, %c0_i32_1 : i32, i32, i32
  }
  func.func @transform_5(%arg0: i32, %arg1: i32, %arg2: i32, %arg3: memref<2xi32, #tpu.memory_space<smem>>, %arg4: memref<2xi32, #tpu.memory_space<smem>>) -> (i32, i32, i32) {
    %c0_i32 = arith.constant 0 : i32
    %c0_i32_0 = arith.constant 0 : i32
    %c0_i32_1 = arith.constant 0 : i32
    %c0_i32_2 = arith.constant 0 : i32
    return %c0_i32, %c0_i32_0, %c0_i32_1 : i32, i32, i32
  }
  func.func @transform_6(%arg0: i32, %arg1: i32, %arg2: i32, %arg3: memref<2xi32, #tpu.memory_space<smem>>, %arg4: memref<2xi32, #tpu.memory_space<smem>>) -> (i32, i32, i32) {
    %c0_i32 = arith.constant 0 : i32
    %c0_i32_0 = arith.constant 0 : i32
    %c0_i32_1 = arith.constant 0 : i32
    %c0_i32_2 = arith.constant 0 : i32
    return %c0_i32, %c0_i32_0, %c0_i32_1 : i32, i32, i32
  }
  func.func @transform_7(%arg0: i32, %arg1: i32, %arg2: i32, %arg3: memref<2xi32, #tpu.memory_space<smem>>, %arg4: memref<2xi32, #tpu.memory_space<smem>>) -> (i32, i32, i32) {
    %c0_i32 = arith.constant 0 : i32
    %c0_i32_0 = arith.constant 0 : i32
    %c0_i32_1 = arith.constant 0 : i32
    %c0_i32_2 = arith.constant 0 : i32
    return %c0_i32, %c0_i32_0, %c0_i32_1 : i32, i32, i32
  }
  func.func @transform_8(%arg0: i32, %arg1: i32, %arg2: i32, %arg3: memref<2xi32, #tpu.memory_space<smem>>, %arg4: memref<2xi32, #tpu.memory_space<smem>>) -> (i32, i32, i32) {
    %c0_i32 = arith.constant 0 : i32
    %c0_i32_0 = arith.constant 0 : i32
    %c0_i32_1 = arith.constant 0 : i32
    %c0_i32_2 = arith.constant 0 : i32
    return %c0_i32, %c0_i32_0, %c0_i32_1 : i32, i32, i32
  }
  func.func @transform_9(%arg0: i32, %arg1: i32, %arg2: i32, %arg3: memref<2xi32, #tpu.memory_space<smem>>, %arg4: memref<2xi32, #tpu.memory_space<smem>>) -> (i32, i32) {
    %c0_i32 = arith.constant 0 : i32
    %c0_i32_0 = arith.constant 0 : i32
    %c0_i32_1 = arith.constant 0 : i32
    return %c0_i32, %c0_i32_0 : i32, i32
  }
  func.func @transform_10(%arg0: i32, %arg1: i32, %arg2: i32, %arg3: memref<2xi32, #tpu.memory_space<smem>>, %arg4: memref<2xi32, #tpu.memory_space<smem>>) -> (i32, i32) {
    %c0_i32 = arith.constant 0 : i32
    %c0_i32_0 = arith.constant 0 : i32
    %c0_i32_1 = arith.constant 0 : i32
    return %c0_i32, %c0_i32_0 : i32, i32
  }
  func.func @transform_11(%arg0: i32, %arg1: i32, %arg2: i32, %arg3: memref<2xi32, #tpu.memory_space<smem>>, %arg4: memref<2xi32, #tpu.memory_space<smem>>) -> (i32, i32) {
    %c0_i32 = arith.constant 0 : i32
    %c0_i32_0 = arith.constant 0 : i32
    %c0_i32_1 = arith.constant 0 : i32
    return %c0_i32, %c0_i32_0 : i32, i32
  }
  func.func @transform_12(%arg0: i32, %arg1: i32, %arg2: i32, %arg3: memref<2xi32, #tpu.memory_space<smem>>, %arg4: memref<2xi32, #tpu.memory_space<smem>>) -> (i32, i32, i32) {
    %c0_i32 = arith.constant 0 : i32
    %c0_i32_0 = arith.constant 0 : i32
    return %arg0, %arg1, %c0_i32 : i32, i32, i32
  }
}

module attributes {stable_mosaic.version = 11 : i64} {
  func.func @_mha_kernel(%arg0: i32, %arg1: i32, %arg2: i32, %arg3: memref<2xi32, #tpu.memory_space<smem>>, %arg4: memref<2xi32, #tpu.memory_space<smem>>, %arg5: memref<1x16x128xbf16, #tpu.memory_space<vmem>>, %arg6: memref<1x16x128xbf16, #tpu.memory_space<vmem>>, %arg7: memref<4x128x32xbf16, #tpu.memory_space<vmem>>, %arg8: memref<4x1x32xf32, #tpu.memory_space<vmem>>, %arg9: memref<4x128x32xbf16, #tpu.memory_space<vmem>>, %arg10: memref<4x1x32xf32, #tpu.memory_space<vmem>>, %arg11: memref<4x128x32xbf16, #tpu.memory_space<vmem>>, %arg12: memref<4x1x32xf32, #tpu.memory_space<vmem>>, %arg13: memref<4x32x128xbf16, #tpu.memory_space<vmem>>, %arg14: memref<1x128xf32, #tpu.memory_space<vmem>>, %arg15: memref<1x128xf32, #tpu.memory_space<vmem>>, %arg16: memref<1x128xf32, #tpu.memory_space<vmem>>, %arg17: memref<1x16x128xbf16, #tpu.memory_space<vmem>>, %arg18: memref<4x16x32xbf16, #tpu.memory_space<vmem>>, %arg19: memref<4x16x1xf32, #tpu.memory_space<vmem>>, %arg20: memref<4x16x1xf32, #tpu.memory_space<vmem>>, %arg21: memref<4x16x32xf32, #tpu.memory_space<vmem>>) attributes {dimension_semantics = [#tpu.dimension_semantics<parallel>, #tpu.dimension_semantics<parallel>, #tpu.dimension_semantics<arbitrary>], iteration_bounds = array<i64: 2, 1, 1>, scalar_prefetch = 2 : i64, scratch_operands = 4 : i64, tpu.core_type = #tpu.core_type<tc>, window_params = [{transform_indices = @transform_0, window_bounds = array<i64: 1, 16, 128>}, {transform_indices = @transform_1, window_bounds = array<i64: 1, 16, 128>}, {pipeline_mode = #tpu.pipeline_mode<synchronous>, transform_indices = @transform_2, window_bounds = array<i64: 4, 128, 32>}, {pipeline_mode = #tpu.pipeline_mode<synchronous>, transform_indices = @transform_3, window_bounds = array<i64: 4, 1, 32>}, {pipeline_mode = #tpu.pipeline_mode<synchronous>, transform_indices = @transform_4, window_bounds = array<i64: 4, 128, 32>}, {pipeline_mode = #tpu.pipeline_mode<synchronous>, transform_indices = @transform_5, window_bounds = array<i64: 4, 1, 32>}, {pipeline_mode = #tpu.pipeline_mode<synchronous>, transform_indices = @transform_6, window_bounds = array<i64: 4, 128, 32>}, {pipeline_mode = #tpu.pipeline_mode<synchronous>, transform_indices = @transform_7, window_bounds = array<i64: 4, 1, 32>}, {pipeline_mode = #tpu.pipeline_mode<synchronous>, transform_indices = @transform_8, window_bounds = array<i64: 4, 32, 128>}, {pipeline_mode = #tpu.pipeline_mode<synchronous>, transform_indices = @transform_9, window_bounds = array<i64: 1, 128>}, {pipeline_mode = #tpu.pipeline_mode<synchronous>, transform_indices = @transform_10, window_bounds = array<i64: 1, 128>}, {pipeline_mode = #tpu.pipeline_mode<synchronous>, transform_indices = @transform_11, window_bounds = array<i64: 1, 128>}, {transform_indices = @transform_12, window_bounds = array<i64: 1, 16, 128>}]} {
    %c0_i32 = arith.constant 0 : i32
    %0 = arith.cmpi eq, %arg2, %c0_i32 : i32
    %1 = arith.extui %0 : i1 to i32
    %c0_i32_0 = arith.constant 0 : i32
    %2 = arith.cmpi ne, %1, %c0_i32_0 : i32
    scf.if %2 {
      %c0_159 = arith.constant 0 : index
      %c0_160 = arith.constant 0 : index
      %c0_161 = arith.constant 0 : index
      %227 = vector.load %arg5[%c0_159, %c0_160, %c0_161] : memref<1x16x128xbf16, #tpu.memory_space<vmem>>, vector<1x16x128xbf16>
      %228 = vector.shape_cast %227 : vector<1x16x128xbf16> to vector<16x128xbf16>
      %c0_162 = arith.constant 0 : index
      %c0_163 = arith.constant 0 : index
      %c0_164 = arith.constant 0 : index
      %229 = vector.load %arg7[%c0_162, %c0_163, %c0_164] : memref<4x128x32xbf16, #tpu.memory_space<vmem>>, vector<1x128x32xbf16>
      %230 = vector.shape_cast %229 : vector<1x128x32xbf16> to vector<128x32xbf16>
      %cst_165 = arith.constant dense<0.000000e+00> : vector<16x32xf32>
      %231 = tpu.matmul %228, %230, %cst_165 {dimension_numbers = #tpu.dot_dimension_numbers<[1], [0], [0], [1], [0, 0, 1, 1], [], []>} : vector<16x128xbf16>, vector<128x32xbf16>, vector<16x32xf32> -> vector<16x32xf32>
      %c0_166 = arith.constant 0 : index
      %c0_167 = arith.constant 0 : index
      %c0_168 = arith.constant 0 : index
      %232 = vector.load %arg8[%c0_166, %c0_167, %c0_168] : memref<4x1x32xf32, #tpu.memory_space<vmem>>, vector<1x1x32xf32>
      %233 = vector.shape_cast %232 : vector<1x1x32xf32> to vector<1x32xf32>
      %234 = vector.broadcast %233 : vector<1x32xf32> to vector<16x32xf32>
      %235 = arith.addf %231, %234 : vector<16x32xf32>
      %cst_169 = arith.constant 0.176776692 : f32
      %236 = vector.broadcast %cst_169 : f32 to vector<16x32xf32>
      %237 = arith.mulf %235, %236 : vector<16x32xf32>
      %238 = arith.truncf %237 : vector<16x32xf32> to vector<16x32xbf16>
      %c0_170 = arith.constant 0 : index
      %c0_171 = arith.constant 0 : index
      %c0_172 = arith.constant 0 : index
      %239 = vector.load %arg18[%c0_170, %c0_171, %c0_172] : memref<4x16x32xbf16, #tpu.memory_space<vmem>>, vector<1x16x32xbf16>
      %240 = vector.shape_cast %239 : vector<1x16x32xbf16> to vector<16x32xbf16>
      %241 = vector.shape_cast %238 : vector<16x32xbf16> to vector<1x16x32xbf16>
      tpu.vector_store %arg18[%c0_170, %c0_171, %c0_172], %241 {strides = array<i32>} : memref<4x16x32xbf16, #tpu.memory_space<vmem>>, vector<1x16x32xbf16>,
      %c1_173 = arith.constant 1 : index
      %c0_174 = arith.constant 0 : index
      %c0_175 = arith.constant 0 : index
      %242 = vector.load %arg7[%c1_173, %c0_174, %c0_175] : memref<4x128x32xbf16, #tpu.memory_space<vmem>>, vector<1x128x32xbf16>
      %243 = vector.shape_cast %242 : vector<1x128x32xbf16> to vector<128x32xbf16>
      %cst_176 = arith.constant dense<0.000000e+00> : vector<16x32xf32>
      %244 = tpu.matmul %228, %243, %cst_176 {dimension_numbers = #tpu.dot_dimension_numbers<[1], [0], [0], [1], [0, 0, 1, 1], [], []>} : vector<16x128xbf16>, vector<128x32xbf16>, vector<16x32xf32> -> vector<16x32xf32>
      %c1_177 = arith.constant 1 : index
      %c0_178 = arith.constant 0 : index
      %c0_179 = arith.constant 0 : index
      %245 = vector.load %arg8[%c1_177, %c0_178, %c0_179] : memref<4x1x32xf32, #tpu.memory_space<vmem>>, vector<1x1x32xf32>
      %246 = vector.shape_cast %245 : vector<1x1x32xf32> to vector<1x32xf32>
      %247 = vector.broadcast %246 : vector<1x32xf32> to vector<16x32xf32>
      %248 = arith.addf %244, %247 : vector<16x32xf32>
      %cst_180 = arith.constant 0.176776692 : f32
      %249 = vector.broadcast %cst_180 : f32 to vector<16x32xf32>
      %250 = arith.mulf %248, %249 : vector<16x32xf32>
      %251 = arith.truncf %250 : vector<16x32xf32> to vector<16x32xbf16>
      %c1_181 = arith.constant 1 : index
      %c0_182 = arith.constant 0 : index
      %c0_183 = arith.constant 0 : index
      %252 = vector.load %arg18[%c1_181, %c0_182, %c0_183] : memref<4x16x32xbf16, #tpu.memory_space<vmem>>, vector<1x16x32xbf16>
      %253 = vector.shape_cast %252 : vector<1x16x32xbf16> to vector<16x32xbf16>
      %254 = vector.shape_cast %251 : vector<16x32xbf16> to vector<1x16x32xbf16>
      tpu.vector_store %arg18[%c1_181, %c0_182, %c0_183], %254 {strides = array<i32>} : memref<4x16x32xbf16, #tpu.memory_space<vmem>>, vector<1x16x32xbf16>,
      %c2_184 = arith.constant 2 : index
      %c0_185 = arith.constant 0 : index
      %c0_186 = arith.constant 0 : index
      %255 = vector.load %arg7[%c2_184, %c0_185, %c0_186] : memref<4x128x32xbf16, #tpu.memory_space<vmem>>, vector<1x128x32xbf16>
      %256 = vector.shape_cast %255 : vector<1x128x32xbf16> to vector<128x32xbf16>
      %cst_187 = arith.constant dense<0.000000e+00> : vector<16x32xf32>
      %257 = tpu.matmul %228, %256, %cst_187 {dimension_numbers = #tpu.dot_dimension_numbers<[1], [0], [0], [1], [0, 0, 1, 1], [], []>} : vector<16x128xbf16>, vector<128x32xbf16>, vector<16x32xf32> -> vector<16x32xf32>
      %c2_188 = arith.constant 2 : index
      %c0_189 = arith.constant 0 : index
      %c0_190 = arith.constant 0 : index
      %258 = vector.load %arg8[%c2_188, %c0_189, %c0_190] : memref<4x1x32xf32, #tpu.memory_space<vmem>>, vector<1x1x32xf32>
      %259 = vector.shape_cast %258 : vector<1x1x32xf32> to vector<1x32xf32>
      %260 = vector.broadcast %259 : vector<1x32xf32> to vector<16x32xf32>
      %261 = arith.addf %257, %260 : vector<16x32xf32>
      %cst_191 = arith.constant 0.176776692 : f32
      %262 = vector.broadcast %cst_191 : f32 to vector<16x32xf32>
      %263 = arith.mulf %261, %262 : vector<16x32xf32>
      %264 = arith.truncf %263 : vector<16x32xf32> to vector<16x32xbf16>
      %c2_192 = arith.constant 2 : index
      %c0_193 = arith.constant 0 : index
      %c0_194 = arith.constant 0 : index
      %265 = vector.load %arg18[%c2_192, %c0_193, %c0_194] : memref<4x16x32xbf16, #tpu.memory_space<vmem>>, vector<1x16x32xbf16>
      %266 = vector.shape_cast %265 : vector<1x16x32xbf16> to vector<16x32xbf16>
      %267 = vector.shape_cast %264 : vector<16x32xbf16> to vector<1x16x32xbf16>
      tpu.vector_store %arg18[%c2_192, %c0_193, %c0_194], %267 {strides = array<i32>} : memref<4x16x32xbf16, #tpu.memory_space<vmem>>, vector<1x16x32xbf16>,
      %c3_195 = arith.constant 3 : index
      %c0_196 = arith.constant 0 : index
      %c0_197 = arith.constant 0 : index
      %268 = vector.load %arg7[%c3_195, %c0_196, %c0_197] : memref<4x128x32xbf16, #tpu.memory_space<vmem>>, vector<1x128x32xbf16>
      %269 = vector.shape_cast %268 : vector<1x128x32xbf16> to vector<128x32xbf16>
      %cst_198 = arith.constant dense<0.000000e+00> : vector<16x32xf32>
      %270 = tpu.matmul %228, %269, %cst_198 {dimension_numbers = #tpu.dot_dimension_numbers<[1], [0], [0], [1], [0, 0, 1, 1], [], []>} : vector<16x128xbf16>, vector<128x32xbf16>, vector<16x32xf32> -> vector<16x32xf32>
      %c3_199 = arith.constant 3 : index
      %c0_200 = arith.constant 0 : index
      %c0_201 = arith.constant 0 : index
      %271 = vector.load %arg8[%c3_199, %c0_200, %c0_201] : memref<4x1x32xf32, #tpu.memory_space<vmem>>, vector<1x1x32xf32>
      %272 = vector.shape_cast %271 : vector<1x1x32xf32> to vector<1x32xf32>
      %273 = vector.broadcast %272 : vector<1x32xf32> to vector<16x32xf32>
      %274 = arith.addf %270, %273 : vector<16x32xf32>
      %cst_202 = arith.constant 0.176776692 : f32
      %275 = vector.broadcast %cst_202 : f32 to vector<16x32xf32>
      %276 = arith.mulf %274, %275 : vector<16x32xf32>
      %277 = arith.truncf %276 : vector<16x32xf32> to vector<16x32xbf16>
      %c3_203 = arith.constant 3 : index
      %c0_204 = arith.constant 0 : index
      %c0_205 = arith.constant 0 : index
      %278 = vector.load %arg18[%c3_203, %c0_204, %c0_205] : memref<4x16x32xbf16, #tpu.memory_space<vmem>>, vector<1x16x32xbf16>
      %279 = vector.shape_cast %278 : vector<1x16x32xbf16> to vector<16x32xbf16>
      %280 = vector.shape_cast %277 : vector<16x32xbf16> to vector<1x16x32xbf16>
      tpu.vector_store %arg18[%c3_203, %c0_204, %c0_205], %280 {strides = array<i32>} : memref<4x16x32xbf16, #tpu.memory_space<vmem>>, vector<1x16x32xbf16>,
      %cst_206 = arith.constant 0xFF800000 : f32
      %281 = vector.broadcast %cst_206 : f32 to vector<4x16x1xf32>
      %c0_207 = arith.constant 0 : index
      %c0_208 = arith.constant 0 : index
      %c0_209 = arith.constant 0 : index
      %282 = vector.load %arg19[%c0_207, %c0_208, %c0_209] : memref<4x16x1xf32, #tpu.memory_space<vmem>>, vector<4x16x1xf32>
      tpu.vector_store %arg19[%c0_207, %c0_208, %c0_209], %281 {strides = array<i32>} : memref<4x16x1xf32, #tpu.memory_space<vmem>>, vector<4x16x1xf32>,
      %cst_210 = arith.constant 0.000000e+00 : f32
      %283 = vector.broadcast %cst_210 : f32 to vector<4x16x1xf32>
      %c0_211 = arith.constant 0 : index
      %c0_212 = arith.constant 0 : index
      %c0_213 = arith.constant 0 : index
      %284 = vector.load %arg20[%c0_211, %c0_212, %c0_213] : memref<4x16x1xf32, #tpu.memory_space<vmem>>, vector<4x16x1xf32>
      tpu.vector_store %arg20[%c0_211, %c0_212, %c0_213], %283 {strides = array<i32>} : memref<4x16x1xf32, #tpu.memory_space<vmem>>, vector<4x16x1xf32>,
      %cst_214 = arith.constant 0.000000e+00 : f32
      %285 = vector.broadcast %cst_214 : f32 to vector<4x16x32xf32>
      %c0_215 = arith.constant 0 : index
      %c0_216 = arith.constant 0 : index
      %c0_217 = arith.constant 0 : index
      %286 = vector.load %arg21[%c0_215, %c0_216, %c0_217] : memref<4x16x32xf32, #tpu.memory_space<vmem>>, vector<4x16x32xf32>
      tpu.vector_store %arg21[%c0_215, %c0_216, %c0_217], %285 {strides = array<i32>} : memref<4x16x32xf32, #tpu.memory_space<vmem>>, vector<4x16x32xf32>,
    } else {
    }
    %c16_i32 = arith.constant 16 : i32
    %3 = arith.muli %arg2, %c16_i32 : i32
    %4 = tpu.iota {dimensions = array<i32: 1>} : vector<16x16xi32>
    %5 = vector.broadcast %3 : i32 to vector<16x16xi32>
    %6 = arith.addi %5, %4 : vector<16x16xi32>
    %7 = arith.index_cast %arg0 : i32 to index
    %8 = memref.load %arg4[%7] : memref<2xi32, #tpu.memory_space<smem>>
    %9 = vector.broadcast %8 : i32 to vector<16x16xi32>
    %10 = arith.cmpi sge, %6, %9 : vector<16x16xi32>
    %cst = arith.constant -1.000000e+30 : f32
    %cst_1 = arith.constant 0.000000e+00 : f32
    %11 = vector.broadcast %cst : f32 to vector<16x16xf32>
    %12 = vector.broadcast %cst_1 : f32 to vector<16x16xf32>
    %13 = arith.select %10, %11, %12 : vector<16x16xi1>, vector<16x16xf32>
    %c0 = arith.constant 0 : index
    %c0_2 = arith.constant 0 : index
    %c0_3 = arith.constant 0 : index
    %14 = vector.load %arg6[%c0, %c0_2, %c0_3] : memref<1x16x128xbf16, #tpu.memory_space<vmem>>, vector<1x16x128xbf16>
    %15 = vector.shape_cast %14 : vector<1x16x128xbf16> to vector<16x128xbf16>
    %c0_4 = arith.constant 0 : index
    %c0_5 = arith.constant 0 : index
    %c0_6 = arith.constant 0 : index
    %16 = vector.load %arg9[%c0_4, %c0_5, %c0_6] : memref<4x128x32xbf16, #tpu.memory_space<vmem>>, vector<1x128x32xbf16>
    %17 = vector.shape_cast %16 : vector<1x128x32xbf16> to vector<128x32xbf16>
    %cst_7 = arith.constant dense<0.000000e+00> : vector<16x32xf32>
    %18 = tpu.matmul %15, %17, %cst_7 {dimension_numbers = #tpu.dot_dimension_numbers<[1], [0], [0], [1], [0, 0, 1, 1], [], []>} : vector<16x128xbf16>, vector<128x32xbf16>, vector<16x32xf32> -> vector<16x32xf32>
    %c0_8 = arith.constant 0 : index
    %c0_9 = arith.constant 0 : index
    %c0_10 = arith.constant 0 : index
    %19 = vector.load %arg10[%c0_8, %c0_9, %c0_10] : memref<4x1x32xf32, #tpu.memory_space<vmem>>, vector<1x1x32xf32>
    %20 = vector.shape_cast %19 : vector<1x1x32xf32> to vector<1x32xf32>
    %21 = vector.broadcast %20 : vector<1x32xf32> to vector<16x32xf32>
    %22 = arith.addf %18, %21 : vector<16x32xf32>
    %23 = arith.truncf %22 : vector<16x32xf32> to vector<16x32xbf16>
    %c0_11 = arith.constant 0 : index
    %c0_12 = arith.constant 0 : index
    %c0_13 = arith.constant 0 : index
    %24 = vector.load %arg11[%c0_11, %c0_12, %c0_13] : memref<4x128x32xbf16, #tpu.memory_space<vmem>>, vector<1x128x32xbf16>
    %25 = vector.shape_cast %24 : vector<1x128x32xbf16> to vector<128x32xbf16>
    %cst_14 = arith.constant dense<0.000000e+00> : vector<16x32xf32>
    %26 = tpu.matmul %15, %25, %cst_14 {dimension_numbers = #tpu.dot_dimension_numbers<[1], [0], [0], [1], [0, 0, 1, 1], [], []>} : vector<16x128xbf16>, vector<128x32xbf16>, vector<16x32xf32> -> vector<16x32xf32>
    %c0_15 = arith.constant 0 : index
    %c0_16 = arith.constant 0 : index
    %c0_17 = arith.constant 0 : index
    %27 = vector.load %arg12[%c0_15, %c0_16, %c0_17] : memref<4x1x32xf32, #tpu.memory_space<vmem>>, vector<1x1x32xf32>
    %28 = vector.shape_cast %27 : vector<1x1x32xf32> to vector<1x32xf32>
    %29 = vector.broadcast %28 : vector<1x32xf32> to vector<16x32xf32>
    %30 = arith.addf %26, %29 : vector<16x32xf32>
    %31 = arith.truncf %30 : vector<16x32xf32> to vector<16x32xbf16>
    %c0_18 = arith.constant 0 : index
    %c0_19 = arith.constant 0 : index
    %c0_20 = arith.constant 0 : index
    %32 = vector.load %arg18[%c0_18, %c0_19, %c0_20] : memref<4x16x32xbf16, #tpu.memory_space<vmem>>, vector<1x16x32xbf16>
    %33 = vector.shape_cast %32 : vector<1x16x32xbf16> to vector<16x32xbf16>
    %cst_21 = arith.constant dense<0.000000e+00> : vector<16x16xf32>
    %34 = tpu.matmul %33, %23, %cst_21 {dimension_numbers = #tpu.dot_dimension_numbers<[1], [1], [0], [0], [0, 0, 1, 0], [], []>} : vector<16x32xbf16>, vector<16x32xbf16>, vector<16x16xf32> -> vector<16x16xf32>
    %35 = arith.addf %34, %13 : vector<16x16xf32>
    %c0_22 = arith.constant 0 : index
    %c0_23 = arith.constant 0 : index
    %c0_24 = arith.constant 0 : index
    %36 = vector.load %arg19[%c0_22, %c0_23, %c0_24] : memref<4x16x1xf32, #tpu.memory_space<vmem>>, vector<1x16x1xf32>
    %37 = vector.shape_cast %36 : vector<1x16x1xf32> to vector<16x1xf32>
    %cst_25 = arith.constant dense<0xFF800000> : vector<16xf32>
    %38 = vector.multi_reduction <maximumf>, %35, %cst_25 [1] : vector<16x16xf32> to vector<16xf32>
    %39 = vector.shape_cast %38 : vector<16xf32> to vector<16x1xf32>
    %40 = arith.maximumf %37, %39 : vector<16x1xf32>
    %41 = arith.subf %37, %40 : vector<16x1xf32>
    %42 = math.exp %41 : vector<16x1xf32>
    %43 = vector.broadcast %40 : vector<16x1xf32> to vector<16x16xf32>
    %44 = arith.subf %35, %43 : vector<16x16xf32>
    %45 = math.exp %44 : vector<16x16xf32>
    %c0_26 = arith.constant 0 : index
    %c0_27 = arith.constant 0 : index
    %c0_28 = arith.constant 0 : index
    %46 = vector.load %arg20[%c0_26, %c0_27, %c0_28] : memref<4x16x1xf32, #tpu.memory_space<vmem>>, vector<1x16x1xf32>
    %47 = vector.shape_cast %46 : vector<1x16x1xf32> to vector<16x1xf32>
    %48 = arith.mulf %42, %47 : vector<16x1xf32>
    %cst_29 = arith.constant dense<0.000000e+00> : vector<16xf32>
    %49 = vector.multi_reduction <add>, %45, %cst_29 [1] : vector<16x16xf32> to vector<16xf32>
    %50 = vector.shape_cast %49 : vector<16xf32> to vector<16x1xf32>
    %51 = arith.addf %48, %50 : vector<16x1xf32>
    %c0_30 = arith.constant 0 : index
    %c0_31 = arith.constant 0 : index
    %c0_32 = arith.constant 0 : index
    %52 = vector.load %arg20[%c0_30, %c0_31, %c0_32] : memref<4x16x1xf32, #tpu.memory_space<vmem>>, vector<1x16x1xf32>
    %53 = vector.shape_cast %52 : vector<1x16x1xf32> to vector<16x1xf32>
    %54 = vector.shape_cast %51 : vector<16x1xf32> to vector<1x16x1xf32>
    tpu.vector_store %arg20[%c0_30, %c0_31, %c0_32], %54 {strides = array<i32>} : memref<4x16x1xf32, #tpu.memory_space<vmem>>, vector<1x16x1xf32>,
    %c0_33 = arith.constant 0 : index
    %c0_34 = arith.constant 0 : index
    %c0_35 = arith.constant 0 : index
    %55 = vector.load %arg21[%c0_33, %c0_34, %c0_35] : memref<4x16x32xf32, #tpu.memory_space<vmem>>, vector<1x16x32xf32>
    %56 = vector.shape_cast %55 : vector<1x16x32xf32> to vector<16x32xf32>
    %57 = vector.broadcast %42 : vector<16x1xf32> to vector<16x32xf32>
    %58 = arith.mulf %57, %56 : vector<16x32xf32>
    %59 = arith.truncf %45 : vector<16x16xf32> to vector<16x16xbf16>
    %cst_36 = arith.constant dense<0.000000e+00> : vector<16x32xf32>
    %60 = tpu.matmul %59, %31, %cst_36 {dimension_numbers = #tpu.dot_dimension_numbers<[1], [0], [0], [1], [0, 0, 1, 1], [], []>} : vector<16x16xbf16>, vector<16x32xbf16>, vector<16x32xf32> -> vector<16x32xf32>
    %61 = arith.addf %58, %60 : vector<16x32xf32>
    %c0_37 = arith.constant 0 : index
    %c0_38 = arith.constant 0 : index
    %c0_39 = arith.constant 0 : index
    %62 = vector.load %arg21[%c0_37, %c0_38, %c0_39] : memref<4x16x32xf32, #tpu.memory_space<vmem>>, vector<1x16x32xf32>
    %63 = vector.shape_cast %62 : vector<1x16x32xf32> to vector<16x32xf32>
    %64 = vector.shape_cast %61 : vector<16x32xf32> to vector<1x16x32xf32>
    tpu.vector_store %arg21[%c0_37, %c0_38, %c0_39], %64 {strides = array<i32>} : memref<4x16x32xf32, #tpu.memory_space<vmem>>, vector<1x16x32xf32>,
    %c0_40 = arith.constant 0 : index
    %c0_41 = arith.constant 0 : index
    %c0_42 = arith.constant 0 : index
    %65 = vector.load %arg19[%c0_40, %c0_41, %c0_42] : memref<4x16x1xf32, #tpu.memory_space<vmem>>, vector<1x16x1xf32>
    %66 = vector.shape_cast %65 : vector<1x16x1xf32> to vector<16x1xf32>
    %67 = vector.shape_cast %40 : vector<16x1xf32> to vector<1x16x1xf32>
    tpu.vector_store %arg19[%c0_40, %c0_41, %c0_42], %67 {strides = array<i32>} : memref<4x16x1xf32, #tpu.memory_space<vmem>>, vector<1x16x1xf32>,
    %c1 = arith.constant 1 : index
    %c0_43 = arith.constant 0 : index
    %c0_44 = arith.constant 0 : index
    %68 = vector.load %arg9[%c1, %c0_43, %c0_44] : memref<4x128x32xbf16, #tpu.memory_space<vmem>>, vector<1x128x32xbf16>
    %69 = vector.shape_cast %68 : vector<1x128x32xbf16> to vector<128x32xbf16>
    %cst_45 = arith.constant dense<0.000000e+00> : vector<16x32xf32>
    %70 = tpu.matmul %15, %69, %cst_45 {dimension_numbers = #tpu.dot_dimension_numbers<[1], [0], [0], [1], [0, 0, 1, 1], [], []>} : vector<16x128xbf16>, vector<128x32xbf16>, vector<16x32xf32> -> vector<16x32xf32>
    %c1_46 = arith.constant 1 : index
    %c0_47 = arith.constant 0 : index
    %c0_48 = arith.constant 0 : index
    %71 = vector.load %arg10[%c1_46, %c0_47, %c0_48] : memref<4x1x32xf32, #tpu.memory_space<vmem>>, vector<1x1x32xf32>
    %72 = vector.shape_cast %71 : vector<1x1x32xf32> to vector<1x32xf32>
    %73 = vector.broadcast %72 : vector<1x32xf32> to vector<16x32xf32>
    %74 = arith.addf %70, %73 : vector<16x32xf32>
    %75 = arith.truncf %74 : vector<16x32xf32> to vector<16x32xbf16>
    %c1_49 = arith.constant 1 : index
    %c0_50 = arith.constant 0 : index
    %c0_51 = arith.constant 0 : index
    %76 = vector.load %arg11[%c1_49, %c0_50, %c0_51] : memref<4x128x32xbf16, #tpu.memory_space<vmem>>, vector<1x128x32xbf16>
    %77 = vector.shape_cast %76 : vector<1x128x32xbf16> to vector<128x32xbf16>
    %cst_52 = arith.constant dense<0.000000e+00> : vector<16x32xf32>
    %78 = tpu.matmul %15, %77, %cst_52 {dimension_numbers = #tpu.dot_dimension_numbers<[1], [0], [0], [1], [0, 0, 1, 1], [], []>} : vector<16x128xbf16>, vector<128x32xbf16>, vector<16x32xf32> -> vector<16x32xf32>
    %c1_53 = arith.constant 1 : index
    %c0_54 = arith.constant 0 : index
    %c0_55 = arith.constant 0 : index
    %79 = vector.load %arg12[%c1_53, %c0_54, %c0_55] : memref<4x1x32xf32, #tpu.memory_space<vmem>>, vector<1x1x32xf32>
    %80 = vector.shape_cast %79 : vector<1x1x32xf32> to vector<1x32xf32>
    %81 = vector.broadcast %80 : vector<1x32xf32> to vector<16x32xf32>
    %82 = arith.addf %78, %81 : vector<16x32xf32>
    %83 = arith.truncf %82 : vector<16x32xf32> to vector<16x32xbf16>
    %c1_56 = arith.constant 1 : index
    %c0_57 = arith.constant 0 : index
    %c0_58 = arith.constant 0 : index
    %84 = vector.load %arg18[%c1_56, %c0_57, %c0_58] : memref<4x16x32xbf16, #tpu.memory_space<vmem>>, vector<1x16x32xbf16>
    %85 = vector.shape_cast %84 : vector<1x16x32xbf16> to vector<16x32xbf16>
    %cst_59 = arith.constant dense<0.000000e+00> : vector<16x16xf32>
    %86 = tpu.matmul %85, %75, %cst_59 {dimension_numbers = #tpu.dot_dimension_numbers<[1], [1], [0], [0], [0, 0, 1, 0], [], []>} : vector<16x32xbf16>, vector<16x32xbf16>, vector<16x16xf32> -> vector<16x16xf32>
    %87 = arith.addf %86, %13 : vector<16x16xf32>
    %c1_60 = arith.constant 1 : index
    %c0_61 = arith.constant 0 : index
    %c0_62 = arith.constant 0 : index
    %88 = vector.load %arg19[%c1_60, %c0_61, %c0_62] : memref<4x16x1xf32, #tpu.memory_space<vmem>>, vector<1x16x1xf32>
    %89 = vector.shape_cast %88 : vector<1x16x1xf32> to vector<16x1xf32>
    %cst_63 = arith.constant dense<0xFF800000> : vector<16xf32>
    %90 = vector.multi_reduction <maximumf>, %87, %cst_63 [1] : vector<16x16xf32> to vector<16xf32>
    %91 = vector.shape_cast %90 : vector<16xf32> to vector<16x1xf32>
    %92 = arith.maximumf %89, %91 : vector<16x1xf32>
    %93 = arith.subf %89, %92 : vector<16x1xf32>
    %94 = math.exp %93 : vector<16x1xf32>
    %95 = vector.broadcast %92 : vector<16x1xf32> to vector<16x16xf32>
    %96 = arith.subf %87, %95 : vector<16x16xf32>
    %97 = math.exp %96 : vector<16x16xf32>
    %c1_64 = arith.constant 1 : index
    %c0_65 = arith.constant 0 : index
    %c0_66 = arith.constant 0 : index
    %98 = vector.load %arg20[%c1_64, %c0_65, %c0_66] : memref<4x16x1xf32, #tpu.memory_space<vmem>>, vector<1x16x1xf32>
    %99 = vector.shape_cast %98 : vector<1x16x1xf32> to vector<16x1xf32>
    %100 = arith.mulf %94, %99 : vector<16x1xf32>
    %cst_67 = arith.constant dense<0.000000e+00> : vector<16xf32>
    %101 = vector.multi_reduction <add>, %97, %cst_67 [1] : vector<16x16xf32> to vector<16xf32>
    %102 = vector.shape_cast %101 : vector<16xf32> to vector<16x1xf32>
    %103 = arith.addf %100, %102 : vector<16x1xf32>
    %c1_68 = arith.constant 1 : index
    %c0_69 = arith.constant 0 : index
    %c0_70 = arith.constant 0 : index
    %104 = vector.load %arg20[%c1_68, %c0_69, %c0_70] : memref<4x16x1xf32, #tpu.memory_space<vmem>>, vector<1x16x1xf32>
    %105 = vector.shape_cast %104 : vector<1x16x1xf32> to vector<16x1xf32>
    %106 = vector.shape_cast %103 : vector<16x1xf32> to vector<1x16x1xf32>
    tpu.vector_store %arg20[%c1_68, %c0_69, %c0_70], %106 {strides = array<i32>} : memref<4x16x1xf32, #tpu.memory_space<vmem>>, vector<1x16x1xf32>,
    %c1_71 = arith.constant 1 : index
    %c0_72 = arith.constant 0 : index
    %c0_73 = arith.constant 0 : index
    %107 = vector.load %arg21[%c1_71, %c0_72, %c0_73] : memref<4x16x32xf32, #tpu.memory_space<vmem>>, vector<1x16x32xf32>
    %108 = vector.shape_cast %107 : vector<1x16x32xf32> to vector<16x32xf32>
    %109 = vector.broadcast %94 : vector<16x1xf32> to vector<16x32xf32>
    %110 = arith.mulf %109, %108 : vector<16x32xf32>
    %111 = arith.truncf %97 : vector<16x16xf32> to vector<16x16xbf16>
    %cst_74 = arith.constant dense<0.000000e+00> : vector<16x32xf32>
    %112 = tpu.matmul %111, %83, %cst_74 {dimension_numbers = #tpu.dot_dimension_numbers<[1], [0], [0], [1], [0, 0, 1, 1], [], []>} : vector<16x16xbf16>, vector<16x32xbf16>, vector<16x32xf32> -> vector<16x32xf32>
    %113 = arith.addf %110, %112 : vector<16x32xf32>
    %c1_75 = arith.constant 1 : index
    %c0_76 = arith.constant 0 : index
    %c0_77 = arith.constant 0 : index
    %114 = vector.load %arg21[%c1_75, %c0_76, %c0_77] : memref<4x16x32xf32, #tpu.memory_space<vmem>>, vector<1x16x32xf32>
    %115 = vector.shape_cast %114 : vector<1x16x32xf32> to vector<16x32xf32>
    %116 = vector.shape_cast %113 : vector<16x32xf32> to vector<1x16x32xf32>
    tpu.vector_store %arg21[%c1_75, %c0_76, %c0_77], %116 {strides = array<i32>} : memref<4x16x32xf32, #tpu.memory_space<vmem>>, vector<1x16x32xf32>,
    %c1_78 = arith.constant 1 : index
    %c0_79 = arith.constant 0 : index
    %c0_80 = arith.constant 0 : index
    %117 = vector.load %arg19[%c1_78, %c0_79, %c0_80] : memref<4x16x1xf32, #tpu.memory_space<vmem>>, vector<1x16x1xf32>
    %118 = vector.shape_cast %117 : vector<1x16x1xf32> to vector<16x1xf32>
    %119 = vector.shape_cast %92 : vector<16x1xf32> to vector<1x16x1xf32>
    tpu.vector_store %arg19[%c1_78, %c0_79, %c0_80], %119 {strides = array<i32>} : memref<4x16x1xf32, #tpu.memory_space<vmem>>, vector<1x16x1xf32>,
    %c2 = arith.constant 2 : index
    %c0_81 = arith.constant 0 : index
    %c0_82 = arith.constant 0 : index
    %120 = vector.load %arg9[%c2, %c0_81, %c0_82] : memref<4x128x32xbf16, #tpu.memory_space<vmem>>, vector<1x128x32xbf16>
    %121 = vector.shape_cast %120 : vector<1x128x32xbf16> to vector<128x32xbf16>
    %cst_83 = arith.constant dense<0.000000e+00> : vector<16x32xf32>
    %122 = tpu.matmul %15, %121, %cst_83 {dimension_numbers = #tpu.dot_dimension_numbers<[1], [0], [0], [1], [0, 0, 1, 1], [], []>} : vector<16x128xbf16>, vector<128x32xbf16>, vector<16x32xf32> -> vector<16x32xf32>
    %c2_84 = arith.constant 2 : index
    %c0_85 = arith.constant 0 : index
    %c0_86 = arith.constant 0 : index
    %123 = vector.load %arg10[%c2_84, %c0_85, %c0_86] : memref<4x1x32xf32, #tpu.memory_space<vmem>>, vector<1x1x32xf32>
    %124 = vector.shape_cast %123 : vector<1x1x32xf32> to vector<1x32xf32>
    %125 = vector.broadcast %124 : vector<1x32xf32> to vector<16x32xf32>
    %126 = arith.addf %122, %125 : vector<16x32xf32>
    %127 = arith.truncf %126 : vector<16x32xf32> to vector<16x32xbf16>
    %c2_87 = arith.constant 2 : index
    %c0_88 = arith.constant 0 : index
    %c0_89 = arith.constant 0 : index
    %128 = vector.load %arg11[%c2_87, %c0_88, %c0_89] : memref<4x128x32xbf16, #tpu.memory_space<vmem>>, vector<1x128x32xbf16>
    %129 = vector.shape_cast %128 : vector<1x128x32xbf16> to vector<128x32xbf16>
    %cst_90 = arith.constant dense<0.000000e+00> : vector<16x32xf32>
    %130 = tpu.matmul %15, %129, %cst_90 {dimension_numbers = #tpu.dot_dimension_numbers<[1], [0], [0], [1], [0, 0, 1, 1], [], []>} : vector<16x128xbf16>, vector<128x32xbf16>, vector<16x32xf32> -> vector<16x32xf32>
    %c2_91 = arith.constant 2 : index
    %c0_92 = arith.constant 0 : index
    %c0_93 = arith.constant 0 : index
    %131 = vector.load %arg12[%c2_91, %c0_92, %c0_93] : memref<4x1x32xf32, #tpu.memory_space<vmem>>, vector<1x1x32xf32>
    %132 = vector.shape_cast %131 : vector<1x1x32xf32> to vector<1x32xf32>
    %133 = vector.broadcast %132 : vector<1x32xf32> to vector<16x32xf32>
    %134 = arith.addf %130, %133 : vector<16x32xf32>
    %135 = arith.truncf %134 : vector<16x32xf32> to vector<16x32xbf16>
    %c2_94 = arith.constant 2 : index
    %c0_95 = arith.constant 0 : index
    %c0_96 = arith.constant 0 : index
    %136 = vector.load %arg18[%c2_94, %c0_95, %c0_96] : memref<4x16x32xbf16, #tpu.memory_space<vmem>>, vector<1x16x32xbf16>
    %137 = vector.shape_cast %136 : vector<1x16x32xbf16> to vector<16x32xbf16>
    %cst_97 = arith.constant dense<0.000000e+00> : vector<16x16xf32>
    %138 = tpu.matmul %137, %127, %cst_97 {dimension_numbers = #tpu.dot_dimension_numbers<[1], [1], [0], [0], [0, 0, 1, 0], [], []>} : vector<16x32xbf16>, vector<16x32xbf16>, vector<16x16xf32> -> vector<16x16xf32>
    %139 = arith.addf %138, %13 : vector<16x16xf32>
    %c2_98 = arith.constant 2 : index
    %c0_99 = arith.constant 0 : index
    %c0_100 = arith.constant 0 : index
    %140 = vector.load %arg19[%c2_98, %c0_99, %c0_100] : memref<4x16x1xf32, #tpu.memory_space<vmem>>, vector<1x16x1xf32>
    %141 = vector.shape_cast %140 : vector<1x16x1xf32> to vector<16x1xf32>
    %cst_101 = arith.constant dense<0xFF800000> : vector<16xf32>
    %142 = vector.multi_reduction <maximumf>, %139, %cst_101 [1] : vector<16x16xf32> to vector<16xf32>
    %143 = vector.shape_cast %142 : vector<16xf32> to vector<16x1xf32>
    %144 = arith.maximumf %141, %143 : vector<16x1xf32>
    %145 = arith.subf %141, %144 : vector<16x1xf32>
    %146 = math.exp %145 : vector<16x1xf32>
    %147 = vector.broadcast %144 : vector<16x1xf32> to vector<16x16xf32>
    %148 = arith.subf %139, %147 : vector<16x16xf32>
    %149 = math.exp %148 : vector<16x16xf32>
    %c2_102 = arith.constant 2 : index
    %c0_103 = arith.constant 0 : index
    %c0_104 = arith.constant 0 : index
    %150 = vector.load %arg20[%c2_102, %c0_103, %c0_104] : memref<4x16x1xf32, #tpu.memory_space<vmem>>, vector<1x16x1xf32>
    %151 = vector.shape_cast %150 : vector<1x16x1xf32> to vector<16x1xf32>
    %152 = arith.mulf %146, %151 : vector<16x1xf32>
    %cst_105 = arith.constant dense<0.000000e+00> : vector<16xf32>
    %153 = vector.multi_reduction <add>, %149, %cst_105 [1] : vector<16x16xf32> to vector<16xf32>
    %154 = vector.shape_cast %153 : vector<16xf32> to vector<16x1xf32>
    %155 = arith.addf %152, %154 : vector<16x1xf32>
    %c2_106 = arith.constant 2 : index
    %c0_107 = arith.constant 0 : index
    %c0_108 = arith.constant 0 : index
    %156 = vector.load %arg20[%c2_106, %c0_107, %c0_108] : memref<4x16x1xf32, #tpu.memory_space<vmem>>, vector<1x16x1xf32>
    %157 = vector.shape_cast %156 : vector<1x16x1xf32> to vector<16x1xf32>
    %158 = vector.shape_cast %155 : vector<16x1xf32> to vector<1x16x1xf32>
    tpu.vector_store %arg20[%c2_106, %c0_107, %c0_108], %158 {strides = array<i32>} : memref<4x16x1xf32, #tpu.memory_space<vmem>>, vector<1x16x1xf32>,
    %c2_109 = arith.constant 2 : index
    %c0_110 = arith.constant 0 : index
    %c0_111 = arith.constant 0 : index
    %159 = vector.load %arg21[%c2_109, %c0_110, %c0_111] : memref<4x16x32xf32, #tpu.memory_space<vmem>>, vector<1x16x32xf32>
    %160 = vector.shape_cast %159 : vector<1x16x32xf32> to vector<16x32xf32>
    %161 = vector.broadcast %146 : vector<16x1xf32> to vector<16x32xf32>
    %162 = arith.mulf %161, %160 : vector<16x32xf32>
    %163 = arith.truncf %149 : vector<16x16xf32> to vector<16x16xbf16>
    %cst_112 = arith.constant dense<0.000000e+00> : vector<16x32xf32>
    %164 = tpu.matmul %163, %135, %cst_112 {dimension_numbers = #tpu.dot_dimension_numbers<[1], [0], [0], [1], [0, 0, 1, 1], [], []>} : vector<16x16xbf16>, vector<16x32xbf16>, vector<16x32xf32> -> vector<16x32xf32>
    %165 = arith.addf %162, %164 : vector<16x32xf32>
    %c2_113 = arith.constant 2 : index
    %c0_114 = arith.constant 0 : index
    %c0_115 = arith.constant 0 : index
    %166 = vector.load %arg21[%c2_113, %c0_114, %c0_115] : memref<4x16x32xf32, #tpu.memory_space<vmem>>, vector<1x16x32xf32>
    %167 = vector.shape_cast %166 : vector<1x16x32xf32> to vector<16x32xf32>
    %168 = vector.shape_cast %165 : vector<16x32xf32> to vector<1x16x32xf32>
    tpu.vector_store %arg21[%c2_113, %c0_114, %c0_115], %168 {strides = array<i32>} : memref<4x16x32xf32, #tpu.memory_space<vmem>>, vector<1x16x32xf32>,
    %c2_116 = arith.constant 2 : index
    %c0_117 = arith.constant 0 : index
    %c0_118 = arith.constant 0 : index
    %169 = vector.load %arg19[%c2_116, %c0_117, %c0_118] : memref<4x16x1xf32, #tpu.memory_space<vmem>>, vector<1x16x1xf32>
    %170 = vector.shape_cast %169 : vector<1x16x1xf32> to vector<16x1xf32>
    %171 = vector.shape_cast %144 : vector<16x1xf32> to vector<1x16x1xf32>
    tpu.vector_store %arg19[%c2_116, %c0_117, %c0_118], %171 {strides = array<i32>} : memref<4x16x1xf32, #tpu.memory_space<vmem>>, vector<1x16x1xf32>,
    %c3 = arith.constant 3 : index
    %c0_119 = arith.constant 0 : index
    %c0_120 = arith.constant 0 : index
    %172 = vector.load %arg9[%c3, %c0_119, %c0_120] : memref<4x128x32xbf16, #tpu.memory_space<vmem>>, vector<1x128x32xbf16>
    %173 = vector.shape_cast %172 : vector<1x128x32xbf16> to vector<128x32xbf16>
    %cst_121 = arith.constant dense<0.000000e+00> : vector<16x32xf32>
    %174 = tpu.matmul %15, %173, %cst_121 {dimension_numbers = #tpu.dot_dimension_numbers<[1], [0], [0], [1], [0, 0, 1, 1], [], []>} : vector<16x128xbf16>, vector<128x32xbf16>, vector<16x32xf32> -> vector<16x32xf32>
    %c3_122 = arith.constant 3 : index
    %c0_123 = arith.constant 0 : index
    %c0_124 = arith.constant 0 : index
    %175 = vector.load %arg10[%c3_122, %c0_123, %c0_124] : memref<4x1x32xf32, #tpu.memory_space<vmem>>, vector<1x1x32xf32>
    %176 = vector.shape_cast %175 : vector<1x1x32xf32> to vector<1x32xf32>
    %177 = vector.broadcast %176 : vector<1x32xf32> to vector<16x32xf32>
    %178 = arith.addf %174, %177 : vector<16x32xf32>
    %179 = arith.truncf %178 : vector<16x32xf32> to vector<16x32xbf16>
    %c3_125 = arith.constant 3 : index
    %c0_126 = arith.constant 0 : index
    %c0_127 = arith.constant 0 : index
    %180 = vector.load %arg11[%c3_125, %c0_126, %c0_127] : memref<4x128x32xbf16, #tpu.memory_space<vmem>>, vector<1x128x32xbf16>
    %181 = vector.shape_cast %180 : vector<1x128x32xbf16> to vector<128x32xbf16>
    %cst_128 = arith.constant dense<0.000000e+00> : vector<16x32xf32>
    %182 = tpu.matmul %15, %181, %cst_128 {dimension_numbers = #tpu.dot_dimension_numbers<[1], [0], [0], [1], [0, 0, 1, 1], [], []>} : vector<16x128xbf16>, vector<128x32xbf16>, vector<16x32xf32> -> vector<16x32xf32>
    %c3_129 = arith.constant 3 : index
    %c0_130 = arith.constant 0 : index
    %c0_131 = arith.constant 0 : index
    %183 = vector.load %arg12[%c3_129, %c0_130, %c0_131] : memref<4x1x32xf32, #tpu.memory_space<vmem>>, vector<1x1x32xf32>
    %184 = vector.shape_cast %183 : vector<1x1x32xf32> to vector<1x32xf32>
    %185 = vector.broadcast %184 : vector<1x32xf32> to vector<16x32xf32>
    %186 = arith.addf %182, %185 : vector<16x32xf32>
    %187 = arith.truncf %186 : vector<16x32xf32> to vector<16x32xbf16>
    %c3_132 = arith.constant 3 : index
    %c0_133 = arith.constant 0 : index
    %c0_134 = arith.constant 0 : index
    %188 = vector.load %arg18[%c3_132, %c0_133, %c0_134] : memref<4x16x32xbf16, #tpu.memory_space<vmem>>, vector<1x16x32xbf16>
    %189 = vector.shape_cast %188 : vector<1x16x32xbf16> to vector<16x32xbf16>
    %cst_135 = arith.constant dense<0.000000e+00> : vector<16x16xf32>
    %190 = tpu.matmul %189, %179, %cst_135 {dimension_numbers = #tpu.dot_dimension_numbers<[1], [1], [0], [0], [0, 0, 1, 0], [], []>} : vector<16x32xbf16>, vector<16x32xbf16>, vector<16x16xf32> -> vector<16x16xf32>
    %191 = arith.addf %190, %13 : vector<16x16xf32>
    %c3_136 = arith.constant 3 : index
    %c0_137 = arith.constant 0 : index
    %c0_138 = arith.constant 0 : index
    %192 = vector.load %arg19[%c3_136, %c0_137, %c0_138] : memref<4x16x1xf32, #tpu.memory_space<vmem>>, vector<1x16x1xf32>
    %193 = vector.shape_cast %192 : vector<1x16x1xf32> to vector<16x1xf32>
    %cst_139 = arith.constant dense<0xFF800000> : vector<16xf32>
    %194 = vector.multi_reduction <maximumf>, %191, %cst_139 [1] : vector<16x16xf32> to vector<16xf32>
    %195 = vector.shape_cast %194 : vector<16xf32> to vector<16x1xf32>
    %196 = arith.maximumf %193, %195 : vector<16x1xf32>
    %197 = arith.subf %193, %196 : vector<16x1xf32>
    %198 = math.exp %197 : vector<16x1xf32>
    %199 = vector.broadcast %196 : vector<16x1xf32> to vector<16x16xf32>
    %200 = arith.subf %191, %199 : vector<16x16xf32>
    %201 = math.exp %200 : vector<16x16xf32>
    %c3_140 = arith.constant 3 : index
    %c0_141 = arith.constant 0 : index
    %c0_142 = arith.constant 0 : index
    %202 = vector.load %arg20[%c3_140, %c0_141, %c0_142] : memref<4x16x1xf32, #tpu.memory_space<vmem>>, vector<1x16x1xf32>
    %203 = vector.shape_cast %202 : vector<1x16x1xf32> to vector<16x1xf32>
    %204 = arith.mulf %198, %203 : vector<16x1xf32>
    %cst_143 = arith.constant dense<0.000000e+00> : vector<16xf32>
    %205 = vector.multi_reduction <add>, %201, %cst_143 [1] : vector<16x16xf32> to vector<16xf32>
    %206 = vector.shape_cast %205 : vector<16xf32> to vector<16x1xf32>
    %207 = arith.addf %204, %206 : vector<16x1xf32>
    %c3_144 = arith.constant 3 : index
    %c0_145 = arith.constant 0 : index
    %c0_146 = arith.constant 0 : index
    %208 = vector.load %arg20[%c3_144, %c0_145, %c0_146] : memref<4x16x1xf32, #tpu.memory_space<vmem>>, vector<1x16x1xf32>
    %209 = vector.shape_cast %208 : vector<1x16x1xf32> to vector<16x1xf32>
    %210 = vector.shape_cast %207 : vector<16x1xf32> to vector<1x16x1xf32>
    tpu.vector_store %arg20[%c3_144, %c0_145, %c0_146], %210 {strides = array<i32>} : memref<4x16x1xf32, #tpu.memory_space<vmem>>, vector<1x16x1xf32>,
    %c3_147 = arith.constant 3 : index
    %c0_148 = arith.constant 0 : index
    %c0_149 = arith.constant 0 : index
    %211 = vector.load %arg21[%c3_147, %c0_148, %c0_149] : memref<4x16x32xf32, #tpu.memory_space<vmem>>, vector<1x16x32xf32>
    %212 = vector.shape_cast %211 : vector<1x16x32xf32> to vector<16x32xf32>
    %213 = vector.broadcast %198 : vector<16x1xf32> to vector<16x32xf32>
    %214 = arith.mulf %213, %212 : vector<16x32xf32>
    %215 = arith.truncf %201 : vector<16x16xf32> to vector<16x16xbf16>
    %cst_150 = arith.constant dense<0.000000e+00> : vector<16x32xf32>
    %216 = tpu.matmul %215, %187, %cst_150 {dimension_numbers = #tpu.dot_dimension_numbers<[1], [0], [0], [1], [0, 0, 1, 1], [], []>} : vector<16x16xbf16>, vector<16x32xbf16>, vector<16x32xf32> -> vector<16x32xf32>
    %217 = arith.addf %214, %216 : vector<16x32xf32>
    %c3_151 = arith.constant 3 : index
    %c0_152 = arith.constant 0 : index
    %c0_153 = arith.constant 0 : index
    %218 = vector.load %arg21[%c3_151, %c0_152, %c0_153] : memref<4x16x32xf32, #tpu.memory_space<vmem>>, vector<1x16x32xf32>
    %219 = vector.shape_cast %218 : vector<1x16x32xf32> to vector<16x32xf32>
    %220 = vector.shape_cast %217 : vector<16x32xf32> to vector<1x16x32xf32>
    tpu.vector_store %arg21[%c3_151, %c0_152, %c0_153], %220 {strides = array<i32>} : memref<4x16x32xf32, #tpu.memory_space<vmem>>, vector<1x16x32xf32>,
    %c3_154 = arith.constant 3 : index
    %c0_155 = arith.constant 0 : index
    %c0_156 = arith.constant 0 : index
    %221 = vector.load %arg19[%c3_154, %c0_155, %c0_156] : memref<4x16x1xf32, #tpu.memory_space<vmem>>, vector<1x16x1xf32>
    %222 = vector.shape_cast %221 : vector<1x16x1xf32> to vector<16x1xf32>
    %223 = vector.shape_cast %196 : vector<16x1xf32> to vector<1x16x1xf32>
    tpu.vector_store %arg19[%c3_154, %c0_155, %c0_156], %223 {strides = array<i32>} : memref<4x16x1xf32, #tpu.memory_space<vmem>>, vector<1x16x1xf32>,
    %c0_i32_157 = arith.constant 0 : i32
    %224 = arith.cmpi eq, %arg2, %c0_i32_157 : i32
    %225 = arith.extui %224 : i1 to i32
    %c0_i32_158 = arith.constant 0 : i32
    %226 = arith.cmpi ne, %225, %c0_i32_158 : i32
    scf.if %226 {
      %c0_159 = arith.constant 0 : index
      %c0_160 = arith.constant 0 : index
      %227 = vector.load %arg14[%c0_159, %c0_160] : memref<1x128xf32, #tpu.memory_space<vmem>>, vector<1x128xf32>
      %c0_161 = arith.constant 0 : index
      %c0_162 = arith.constant 0 : index
      %c0_163 = arith.constant 0 : index
      %228 = vector.load %arg21[%c0_161, %c0_162, %c0_163] : memref<4x16x32xf32, #tpu.memory_space<vmem>>, vector<1x16x32xf32>
      %229 = vector.shape_cast %228 : vector<1x16x32xf32> to vector<16x32xf32>
      %c0_164 = arith.constant 0 : index
      %c0_165 = arith.constant 0 : index
      %c0_166 = arith.constant 0 : index
      %230 = vector.load %arg20[%c0_164, %c0_165, %c0_166] : memref<4x16x1xf32, #tpu.memory_space<vmem>>, vector<1x16x1xf32>
      %231 = vector.shape_cast %230 : vector<1x16x1xf32> to vector<16x1xf32>
      %232 = tpu.reciprocal %231 {approx = true} : vector<16x1xf32> -> vector<16x1xf32>
      %233 = vector.broadcast %232 : vector<16x1xf32> to vector<16x32xf32>
      %234 = arith.mulf %229, %233 : vector<16x32xf32>
      %235 = arith.truncf %234 : vector<16x32xf32> to vector<16x32xbf16>
      %c0_167 = arith.constant 0 : index
      %c0_168 = arith.constant 0 : index
      %c0_169 = arith.constant 0 : index
      %236 = vector.load %arg13[%c0_167, %c0_168, %c0_169] : memref<4x32x128xbf16, #tpu.memory_space<vmem>>, vector<1x32x128xbf16>
      %237 = vector.shape_cast %236 : vector<1x32x128xbf16> to vector<32x128xbf16>
      %cst_170 = arith.constant dense<0.000000e+00> : vector<16x128xf32>
      %238 = tpu.matmul %235, %237, %cst_170 {dimension_numbers = #tpu.dot_dimension_numbers<[1], [0], [0], [1], [0, 0, 1, 1], [], []>} : vector<16x32xbf16>, vector<32x128xbf16>, vector<16x128xf32> -> vector<16x128xf32>
      %239 = vector.broadcast %227 : vector<1x128xf32> to vector<16x128xf32>
      %240 = arith.addf %239, %238 : vector<16x128xf32>
      %c1_171 = arith.constant 1 : index
      %c0_172 = arith.constant 0 : index
      %c0_173 = arith.constant 0 : index
      %241 = vector.load %arg21[%c1_171, %c0_172, %c0_173] : memref<4x16x32xf32, #tpu.memory_space<vmem>>, vector<1x16x32xf32>
      %242 = vector.shape_cast %241 : vector<1x16x32xf32> to vector<16x32xf32>
      %c1_174 = arith.constant 1 : index
      %c0_175 = arith.constant 0 : index
      %c0_176 = arith.constant 0 : index
      %243 = vector.load %arg20[%c1_174, %c0_175, %c0_176] : memref<4x16x1xf32, #tpu.memory_space<vmem>>, vector<1x16x1xf32>
      %244 = vector.shape_cast %243 : vector<1x16x1xf32> to vector<16x1xf32>
      %245 = tpu.reciprocal %244 {approx = true} : vector<16x1xf32> -> vector<16x1xf32>
      %246 = vector.broadcast %245 : vector<16x1xf32> to vector<16x32xf32>
      %247 = arith.mulf %242, %246 : vector<16x32xf32>
      %248 = arith.truncf %247 : vector<16x32xf32> to vector<16x32xbf16>
      %c1_177 = arith.constant 1 : index
      %c0_178 = arith.constant 0 : index
      %c0_179 = arith.constant 0 : index
      %249 = vector.load %arg13[%c1_177, %c0_178, %c0_179] : memref<4x32x128xbf16, #tpu.memory_space<vmem>>, vector<1x32x128xbf16>
      %250 = vector.shape_cast %249 : vector<1x32x128xbf16> to vector<32x128xbf16>
      %cst_180 = arith.constant dense<0.000000e+00> : vector<16x128xf32>
      %251 = tpu.matmul %248, %250, %cst_180 {dimension_numbers = #tpu.dot_dimension_numbers<[1], [0], [0], [1], [0, 0, 1, 1], [], []>} : vector<16x32xbf16>, vector<32x128xbf16>, vector<16x128xf32> -> vector<16x128xf32>
      %252 = arith.addf %240, %251 : vector<16x128xf32>
      %c2_181 = arith.constant 2 : index
      %c0_182 = arith.constant 0 : index
      %c0_183 = arith.constant 0 : index
      %253 = vector.load %arg21[%c2_181, %c0_182, %c0_183] : memref<4x16x32xf32, #tpu.memory_space<vmem>>, vector<1x16x32xf32>
      %254 = vector.shape_cast %253 : vector<1x16x32xf32> to vector<16x32xf32>
      %c2_184 = arith.constant 2 : index
      %c0_185 = arith.constant 0 : index
      %c0_186 = arith.constant 0 : index
      %255 = vector.load %arg20[%c2_184, %c0_185, %c0_186] : memref<4x16x1xf32, #tpu.memory_space<vmem>>, vector<1x16x1xf32>
      %256 = vector.shape_cast %255 : vector<1x16x1xf32> to vector<16x1xf32>
      %257 = tpu.reciprocal %256 {approx = true} : vector<16x1xf32> -> vector<16x1xf32>
      %258 = vector.broadcast %257 : vector<16x1xf32> to vector<16x32xf32>
      %259 = arith.mulf %254, %258 : vector<16x32xf32>
      %260 = arith.truncf %259 : vector<16x32xf32> to vector<16x32xbf16>
      %c2_187 = arith.constant 2 : index
      %c0_188 = arith.constant 0 : index
      %c0_189 = arith.constant 0 : index
      %261 = vector.load %arg13[%c2_187, %c0_188, %c0_189] : memref<4x32x128xbf16, #tpu.memory_space<vmem>>, vector<1x32x128xbf16>
      %262 = vector.shape_cast %261 : vector<1x32x128xbf16> to vector<32x128xbf16>
      %cst_190 = arith.constant dense<0.000000e+00> : vector<16x128xf32>
      %263 = tpu.matmul %260, %262, %cst_190 {dimension_numbers = #tpu.dot_dimension_numbers<[1], [0], [0], [1], [0, 0, 1, 1], [], []>} : vector<16x32xbf16>, vector<32x128xbf16>, vector<16x128xf32> -> vector<16x128xf32>
      %264 = arith.addf %252, %263 : vector<16x128xf32>
      %c3_191 = arith.constant 3 : index
      %c0_192 = arith.constant 0 : index
      %c0_193 = arith.constant 0 : index
      %265 = vector.load %arg21[%c3_191, %c0_192, %c0_193] : memref<4x16x32xf32, #tpu.memory_space<vmem>>, vector<1x16x32xf32>
      %266 = vector.shape_cast %265 : vector<1x16x32xf32> to vector<16x32xf32>
      %c3_194 = arith.constant 3 : index
      %c0_195 = arith.constant 0 : index
      %c0_196 = arith.constant 0 : index
      %267 = vector.load %arg20[%c3_194, %c0_195, %c0_196] : memref<4x16x1xf32, #tpu.memory_space<vmem>>, vector<1x16x1xf32>
      %268 = vector.shape_cast %267 : vector<1x16x1xf32> to vector<16x1xf32>
      %269 = tpu.reciprocal %268 {approx = true} : vector<16x1xf32> -> vector<16x1xf32>
      %270 = vector.broadcast %269 : vector<16x1xf32> to vector<16x32xf32>
      %271 = arith.mulf %266, %270 : vector<16x32xf32>
      %272 = arith.truncf %271 : vector<16x32xf32> to vector<16x32xbf16>
      %c3_197 = arith.constant 3 : index
      %c0_198 = arith.constant 0 : index
      %c0_199 = arith.constant 0 : index
      %273 = vector.load %arg13[%c3_197, %c0_198, %c0_199] : memref<4x32x128xbf16, #tpu.memory_space<vmem>>, vector<1x32x128xbf16>
      %274 = vector.shape_cast %273 : vector<1x32x128xbf16> to vector<32x128xbf16>
      %cst_200 = arith.constant dense<0.000000e+00> : vector<16x128xf32>
      %275 = tpu.matmul %272, %274, %cst_200 {dimension_numbers = #tpu.dot_dimension_numbers<[1], [0], [0], [1], [0, 0, 1, 1], [], []>} : vector<16x32xbf16>, vector<32x128xbf16>, vector<16x128xf32> -> vector<16x128xf32>
      %276 = arith.addf %264, %275 : vector<16x128xf32>
      %c0_201 = arith.constant 0 : index
      %c0_202 = arith.constant 0 : index
      %c0_203 = arith.constant 0 : index
      %277 = vector.load %arg5[%c0_201, %c0_202, %c0_203] : memref<1x16x128xbf16, #tpu.memory_space<vmem>>, vector<1x16x128xbf16>
      %278 = vector.shape_cast %277 : vector<1x16x128xbf16> to vector<16x128xbf16>
      %279 = arith.extf %278 : vector<16x128xbf16> to vector<16x128xf32>
      %280 = arith.addf %276, %279 : vector<16x128xf32>
      %c0_204 = arith.constant 0 : index
      %c0_205 = arith.constant 0 : index
      %281 = vector.load %arg15[%c0_204, %c0_205] : memref<1x128xf32, #tpu.memory_space<vmem>>, vector<1x128xf32>
      %c0_206 = arith.constant 0 : index
      %c0_207 = arith.constant 0 : index
      %282 = vector.load %arg16[%c0_206, %c0_207] : memref<1x128xf32, #tpu.memory_space<vmem>>, vector<1x128xf32>
      %cst_208 = arith.constant dense<0.000000e+00> : vector<16xf32>
      %283 = vector.multi_reduction <add>, %280, %cst_208 [1] : vector<16x128xf32> to vector<16xf32>
      %284 = vector.shape_cast %283 : vector<16xf32> to vector<16x1xf32>
      %cst_209 = arith.constant 1.280000e+02 : f32
      %285 = vector.broadcast %cst_209 : f32 to vector<16x1xf32>
      %286 = arith.divf %284, %285 : vector<16x1xf32>
      %287 = vector.broadcast %286 : vector<16x1xf32> to vector<16x128xf32>
      %288 = arith.subf %280, %287 : vector<16x128xf32>
      %289 = arith.mulf %288, %288 : vector<16x128xf32>
      %cst_210 = arith.constant dense<0.000000e+00> : vector<16xf32>
      %290 = vector.multi_reduction <add>, %289, %cst_210 [1] : vector<16x128xf32> to vector<16xf32>
      %291 = vector.shape_cast %290 : vector<16xf32> to vector<16x1xf32>
      %cst_211 = arith.constant 1.280000e+02 : f32
      %292 = vector.broadcast %cst_211 : f32 to vector<16x1xf32>
      %293 = arith.divf %291, %292 : vector<16x1xf32>
      %294 = vector.broadcast %286 : vector<16x1xf32> to vector<16x128xf32>
      %295 = arith.subf %280, %294 : vector<16x128xf32>
      %cst_212 = arith.constant 9.99999974E-6 : f32
      %296 = vector.broadcast %cst_212 : f32 to vector<16x1xf32>
      %297 = arith.addf %293, %296 : vector<16x1xf32>
      %298 = math.rsqrt %297 : vector<16x1xf32>
      %299 = vector.broadcast %298 : vector<16x1xf32> to vector<16x128xf32>
      %300 = arith.mulf %295, %299 : vector<16x128xf32>
      %301 = vector.broadcast %281 : vector<1x128xf32> to vector<16x128xf32>
      %302 = arith.mulf %300, %301 : vector<16x128xf32>
      %303 = vector.broadcast %282 : vector<1x128xf32> to vector<16x128xf32>
      %304 = arith.addf %302, %303 : vector<16x128xf32>
      %c16_i32_213 = arith.constant 16 : i32
      %305 = arith.muli %arg1, %c16_i32_213 : i32
      %306 = tpu.iota {dimensions = array<i32: 0>} : vector<16x1xi32>
      %307 = vector.broadcast %305 : i32 to vector<16x1xi32>
      %308 = arith.addi %307, %306 : vector<16x1xi32>
      %309 = arith.index_cast %arg0 : i32 to index
      %310 = memref.load %arg3[%309] : memref<2xi32, #tpu.memory_space<smem>>
      %311 = vector.broadcast %310 : i32 to vector<16x1xi32>
      %312 = arith.cmpi slt, %308, %311 : vector<16x1xi32>
      %313 = arith.extui %312 : vector<16x1xi1> to vector<16x1xi32>
      %314 = arith.sitofp %313 : vector<16x1xi32> to vector<16x1xf32>
      %315 = vector.broadcast %314 : vector<16x1xf32> to vector<16x128xf32>
      %316 = arith.mulf %304, %315 : vector<16x128xf32>
      %317 = arith.truncf %316 : vector<16x128xf32> to vector<16x128xbf16>
      %c0_214 = arith.constant 0 : index
      %c0_215 = arith.constant 0 : index
      %c0_216 = arith.constant 0 : index
      %318 = vector.load %arg17[%c0_214, %c0_215, %c0_216] : memref<1x16x128xbf16, #tpu.memory_space<vmem>>, vector<1x16x128xbf16>
      %319 = vector.shape_cast %318 : vector<1x16x128xbf16> to vector<16x128xbf16>
      %320 = vector.shape_cast %317 : vector<16x128xbf16> to vector<1x16x128xbf16>
      tpu.vector_store %arg17[%c0_214, %c0_215, %c0_216], %320 {strides = array<i32>} : memref<1x16x128xbf16, #tpu.memory_space<vmem>>, vector<1x16x128xbf16>,
    } else {
    }
    return
  }
  func.func @transform_0(%arg0: i32, %arg1: i32, %arg2: i32, %arg3: memref<2xi32, #tpu.memory_space<smem>>, %arg4: memref<2xi32, #tpu.memory_space<smem>>) -> (i32, i32, i32) {
    %c0_i32 = arith.constant 0 : i32
    %c0_i32_0 = arith.constant 0 : i32
    return %arg0, %arg1, %c0_i32 : i32, i32, i32
  }
  func.func @transform_1(%arg0: i32, %arg1: i32, %arg2: i32, %arg3: memref<2xi32, #tpu.memory_space<smem>>, %arg4: memref<2xi32, #tpu.memory_space<smem>>) -> (i32, i32, i32) {
    %c0_i32 = arith.constant 0 : i32
    %c0_i32_0 = arith.constant 0 : i32
    return %arg0, %arg2, %c0_i32 : i32, i32, i32
  }
  func.func @transform_2(%arg0: i32, %arg1: i32, %arg2: i32, %arg3: memref<2xi32, #tpu.memory_space<smem>>, %arg4: memref<2xi32, #tpu.memory_space<smem>>) -> (i32, i32, i32) {
    %c0_i32 = arith.constant 0 : i32
    %c0_i32_0 = arith.constant 0 : i32
    %c0_i32_1 = arith.constant 0 : i32
    %c0_i32_2 = arith.constant 0 : i32
    return %c0_i32, %c0_i32_0, %c0_i32_1 : i32, i32, i32
  }
  func.func @transform_3(%arg0: i32, %arg1: i32, %arg2: i32, %arg3: memref<2xi32, #tpu.memory_space<smem>>, %arg4: memref<2xi32, #tpu.memory_space<smem>>) -> (i32, i32, i32) {
    %c0_i32 = arith.constant 0 : i32
    %c0_i32_0 = arith.constant 0 : i32
    %c0_i32_1 = arith.constant 0 : i32
    %c0_i32_2 = arith.constant 0 : i32
    return %c0_i32, %c0_i32_0, %c0_i32_1 : i32, i32, i32
  }
  func.func @transform_4(%arg0: i32, %arg1: i32, %arg2: i32, %arg3: memref<2xi32, #tpu.memory_space<smem>>, %arg4: memref<2xi32, #tpu.memory_space<smem>>) -> (i32, i32, i32) {
    %c0_i32 = arith.constant 0 : i32
    %c0_i32_0 = arith.constant 0 : i32
    %c0_i32_1 = arith.constant 0 : i32
    %c0_i32_2 = arith.constant 0 : i32
    return %c0_i32, %c0_i32_0, %c0_i32_1 : i32, i32, i32
  }
  func.func @transform_5(%arg0: i32, %arg1: i32, %arg2: i32, %arg3: memref<2xi32, #tpu.memory_space<smem>>, %arg4: memref<2xi32, #tpu.memory_space<smem>>) -> (i32, i32, i32) {
    %c0_i32 = arith.constant 0 : i32
    %c0_i32_0 = arith.constant 0 : i32
    %c0_i32_1 = arith.constant 0 : i32
    %c0_i32_2 = arith.constant 0 : i32
    return %c0_i32, %c0_i32_0, %c0_i32_1 : i32, i32, i32
  }
  func.func @transform_6(%arg0: i32, %arg1: i32, %arg2: i32, %arg3: memref<2xi32, #tpu.memory_space<smem>>, %arg4: memref<2xi32, #tpu.memory_space<smem>>) -> (i32, i32, i32) {
    %c0_i32 = arith.constant 0 : i32
    %c0_i32_0 = arith.constant 0 : i32
    %c0_i32_1 = arith.constant 0 : i32
    %c0_i32_2 = arith.constant 0 : i32
    return %c0_i32, %c0_i32_0, %c0_i32_1 : i32, i32, i32
  }
  func.func @transform_7(%arg0: i32, %arg1: i32, %arg2: i32, %arg3: memref<2xi32, #tpu.memory_space<smem>>, %arg4: memref<2xi32, #tpu.memory_space<smem>>) -> (i32, i32, i32) {
    %c0_i32 = arith.constant 0 : i32
    %c0_i32_0 = arith.constant 0 : i32
    %c0_i32_1 = arith.constant 0 : i32
    %c0_i32_2 = arith.constant 0 : i32
    return %c0_i32, %c0_i32_0, %c0_i32_1 : i32, i32, i32
  }
  func.func @transform_8(%arg0: i32, %arg1: i32, %arg2: i32, %arg3: memref<2xi32, #tpu.memory_space<smem>>, %arg4: memref<2xi32, #tpu.memory_space<smem>>) -> (i32, i32, i32) {
    %c0_i32 = arith.constant 0 : i32
    %c0_i32_0 = arith.constant 0 : i32
    %c0_i32_1 = arith.constant 0 : i32
    %c0_i32_2 = arith.constant 0 : i32
    return %c0_i32, %c0_i32_0, %c0_i32_1 : i32, i32, i32
  }
  func.func @transform_9(%arg0: i32, %arg1: i32, %arg2: i32, %arg3: memref<2xi32, #tpu.memory_space<smem>>, %arg4: memref<2xi32, #tpu.memory_space<smem>>) -> (i32, i32) {
    %c0_i32 = arith.constant 0 : i32
    %c0_i32_0 = arith.constant 0 : i32
    %c0_i32_1 = arith.constant 0 : i32
    return %c0_i32, %c0_i32_0 : i32, i32
  }
  func.func @transform_10(%arg0: i32, %arg1: i32, %arg2: i32, %arg3: memref<2xi32, #tpu.memory_space<smem>>, %arg4: memref<2xi32, #tpu.memory_space<smem>>) -> (i32, i32) {
    %c0_i32 = arith.constant 0 : i32
    %c0_i32_0 = arith.constant 0 : i32
    %c0_i32_1 = arith.constant 0 : i32
    return %c0_i32, %c0_i32_0 : i32, i32
  }
  func.func @transform_11(%arg0: i32, %arg1: i32, %arg2: i32, %arg3: memref<2xi32, #tpu.memory_space<smem>>, %arg4: memref<2xi32, #tpu.memory_space<smem>>) -> (i32, i32) {
    %c0_i32 = arith.constant 0 : i32
    %c0_i32_0 = arith.constant 0 : i32
    %c0_i32_1 = arith.constant 0 : i32
    return %c0_i32, %c0_i32_0 : i32, i32
  }
  func.func @transform_12(%arg0: i32, %arg1: i32, %arg2: i32, %arg3: memref<2xi32, #tpu.memory_space<smem>>, %arg4: memref<2xi32, #tpu.memory_space<smem>>) -> (i32, i32, i32) {
    %c0_i32 = arith.constant 0 : i32
    %c0_i32_0 = arith.constant 0 : i32
    return %arg0, %arg1, %c0_i32 : i32, i32, i32
  }
}

module attributes {stable_mosaic.version = 11 : i64} {
  func.func @_mha_kernel(%arg0: i32, %arg1: i32, %arg2: i32, %arg3: memref<2xi32, #tpu.memory_space<smem>>, %arg4: memref<2xi32, #tpu.memory_space<smem>>, %arg5: memref<1x9x128xbf16, #tpu.memory_space<vmem>>, %arg6: memref<1x16x128xbf16, #tpu.memory_space<vmem>>, %arg7: memref<4x128x32xbf16, #tpu.memory_space<vmem>>, %arg8: memref<4x1x32xf32, #tpu.memory_space<vmem>>, %arg9: memref<4x128x32xbf16, #tpu.memory_space<vmem>>, %arg10: memref<4x1x32xf32, #tpu.memory_space<vmem>>, %arg11: memref<4x128x32xbf16, #tpu.memory_space<vmem>>, %arg12: memref<4x1x32xf32, #tpu.memory_space<vmem>>, %arg13: memref<4x32x128xbf16, #tpu.memory_space<vmem>>, %arg14: memref<1x128xf32, #tpu.memory_space<vmem>>, %arg15: memref<1x128xf32, #tpu.memory_space<vmem>>, %arg16: memref<1x128xf32, #tpu.memory_space<vmem>>, %arg17: memref<1x9x128xbf16, #tpu.memory_space<vmem>>, %arg18: memref<4x9x32xbf16, #tpu.memory_space<vmem>>, %arg19: memref<4x9x1xf32, #tpu.memory_space<vmem>>, %arg20: memref<4x9x1xf32, #tpu.memory_space<vmem>>, %arg21: memref<4x9x32xf32, #tpu.memory_space<vmem>>) attributes {dimension_semantics = [#tpu.dimension_semantics<parallel>, #tpu.dimension_semantics<parallel>, #tpu.dimension_semantics<arbitrary>], iteration_bounds = array<i64: 2, 1, 1>, scalar_prefetch = 2 : i64, scratch_operands = 4 : i64, tpu.core_type = #tpu.core_type<tc>, window_params = [{transform_indices = @transform_0, window_bounds = array<i64: 1, 9, 128>}, {transform_indices = @transform_1, window_bounds = array<i64: 1, 16, 128>}, {pipeline_mode = #tpu.pipeline_mode<synchronous>, transform_indices = @transform_2, window_bounds = array<i64: 4, 128, 32>}, {pipeline_mode = #tpu.pipeline_mode<synchronous>, transform_indices = @transform_3, window_bounds = array<i64: 4, 1, 32>}, {pipeline_mode = #tpu.pipeline_mode<synchronous>, transform_indices = @transform_4, window_bounds = array<i64: 4, 128, 32>}, {pipeline_mode = #tpu.pipeline_mode<synchronous>, transform_indices = @transform_5, window_bounds = array<i64: 4, 1, 32>}, {pipeline_mode = #tpu.pipeline_mode<synchronous>, transform_indices = @transform_6, window_bounds = array<i64: 4, 128, 32>}, {pipeline_mode = #tpu.pipeline_mode<synchronous>, transform_indices = @transform_7, window_bounds = array<i64: 4, 1, 32>}, {pipeline_mode = #tpu.pipeline_mode<synchronous>, transform_indices = @transform_8, window_bounds = array<i64: 4, 32, 128>}, {pipeline_mode = #tpu.pipeline_mode<synchronous>, transform_indices = @transform_9, window_bounds = array<i64: 1, 128>}, {pipeline_mode = #tpu.pipeline_mode<synchronous>, transform_indices = @transform_10, window_bounds = array<i64: 1, 128>}, {pipeline_mode = #tpu.pipeline_mode<synchronous>, transform_indices = @transform_11, window_bounds = array<i64: 1, 128>}, {transform_indices = @transform_12, window_bounds = array<i64: 1, 9, 128>}]} {
    %c0_i32 = arith.constant 0 : i32
    %0 = arith.cmpi eq, %arg2, %c0_i32 : i32
    %1 = arith.extui %0 : i1 to i32
    %c0_i32_0 = arith.constant 0 : i32
    %2 = arith.cmpi ne, %1, %c0_i32_0 : i32
    scf.if %2 {
      %c0_159 = arith.constant 0 : index
      %c0_160 = arith.constant 0 : index
      %c0_161 = arith.constant 0 : index
      %227 = vector.load %arg5[%c0_159, %c0_160, %c0_161] : memref<1x9x128xbf16, #tpu.memory_space<vmem>>, vector<1x9x128xbf16>
      %228 = vector.shape_cast %227 : vector<1x9x128xbf16> to vector<9x128xbf16>
      %c0_162 = arith.constant 0 : index
      %c0_163 = arith.constant 0 : index
      %c0_164 = arith.constant 0 : index
      %229 = vector.load %arg7[%c0_162, %c0_163, %c0_164] : memref<4x128x32xbf16, #tpu.memory_space<vmem>>, vector<1x128x32xbf16>
      %230 = vector.shape_cast %229 : vector<1x128x32xbf16> to vector<128x32xbf16>
      %cst_165 = arith.constant dense<0.000000e+00> : vector<9x32xf32>
      %231 = tpu.matmul %228, %230, %cst_165 {dimension_numbers = #tpu.dot_dimension_numbers<[1], [0], [0], [1], [0, 0, 1, 1], [], []>} : vector<9x128xbf16>, vector<128x32xbf16>, vector<9x32xf32> -> vector<9x32xf32>
      %c0_166 = arith.constant 0 : index
      %c0_167 = arith.constant 0 : index
      %c0_168 = arith.constant 0 : index
      %232 = vector.load %arg8[%c0_166, %c0_167, %c0_168] : memref<4x1x32xf32, #tpu.memory_space<vmem>>, vector<1x1x32xf32>
      %233 = vector.shape_cast %232 : vector<1x1x32xf32> to vector<1x32xf32>
      %234 = vector.broadcast %233 : vector<1x32xf32> to vector<9x32xf32>
      %235 = arith.addf %231, %234 : vector<9x32xf32>
      %cst_169 = arith.constant 0.176776692 : f32
      %236 = vector.broadcast %cst_169 : f32 to vector<9x32xf32>
      %237 = arith.mulf %235, %236 : vector<9x32xf32>
      %238 = arith.truncf %237 : vector<9x32xf32> to vector<9x32xbf16>
      %c0_170 = arith.constant 0 : index
      %c0_171 = arith.constant 0 : index
      %c0_172 = arith.constant 0 : index
      %239 = vector.load %arg18[%c0_170, %c0_171, %c0_172] : memref<4x9x32xbf16, #tpu.memory_space<vmem>>, vector<1x9x32xbf16>
      %240 = vector.shape_cast %239 : vector<1x9x32xbf16> to vector<9x32xbf16>
      %241 = vector.shape_cast %238 : vector<9x32xbf16> to vector<1x9x32xbf16>
      tpu.vector_store %arg18[%c0_170, %c0_171, %c0_172], %241 {strides = array<i32>} : memref<4x9x32xbf16, #tpu.memory_space<vmem>>, vector<1x9x32xbf16>,
      %c1_173 = arith.constant 1 : index
      %c0_174 = arith.constant 0 : index
      %c0_175 = arith.constant 0 : index
      %242 = vector.load %arg7[%c1_173, %c0_174, %c0_175] : memref<4x128x32xbf16, #tpu.memory_space<vmem>>, vector<1x128x32xbf16>
      %243 = vector.shape_cast %242 : vector<1x128x32xbf16> to vector<128x32xbf16>
      %cst_176 = arith.constant dense<0.000000e+00> : vector<9x32xf32>
      %244 = tpu.matmul %228, %243, %cst_176 {dimension_numbers = #tpu.dot_dimension_numbers<[1], [0], [0], [1], [0, 0, 1, 1], [], []>} : vector<9x128xbf16>, vector<128x32xbf16>, vector<9x32xf32> -> vector<9x32xf32>
      %c1_177 = arith.constant 1 : index
      %c0_178 = arith.constant 0 : index
      %c0_179 = arith.constant 0 : index
      %245 = vector.load %arg8[%c1_177, %c0_178, %c0_179] : memref<4x1x32xf32, #tpu.memory_space<vmem>>, vector<1x1x32xf32>
      %246 = vector.shape_cast %245 : vector<1x1x32xf32> to vector<1x32xf32>
      %247 = vector.broadcast %246 : vector<1x32xf32> to vector<9x32xf32>
      %248 = arith.addf %244, %247 : vector<9x32xf32>
      %cst_180 = arith.constant 0.176776692 : f32
      %249 = vector.broadcast %cst_180 : f32 to vector<9x32xf32>
      %250 = arith.mulf %248, %249 : vector<9x32xf32>
      %251 = arith.truncf %250 : vector<9x32xf32> to vector<9x32xbf16>
      %c1_181 = arith.constant 1 : index
      %c0_182 = arith.constant 0 : index
      %c0_183 = arith.constant 0 : index
      %252 = vector.load %arg18[%c1_181, %c0_182, %c0_183] : memref<4x9x32xbf16, #tpu.memory_space<vmem>>, vector<1x9x32xbf16>
      %253 = vector.shape_cast %252 : vector<1x9x32xbf16> to vector<9x32xbf16>
      %254 = vector.shape_cast %251 : vector<9x32xbf16> to vector<1x9x32xbf16>
      tpu.vector_store %arg18[%c1_181, %c0_182, %c0_183], %254 {strides = array<i32>} : memref<4x9x32xbf16, #tpu.memory_space<vmem>>, vector<1x9x32xbf16>,
      %c2_184 = arith.constant 2 : index
      %c0_185 = arith.constant 0 : index
      %c0_186 = arith.constant 0 : index
      %255 = vector.load %arg7[%c2_184, %c0_185, %c0_186] : memref<4x128x32xbf16, #tpu.memory_space<vmem>>, vector<1x128x32xbf16>
      %256 = vector.shape_cast %255 : vector<1x128x32xbf16> to vector<128x32xbf16>
      %cst_187 = arith.constant dense<0.000000e+00> : vector<9x32xf32>
      %257 = tpu.matmul %228, %256, %cst_187 {dimension_numbers = #tpu.dot_dimension_numbers<[1], [0], [0], [1], [0, 0, 1, 1], [], []>} : vector<9x128xbf16>, vector<128x32xbf16>, vector<9x32xf32> -> vector<9x32xf32>
      %c2_188 = arith.constant 2 : index
      %c0_189 = arith.constant 0 : index
      %c0_190 = arith.constant 0 : index
      %258 = vector.load %arg8[%c2_188, %c0_189, %c0_190] : memref<4x1x32xf32, #tpu.memory_space<vmem>>, vector<1x1x32xf32>
      %259 = vector.shape_cast %258 : vector<1x1x32xf32> to vector<1x32xf32>
      %260 = vector.broadcast %259 : vector<1x32xf32> to vector<9x32xf32>
      %261 = arith.addf %257, %260 : vector<9x32xf32>
      %cst_191 = arith.constant 0.176776692 : f32
      %262 = vector.broadcast %cst_191 : f32 to vector<9x32xf32>
      %263 = arith.mulf %261, %262 : vector<9x32xf32>
      %264 = arith.truncf %263 : vector<9x32xf32> to vector<9x32xbf16>
      %c2_192 = arith.constant 2 : index
      %c0_193 = arith.constant 0 : index
      %c0_194 = arith.constant 0 : index
      %265 = vector.load %arg18[%c2_192, %c0_193, %c0_194] : memref<4x9x32xbf16, #tpu.memory_space<vmem>>, vector<1x9x32xbf16>
      %266 = vector.shape_cast %265 : vector<1x9x32xbf16> to vector<9x32xbf16>
      %267 = vector.shape_cast %264 : vector<9x32xbf16> to vector<1x9x32xbf16>
      tpu.vector_store %arg18[%c2_192, %c0_193, %c0_194], %267 {strides = array<i32>} : memref<4x9x32xbf16, #tpu.memory_space<vmem>>, vector<1x9x32xbf16>,
      %c3_195 = arith.constant 3 : index
      %c0_196 = arith.constant 0 : index
      %c0_197 = arith.constant 0 : index
      %268 = vector.load %arg7[%c3_195, %c0_196, %c0_197] : memref<4x128x32xbf16, #tpu.memory_space<vmem>>, vector<1x128x32xbf16>
      %269 = vector.shape_cast %268 : vector<1x128x32xbf16> to vector<128x32xbf16>
      %cst_198 = arith.constant dense<0.000000e+00> : vector<9x32xf32>
      %270 = tpu.matmul %228, %269, %cst_198 {dimension_numbers = #tpu.dot_dimension_numbers<[1], [0], [0], [1], [0, 0, 1, 1], [], []>} : vector<9x128xbf16>, vector<128x32xbf16>, vector<9x32xf32> -> vector<9x32xf32>
      %c3_199 = arith.constant 3 : index
      %c0_200 = arith.constant 0 : index
      %c0_201 = arith.constant 0 : index
      %271 = vector.load %arg8[%c3_199, %c0_200, %c0_201] : memref<4x1x32xf32, #tpu.memory_space<vmem>>, vector<1x1x32xf32>
      %272 = vector.shape_cast %271 : vector<1x1x32xf32> to vector<1x32xf32>
      %273 = vector.broadcast %272 : vector<1x32xf32> to vector<9x32xf32>
      %274 = arith.addf %270, %273 : vector<9x32xf32>
      %cst_202 = arith.constant 0.176776692 : f32
      %275 = vector.broadcast %cst_202 : f32 to vector<9x32xf32>
      %276 = arith.mulf %274, %275 : vector<9x32xf32>
      %277 = arith.truncf %276 : vector<9x32xf32> to vector<9x32xbf16>
      %c3_203 = arith.constant 3 : index
      %c0_204 = arith.constant 0 : index
      %c0_205 = arith.constant 0 : index
      %278 = vector.load %arg18[%c3_203, %c0_204, %c0_205] : memref<4x9x32xbf16, #tpu.memory_space<vmem>>, vector<1x9x32xbf16>
      %279 = vector.shape_cast %278 : vector<1x9x32xbf16> to vector<9x32xbf16>
      %280 = vector.shape_cast %277 : vector<9x32xbf16> to vector<1x9x32xbf16>
      tpu.vector_store %arg18[%c3_203, %c0_204, %c0_205], %280 {strides = array<i32>} : memref<4x9x32xbf16, #tpu.memory_space<vmem>>, vector<1x9x32xbf16>,
      %cst_206 = arith.constant 0xFF800000 : f32
      %281 = vector.broadcast %cst_206 : f32 to vector<4x9x1xf32>
      %c0_207 = arith.constant 0 : index
      %c0_208 = arith.constant 0 : index
      %c0_209 = arith.constant 0 : index
      %282 = vector.load %arg19[%c0_207, %c0_208, %c0_209] : memref<4x9x1xf32, #tpu.memory_space<vmem>>, vector<4x9x1xf32>
      tpu.vector_store %arg19[%c0_207, %c0_208, %c0_209], %281 {strides = array<i32>} : memref<4x9x1xf32, #tpu.memory_space<vmem>>, vector<4x9x1xf32>,
      %cst_210 = arith.constant 0.000000e+00 : f32
      %283 = vector.broadcast %cst_210 : f32 to vector<4x9x1xf32>
      %c0_211 = arith.constant 0 : index
      %c0_212 = arith.constant 0 : index
      %c0_213 = arith.constant 0 : index
      %284 = vector.load %arg20[%c0_211, %c0_212, %c0_213] : memref<4x9x1xf32, #tpu.memory_space<vmem>>, vector<4x9x1xf32>
      tpu.vector_store %arg20[%c0_211, %c0_212, %c0_213], %283 {strides = array<i32>} : memref<4x9x1xf32, #tpu.memory_space<vmem>>, vector<4x9x1xf32>,
      %cst_214 = arith.constant 0.000000e+00 : f32
      %285 = vector.broadcast %cst_214 : f32 to vector<4x9x32xf32>
      %c0_215 = arith.constant 0 : index
      %c0_216 = arith.constant 0 : index
      %c0_217 = arith.constant 0 : index
      %286 = vector.load %arg21[%c0_215, %c0_216, %c0_217] : memref<4x9x32xf32, #tpu.memory_space<vmem>>, vector<4x9x32xf32>
      tpu.vector_store %arg21[%c0_215, %c0_216, %c0_217], %285 {strides = array<i32>} : memref<4x9x32xf32, #tpu.memory_space<vmem>>, vector<4x9x32xf32>,
    } else {
    }
    %c16_i32 = arith.constant 16 : i32
    %3 = arith.muli %arg2, %c16_i32 : i32
    %4 = tpu.iota {dimensions = array<i32: 1>} : vector<9x16xi32>
    %5 = vector.broadcast %3 : i32 to vector<9x16xi32>
    %6 = arith.addi %5, %4 : vector<9x16xi32>
    %7 = arith.index_cast %arg0 : i32 to index
    %8 = memref.load %arg4[%7] : memref<2xi32, #tpu.memory_space<smem>>
    %9 = vector.broadcast %8 : i32 to vector<9x16xi32>
    %10 = arith.cmpi sge, %6, %9 : vector<9x16xi32>
    %cst = arith.constant -1.000000e+30 : f32
    %cst_1 = arith.constant 0.000000e+00 : f32
    %11 = vector.broadcast %cst : f32 to vector<9x16xf32>
    %12 = vector.broadcast %cst_1 : f32 to vector<9x16xf32>
    %13 = arith.select %10, %11, %12 : vector<9x16xi1>, vector<9x16xf32>
    %c0 = arith.constant 0 : index
    %c0_2 = arith.constant 0 : index
    %c0_3 = arith.constant 0 : index
    %14 = vector.load %arg6[%c0, %c0_2, %c0_3] : memref<1x16x128xbf16, #tpu.memory_space<vmem>>, vector<1x16x128xbf16>
    %15 = vector.shape_cast %14 : vector<1x16x128xbf16> to vector<16x128xbf16>
    %c0_4 = arith.constant 0 : index
    %c0_5 = arith.constant 0 : index
    %c0_6 = arith.constant 0 : index
    %16 = vector.load %arg9[%c0_4, %c0_5, %c0_6] : memref<4x128x32xbf16, #tpu.memory_space<vmem>>, vector<1x128x32xbf16>
    %17 = vector.shape_cast %16 : vector<1x128x32xbf16> to vector<128x32xbf16>
    %cst_7 = arith.constant dense<0.000000e+00> : vector<16x32xf32>
    %18 = tpu.matmul %15, %17, %cst_7 {dimension_numbers = #tpu.dot_dimension_numbers<[1], [0], [0], [1], [0, 0, 1, 1], [], []>} : vector<16x128xbf16>, vector<128x32xbf16>, vector<16x32xf32> -> vector<16x32xf32>
    %c0_8 = arith.constant 0 : index
    %c0_9 = arith.constant 0 : index
    %c0_10 = arith.constant 0 : index
    %19 = vector.load %arg10[%c0_8, %c0_9, %c0_10] : memref<4x1x32xf32, #tpu.memory_space<vmem>>, vector<1x1x32xf32>
    %20 = vector.shape_cast %19 : vector<1x1x32xf32> to vector<1x32xf32>
    %21 = vector.broadcast %20 : vector<1x32xf32> to vector<16x32xf32>
    %22 = arith.addf %18, %21 : vector<16x32xf32>
    %23 = arith.truncf %22 : vector<16x32xf32> to vector<16x32xbf16>
    %c0_11 = arith.constant 0 : index
    %c0_12 = arith.constant 0 : index
    %c0_13 = arith.constant 0 : index
    %24 = vector.load %arg11[%c0_11, %c0_12, %c0_13] : memref<4x128x32xbf16, #tpu.memory_space<vmem>>, vector<1x128x32xbf16>
    %25 = vector.shape_cast %24 : vector<1x128x32xbf16> to vector<128x32xbf16>
    %cst_14 = arith.constant dense<0.000000e+00> : vector<16x32xf32>
    %26 = tpu.matmul %15, %25, %cst_14 {dimension_numbers = #tpu.dot_dimension_numbers<[1], [0], [0], [1], [0, 0, 1, 1], [], []>} : vector<16x128xbf16>, vector<128x32xbf16>, vector<16x32xf32> -> vector<16x32xf32>
    %c0_15 = arith.constant 0 : index
    %c0_16 = arith.constant 0 : index
    %c0_17 = arith.constant 0 : index
    %27 = vector.load %arg12[%c0_15, %c0_16, %c0_17] : memref<4x1x32xf32, #tpu.memory_space<vmem>>, vector<1x1x32xf32>
    %28 = vector.shape_cast %27 : vector<1x1x32xf32> to vector<1x32xf32>
    %29 = vector.broadcast %28 : vector<1x32xf32> to vector<16x32xf32>
    %30 = arith.addf %26, %29 : vector<16x32xf32>
    %31 = arith.truncf %30 : vector<16x32xf32> to vector<16x32xbf16>
    %c0_18 = arith.constant 0 : index
    %c0_19 = arith.constant 0 : index
    %c0_20 = arith.constant 0 : index
    %32 = vector.load %arg18[%c0_18, %c0_19, %c0_20] : memref<4x9x32xbf16, #tpu.memory_space<vmem>>, vector<1x9x32xbf16>
    %33 = vector.shape_cast %32 : vector<1x9x32xbf16> to vector<9x32xbf16>
    %cst_21 = arith.constant dense<0.000000e+00> : vector<9x16xf32>
    %34 = tpu.matmul %33, %23, %cst_21 {dimension_numbers = #tpu.dot_dimension_numbers<[1], [1], [0], [0], [0, 0, 1, 0], [], []>} : vector<9x32xbf16>, vector<16x32xbf16>, vector<9x16xf32> -> vector<9x16xf32>
    %35 = arith.addf %34, %13 : vector<9x16xf32>
    %c0_22 = arith.constant 0 : index
    %c0_23 = arith.constant 0 : index
    %c0_24 = arith.constant 0 : index
    %36 = vector.load %arg19[%c0_22, %c0_23, %c0_24] : memref<4x9x1xf32, #tpu.memory_space<vmem>>, vector<1x9x1xf32>
    %37 = vector.shape_cast %36 : vector<1x9x1xf32> to vector<9x1xf32>
    %cst_25 = arith.constant dense<0xFF800000> : vector<9xf32>
    %38 = vector.multi_reduction <maximumf>, %35, %cst_25 [1] : vector<9x16xf32> to vector<9xf32>
    %39 = vector.shape_cast %38 : vector<9xf32> to vector<9x1xf32>
    %40 = arith.maximumf %37, %39 : vector<9x1xf32>
    %41 = arith.subf %37, %40 : vector<9x1xf32>
    %42 = math.exp %41 : vector<9x1xf32>
    %43 = vector.broadcast %40 : vector<9x1xf32> to vector<9x16xf32>
    %44 = arith.subf %35, %43 : vector<9x16xf32>
    %45 = math.exp %44 : vector<9x16xf32>
    %c0_26 = arith.constant 0 : index
    %c0_27 = arith.constant 0 : index
    %c0_28 = arith.constant 0 : index
    %46 = vector.load %arg20[%c0_26, %c0_27, %c0_28] : memref<4x9x1xf32, #tpu.memory_space<vmem>>, vector<1x9x1xf32>
    %47 = vector.shape_cast %46 : vector<1x9x1xf32> to vector<9x1xf32>
    %48 = arith.mulf %42, %47 : vector<9x1xf32>
    %cst_29 = arith.constant dense<0.000000e+00> : vector<9xf32>
    %49 = vector.multi_reduction <add>, %45, %cst_29 [1] : vector<9x16xf32> to vector<9xf32>
    %50 = vector.shape_cast %49 : vector<9xf32> to vector<9x1xf32>
    %51 = arith.addf %48, %50 : vector<9x1xf32>
    %c0_30 = arith.constant 0 : index
    %c0_31 = arith.constant 0 : index
    %c0_32 = arith.constant 0 : index
    %52 = vector.load %arg20[%c0_30, %c0_31, %c0_32] : memref<4x9x1xf32, #tpu.memory_space<vmem>>, vector<1x9x1xf32>
    %53 = vector.shape_cast %52 : vector<1x9x1xf32> to vector<9x1xf32>
    %54 = vector.shape_cast %51 : vector<9x1xf32> to vector<1x9x1xf32>
    tpu.vector_store %arg20[%c0_30, %c0_31, %c0_32], %54 {strides = array<i32>} : memref<4x9x1xf32, #tpu.memory_space<vmem>>, vector<1x9x1xf32>,
    %c0_33 = arith.constant 0 : index
    %c0_34 = arith.constant 0 : index
    %c0_35 = arith.constant 0 : index
    %55 = vector.load %arg21[%c0_33, %c0_34, %c0_35] : memref<4x9x32xf32, #tpu.memory_space<vmem>>, vector<1x9x32xf32>
    %56 = vector.shape_cast %55 : vector<1x9x32xf32> to vector<9x32xf32>
    %57 = vector.broadcast %42 : vector<9x1xf32> to vector<9x32xf32>
    %58 = arith.mulf %57, %56 : vector<9x32xf32>
    %59 = arith.truncf %45 : vector<9x16xf32> to vector<9x16xbf16>
    %cst_36 = arith.constant dense<0.000000e+00> : vector<9x32xf32>
    %60 = tpu.matmul %59, %31, %cst_36 {dimension_numbers = #tpu.dot_dimension_numbers<[1], [0], [0], [1], [0, 0, 1, 1], [], []>} : vector<9x16xbf16>, vector<16x32xbf16>, vector<9x32xf32> -> vector<9x32xf32>
    %61 = arith.addf %58, %60 : vector<9x32xf32>
    %c0_37 = arith.constant 0 : index
    %c0_38 = arith.constant 0 : index
    %c0_39 = arith.constant 0 : index
    %62 = vector.load %arg21[%c0_37, %c0_38, %c0_39] : memref<4x9x32xf32, #tpu.memory_space<vmem>>, vector<1x9x32xf32>
    %63 = vector.shape_cast %62 : vector<1x9x32xf32> to vector<9x32xf32>
    %64 = vector.shape_cast %61 : vector<9x32xf32> to vector<1x9x32xf32>
    tpu.vector_store %arg21[%c0_37, %c0_38, %c0_39], %64 {strides = array<i32>} : memref<4x9x32xf32, #tpu.memory_space<vmem>>, vector<1x9x32xf32>,
    %c0_40 = arith.constant 0 : index
    %c0_41 = arith.constant 0 : index
    %c0_42 = arith.constant 0 : index
    %65 = vector.load %arg19[%c0_40, %c0_41, %c0_42] : memref<4x9x1xf32, #tpu.memory_space<vmem>>, vector<1x9x1xf32>
    %66 = vector.shape_cast %65 : vector<1x9x1xf32> to vector<9x1xf32>
    %67 = vector.shape_cast %40 : vector<9x1xf32> to vector<1x9x1xf32>
    tpu.vector_store %arg19[%c0_40, %c0_41, %c0_42], %67 {strides = array<i32>} : memref<4x9x1xf32, #tpu.memory_space<vmem>>, vector<1x9x1xf32>,
    %c1 = arith.constant 1 : index
    %c0_43 = arith.constant 0 : index
    %c0_44 = arith.constant 0 : index
    %68 = vector.load %arg9[%c1, %c0_43, %c0_44] : memref<4x128x32xbf16, #tpu.memory_space<vmem>>, vector<1x128x32xbf16>
    %69 = vector.shape_cast %68 : vector<1x128x32xbf16> to vector<128x32xbf16>
    %cst_45 = arith.constant dense<0.000000e+00> : vector<16x32xf32>
    %70 = tpu.matmul %15, %69, %cst_45 {dimension_numbers = #tpu.dot_dimension_numbers<[1], [0], [0], [1], [0, 0, 1, 1], [], []>} : vector<16x128xbf16>, vector<128x32xbf16>, vector<16x32xf32> -> vector<16x32xf32>
    %c1_46 = arith.constant 1 : index
    %c0_47 = arith.constant 0 : index
    %c0_48 = arith.constant 0 : index
    %71 = vector.load %arg10[%c1_46, %c0_47, %c0_48] : memref<4x1x32xf32, #tpu.memory_space<vmem>>, vector<1x1x32xf32>
    %72 = vector.shape_cast %71 : vector<1x1x32xf32> to vector<1x32xf32>
    %73 = vector.broadcast %72 : vector<1x32xf32> to vector<16x32xf32>
    %74 = arith.addf %70, %73 : vector<16x32xf32>
    %75 = arith.truncf %74 : vector<16x32xf32> to vector<16x32xbf16>
    %c1_49 = arith.constant 1 : index
    %c0_50 = arith.constant 0 : index
    %c0_51 = arith.constant 0 : index
    %76 = vector.load %arg11[%c1_49, %c0_50, %c0_51] : memref<4x128x32xbf16, #tpu.memory_space<vmem>>, vector<1x128x32xbf16>
    %77 = vector.shape_cast %76 : vector<1x128x32xbf16> to vector<128x32xbf16>
    %cst_52 = arith.constant dense<0.000000e+00> : vector<16x32xf32>
    %78 = tpu.matmul %15, %77, %cst_52 {dimension_numbers = #tpu.dot_dimension_numbers<[1], [0], [0], [1], [0, 0, 1, 1], [], []>} : vector<16x128xbf16>, vector<128x32xbf16>, vector<16x32xf32> -> vector<16x32xf32>
    %c1_53 = arith.constant 1 : index
    %c0_54 = arith.constant 0 : index
    %c0_55 = arith.constant 0 : index
    %79 = vector.load %arg12[%c1_53, %c0_54, %c0_55] : memref<4x1x32xf32, #tpu.memory_space<vmem>>, vector<1x1x32xf32>
    %80 = vector.shape_cast %79 : vector<1x1x32xf32> to vector<1x32xf32>
    %81 = vector.broadcast %80 : vector<1x32xf32> to vector<16x32xf32>
    %82 = arith.addf %78, %81 : vector<16x32xf32>
    %83 = arith.truncf %82 : vector<16x32xf32> to vector<16x32xbf16>
    %c1_56 = arith.constant 1 : index
    %c0_57 = arith.constant 0 : index
    %c0_58 = arith.constant 0 : index
    %84 = vector.load %arg18[%c1_56, %c0_57, %c0_58] : memref<4x9x32xbf16, #tpu.memory_space<vmem>>, vector<1x9x32xbf16>
    %85 = vector.shape_cast %84 : vector<1x9x32xbf16> to vector<9x32xbf16>
    %cst_59 = arith.constant dense<0.000000e+00> : vector<9x16xf32>
    %86 = tpu.matmul %85, %75, %cst_59 {dimension_numbers = #tpu.dot_dimension_numbers<[1], [1], [0], [0], [0, 0, 1, 0], [], []>} : vector<9x32xbf16>, vector<16x32xbf16>, vector<9x16xf32> -> vector<9x16xf32>
    %87 = arith.addf %86, %13 : vector<9x16xf32>
    %c1_60 = arith.constant 1 : index
    %c0_61 = arith.constant 0 : index
    %c0_62 = arith.constant 0 : index
    %88 = vector.load %arg19[%c1_60, %c0_61, %c0_62] : memref<4x9x1xf32, #tpu.memory_space<vmem>>, vector<1x9x1xf32>
    %89 = vector.shape_cast %88 : vector<1x9x1xf32> to vector<9x1xf32>
    %cst_63 = arith.constant dense<0xFF800000> : vector<9xf32>
    %90 = vector.multi_reduction <maximumf>, %87, %cst_63 [1] : vector<9x16xf32> to vector<9xf32>
    %91 = vector.shape_cast %90 : vector<9xf32> to vector<9x1xf32>
    %92 = arith.maximumf %89, %91 : vector<9x1xf32>
    %93 = arith.subf %89, %92 : vector<9x1xf32>
    %94 = math.exp %93 : vector<9x1xf32>
    %95 = vector.broadcast %92 : vector<9x1xf32> to vector<9x16xf32>
    %96 = arith.subf %87, %95 : vector<9x16xf32>
    %97 = math.exp %96 : vector<9x16xf32>
    %c1_64 = arith.constant 1 : index
    %c0_65 = arith.constant 0 : index
    %c0_66 = arith.constant 0 : index
    %98 = vector.load %arg20[%c1_64, %c0_65, %c0_66] : memref<4x9x1xf32, #tpu.memory_space<vmem>>, vector<1x9x1xf32>
    %99 = vector.shape_cast %98 : vector<1x9x1xf32> to vector<9x1xf32>
    %100 = arith.mulf %94, %99 : vector<9x1xf32>
    %cst_67 = arith.constant dense<0.000000e+00> : vector<9xf32>
    %101 = vector.multi_reduction <add>, %97, %cst_67 [1] : vector<9x16xf32> to vector<9xf32>
    %102 = vector.shape_cast %101 : vector<9xf32> to vector<9x1xf32>
    %103 = arith.addf %100, %102 : vector<9x1xf32>
    %c1_68 = arith.constant 1 : index
    %c0_69 = arith.constant 0 : index
    %c0_70 = arith.constant 0 : index
    %104 = vector.load %arg20[%c1_68, %c0_69, %c0_70] : memref<4x9x1xf32, #tpu.memory_space<vmem>>, vector<1x9x1xf32>
    %105 = vector.shape_cast %104 : vector<1x9x1xf32> to vector<9x1xf32>
    %106 = vector.shape_cast %103 : vector<9x1xf32> to vector<1x9x1xf32>
    tpu.vector_store %arg20[%c1_68, %c0_69, %c0_70], %106 {strides = array<i32>} : memref<4x9x1xf32, #tpu.memory_space<vmem>>, vector<1x9x1xf32>,
    %c1_71 = arith.constant 1 : index
    %c0_72 = arith.constant 0 : index
    %c0_73 = arith.constant 0 : index
    %107 = vector.load %arg21[%c1_71, %c0_72, %c0_73] : memref<4x9x32xf32, #tpu.memory_space<vmem>>, vector<1x9x32xf32>
    %108 = vector.shape_cast %107 : vector<1x9x32xf32> to vector<9x32xf32>
    %109 = vector.broadcast %94 : vector<9x1xf32> to vector<9x32xf32>
    %110 = arith.mulf %109, %108 : vector<9x32xf32>
    %111 = arith.truncf %97 : vector<9x16xf32> to vector<9x16xbf16>
    %cst_74 = arith.constant dense<0.000000e+00> : vector<9x32xf32>
    %112 = tpu.matmul %111, %83, %cst_74 {dimension_numbers = #tpu.dot_dimension_numbers<[1], [0], [0], [1], [0, 0, 1, 1], [], []>} : vector<9x16xbf16>, vector<16x32xbf16>, vector<9x32xf32> -> vector<9x32xf32>
    %113 = arith.addf %110, %112 : vector<9x32xf32>
    %c1_75 = arith.constant 1 : index
    %c0_76 = arith.constant 0 : index
    %c0_77 = arith.constant 0 : index
    %114 = vector.load %arg21[%c1_75, %c0_76, %c0_77] : memref<4x9x32xf32, #tpu.memory_space<vmem>>, vector<1x9x32xf32>
    %115 = vector.shape_cast %114 : vector<1x9x32xf32> to vector<9x32xf32>
    %116 = vector.shape_cast %113 : vector<9x32xf32> to vector<1x9x32xf32>
    tpu.vector_store %arg21[%c1_75, %c0_76, %c0_77], %116 {strides = array<i32>} : memref<4x9x32xf32, #tpu.memory_space<vmem>>, vector<1x9x32xf32>,
    %c1_78 = arith.constant 1 : index
    %c0_79 = arith.constant 0 : index
    %c0_80 = arith.constant 0 : index
    %117 = vector.load %arg19[%c1_78, %c0_79, %c0_80] : memref<4x9x1xf32, #tpu.memory_space<vmem>>, vector<1x9x1xf32>
    %118 = vector.shape_cast %117 : vector<1x9x1xf32> to vector<9x1xf32>
    %119 = vector.shape_cast %92 : vector<9x1xf32> to vector<1x9x1xf32>
    tpu.vector_store %arg19[%c1_78, %c0_79, %c0_80], %119 {strides = array<i32>} : memref<4x9x1xf32, #tpu.memory_space<vmem>>, vector<1x9x1xf32>,
    %c2 = arith.constant 2 : index
    %c0_81 = arith.constant 0 : index
    %c0_82 = arith.constant 0 : index
    %120 = vector.load %arg9[%c2, %c0_81, %c0_82] : memref<4x128x32xbf16, #tpu.memory_space<vmem>>, vector<1x128x32xbf16>
    %121 = vector.shape_cast %120 : vector<1x128x32xbf16> to vector<128x32xbf16>
    %cst_83 = arith.constant dense<0.000000e+00> : vector<16x32xf32>
    %122 = tpu.matmul %15, %121, %cst_83 {dimension_numbers = #tpu.dot_dimension_numbers<[1], [0], [0], [1], [0, 0, 1, 1], [], []>} : vector<16x128xbf16>, vector<128x32xbf16>, vector<16x32xf32> -> vector<16x32xf32>
    %c2_84 = arith.constant 2 : index
    %c0_85 = arith.constant 0 : index
    %c0_86 = arith.constant 0 : index
    %123 = vector.load %arg10[%c2_84, %c0_85, %c0_86] : memref<4x1x32xf32, #tpu.memory_space<vmem>>, vector<1x1x32xf32>
    %124 = vector.shape_cast %123 : vector<1x1x32xf32> to vector<1x32xf32>
    %125 = vector.broadcast %124 : vector<1x32xf32> to vector<16x32xf32>
    %126 = arith.addf %122, %125 : vector<16x32xf32>
    %127 = arith.truncf %126 : vector<16x32xf32> to vector<16x32xbf16>
    %c2_87 = arith.constant 2 : index
    %c0_88 = arith.constant 0 : index
    %c0_89 = arith.constant 0 : index
    %128 = vector.load %arg11[%c2_87, %c0_88, %c0_89] : memref<4x128x32xbf16, #tpu.memory_space<vmem>>, vector<1x128x32xbf16>
    %129 = vector.shape_cast %128 : vector<1x128x32xbf16> to vector<128x32xbf16>
    %cst_90 = arith.constant dense<0.000000e+00> : vector<16x32xf32>
    %130 = tpu.matmul %15, %129, %cst_90 {dimension_numbers = #tpu.dot_dimension_numbers<[1], [0], [0], [1], [0, 0, 1, 1], [], []>} : vector<16x128xbf16>, vector<128x32xbf16>, vector<16x32xf32> -> vector<16x32xf32>
    %c2_91 = arith.constant 2 : index
    %c0_92 = arith.constant 0 : index
    %c0_93 = arith.constant 0 : index
    %131 = vector.load %arg12[%c2_91, %c0_92, %c0_93] : memref<4x1x32xf32, #tpu.memory_space<vmem>>, vector<1x1x32xf32>
    %132 = vector.shape_cast %131 : vector<1x1x32xf32> to vector<1x32xf32>
    %133 = vector.broadcast %132 : vector<1x32xf32> to vector<16x32xf32>
    %134 = arith.addf %130, %133 : vector<16x32xf32>
    %135 = arith.truncf %134 : vector<16x32xf32> to vector<16x32xbf16>
    %c2_94 = arith.constant 2 : index
    %c0_95 = arith.constant 0 : index
    %c0_96 = arith.constant 0 : index
    %136 = vector.load %arg18[%c2_94, %c0_95, %c0_96] : memref<4x9x32xbf16, #tpu.memory_space<vmem>>, vector<1x9x32xbf16>
    %137 = vector.shape_cast %136 : vector<1x9x32xbf16> to vector<9x32xbf16>
    %cst_97 = arith.constant dense<0.000000e+00> : vector<9x16xf32>
    %138 = tpu.matmul %137, %127, %cst_97 {dimension_numbers = #tpu.dot_dimension_numbers<[1], [1], [0], [0], [0, 0, 1, 0], [], []>} : vector<9x32xbf16>, vector<16x32xbf16>, vector<9x16xf32> -> vector<9x16xf32>
    %139 = arith.addf %138, %13 : vector<9x16xf32>
    %c2_98 = arith.constant 2 : index
    %c0_99 = arith.constant 0 : index
    %c0_100 = arith.constant 0 : index
    %140 = vector.load %arg19[%c2_98, %c0_99, %c0_100] : memref<4x9x1xf32, #tpu.memory_space<vmem>>, vector<1x9x1xf32>
    %141 = vector.shape_cast %140 : vector<1x9x1xf32> to vector<9x1xf32>
    %cst_101 = arith.constant dense<0xFF800000> : vector<9xf32>
    %142 = vector.multi_reduction <maximumf>, %139, %cst_101 [1] : vector<9x16xf32> to vector<9xf32>
    %143 = vector.shape_cast %142 : vector<9xf32> to vector<9x1xf32>
    %144 = arith.maximumf %141, %143 : vector<9x1xf32>
    %145 = arith.subf %141, %144 : vector<9x1xf32>
    %146 = math.exp %145 : vector<9x1xf32>
    %147 = vector.broadcast %144 : vector<9x1xf32> to vector<9x16xf32>
    %148 = arith.subf %139, %147 : vector<9x16xf32>
    %149 = math.exp %148 : vector<9x16xf32>
    %c2_102 = arith.constant 2 : index
    %c0_103 = arith.constant 0 : index
    %c0_104 = arith.constant 0 : index
    %150 = vector.load %arg20[%c2_102, %c0_103, %c0_104] : memref<4x9x1xf32, #tpu.memory_space<vmem>>, vector<1x9x1xf32>
    %151 = vector.shape_cast %150 : vector<1x9x1xf32> to vector<9x1xf32>
    %152 = arith.mulf %146, %151 : vector<9x1xf32>
    %cst_105 = arith.constant dense<0.000000e+00> : vector<9xf32>
    %153 = vector.multi_reduction <add>, %149, %cst_105 [1] : vector<9x16xf32> to vector<9xf32>
    %154 = vector.shape_cast %153 : vector<9xf32> to vector<9x1xf32>
    %155 = arith.addf %152, %154 : vector<9x1xf32>
    %c2_106 = arith.constant 2 : index
    %c0_107 = arith.constant 0 : index
    %c0_108 = arith.constant 0 : index
    %156 = vector.load %arg20[%c2_106, %c0_107, %c0_108] : memref<4x9x1xf32, #tpu.memory_space<vmem>>, vector<1x9x1xf32>
    %157 = vector.shape_cast %156 : vector<1x9x1xf32> to vector<9x1xf32>
    %158 = vector.shape_cast %155 : vector<9x1xf32> to vector<1x9x1xf32>
    tpu.vector_store %arg20[%c2_106, %c0_107, %c0_108], %158 {strides = array<i32>} : memref<4x9x1xf32, #tpu.memory_space<vmem>>, vector<1x9x1xf32>,
    %c2_109 = arith.constant 2 : index
    %c0_110 = arith.constant 0 : index
    %c0_111 = arith.constant 0 : index
    %159 = vector.load %arg21[%c2_109, %c0_110, %c0_111] : memref<4x9x32xf32, #tpu.memory_space<vmem>>, vector<1x9x32xf32>
    %160 = vector.shape_cast %159 : vector<1x9x32xf32> to vector<9x32xf32>
    %161 = vector.broadcast %146 : vector<9x1xf32> to vector<9x32xf32>
    %162 = arith.mulf %161, %160 : vector<9x32xf32>
    %163 = arith.truncf %149 : vector<9x16xf32> to vector<9x16xbf16>
    %cst_112 = arith.constant dense<0.000000e+00> : vector<9x32xf32>
    %164 = tpu.matmul %163, %135, %cst_112 {dimension_numbers = #tpu.dot_dimension_numbers<[1], [0], [0], [1], [0, 0, 1, 1], [], []>} : vector<9x16xbf16>, vector<16x32xbf16>, vector<9x32xf32> -> vector<9x32xf32>
    %165 = arith.addf %162, %164 : vector<9x32xf32>
    %c2_113 = arith.constant 2 : index
    %c0_114 = arith.constant 0 : index
    %c0_115 = arith.constant 0 : index
    %166 = vector.load %arg21[%c2_113, %c0_114, %c0_115] : memref<4x9x32xf32, #tpu.memory_space<vmem>>, vector<1x9x32xf32>
    %167 = vector.shape_cast %166 : vector<1x9x32xf32> to vector<9x32xf32>
    %168 = vector.shape_cast %165 : vector<9x32xf32> to vector<1x9x32xf32>
    tpu.vector_store %arg21[%c2_113, %c0_114, %c0_115], %168 {strides = array<i32>} : memref<4x9x32xf32, #tpu.memory_space<vmem>>, vector<1x9x32xf32>,
    %c2_116 = arith.constant 2 : index
    %c0_117 = arith.constant 0 : index
    %c0_118 = arith.constant 0 : index
    %169 = vector.load %arg19[%c2_116, %c0_117, %c0_118] : memref<4x9x1xf32, #tpu.memory_space<vmem>>, vector<1x9x1xf32>
    %170 = vector.shape_cast %169 : vector<1x9x1xf32> to vector<9x1xf32>
    %171 = vector.shape_cast %144 : vector<9x1xf32> to vector<1x9x1xf32>
    tpu.vector_store %arg19[%c2_116, %c0_117, %c0_118], %171 {strides = array<i32>} : memref<4x9x1xf32, #tpu.memory_space<vmem>>, vector<1x9x1xf32>,
    %c3 = arith.constant 3 : index
    %c0_119 = arith.constant 0 : index
    %c0_120 = arith.constant 0 : index
    %172 = vector.load %arg9[%c3, %c0_119, %c0_120] : memref<4x128x32xbf16, #tpu.memory_space<vmem>>, vector<1x128x32xbf16>
    %173 = vector.shape_cast %172 : vector<1x128x32xbf16> to vector<128x32xbf16>
    %cst_121 = arith.constant dense<0.000000e+00> : vector<16x32xf32>
    %174 = tpu.matmul %15, %173, %cst_121 {dimension_numbers = #tpu.dot_dimension_numbers<[1], [0], [0], [1], [0, 0, 1, 1], [], []>} : vector<16x128xbf16>, vector<128x32xbf16>, vector<16x32xf32> -> vector<16x32xf32>
    %c3_122 = arith.constant 3 : index
    %c0_123 = arith.constant 0 : index
    %c0_124 = arith.constant 0 : index
    %175 = vector.load %arg10[%c3_122, %c0_123, %c0_124] : memref<4x1x32xf32, #tpu.memory_space<vmem>>, vector<1x1x32xf32>
    %176 = vector.shape_cast %175 : vector<1x1x32xf32> to vector<1x32xf32>
    %177 = vector.broadcast %176 : vector<1x32xf32> to vector<16x32xf32>
    %178 = arith.addf %174, %177 : vector<16x32xf32>
    %179 = arith.truncf %178 : vector<16x32xf32> to vector<16x32xbf16>
    %c3_125 = arith.constant 3 : index
    %c0_126 = arith.constant 0 : index
    %c0_127 = arith.constant 0 : index
    %180 = vector.load %arg11[%c3_125, %c0_126, %c0_127] : memref<4x128x32xbf16, #tpu.memory_space<vmem>>, vector<1x128x32xbf16>
    %181 = vector.shape_cast %180 : vector<1x128x32xbf16> to vector<128x32xbf16>
    %cst_128 = arith.constant dense<0.000000e+00> : vector<16x32xf32>
    %182 = tpu.matmul %15, %181, %cst_128 {dimension_numbers = #tpu.dot_dimension_numbers<[1], [0], [0], [1], [0, 0, 1, 1], [], []>} : vector<16x128xbf16>, vector<128x32xbf16>, vector<16x32xf32> -> vector<16x32xf32>
    %c3_129 = arith.constant 3 : index
    %c0_130 = arith.constant 0 : index
    %c0_131 = arith.constant 0 : index
    %183 = vector.load %arg12[%c3_129, %c0_130, %c0_131] : memref<4x1x32xf32, #tpu.memory_space<vmem>>, vector<1x1x32xf32>
    %184 = vector.shape_cast %183 : vector<1x1x32xf32> to vector<1x32xf32>
    %185 = vector.broadcast %184 : vector<1x32xf32> to vector<16x32xf32>
    %186 = arith.addf %182, %185 : vector<16x32xf32>
    %187 = arith.truncf %186 : vector<16x32xf32> to vector<16x32xbf16>
    %c3_132 = arith.constant 3 : index
    %c0_133 = arith.constant 0 : index
    %c0_134 = arith.constant 0 : index
    %188 = vector.load %arg18[%c3_132, %c0_133, %c0_134] : memref<4x9x32xbf16, #tpu.memory_space<vmem>>, vector<1x9x32xbf16>
    %189 = vector.shape_cast %188 : vector<1x9x32xbf16> to vector<9x32xbf16>
    %cst_135 = arith.constant dense<0.000000e+00> : vector<9x16xf32>
    %190 = tpu.matmul %189, %179, %cst_135 {dimension_numbers = #tpu.dot_dimension_numbers<[1], [1], [0], [0], [0, 0, 1, 0], [], []>} : vector<9x32xbf16>, vector<16x32xbf16>, vector<9x16xf32> -> vector<9x16xf32>
    %191 = arith.addf %190, %13 : vector<9x16xf32>
    %c3_136 = arith.constant 3 : index
    %c0_137 = arith.constant 0 : index
    %c0_138 = arith.constant 0 : index
    %192 = vector.load %arg19[%c3_136, %c0_137, %c0_138] : memref<4x9x1xf32, #tpu.memory_space<vmem>>, vector<1x9x1xf32>
    %193 = vector.shape_cast %192 : vector<1x9x1xf32> to vector<9x1xf32>
    %cst_139 = arith.constant dense<0xFF800000> : vector<9xf32>
    %194 = vector.multi_reduction <maximumf>, %191, %cst_139 [1] : vector<9x16xf32> to vector<9xf32>
    %195 = vector.shape_cast %194 : vector<9xf32> to vector<9x1xf32>
    %196 = arith.maximumf %193, %195 : vector<9x1xf32>
    %197 = arith.subf %193, %196 : vector<9x1xf32>
    %198 = math.exp %197 : vector<9x1xf32>
    %199 = vector.broadcast %196 : vector<9x1xf32> to vector<9x16xf32>
    %200 = arith.subf %191, %199 : vector<9x16xf32>
    %201 = math.exp %200 : vector<9x16xf32>
    %c3_140 = arith.constant 3 : index
    %c0_141 = arith.constant 0 : index
    %c0_142 = arith.constant 0 : index
    %202 = vector.load %arg20[%c3_140, %c0_141, %c0_142] : memref<4x9x1xf32, #tpu.memory_space<vmem>>, vector<1x9x1xf32>
    %203 = vector.shape_cast %202 : vector<1x9x1xf32> to vector<9x1xf32>
    %204 = arith.mulf %198, %203 : vector<9x1xf32>
    %cst_143 = arith.constant dense<0.000000e+00> : vector<9xf32>
    %205 = vector.multi_reduction <add>, %201, %cst_143 [1] : vector<9x16xf32> to vector<9xf32>
    %206 = vector.shape_cast %205 : vector<9xf32> to vector<9x1xf32>
    %207 = arith.addf %204, %206 : vector<9x1xf32>
    %c3_144 = arith.constant 3 : index
    %c0_145 = arith.constant 0 : index
    %c0_146 = arith.constant 0 : index
    %208 = vector.load %arg20[%c3_144, %c0_145, %c0_146] : memref<4x9x1xf32, #tpu.memory_space<vmem>>, vector<1x9x1xf32>
    %209 = vector.shape_cast %208 : vector<1x9x1xf32> to vector<9x1xf32>
    %210 = vector.shape_cast %207 : vector<9x1xf32> to vector<1x9x1xf32>
    tpu.vector_store %arg20[%c3_144, %c0_145, %c0_146], %210 {strides = array<i32>} : memref<4x9x1xf32, #tpu.memory_space<vmem>>, vector<1x9x1xf32>,
    %c3_147 = arith.constant 3 : index
    %c0_148 = arith.constant 0 : index
    %c0_149 = arith.constant 0 : index
    %211 = vector.load %arg21[%c3_147, %c0_148, %c0_149] : memref<4x9x32xf32, #tpu.memory_space<vmem>>, vector<1x9x32xf32>
    %212 = vector.shape_cast %211 : vector<1x9x32xf32> to vector<9x32xf32>
    %213 = vector.broadcast %198 : vector<9x1xf32> to vector<9x32xf32>
    %214 = arith.mulf %213, %212 : vector<9x32xf32>
    %215 = arith.truncf %201 : vector<9x16xf32> to vector<9x16xbf16>
    %cst_150 = arith.constant dense<0.000000e+00> : vector<9x32xf32>
    %216 = tpu.matmul %215, %187, %cst_150 {dimension_numbers = #tpu.dot_dimension_numbers<[1], [0], [0], [1], [0, 0, 1, 1], [], []>} : vector<9x16xbf16>, vector<16x32xbf16>, vector<9x32xf32> -> vector<9x32xf32>
    %217 = arith.addf %214, %216 : vector<9x32xf32>
    %c3_151 = arith.constant 3 : index
    %c0_152 = arith.constant 0 : index
    %c0_153 = arith.constant 0 : index
    %218 = vector.load %arg21[%c3_151, %c0_152, %c0_153] : memref<4x9x32xf32, #tpu.memory_space<vmem>>, vector<1x9x32xf32>
    %219 = vector.shape_cast %218 : vector<1x9x32xf32> to vector<9x32xf32>
    %220 = vector.shape_cast %217 : vector<9x32xf32> to vector<1x9x32xf32>
    tpu.vector_store %arg21[%c3_151, %c0_152, %c0_153], %220 {strides = array<i32>} : memref<4x9x32xf32, #tpu.memory_space<vmem>>, vector<1x9x32xf32>,
    %c3_154 = arith.constant 3 : index
    %c0_155 = arith.constant 0 : index
    %c0_156 = arith.constant 0 : index
    %221 = vector.load %arg19[%c3_154, %c0_155, %c0_156] : memref<4x9x1xf32, #tpu.memory_space<vmem>>, vector<1x9x1xf32>
    %222 = vector.shape_cast %221 : vector<1x9x1xf32> to vector<9x1xf32>
    %223 = vector.shape_cast %196 : vector<9x1xf32> to vector<1x9x1xf32>
    tpu.vector_store %arg19[%c3_154, %c0_155, %c0_156], %223 {strides = array<i32>} : memref<4x9x1xf32, #tpu.memory_space<vmem>>, vector<1x9x1xf32>,
    %c0_i32_157 = arith.constant 0 : i32
    %224 = arith.cmpi eq, %arg2, %c0_i32_157 : i32
    %225 = arith.extui %224 : i1 to i32
    %c0_i32_158 = arith.constant 0 : i32
    %226 = arith.cmpi ne, %225, %c0_i32_158 : i32
    scf.if %226 {
      %c0_159 = arith.constant 0 : index
      %c0_160 = arith.constant 0 : index
      %227 = vector.load %arg14[%c0_159, %c0_160] : memref<1x128xf32, #tpu.memory_space<vmem>>, vector<1x128xf32>
      %c0_161 = arith.constant 0 : index
      %c0_162 = arith.constant 0 : index
      %c0_163 = arith.constant 0 : index
      %228 = vector.load %arg21[%c0_161, %c0_162, %c0_163] : memref<4x9x32xf32, #tpu.memory_space<vmem>>, vector<1x9x32xf32>
      %229 = vector.shape_cast %228 : vector<1x9x32xf32> to vector<9x32xf32>
      %c0_164 = arith.constant 0 : index
      %c0_165 = arith.constant 0 : index
      %c0_166 = arith.constant 0 : index
      %230 = vector.load %arg20[%c0_164, %c0_165, %c0_166] : memref<4x9x1xf32, #tpu.memory_space<vmem>>, vector<1x9x1xf32>
      %231 = vector.shape_cast %230 : vector<1x9x1xf32> to vector<9x1xf32>
      %232 = tpu.reciprocal %231 {approx = true} : vector<9x1xf32> -> vector<9x1xf32>
      %233 = vector.broadcast %232 : vector<9x1xf32> to vector<9x32xf32>
      %234 = arith.mulf %229, %233 : vector<9x32xf32>
      %235 = arith.truncf %234 : vector<9x32xf32> to vector<9x32xbf16>
      %c0_167 = arith.constant 0 : index
      %c0_168 = arith.constant 0 : index
      %c0_169 = arith.constant 0 : index
      %236 = vector.load %arg13[%c0_167, %c0_168, %c0_169] : memref<4x32x128xbf16, #tpu.memory_space<vmem>>, vector<1x32x128xbf16>
      %237 = vector.shape_cast %236 : vector<1x32x128xbf16> to vector<32x128xbf16>
      %cst_170 = arith.constant dense<0.000000e+00> : vector<9x128xf32>
      %238 = tpu.matmul %235, %237, %cst_170 {dimension_numbers = #tpu.dot_dimension_numbers<[1], [0], [0], [1], [0, 0, 1, 1], [], []>} : vector<9x32xbf16>, vector<32x128xbf16>, vector<9x128xf32> -> vector<9x128xf32>
      %239 = vector.broadcast %227 : vector<1x128xf32> to vector<9x128xf32>
      %240 = arith.addf %239, %238 : vector<9x128xf32>
      %c1_171 = arith.constant 1 : index
      %c0_172 = arith.constant 0 : index
      %c0_173 = arith.constant 0 : index
      %241 = vector.load %arg21[%c1_171, %c0_172, %c0_173] : memref<4x9x32xf32, #tpu.memory_space<vmem>>, vector<1x9x32xf32>
      %242 = vector.shape_cast %241 : vector<1x9x32xf32> to vector<9x32xf32>
      %c1_174 = arith.constant 1 : index
      %c0_175 = arith.constant 0 : index
      %c0_176 = arith.constant 0 : index
      %243 = vector.load %arg20[%c1_174, %c0_175, %c0_176] : memref<4x9x1xf32, #tpu.memory_space<vmem>>, vector<1x9x1xf32>
      %244 = vector.shape_cast %243 : vector<1x9x1xf32> to vector<9x1xf32>
      %245 = tpu.reciprocal %244 {approx = true} : vector<9x1xf32> -> vector<9x1xf32>
      %246 = vector.broadcast %245 : vector<9x1xf32> to vector<9x32xf32>
      %247 = arith.mulf %242, %246 : vector<9x32xf32>
      %248 = arith.truncf %247 : vector<9x32xf32> to vector<9x32xbf16>
      %c1_177 = arith.constant 1 : index
      %c0_178 = arith.constant 0 : index
      %c0_179 = arith.constant 0 : index
      %249 = vector.load %arg13[%c1_177, %c0_178, %c0_179] : memref<4x32x128xbf16, #tpu.memory_space<vmem>>, vector<1x32x128xbf16>
      %250 = vector.shape_cast %249 : vector<1x32x128xbf16> to vector<32x128xbf16>
      %cst_180 = arith.constant dense<0.000000e+00> : vector<9x128xf32>
      %251 = tpu.matmul %248, %250, %cst_180 {dimension_numbers = #tpu.dot_dimension_numbers<[1], [0], [0], [1], [0, 0, 1, 1], [], []>} : vector<9x32xbf16>, vector<32x128xbf16>, vector<9x128xf32> -> vector<9x128xf32>
      %252 = arith.addf %240, %251 : vector<9x128xf32>
      %c2_181 = arith.constant 2 : index
      %c0_182 = arith.constant 0 : index
      %c0_183 = arith.constant 0 : index
      %253 = vector.load %arg21[%c2_181, %c0_182, %c0_183] : memref<4x9x32xf32, #tpu.memory_space<vmem>>, vector<1x9x32xf32>
      %254 = vector.shape_cast %253 : vector<1x9x32xf32> to vector<9x32xf32>
      %c2_184 = arith.constant 2 : index
      %c0_185 = arith.constant 0 : index
      %c0_186 = arith.constant 0 : index
      %255 = vector.load %arg20[%c2_184, %c0_185, %c0_186] : memref<4x9x1xf32, #tpu.memory_space<vmem>>, vector<1x9x1xf32>
      %256 = vector.shape_cast %255 : vector<1x9x1xf32> to vector<9x1xf32>
      %257 = tpu.reciprocal %256 {approx = true} : vector<9x1xf32> -> vector<9x1xf32>
      %258 = vector.broadcast %257 : vector<9x1xf32> to vector<9x32xf32>
      %259 = arith.mulf %254, %258 : vector<9x32xf32>
      %260 = arith.truncf %259 : vector<9x32xf32> to vector<9x32xbf16>
      %c2_187 = arith.constant 2 : index
      %c0_188 = arith.constant 0 : index
      %c0_189 = arith.constant 0 : index
      %261 = vector.load %arg13[%c2_187, %c0_188, %c0_189] : memref<4x32x128xbf16, #tpu.memory_space<vmem>>, vector<1x32x128xbf16>
      %262 = vector.shape_cast %261 : vector<1x32x128xbf16> to vector<32x128xbf16>
      %cst_190 = arith.constant dense<0.000000e+00> : vector<9x128xf32>
      %263 = tpu.matmul %260, %262, %cst_190 {dimension_numbers = #tpu.dot_dimension_numbers<[1], [0], [0], [1], [0, 0, 1, 1], [], []>} : vector<9x32xbf16>, vector<32x128xbf16>, vector<9x128xf32> -> vector<9x128xf32>
      %264 = arith.addf %252, %263 : vector<9x128xf32>
      %c3_191 = arith.constant 3 : index
      %c0_192 = arith.constant 0 : index
      %c0_193 = arith.constant 0 : index
      %265 = vector.load %arg21[%c3_191, %c0_192, %c0_193] : memref<4x9x32xf32, #tpu.memory_space<vmem>>, vector<1x9x32xf32>
      %266 = vector.shape_cast %265 : vector<1x9x32xf32> to vector<9x32xf32>
      %c3_194 = arith.constant 3 : index
      %c0_195 = arith.constant 0 : index
      %c0_196 = arith.constant 0 : index
      %267 = vector.load %arg20[%c3_194, %c0_195, %c0_196] : memref<4x9x1xf32, #tpu.memory_space<vmem>>, vector<1x9x1xf32>
      %268 = vector.shape_cast %267 : vector<1x9x1xf32> to vector<9x1xf32>
      %269 = tpu.reciprocal %268 {approx = true} : vector<9x1xf32> -> vector<9x1xf32>
      %270 = vector.broadcast %269 : vector<9x1xf32> to vector<9x32xf32>
      %271 = arith.mulf %266, %270 : vector<9x32xf32>
      %272 = arith.truncf %271 : vector<9x32xf32> to vector<9x32xbf16>
      %c3_197 = arith.constant 3 : index
      %c0_198 = arith.constant 0 : index
      %c0_199 = arith.constant 0 : index
      %273 = vector.load %arg13[%c3_197, %c0_198, %c0_199] : memref<4x32x128xbf16, #tpu.memory_space<vmem>>, vector<1x32x128xbf16>
      %274 = vector.shape_cast %273 : vector<1x32x128xbf16> to vector<32x128xbf16>
      %cst_200 = arith.constant dense<0.000000e+00> : vector<9x128xf32>
      %275 = tpu.matmul %272, %274, %cst_200 {dimension_numbers = #tpu.dot_dimension_numbers<[1], [0], [0], [1], [0, 0, 1, 1], [], []>} : vector<9x32xbf16>, vector<32x128xbf16>, vector<9x128xf32> -> vector<9x128xf32>
      %276 = arith.addf %264, %275 : vector<9x128xf32>
      %c0_201 = arith.constant 0 : index
      %c0_202 = arith.constant 0 : index
      %c0_203 = arith.constant 0 : index
      %277 = vector.load %arg5[%c0_201, %c0_202, %c0_203] : memref<1x9x128xbf16, #tpu.memory_space<vmem>>, vector<1x9x128xbf16>
      %278 = vector.shape_cast %277 : vector<1x9x128xbf16> to vector<9x128xbf16>
      %279 = arith.extf %278 : vector<9x128xbf16> to vector<9x128xf32>
      %280 = arith.addf %276, %279 : vector<9x128xf32>
      %c0_204 = arith.constant 0 : index
      %c0_205 = arith.constant 0 : index
      %281 = vector.load %arg15[%c0_204, %c0_205] : memref<1x128xf32, #tpu.memory_space<vmem>>, vector<1x128xf32>
      %c0_206 = arith.constant 0 : index
      %c0_207 = arith.constant 0 : index
      %282 = vector.load %arg16[%c0_206, %c0_207] : memref<1x128xf32, #tpu.memory_space<vmem>>, vector<1x128xf32>
      %cst_208 = arith.constant dense<0.000000e+00> : vector<9xf32>
      %283 = vector.multi_reduction <add>, %280, %cst_208 [1] : vector<9x128xf32> to vector<9xf32>
      %284 = vector.shape_cast %283 : vector<9xf32> to vector<9x1xf32>
      %cst_209 = arith.constant 1.280000e+02 : f32
      %285 = vector.broadcast %cst_209 : f32 to vector<9x1xf32>
      %286 = arith.divf %284, %285 : vector<9x1xf32>
      %287 = vector.broadcast %286 : vector<9x1xf32> to vector<9x128xf32>
      %288 = arith.subf %280, %287 : vector<9x128xf32>
      %289 = arith.mulf %288, %288 : vector<9x128xf32>
      %cst_210 = arith.constant dense<0.000000e+00> : vector<9xf32>
      %290 = vector.multi_reduction <add>, %289, %cst_210 [1] : vector<9x128xf32> to vector<9xf32>
      %291 = vector.shape_cast %290 : vector<9xf32> to vector<9x1xf32>
      %cst_211 = arith.constant 1.280000e+02 : f32
      %292 = vector.broadcast %cst_211 : f32 to vector<9x1xf32>
      %293 = arith.divf %291, %292 : vector<9x1xf32>
      %294 = vector.broadcast %286 : vector<9x1xf32> to vector<9x128xf32>
      %295 = arith.subf %280, %294 : vector<9x128xf32>
      %cst_212 = arith.constant 9.99999974E-6 : f32
      %296 = vector.broadcast %cst_212 : f32 to vector<9x1xf32>
      %297 = arith.addf %293, %296 : vector<9x1xf32>
      %298 = math.rsqrt %297 : vector<9x1xf32>
      %299 = vector.broadcast %298 : vector<9x1xf32> to vector<9x128xf32>
      %300 = arith.mulf %295, %299 : vector<9x128xf32>
      %301 = vector.broadcast %281 : vector<1x128xf32> to vector<9x128xf32>
      %302 = arith.mulf %300, %301 : vector<9x128xf32>
      %303 = vector.broadcast %282 : vector<1x128xf32> to vector<9x128xf32>
      %304 = arith.addf %302, %303 : vector<9x128xf32>
      %c9_i32 = arith.constant 9 : i32
      %305 = arith.muli %arg1, %c9_i32 : i32
      %306 = tpu.iota {dimensions = array<i32: 0>} : vector<9x1xi32>
      %307 = vector.broadcast %305 : i32 to vector<9x1xi32>
      %308 = arith.addi %307, %306 : vector<9x1xi32>
      %309 = arith.index_cast %arg0 : i32 to index
      %310 = memref.load %arg3[%309] : memref<2xi32, #tpu.memory_space<smem>>
      %311 = vector.broadcast %310 : i32 to vector<9x1xi32>
      %312 = arith.cmpi slt, %308, %311 : vector<9x1xi32>
      %313 = arith.extui %312 : vector<9x1xi1> to vector<9x1xi32>
      %314 = arith.sitofp %313 : vector<9x1xi32> to vector<9x1xf32>
      %315 = vector.broadcast %314 : vector<9x1xf32> to vector<9x128xf32>
      %316 = arith.mulf %304, %315 : vector<9x128xf32>
      %317 = arith.truncf %316 : vector<9x128xf32> to vector<9x128xbf16>
      %c0_213 = arith.constant 0 : index
      %c0_214 = arith.constant 0 : index
      %c0_215 = arith.constant 0 : index
      %318 = vector.load %arg17[%c0_213, %c0_214, %c0_215] : memref<1x9x128xbf16, #tpu.memory_space<vmem>>, vector<1x9x128xbf16>
      %319 = vector.shape_cast %318 : vector<1x9x128xbf16> to vector<9x128xbf16>
      %320 = vector.shape_cast %317 : vector<9x128xbf16> to vector<1x9x128xbf16>
      tpu.vector_store %arg17[%c0_213, %c0_214, %c0_215], %320 {strides = array<i32>} : memref<1x9x128xbf16, #tpu.memory_space<vmem>>, vector<1x9x128xbf16>,
    } else {
    }
    return
  }
  func.func @transform_0(%arg0: i32, %arg1: i32, %arg2: i32, %arg3: memref<2xi32, #tpu.memory_space<smem>>, %arg4: memref<2xi32, #tpu.memory_space<smem>>) -> (i32, i32, i32) {
    %c0_i32 = arith.constant 0 : i32
    %c0_i32_0 = arith.constant 0 : i32
    return %arg0, %arg1, %c0_i32 : i32, i32, i32
  }
  func.func @transform_1(%arg0: i32, %arg1: i32, %arg2: i32, %arg3: memref<2xi32, #tpu.memory_space<smem>>, %arg4: memref<2xi32, #tpu.memory_space<smem>>) -> (i32, i32, i32) {
    %c0_i32 = arith.constant 0 : i32
    %c0_i32_0 = arith.constant 0 : i32
    return %arg0, %arg2, %c0_i32 : i32, i32, i32
  }
  func.func @transform_2(%arg0: i32, %arg1: i32, %arg2: i32, %arg3: memref<2xi32, #tpu.memory_space<smem>>, %arg4: memref<2xi32, #tpu.memory_space<smem>>) -> (i32, i32, i32) {
    %c0_i32 = arith.constant 0 : i32
    %c0_i32_0 = arith.constant 0 : i32
    %c0_i32_1 = arith.constant 0 : i32
    %c0_i32_2 = arith.constant 0 : i32
    return %c0_i32, %c0_i32_0, %c0_i32_1 : i32, i32, i32
  }
  func.func @transform_3(%arg0: i32, %arg1: i32, %arg2: i32, %arg3: memref<2xi32, #tpu.memory_space<smem>>, %arg4: memref<2xi32, #tpu.memory_space<smem>>) -> (i32, i32, i32) {
    %c0_i32 = arith.constant 0 : i32
    %c0_i32_0 = arith.constant 0 : i32
    %c0_i32_1 = arith.constant 0 : i32
    %c0_i32_2 = arith.constant 0 : i32
    return %c0_i32, %c0_i32_0, %c0_i32_1 : i32, i32, i32
  }
  func.func @transform_4(%arg0: i32, %arg1: i32, %arg2: i32, %arg3: memref<2xi32, #tpu.memory_space<smem>>, %arg4: memref<2xi32, #tpu.memory_space<smem>>) -> (i32, i32, i32) {
    %c0_i32 = arith.constant 0 : i32
    %c0_i32_0 = arith.constant 0 : i32
    %c0_i32_1 = arith.constant 0 : i32
    %c0_i32_2 = arith.constant 0 : i32
    return %c0_i32, %c0_i32_0, %c0_i32_1 : i32, i32, i32
  }
  func.func @transform_5(%arg0: i32, %arg1: i32, %arg2: i32, %arg3: memref<2xi32, #tpu.memory_space<smem>>, %arg4: memref<2xi32, #tpu.memory_space<smem>>) -> (i32, i32, i32) {
    %c0_i32 = arith.constant 0 : i32
    %c0_i32_0 = arith.constant 0 : i32
    %c0_i32_1 = arith.constant 0 : i32
    %c0_i32_2 = arith.constant 0 : i32
    return %c0_i32, %c0_i32_0, %c0_i32_1 : i32, i32, i32
  }
  func.func @transform_6(%arg0: i32, %arg1: i32, %arg2: i32, %arg3: memref<2xi32, #tpu.memory_space<smem>>, %arg4: memref<2xi32, #tpu.memory_space<smem>>) -> (i32, i32, i32) {
    %c0_i32 = arith.constant 0 : i32
    %c0_i32_0 = arith.constant 0 : i32
    %c0_i32_1 = arith.constant 0 : i32
    %c0_i32_2 = arith.constant 0 : i32
    return %c0_i32, %c0_i32_0, %c0_i32_1 : i32, i32, i32
  }
  func.func @transform_7(%arg0: i32, %arg1: i32, %arg2: i32, %arg3: memref<2xi32, #tpu.memory_space<smem>>, %arg4: memref<2xi32, #tpu.memory_space<smem>>) -> (i32, i32, i32) {
    %c0_i32 = arith.constant 0 : i32
    %c0_i32_0 = arith.constant 0 : i32
    %c0_i32_1 = arith.constant 0 : i32
    %c0_i32_2 = arith.constant 0 : i32
    return %c0_i32, %c0_i32_0, %c0_i32_1 : i32, i32, i32
  }
  func.func @transform_8(%arg0: i32, %arg1: i32, %arg2: i32, %arg3: memref<2xi32, #tpu.memory_space<smem>>, %arg4: memref<2xi32, #tpu.memory_space<smem>>) -> (i32, i32, i32) {
    %c0_i32 = arith.constant 0 : i32
    %c0_i32_0 = arith.constant 0 : i32
    %c0_i32_1 = arith.constant 0 : i32
    %c0_i32_2 = arith.constant 0 : i32
    return %c0_i32, %c0_i32_0, %c0_i32_1 : i32, i32, i32
  }
  func.func @transform_9(%arg0: i32, %arg1: i32, %arg2: i32, %arg3: memref<2xi32, #tpu.memory_space<smem>>, %arg4: memref<2xi32, #tpu.memory_space<smem>>) -> (i32, i32) {
    %c0_i32 = arith.constant 0 : i32
    %c0_i32_0 = arith.constant 0 : i32
    %c0_i32_1 = arith.constant 0 : i32
    return %c0_i32, %c0_i32_0 : i32, i32
  }
  func.func @transform_10(%arg0: i32, %arg1: i32, %arg2: i32, %arg3: memref<2xi32, #tpu.memory_space<smem>>, %arg4: memref<2xi32, #tpu.memory_space<smem>>) -> (i32, i32) {
    %c0_i32 = arith.constant 0 : i32
    %c0_i32_0 = arith.constant 0 : i32
    %c0_i32_1 = arith.constant 0 : i32
    return %c0_i32, %c0_i32_0 : i32, i32
  }
  func.func @transform_11(%arg0: i32, %arg1: i32, %arg2: i32, %arg3: memref<2xi32, #tpu.memory_space<smem>>, %arg4: memref<2xi32, #tpu.memory_space<smem>>) -> (i32, i32) {
    %c0_i32 = arith.constant 0 : i32
    %c0_i32_0 = arith.constant 0 : i32
    %c0_i32_1 = arith.constant 0 : i32
    return %c0_i32, %c0_i32_0 : i32, i32
  }
  func.func @transform_12(%arg0: i32, %arg1: i32, %arg2: i32, %arg3: memref<2xi32, #tpu.memory_space<smem>>, %arg4: memref<2xi32, #tpu.memory_space<smem>>) -> (i32, i32, i32) {
    %c0_i32 = arith.constant 0 : i32
    %c0_i32_0 = arith.constant 0 : i32
    return %arg0, %arg1, %c0_i32 : i32, i32, i32
  }
}

module attributes {stable_mosaic.version = 11 : i64} {
  func.func @_ffn_kernel(%arg0: i32, %arg1: i32, %arg2: memref<2xi32, #tpu.memory_space<smem>>, %arg3: memref<1x9x128xbf16, #tpu.memory_space<vmem>>, %arg4: memref<128x256xbf16, #tpu.memory_space<vmem>>, %arg5: memref<1x256xf32, #tpu.memory_space<vmem>>, %arg6: memref<256x128xbf16, #tpu.memory_space<vmem>>, %arg7: memref<1x128xf32, #tpu.memory_space<vmem>>, %arg8: memref<1x128xf32, #tpu.memory_space<vmem>>, %arg9: memref<1x128xf32, #tpu.memory_space<vmem>>, %arg10: memref<1x9x128xbf16, #tpu.memory_space<vmem>>) attributes {dimension_semantics = [#tpu.dimension_semantics<parallel>, #tpu.dimension_semantics<parallel>], iteration_bounds = array<i64: 2, 1>, scalar_prefetch = 1 : i64, scratch_operands = 0 : i64, tpu.core_type = #tpu.core_type<tc>, window_params = [{transform_indices = @transform_0, window_bounds = array<i64: 1, 9, 128>}, {pipeline_mode = #tpu.pipeline_mode<synchronous>, transform_indices = @transform_1, window_bounds = array<i64: 128, 256>}, {pipeline_mode = #tpu.pipeline_mode<synchronous>, transform_indices = @transform_2, window_bounds = array<i64: 1, 256>}, {pipeline_mode = #tpu.pipeline_mode<synchronous>, transform_indices = @transform_3, window_bounds = array<i64: 256, 128>}, {pipeline_mode = #tpu.pipeline_mode<synchronous>, transform_indices = @transform_4, window_bounds = array<i64: 1, 128>}, {pipeline_mode = #tpu.pipeline_mode<synchronous>, transform_indices = @transform_5, window_bounds = array<i64: 1, 128>}, {pipeline_mode = #tpu.pipeline_mode<synchronous>, transform_indices = @transform_6, window_bounds = array<i64: 1, 128>}, {transform_indices = @transform_7, window_bounds = array<i64: 1, 9, 128>}]} {
    %c0 = arith.constant 0 : index
    %c0_0 = arith.constant 0 : index
    %c0_1 = arith.constant 0 : index
    %0 = vector.load %arg3[%c0, %c0_0, %c0_1] : memref<1x9x128xbf16, #tpu.memory_space<vmem>>, vector<1x9x128xbf16>
    %1 = vector.shape_cast %0 : vector<1x9x128xbf16> to vector<9x128xbf16>
    %2 = arith.extf %1 : vector<9x128xbf16> to vector<9x128xf32>
    %c0_2 = arith.constant 0 : index
    %c0_3 = arith.constant 0 : index
    %3 = vector.load %arg4[%c0_2, %c0_3] : memref<128x256xbf16, #tpu.memory_space<vmem>>, vector<128x256xbf16>
    %cst = arith.constant dense<0.000000e+00> : vector<9x256xf32>
    %4 = tpu.matmul %1, %3, %cst {dimension_numbers = #tpu.dot_dimension_numbers<[1], [0], [0], [1], [0, 0, 1, 1], [], []>} : vector<9x128xbf16>, vector<128x256xbf16>, vector<9x256xf32> -> vector<9x256xf32>
    %c0_4 = arith.constant 0 : index
    %c0_5 = arith.constant 0 : index
    %5 = vector.load %arg5[%c0_4, %c0_5] : memref<1x256xf32, #tpu.memory_space<vmem>>, vector<1x256xf32>
    %6 = vector.broadcast %5 : vector<1x256xf32> to vector<9x256xf32>
    %7 = arith.addf %4, %6 : vector<9x256xf32>
    %cst_6 = arith.constant 0.000000e+00 : f32
    %8 = vector.broadcast %cst_6 : f32 to vector<9x256xf32>
    %9 = arith.maximumf %7, %8 : vector<9x256xf32>
    %10 = arith.truncf %9 : vector<9x256xf32> to vector<9x256xbf16>
    %c0_7 = arith.constant 0 : index
    %c0_8 = arith.constant 0 : index
    %11 = vector.load %arg6[%c0_7, %c0_8] : memref<256x128xbf16, #tpu.memory_space<vmem>>, vector<256x128xbf16>
    %cst_9 = arith.constant dense<0.000000e+00> : vector<9x128xf32>
    %12 = tpu.matmul %10, %11, %cst_9 {dimension_numbers = #tpu.dot_dimension_numbers<[1], [0], [0], [1], [0, 0, 1, 1], [], []>} : vector<9x256xbf16>, vector<256x128xbf16>, vector<9x128xf32> -> vector<9x128xf32>
    %c0_10 = arith.constant 0 : index
    %c0_11 = arith.constant 0 : index
    %13 = vector.load %arg7[%c0_10, %c0_11] : memref<1x128xf32, #tpu.memory_space<vmem>>, vector<1x128xf32>
    %14 = vector.broadcast %13 : vector<1x128xf32> to vector<9x128xf32>
    %15 = arith.addf %12, %14 : vector<9x128xf32>
    %16 = arith.addf %15, %2 : vector<9x128xf32>
    %c0_12 = arith.constant 0 : index
    %c0_13 = arith.constant 0 : index
    %17 = vector.load %arg8[%c0_12, %c0_13] : memref<1x128xf32, #tpu.memory_space<vmem>>, vector<1x128xf32>
    %c0_14 = arith.constant 0 : index
    %c0_15 = arith.constant 0 : index
    %18 = vector.load %arg9[%c0_14, %c0_15] : memref<1x128xf32, #tpu.memory_space<vmem>>, vector<1x128xf32>
    %cst_16 = arith.constant dense<0.000000e+00> : vector<9xf32>
    %19 = vector.multi_reduction <add>, %16, %cst_16 [1] : vector<9x128xf32> to vector<9xf32>
    %20 = vector.shape_cast %19 : vector<9xf32> to vector<9x1xf32>
    %cst_17 = arith.constant 1.280000e+02 : f32
    %21 = vector.broadcast %cst_17 : f32 to vector<9x1xf32>
    %22 = arith.divf %20, %21 : vector<9x1xf32>
    %23 = vector.broadcast %22 : vector<9x1xf32> to vector<9x128xf32>
    %24 = arith.subf %16, %23 : vector<9x128xf32>
    %25 = arith.mulf %24, %24 : vector<9x128xf32>
    %cst_18 = arith.constant dense<0.000000e+00> : vector<9xf32>
    %26 = vector.multi_reduction <add>, %25, %cst_18 [1] : vector<9x128xf32> to vector<9xf32>
    %27 = vector.shape_cast %26 : vector<9xf32> to vector<9x1xf32>
    %cst_19 = arith.constant 1.280000e+02 : f32
    %28 = vector.broadcast %cst_19 : f32 to vector<9x1xf32>
    %29 = arith.divf %27, %28 : vector<9x1xf32>
    %30 = vector.broadcast %22 : vector<9x1xf32> to vector<9x128xf32>
    %31 = arith.subf %16, %30 : vector<9x128xf32>
    %cst_20 = arith.constant 9.99999974E-6 : f32
    %32 = vector.broadcast %cst_20 : f32 to vector<9x1xf32>
    %33 = arith.addf %29, %32 : vector<9x1xf32>
    %34 = math.rsqrt %33 : vector<9x1xf32>
    %35 = vector.broadcast %34 : vector<9x1xf32> to vector<9x128xf32>
    %36 = arith.mulf %31, %35 : vector<9x128xf32>
    %37 = vector.broadcast %17 : vector<1x128xf32> to vector<9x128xf32>
    %38 = arith.mulf %36, %37 : vector<9x128xf32>
    %39 = vector.broadcast %18 : vector<1x128xf32> to vector<9x128xf32>
    %40 = arith.addf %38, %39 : vector<9x128xf32>
    %c9_i32 = arith.constant 9 : i32
    %41 = arith.muli %arg1, %c9_i32 : i32
    %42 = tpu.iota {dimensions = array<i32: 0>} : vector<9x1xi32>
    %43 = vector.broadcast %41 : i32 to vector<9x1xi32>
    %44 = arith.addi %43, %42 : vector<9x1xi32>
    %45 = arith.index_cast %arg0 : i32 to index
    %46 = memref.load %arg2[%45] : memref<2xi32, #tpu.memory_space<smem>>
    %47 = vector.broadcast %46 : i32 to vector<9x1xi32>
    %48 = arith.cmpi slt, %44, %47 : vector<9x1xi32>
    %49 = arith.extui %48 : vector<9x1xi1> to vector<9x1xi32>
    %50 = arith.sitofp %49 : vector<9x1xi32> to vector<9x1xf32>
    %51 = vector.broadcast %50 : vector<9x1xf32> to vector<9x128xf32>
    %52 = arith.mulf %40, %51 : vector<9x128xf32>
    %53 = arith.truncf %52 : vector<9x128xf32> to vector<9x128xbf16>
    %c0_21 = arith.constant 0 : index
    %c0_22 = arith.constant 0 : index
    %c0_23 = arith.constant 0 : index
    %54 = vector.load %arg10[%c0_21, %c0_22, %c0_23] : memref<1x9x128xbf16, #tpu.memory_space<vmem>>, vector<1x9x128xbf16>
    %55 = vector.shape_cast %54 : vector<1x9x128xbf16> to vector<9x128xbf16>
    %56 = vector.shape_cast %53 : vector<9x128xbf16> to vector<1x9x128xbf16>
    tpu.vector_store %arg10[%c0_21, %c0_22, %c0_23], %56 {strides = array<i32>} : memref<1x9x128xbf16, #tpu.memory_space<vmem>>, vector<1x9x128xbf16>,
    return
  }
  func.func @transform_0(%arg0: i32, %arg1: i32, %arg2: memref<2xi32, #tpu.memory_space<smem>>) -> (i32, i32, i32) {
    %c0_i32 = arith.constant 0 : i32
    %c0_i32_0 = arith.constant 0 : i32
    return %arg0, %arg1, %c0_i32 : i32, i32, i32
  }
  func.func @transform_1(%arg0: i32, %arg1: i32, %arg2: memref<2xi32, #tpu.memory_space<smem>>) -> (i32, i32) {
    %c0_i32 = arith.constant 0 : i32
    %c0_i32_0 = arith.constant 0 : i32
    %c0_i32_1 = arith.constant 0 : i32
    return %c0_i32, %c0_i32_0 : i32, i32
  }
  func.func @transform_2(%arg0: i32, %arg1: i32, %arg2: memref<2xi32, #tpu.memory_space<smem>>) -> (i32, i32) {
    %c0_i32 = arith.constant 0 : i32
    %c0_i32_0 = arith.constant 0 : i32
    %c0_i32_1 = arith.constant 0 : i32
    return %c0_i32, %c0_i32_0 : i32, i32
  }
  func.func @transform_3(%arg0: i32, %arg1: i32, %arg2: memref<2xi32, #tpu.memory_space<smem>>) -> (i32, i32) {
    %c0_i32 = arith.constant 0 : i32
    %c0_i32_0 = arith.constant 0 : i32
    %c0_i32_1 = arith.constant 0 : i32
    return %c0_i32, %c0_i32_0 : i32, i32
  }
  func.func @transform_4(%arg0: i32, %arg1: i32, %arg2: memref<2xi32, #tpu.memory_space<smem>>) -> (i32, i32) {
    %c0_i32 = arith.constant 0 : i32
    %c0_i32_0 = arith.constant 0 : i32
    %c0_i32_1 = arith.constant 0 : i32
    return %c0_i32, %c0_i32_0 : i32, i32
  }
  func.func @transform_5(%arg0: i32, %arg1: i32, %arg2: memref<2xi32, #tpu.memory_space<smem>>) -> (i32, i32) {
    %c0_i32 = arith.constant 0 : i32
    %c0_i32_0 = arith.constant 0 : i32
    %c0_i32_1 = arith.constant 0 : i32
    return %c0_i32, %c0_i32_0 : i32, i32
  }
  func.func @transform_6(%arg0: i32, %arg1: i32, %arg2: memref<2xi32, #tpu.memory_space<smem>>) -> (i32, i32) {
    %c0_i32 = arith.constant 0 : i32
    %c0_i32_0 = arith.constant 0 : i32
    %c0_i32_1 = arith.constant 0 : i32
    return %c0_i32, %c0_i32_0 : i32, i32
  }
  func.func @transform_7(%arg0: i32, %arg1: i32, %arg2: memref<2xi32, #tpu.memory_space<smem>>) -> (i32, i32, i32) {
    %c0_i32 = arith.constant 0 : i32
    %c0_i32_0 = arith.constant 0 : i32
    return %arg0, %arg1, %c0_i32 : i32, i32, i32
  }
}

module attributes {stable_mosaic.version = 11 : i64} {
  func.func @_proj_kernel(%arg0: i32, %arg1: i32, %arg2: memref<24x128xbf16, #tpu.memory_space<vmem>>, %arg3: memref<128x128xbf16, #tpu.memory_space<vmem>>, %arg4: memref<24x128xf32, #tpu.memory_space<vmem>>) attributes {dimension_semantics = [#tpu.dimension_semantics<parallel>, #tpu.dimension_semantics<parallel>], iteration_bounds = array<i64: 1, 1>, scalar_prefetch = 0 : i64, scratch_operands = 0 : i64, tpu.core_type = #tpu.core_type<tc>, window_params = [{transform_indices = @transform_0, window_bounds = array<i64: 24, 128>}, {transform_indices = @transform_1, window_bounds = array<i64: 128, 128>}, {transform_indices = @transform_2, window_bounds = array<i64: 24, 128>}]} {
    %c0 = arith.constant 0 : index
    %c0_0 = arith.constant 0 : index
    %0 = vector.load %arg2[%c0, %c0_0] : memref<24x128xbf16, #tpu.memory_space<vmem>>, vector<24x128xbf16>
    %c0_1 = arith.constant 0 : index
    %c0_2 = arith.constant 0 : index
    %1 = vector.load %arg3[%c0_1, %c0_2] : memref<128x128xbf16, #tpu.memory_space<vmem>>, vector<128x128xbf16>
    %cst = arith.constant dense<0.000000e+00> : vector<24x128xf32>
    %2 = tpu.matmul %0, %1, %cst {dimension_numbers = #tpu.dot_dimension_numbers<[1], [0], [0], [1], [0, 0, 1, 1], [], []>} : vector<24x128xbf16>, vector<128x128xbf16>, vector<24x128xf32> -> vector<24x128xf32>
    %c0_3 = arith.constant 0 : index
    %c0_4 = arith.constant 0 : index
    %3 = vector.load %arg4[%c0_3, %c0_4] : memref<24x128xf32, #tpu.memory_space<vmem>>, vector<24x128xf32>
    tpu.vector_store %arg4[%c0_3, %c0_4], %2 {strides = array<i32>} : memref<24x128xf32, #tpu.memory_space<vmem>>, vector<24x128xf32>,
    return
  }
  func.func @transform_0(%arg0: i32, %arg1: i32) -> (i32, i32) {
    %c0_i32 = arith.constant 0 : i32
    %c0_i32_0 = arith.constant 0 : i32
    return %arg0, %c0_i32 : i32, i32
  }
  func.func @transform_1(%arg0: i32, %arg1: i32) -> (i32, i32) {
    %c0_i32 = arith.constant 0 : i32
    %c0_i32_0 = arith.constant 0 : i32
    return %c0_i32, %arg1 : i32, i32
  }
  func.func @transform_2(%arg0: i32, %arg1: i32) -> (i32, i32) {
    %c0_i32 = arith.constant 0 : i32
    return %arg0, %arg1 : i32, i32
  }
}

</mosaic_0001>

<bundles_post_ra>
// kernel: tpu_custom_call.1
= control target key start
LH: loop header
LB: loop body
LE: loop exit
PB: predicated region body
PF: predicated region fallthrough
CT: control target
= control target key end

     0   :  { %7 = vsyncpa [#allocation3], 0  ;;  %s185_s0 = inlined_call_operand.hbm [shape: f32[8,128], index: 0, kind: input, shape index: {}]   ;;  %s186_s1 = inlined_call_operand.hbm [shape: f32[8,128], index: 1, kind: input, shape index: {}]   ;;  %s187_s2 = inlined_call_operand.hbm [shape: f32[8,128], index: 2, kind: output, shape index: {}]  }
   0x1   :  { %8 = vsyncpa [#allocation6], 0 }
   0x2   :  { %9 = vsyncpa [#allocation4], 0  ;;  %s131_s9 = smov [#allocation2]   ;;  %s132_s11 = smov [#allocation5]  }
   0x3   :  { %s16_s10 = sshll.u32 %s131_s9, 4  ;;  %s26_s12 = sshll.u32 %s132_s11, 4  ;;  %s17_s10 = int_to_ptr.vmem [resolvable:$true] %s16_s10  ;;  %s27_s12 = int_to_ptr.vmem [resolvable:$true] %s26_s12 }
   0x4   :  { %s59_s15 = scalar_lea.hbm %s185_s0, 128 }
   0x5   :  { %p60_p0 = scmp.ne.s32.totalorder %s185_s0, %s59_s15  ;;  %p63_p1 = scmp.lt.u32.totalorder %s59_s15, %s185_s0 }
   0x7   :  { %p65_p2 = pnand %p63_p1, %p60_p0 }
   0x9   :  { %68 = shalt.err (!%p65_p2)
}
   0xa   :  { %s69_s20 = scalar_lea.vmem %s17_s10, 128  ;;  %p74_p4 = scmp.lt.s32.totalorder %s17_s10, %s17_s10 }
   0xb   :  { %p70_p3 = scmp.ne.s32.totalorder %s17_s10, %s69_s20  ;;  %p75_p5 = scmp.lt.s32.totalorder %s69_s20, %s69_s20 }
   0xd   :  { %p76_p6 = por %p75_p5, %p74_p4 }
   0xf   :  { %p77_p7 = pnand %p76_p6, %p70_p3 }
  0x11   :  { %80 = shalt.err (!%p77_p7)
}
  0x12   :  { %19 = dma.hbm_to_vmem [thread:$0]  %s185_s0, 128, %s17_s10, [#allocation3]  }
  0x13   :  { %s81_s25 = scalar_lea.hbm %s186_s1, 128 }
  0x14   :  { %p82_p8 = scmp.ne.s32.totalorder %s186_s1, %s81_s25  ;;  %p85_p9 = scmp.lt.u32.totalorder %s81_s25, %s186_s1 }
  0x16   :  { %p87_p10 = pnand %p85_p9, %p82_p8 }
  0x18   :  { %90 = shalt.err (!%p87_p10)
}
  0x19   :  { %s91_s30 = scalar_lea.vmem %s27_s12, 128  ;;  %p96_p12 = scmp.lt.s32.totalorder %s27_s12, %s27_s12 }
  0x1a   :  { %p92_p11 = scmp.ne.s32.totalorder %s27_s12, %s91_s30  ;;  %p97_p13 = scmp.lt.s32.totalorder %s91_s30, %s91_s30 }
  0x1c   :  { %p98_p0 = por %p97_p13, %p96_p12 }
  0x1e   :  { %p99_p1 = pnand %p98_p0, %p92_p11 }
  0x20   :  { %102 = shalt.err (!%p99_p1)
}
  0x21   :  { %29 = dma.hbm_to_vmem [thread:$0]  %s186_s1, 128, %s27_s12, [#allocation6]  }
  0x22   :  { %125 = dma.done.wait [#allocation3], 128  }
  0x23   :  { %126 = vsyncadd [#allocation3], 4294967168 }
  0x24   :  { %127 = dma.done.wait [#allocation6], 128  }
  0x25   :  { %128 = vsyncadd [#allocation6], 4294967168  ;;  %s133_s4 = smov [#allocation7]   ;;  %v36_v0 = vld [vmem:[#allocation2] sm:$0xff]  ;;  %v37_v1 = vld [vmem:[#allocation5] sm:$0xff] }
  0x26   :  { %s46_s5 = sshll.u32 %s133_s4, 4  ;;  %v38_v2 = vadd.f32 %v37_v1, %v36_v0  ;;  %s47_s5 = int_to_ptr.vmem [resolvable:$true] %s46_s5 }
  0x27   :  { %s103_s6 = scalar_lea.vmem %s47_s5, 128  ;;  %p108_p3 = scmp.lt.s32.totalorder %s47_s5, %s47_s5 }
  0x28   :  { %39 = vst [vmem:[#allocation7] sm:$0xff] %v38_v2  ;;  %p104_p2 = scmp.ne.s32.totalorder %s47_s5, %s103_s6  ;;  %p109_p4 = scmp.lt.s32.totalorder %s103_s6, %s103_s6 }
  0x2a   :  { %p110_p5 = por %p109_p4, %p108_p3 }
  0x2c   :  { %p111_p6 = pnand %p110_p5, %p104_p2 }
  0x2e   :  { %114 = shalt.err (!%p111_p6)
}
  0x2f   :  { %s115_s8 = scalar_lea.hbm %s187_s2, 128 }
  0x30   :  { %p116_p7 = scmp.ne.s32.totalorder %s187_s2, %s115_s8  ;;  %p119_p8 = scmp.lt.u32.totalorder %s115_s8, %s187_s2 }
  0x32   :  { %p121_p9 = pnand %p119_p8, %p116_p7 }
  0x34   :  { %124 = shalt.err (!%p121_p9)
}
  0x35   :  { %49 = dma.vmem_to_hbm [thread:$0]  %s47_s5, 128, %s187_s2, [#allocation4]  }
  0x36   :  { %129 = dma.done.wait [#allocation4], 128  }
  0x37   :  { %130 = vsyncadd [#allocation4], 4294967168 }
  0x38   :  { %53 = vsyncpa [#allocation3], 1 }
  0x39   :  { %54 = vsyncpa [#allocation6], 1 }
  0x3a   :  { %55 = vsyncpa [#allocation4], 1 }

// kernel: _lambda_.12
= control target key start
LH: loop header
LB: loop body
LE: loop exit
PB: predicated region body
PF: predicated region fallthrough
CT: control target
= control target key end

     0   :  { %s665_s21 = smov 0   ;;  %s667_s22 = smov 0   ;;  %s720_s0 = inlined_call_operand.vmem [shape: f32[2,16,12], index: 0, kind: input, shape index: {}]   ;;  %s721_s1 = inlined_call_operand.vmem [shape: bf16[12,128], index: 1, kind: input, shape index: {}]   ;;  %s722_s2 = inlined_call_operand.vmem [shape: f32[1,128], index: 2, kind: input, shape index: {}]   ;;  %s723_s3 = inlined_call_operand.vmem [shape: f32[1,128], index: 3, kind: input, shape index: {}]   ;;  %s724_s4 = inlined_call_operand.vmem [shape: f32[1,128], index: 4, kind: input, shape index: {}]   ;;  %s725_s5 = inlined_call_operand.vmem [shape: f32[16,128], index: 5, kind: input, shape index: {}]   ;;  %s726_s6 = inlined_call_operand.vmem [shape: bf16[2,16,128], index: 6, kind: output, shape index: {}]  }
   0x1   :  { %s669_s23 = smov 0  }
   0x2 LB: > { %s28_s24 = sadd.s32 1, %s622_s22  ;;  %p542_p0 = scmp.ge.s32.totalorder %s626_s23, 1  ;;  %s626_s23 = sphi %s669_s23, %s16_s23   ;;  %s622_s22 = sphi %s667_s22, %s728_s22   ;;  %s618_s21 = sphi %s665_s21, %s727_s21  }
   0x3   : > { %p30_p1 = scmp.ge.s32.totalorder %s28_s24, 2  ;;  %p244_p2 = scmp.lt.s32.totalorder %s626_s23, 3 }
   0x5   : > { %s730_s24 = smov (%p30_p1, %s28_s24), 0  ;;  %p245_p3 = pnand %p542_p0, %p244_p2 }
   0x6   : > { %vm335_vm0 = vcmask (!%p245_p3), 1045504   ;;  %v628_v0 = vmov (!%p245_p3), 0.0   ;;  %v599_v1 = vld [vmem:[%s721_s1] sm:$0x3f] (!%p245_p3)   ;;  %p288_p4 = scmp.lt.s32.totalorder (!%p245_p3), %s618_s21, 1  ;;  %vm629_vm1 = vmmov (!%p245_p3), 0  }
   0x7   : > { %248 = sbr.rel (%p245_p3) target bundleno = 554 (0x22a), region = 44  ;;  %567 = vmatprep.subr.bf16.mxu0 (!%p245_p3), %v628_v0  ;;  %569 = vmatprep.mubr.msk.bf16.mxu0 (!%p245_p3), %vm629_vm1, %v628_v0  ;;  %v337_v2 = vsel (!%p245_p3), %vm335_vm0, %v599_v1, 0  ;;  %vm331_vm2 = vcmask (!%p245_p3), 97280   ;;  %v547_v6 = vld [vmem:[%s722_s2] ss:$0 sm:$0xff] (!%p245_p3)  ;;  %v422_v37 = vld [vmem:[%s725_s5 + $0x8] sm:$0xff] (!%p245_p3) }
   0x8   : > { %568 = vmatpush3.bf16.msra.mxu0 (!%p245_p3), %v337_v2  ;;  %v550_v28 = vld [vmem:[%s723_s3] ss:$0 sm:$0xff] (!%p245_p3) }
   0x9   : > { %v551_v32 = vld [vmem:[%s724_s4] ss:$0 sm:$0xff] (!%p245_p3) }
   0xa   : > { %v421_v36 = vld [vmem:[%s725_s5] sm:$0xff] (!%p245_p3) }
   0xe   : > { %s732_s21 = smov (!%p288_p4, %s618_s21), 1 }
   0xf   : > { %s556_s27 = sshll.u32 %s732_s21, 4  ;;  %s557_s17 = sshll.u32 %s732_s21, 3 }
  0x10   : > { %s295_s30 = scalar_lea.vmem %s720_s0, %s556_s27  ;;  %s311_s20 = scalar_lea.vmem %s726_s6, %s557_s17 }
  0x11   : > { %v314_v3 = vld [vmem:[%s295_s30] sm:$0xff]  ;;  %v315_v4 = vld [vmem:[%s295_s30 + $0x8] sm:$0xff] }
  0x12   : > { %v316_v5 = vpack.c.bf16 %v315_v4, %v314_v3 }
  0x14   : > { %570 = vmatmul.mubr.msk.bf16.vlgmr.msra.gmra.mrb[0].mxu0 %vm331_vm2, %v316_v5 }
  0xe7   : > { %v373_v7 = vpop.f32.mrb[0].mxu0 }
  0xe8   : > { %v374_v8 = vadd.f32 %v547_v6, %v373_v7  ;;  %v571_v9 = vpop.f32.mrb[1].mxu0 }
  0xe9   : > { %v376_v10 = vpop.f32.mrb[2].mxu0 }
  0xea   : > { %382 = vadd.xlane.f32.xlu0 %v374_v8  ;;  %v572_v11 = vpop.f32.mrb[3].mxu0  ;;  %v377_v12 = vadd.f32 %v547_v6, %v376_v10 }
  0xee   : > { %384 = vadd.xlane.f32.xlu0 %v377_v12 }
 0x177   : > { %v383_v13 = vpop.xlane.xlu0 %382 }
 0x178   : > { %v387_v14 = vmul.f32 0.0078125, %v383_v13 }
 0x17a   : > { %v389_v15 = vsub.f32 %v374_v8, %v387_v14 }
 0x17b   : > { %v385_v16 = vpop.xlane.xlu0 %384 }
 0x17c   : > { %v388_v17 = vmul.f32 0.0078125, %v385_v16  ;;  %v391_v18 = vmul.f32 %v389_v15, %v389_v15 }
 0x17e   : > { %v390_v19 = vsub.f32 %v377_v12, %v388_v17  ;;  %393 = vadd.xlane.f32.xlu1 %v391_v18 }
 0x180   : > { %v392_v20 = vmul.f32 %v390_v19, %v390_v19 }
 0x182   : > { %395 = vadd.xlane.f32.xlu1 %v392_v20 }
 0x20b   : > { %v394_v21 = vpop.xlane.xlu1 %393 }
 0x20c   : > { %v397_v22 = vmul.f32 0.0078125, %v394_v21 }
 0x20e   : > { %v399_v23 = vadd.f32 1e-05, %v397_v22 }
 0x20f   : > { %v396_v24 = vpop.xlane.xlu1 %395 }
 0x210   : > { %600 = vrsqrt.f32 %v399_v23  ;;  %v398_v25 = vmul.f32 0.0078125, %v396_v24 }
 0x212   : > { %v400_v26 = vadd.f32 1e-05, %v398_v25 }
 0x214   : > { %602 = vrsqrt.f32 %v400_v26 }
 0x21a   : > { %v601_v27 = vpop.eup %600 }
 0x21b   : > { %v403_v29 = vmul.f32 %v601_v27, %v389_v15 }
 0x21d   : > { %v411_v30 = vmul.f32 %v550_v28, %v403_v29 }
 0x21e   : > { %v603_v31 = vpop.eup %602 }
 0x21f   : > { %v404_v33 = vmul.f32 %v603_v31, %v390_v19  ;;  %v419_v34 = vadd.f32 %v551_v32, %v411_v30 }
 0x221   : > { %v412_v35 = vmul.f32 %v550_v28, %v404_v33  ;;  %v423_v39 = vadd.f32 %v421_v36, %v419_v34 }
 0x223   : > { %v420_v38 = vadd.f32 %v551_v32, %v412_v35 }
 0x225   : > { %v424_v40 = vadd.f32 %v422_v37, %v420_v38 }
 0x227   : > { %v563_v41 = vpack.c.bf16 %v424_v40, %v423_v39 }
 0x229   : > { %564 = vst [vmem:[%s311_s20] sm:$0xff] %v563_v41  }
 0x22a PF: > { %s16_s23 = sadd.s32 1, %s626_s23   ;;  %s727_s21 = smov %s622_s22 }
 0x22b   : > { %p13_p5 = scmp.ge.s32.totalorder %s16_s23, 4   ;;  %s728_s22 = smov %s730_s24 }
 0x22d   :  { %15 = sbr.rel (!%p13_p5) target bundleno = 2 (0x2), region = 77 }

// kernel: _lambda_.14
= control target key start
LH: loop header
LB: loop body
LE: loop exit
PB: predicated region body
PF: predicated region fallthrough
CT: control target
= control target key end

     0   :  { %s1229_s0 = inlined_call_operand.vmem [shape: s32[2], index: 0, kind: input, shape index: {}]   ;;  %s1230_s1 = inlined_call_operand.vmem [shape: bf16[2,16,128], index: 1, kind: input, shape index: {}]   ;;  %s1231_s2 = inlined_call_operand.vmem [shape: bf16[128,256], index: 2, kind: input, shape index: {}]   ;;  %s1232_s3 = inlined_call_operand.vmem [shape: f32[1,256], index: 3, kind: input, shape index: {}]   ;;  %s1233_s4 = inlined_call_operand.vmem [shape: bf16[256,128], index: 4, kind: input, shape index: {}]   ;;  %s1234_s5 = inlined_call_operand.vmem [shape: f32[1,128], index: 5, kind: input, shape index: {}]   ;;  %s1235_s6 = inlined_call_operand.vmem [shape: f32[1,128], index: 6, kind: input, shape index: {}]   ;;  %s1236_s7 = inlined_call_operand.vmem [shape: f32[1,128], index: 7, kind: input, shape index: {}]   ;;  %s1237_s8 = inlined_call_operand.vmem [shape: bf16[2,16,128], index: 8, kind: output, shape index: {}]  }
   0x1   :  { %s13_s29 = sshll.u32 %s1229_s0, 4  ;;  %s14_s29 = int_to_ptr.vmem [resolvable:$true] %s13_s29 }
   0x2   :  { %s981_s30 = scalar_lea.vmem %s14_s29, 16  ;;  %p986_p1 = scmp.lt.s32.totalorder %s14_s29, %s14_s29 }
   0x3   :  { %p982_p0 = scmp.ne.s32.totalorder %s14_s29, %s981_s30  ;;  %p987_p2 = scmp.lt.s32.totalorder %s981_s30, %s981_s30 }
   0x5   :  { %p988_p3 = por %p987_p2, %p986_p1 }
   0x7   :  { %p989_p4 = pnand %p988_p3, %p982_p0 }
   0x9   :  { %992 = shalt.err (!%p989_p4)  }
   0xa   :  { %s1019_s9 = smov [#allocation3]  }
   0xb   :  { %16 = dma.vmem_to_smem %s14_s29, 16, %s1019_s9, [#allocation2] }
   0xc   :  { %1005 = dma.done.wait [#allocation2], 16 }
   0xd   :  { %1006 = vsyncadd [#allocation2], 4294967280 }
   0xe   :  { %18 = sfence }
   0xf   :  { %s1070_s10 = smov 0   ;;  %s1072_s11 = smov 0  }
  0x10   :  { %s1074_s12 = smov 0  }
  0x11 LB: > { %s36_s0 = sadd.s32 1, %s1013_s11  ;;  %p830_p5 = scmp.ge.s32.totalorder %s1017_s12, 1  ;;  %s1017_s12 = sphi %s1074_s12, %s24_s12   ;;  %s1013_s11 = sphi %s1072_s11, %s1239_s11   ;;  %s1009_s10 = sphi %s1070_s10, %s1238_s10  }
  0x12   : > { %p38_p6 = scmp.ge.s32.totalorder %s36_s0, 2  ;;  %p265_p7 = scmp.lt.s32.totalorder %s1017_s12, 3 }
  0x14   : > { %s1241_s0 = smov (%p38_p6, %s36_s0), 0  ;;  %p266_p8 = pnand %p830_p5, %p265_p7 }
  0x15   : > { %v935_v0 = vld [vmem:[%s1231_s2 + $0x4] ss:$8 sps:$4 sm:$0xff] (!%p266_p8)   ;;  %v937_v1 = vld [vmem:[%s1231_s2] ss:$8 sps:$4 sm:$0xff] (!%p266_p8)   ;;  %v1020_v2 = vmov (!%p266_p8), 0   ;;  %p306_p9 = scmp.lt.s32.totalorder (!%p266_p8), %s1009_s10, 1  ;;  %v348_v34 = vlaneseq (!%p266_p8) }
  0x16   : > { %269 = sbr.rel (%p266_p8) target bundleno = 815 (0x32f), region = 48  ;;  %476 = vmatprep.mubr.bf16.mxu0 (!%p266_p8), %v1020_v2  ;;  %444 = vmatprep.subr.bf16.mxu0 (!%p266_p8), %v935_v0  ;;  %v938_v3 = vld [vmem:[%s1231_s2 + $0x14] ss:$8 sps:$4 sm:$0xff] (!%p266_p8)   ;;  %v940_v4 = vld [vmem:[%s1231_s2 + $0x10] ss:$8 sps:$4 sm:$0xff] (!%p266_p8)   ;;  %v960_v10 = vld [vmem:[%s1233_s4 + $0x40] sm:$0xff] (!%p266_p8)  }
  0x17   : > { %445 = vmatpush1.bf16.msra.mxu0 (!%p266_p8), %v937_v1  ;;  %v941_v5 = vld [vmem:[%s1231_s2 + $0x24] ss:$8 sps:$4 sm:$0xff] (!%p266_p8)   ;;  %v943_v6 = vld [vmem:[%s1231_s2 + $0x20] ss:$8 sps:$4 sm:$0xff] (!%p266_p8)   ;;  %v944_v7 = vld [vmem:[%s1231_s2 + $0x34] ss:$8 sps:$4 sm:$0xff] (!%p266_p8)   ;;  %886 = vmatprep.subr.bf16.mxu1 (!%p266_p8), %v960_v10 }
  0x18   : > { %446 = vmatprep.subr.bf16.mxu0 (!%p266_p8), %v938_v3  ;;  %v946_v8 = vld [vmem:[%s1231_s2 + $0x30] ss:$8 sps:$4 sm:$0xff] (!%p266_p8)   ;;  %v947_v9 = vld [vmem:[%s1231_s2 + $0x44] ss:$8 sps:$4 sm:$0xff] (!%p266_p8)   ;;  %v949_v12 = vld [vmem:[%s1231_s2 + $0x40] ss:$8 sps:$4 sm:$0xff] (!%p266_p8)  }
  0x19   : > { %v961_v11 = vld [vmem:[%s1233_s4] sm:$0xff] (!%p266_p8)   ;;  %v962_v13 = vld [vmem:[%s1233_s4 + $0x48] sm:$0xff] (!%p266_p8)   ;;  %v964_v15 = vld [vmem:[%s1233_s4 + $0x50] sm:$0xff] (!%p266_p8)   ;;  %v1196_v35 = vshrl.u32 (!%p266_p8), %v348_v34, 7  ;;  %s719_s13 = sld [smem:[#allocation3 + %s1009_s10]] (!%p266_p8) }
  0x1a   : > { %887 = vmatpush3.bf16.msra.mxu1 (!%p266_p8), %v961_v11  ;;  %v963_v14 = vld [vmem:[%s1233_s4 + $0x8] sm:$0xff] (!%p266_p8)   ;;  %v950_v16 = vld [vmem:[%s1231_s2 + $0x54] ss:$8 sps:$4 sm:$0xff] (!%p266_p8)   ;;  %v952_v17 = vld [vmem:[%s1231_s2 + $0x50] ss:$8 sps:$4 sm:$0xff] (!%p266_p8)  }
  0x1b   : > { %447 = vmatpush1.bf16.msra.mxu0 (!%p266_p8), %v940_v4  ;;  %888 = vmatprep.subr.bf16.mxu1 (!%p266_p8), %v962_v13  ;;  %v965_v18 = vld [vmem:[%s1233_s4 + $0x10] sm:$0xff] (!%p266_p8)   ;;  %v966_v19 = vld [vmem:[%s1233_s4 + $0x58] sm:$0xff] (!%p266_p8)   ;;  %v953_v20 = vld [vmem:[%s1231_s2 + $0x64] ss:$8 sps:$4 sm:$0xff] (!%p266_p8)   ;;  %v350_v36 = vsub.s32 (!%p266_p8), 0, %v1196_v35  ;;  %v354_v38 = vsub.s32 (!%p266_p8), 1, %v1196_v35 }
  0x1c   : > { %448 = vmatprep.subr.bf16.mxu0 (!%p266_p8), %v941_v5  ;;  %v955_v21 = vld [vmem:[%s1231_s2 + $0x60] ss:$8 sps:$4 sm:$0xff] (!%p266_p8)   ;;  %v967_v22 = vld [vmem:[%s1233_s4 + $0x18] sm:$0xff] (!%p266_p8)   ;;  %v972_v30 = vld [vmem:[%s1233_s4 + $0x70] sm:$0xff] (!%p266_p8)  }
  0x1d   : > { %s1134_s22 = scalar_select %p306_p9, %s1009_s10, 1  ;;  %v956_v23 = vld [vmem:[%s1231_s2 + $0x74] ss:$8 sps:$4 sm:$0xff]   ;;  %v968_v24 = vld [vmem:[%s1233_s4 + $0x60] sm:$0xff]   ;;  %v958_v26 = vld [vmem:[%s1231_s2 + $0x70] ss:$8 sps:$4 sm:$0xff]  }
  0x1e   : > { %889 = vmatpush3.bf16.msra.mxu1 %v963_v14  ;;  %v969_v25 = vld [vmem:[%s1233_s4 + $0x20] sm:$0xff]   ;;  %v970_v28 = vld [vmem:[%s1233_s4 + $0x68] sm:$0xff]   ;;  %v973_v31 = vld [vmem:[%s1233_s4 + $0x30] sm:$0xff]  }
  0x1f   : > { %449 = vmatpush1.bf16.msra.mxu0 %v943_v6  ;;  %890 = vmatprep.subr.bf16.mxu1 %v964_v15  ;;  %s877_s18 = sshll.u32 %s1134_s22, 3  ;;  %v971_v29 = vld [vmem:[%s1233_s4 + $0x28] sm:$0xff]   ;;  %v974_v32 = vld [vmem:[%s1233_s4 + $0x78] sm:$0xff]   ;;  %v346_v37 = vld [vmem:[%s1232_s3] sm:$0x3] }
  0x20   : > { %450 = vmatprep.subr.bf16.mxu0 %v944_v7  ;;  %s313_s28 = scalar_lea.vmem %s1230_s1, %s877_s18  ;;  %v975_v33 = vld [vmem:[%s1233_s4 + $0x38] sm:$0xff]   ;;  %v351_v39 = vrot.slane %v346_v37, %v350_v36  ;;  %v355_v40 = vrot.slane %v346_v37, %v354_v38  ;;  %v852_v56 = vld [vmem:[%s1234_s5] ss:$0 sm:$0xff]  ;;  %s323_s20 = scalar_lea.vmem %s1237_s8, %s877_s18 }
  0x21   : > { %v326_v27 = vld [vmem:[%s313_s28] sm:$0xff]  }
  0x22   : > { %891 = vmatpush3.bf16.msra.mxu1 %v965_v18  ;;  %v328_v60 = vunpack.c.l.bf16 %v326_v27  ;;  %v329_v2 = vunpack.c.h.bf16 %v326_v27 }
  0x23   : > { %451 = vmatpush1.bf16.msra.mxu0 %v946_v8  ;;  %892 = vmatprep.subr.bf16.mxu1 %v966_v19  ;;  %v869_v19 = vld [vmem:[%s1235_s6] ss:$0 sm:$0xff] }
  0x24   : > { %452 = vmatprep.subr.bf16.mxu0 %v947_v9 }
  0x26   : > { %893 = vmatpush3.bf16.msra.mxu1 %v967_v22  ;;  %v720_v22 = vstv %s719_s13 }
  0x27   : > { %453 = vmatpush1.bf16.msra.mxu0 %v949_v12  ;;  %894 = vmatprep.subr.bf16.mxu1 %v968_v24  ;;  %vm721_vm0 = vcmp.lt.s32.totalorder %v1196_v35, %v720_v22 }
  0x28   : > { %454 = vmatprep.subr.bf16.mxu0 %v950_v16 }
  0x2a   : > { %895 = vmatpush3.bf16.msra.mxu1 %v969_v25  ;;  %v870_v25 = vld [vmem:[%s1236_s7] ss:$0 sm:$0xff] }
  0x2b   : > { %455 = vmatpush1.bf16.msra.mxu0 %v952_v17  ;;  %896 = vmatprep.subr.bf16.mxu1 %v970_v28 }
  0x2c   : > { %456 = vmatprep.subr.bf16.mxu0 %v953_v20  ;;  %v715_v20 = vadd.s32 8, %v1196_v35 }
  0x2e   : > { %897 = vmatpush3.bf16.msra.mxu1 %v971_v29  ;;  %vm722_vm1 = vcmp.lt.s32.totalorder %v715_v20, %v720_v22  ;;  %v1021_v29 = vmov 0.0  }
  0x2f   : > { %457 = vmatpush1.bf16.msra.mxu0 %v955_v21  ;;  %898 = vmatprep.subr.bf16.mxu1 %v972_v30  ;;  %v871_v30 = vsel %vm721_vm0, 1.0, %v1021_v29 }
  0x30   : > { %458 = vmatprep.subr.bf16.mxu0 %v956_v23 }
  0x32   : > { %899 = vmatpush3.bf16.msra.mxu1 %v973_v31  ;;  %v872_v31 = vsel %vm722_vm1, 1.0, %v1021_v29 }
  0x33   : > { %459 = vmatpush1.bf16.msra.mxu0 %v958_v26  ;;  %900 = vmatprep.subr.bf16.mxu1 %v974_v32 }
  0x36   : > { %477 = vmatmul.mubr.bf16.vlgmr.msra.gmra.mrb[0].mxu0 %v326_v27  ;;  %901 = vmatpush3.bf16.msra.mxu1 %v975_v33 }
 0x109   : > { %v478_v41 = vpop.f32.mrb[0].mxu0 }
 0x10a   : > { %v479_v42 = vadd.f32 %v478_v41, %v351_v39  ;;  %v480_v43 = vpop.f32.mrb[1].mxu0 }
 0x10b   : > { %v481_v44 = vadd.f32 %v480_v43, %v355_v40  ;;  %v482_v45 = vpop.f32.mrb[2].mxu0 }
 0x10c   : > { %v483_v46 = vadd.f32 %v482_v45, %v351_v39  ;;  %v484_v47 = vpop.f32.mrb[3].mxu0  ;;  %v487_v49 = vmax.f32 %v479_v42, 0.0 }
 0x10d   : > { %v485_v48 = vadd.f32 %v484_v47, %v355_v40  ;;  %v488_v51 = vmax.f32 %v481_v44, 0.0 }
 0x10e   : > { %v489_v50 = vmax.f32 %v483_v46, 0.0 }
 0x10f   : > { %v490_v52 = vmax.f32 %v485_v48, 0.0 }
 0x110   : > { %v491_v53 = vpack.c.bf16 %v489_v50, %v487_v49 }
 0x111   : > { %v492_v54 = vpack.c.bf16 %v490_v52, %v488_v51 }
 0x113   : > { %660 = vmatprep.mubr.bf16.mxu1 %v492_v54 }
 0x114   : > { %661 = vmatmul.mubr.bf16.vlgmr.msra.gmra.mrb[0].mxu1 %v491_v53 }
 0x1e7   : > { %v902_v55 = vpop.f32.mrb[0].mxu1 }
 0x1e8   : > { %v903_v57 = vpop.f32.mrb[1].mxu1 }
 0x1e9   : > { %v904_v58 = vadd.f32 %v903_v57, %v902_v55  ;;  %v905_v59 = vpop.f32.mrb[2].mxu1 }
 0x1ea   : > { %v906_v61 = vpop.f32.mrb[3].mxu1 }
 0x1eb   : > { %v663_v62 = vadd.f32 %v904_v58, %v852_v56  ;;  %v907_v63 = vadd.f32 %v906_v61, %v905_v59 }
 0x1ed   : > { %v666_v0 = vadd.f32 %v907_v63, %v852_v56  ;;  %v669_v1 = vadd.f32 %v663_v62, %v328_v60 }
 0x1ef   : > { %673 = vadd.xlane.f32.xlu0 %v669_v1  ;;  %v670_v3 = vadd.f32 %v666_v0, %v329_v2 }
 0x1f3   : > { %675 = vadd.xlane.f32.xlu0 %v670_v3 }
 0x27c   : > { %v674_v4 = vpop.xlane.xlu0 %673 }
 0x27d   : > { %v678_v5 = vmul.f32 0.0078125, %v674_v4 }
 0x27f   : > { %v680_v6 = vsub.f32 %v669_v1, %v678_v5 }
 0x280   : > { %v676_v7 = vpop.xlane.xlu0 %675 }
 0x281   : > { %v679_v8 = vmul.f32 0.0078125, %v676_v7  ;;  %v682_v9 = vmul.f32 %v680_v6, %v680_v6 }
 0x283   : > { %v681_v10 = vsub.f32 %v670_v3, %v679_v8  ;;  %684 = vadd.xlane.f32.xlu1 %v682_v9 }
 0x285   : > { %v683_v11 = vmul.f32 %v681_v10, %v681_v10 }
 0x287   : > { %686 = vadd.xlane.f32.xlu1 %v683_v11 }
 0x310   : > { %v685_v12 = vpop.xlane.xlu1 %684 }
 0x311   : > { %v688_v13 = vmul.f32 0.0078125, %v685_v12 }
 0x313   : > { %v690_v14 = vadd.f32 1e-05, %v688_v13 }
 0x314   : > { %v687_v15 = vpop.xlane.xlu1 %686 }
 0x315   : > { %977 = vrsqrt.f32 %v690_v14  ;;  %v689_v16 = vmul.f32 0.0078125, %v687_v15 }
 0x317   : > { %v691_v17 = vadd.f32 1e-05, %v689_v16 }
 0x319   : > { %979 = vrsqrt.f32 %v691_v17 }
 0x31f   : > { %v978_v18 = vpop.eup %977 }
 0x320   : > { %v694_v21 = vmul.f32 %v978_v18, %v680_v6 }
 0x322   : > { %v702_v23 = vmul.f32 %v869_v19, %v694_v21 }
 0x323   : > { %v980_v24 = vpop.eup %979 }
 0x324   : > { %v695_v26 = vmul.f32 %v980_v24, %v681_v10  ;;  %v710_v27 = vadd.f32 %v870_v25, %v702_v23 }
 0x326   : > { %v703_v28 = vmul.f32 %v869_v19, %v695_v26  ;;  %v727_v33 = vmul.f32 %v871_v30, %v710_v27 }
 0x328   : > { %v711_v32 = vadd.f32 %v870_v25, %v703_v28 }
 0x32a   : > { %v728_v34 = vmul.f32 %v872_v31, %v711_v32 }
 0x32c   : > { %v884_v36 = vpack.c.bf16 %v728_v34, %v727_v33 }
 0x32e   : > { %885 = vst [vmem:[%s323_s20] sm:$0xff] %v884_v36  }
 0x32f PF: > { %s24_s12 = sadd.s32 1, %s1017_s12   ;;  %s1238_s10 = smov %s1013_s11 }
 0x330   : > { %p21_p10 = scmp.ge.s32.totalorder %s24_s12, 4   ;;  %s1239_s11 = smov %s1241_s0 }
 0x332   :  { %23 = sbr.rel (!%p21_p10) target bundleno = 17 (0x11), region = 78 }

// kernel: _lambda_.19
= control target key start
LH: loop header
LB: loop body
LE: loop exit
PB: predicated region body
PF: predicated region fallthrough
CT: control target
= control target key end

     0   :  { %s1234_s0 = inlined_call_operand.vmem [shape: s32[2], index: 0, kind: input, shape index: {}]   ;;  %s1235_s1 = inlined_call_operand.vmem [shape: bf16[2,9,128], index: 1, kind: input, shape index: {}]   ;;  %s1236_s2 = inlined_call_operand.vmem [shape: bf16[128,256], index: 2, kind: input, shape index: {}]   ;;  %s1237_s3 = inlined_call_operand.vmem [shape: f32[1,256], index: 3, kind: input, shape index: {}]   ;;  %s1238_s4 = inlined_call_operand.vmem [shape: bf16[256,128], index: 4, kind: input, shape index: {}]   ;;  %s1239_s5 = inlined_call_operand.vmem [shape: f32[1,128], index: 5, kind: input, shape index: {}]   ;;  %s1240_s6 = inlined_call_operand.vmem [shape: f32[1,128], index: 6, kind: input, shape index: {}]   ;;  %s1241_s7 = inlined_call_operand.vmem [shape: f32[1,128], index: 7, kind: input, shape index: {}]   ;;  %s1242_s8 = inlined_call_operand.vmem [shape: bf16[2,9,128], index: 8, kind: output, shape index: {}]  }
   0x1   :  { %s13_s29 = sshll.u32 %s1234_s0, 4  ;;  %s14_s29 = int_to_ptr.vmem [resolvable:$true] %s13_s29 }
   0x2   :  { %s983_s30 = scalar_lea.vmem %s14_s29, 16  ;;  %p988_p1 = scmp.lt.s32.totalorder %s14_s29, %s14_s29 }
   0x3   :  { %p984_p0 = scmp.ne.s32.totalorder %s14_s29, %s983_s30  ;;  %p989_p2 = scmp.lt.s32.totalorder %s983_s30, %s983_s30 }
   0x5   :  { %p990_p3 = por %p989_p2, %p988_p1 }
   0x7   :  { %p991_p4 = pnand %p990_p3, %p984_p0 }
   0x9   :  { %994 = shalt.err (!%p991_p4)  }
   0xa   :  { %s1021_s9 = smov [#allocation3]  }
   0xb   :  { %16 = dma.vmem_to_smem %s14_s29, 16, %s1021_s9, [#allocation2] }
   0xc   :  { %1007 = dma.done.wait [#allocation2], 16 }
   0xd   :  { %1008 = vsyncadd [#allocation2], 4294967280 }
   0xe   :  { %18 = sfence }
   0xf   :  { %s1072_s10 = smov 0   ;;  %s1074_s11 = smov 0  }
  0x10   :  { %s1076_s12 = smov 0  }
  0x11 LB: > { %s36_s0 = sadd.s32 1, %s1015_s11  ;;  %p838_p5 = scmp.ge.s32.totalorder %s1019_s12, 1  ;;  %s1019_s12 = sphi %s1076_s12, %s24_s12   ;;  %s1015_s11 = sphi %s1074_s11, %s1244_s11   ;;  %s1011_s10 = sphi %s1072_s10, %s1243_s10  }
  0x12   : > { %p38_p6 = scmp.ge.s32.totalorder %s36_s0, 2  ;;  %p265_p7 = scmp.lt.s32.totalorder %s1019_s12, 3 }
  0x14   : > { %s1246_s0 = smov (%p38_p6, %s36_s0), 0  ;;  %p266_p8 = pnand %p838_p5, %p265_p7 }
  0x15   : > { %v938_v0 = vld [vmem:[%s1236_s2 + $0x4] ss:$8 sps:$4 sm:$0xff] (!%p266_p8)   ;;  %v940_v1 = vld [vmem:[%s1236_s2] ss:$8 sps:$4 sm:$0xff] (!%p266_p8)   ;;  %v1022_v2 = vmov (!%p266_p8), 0   ;;  %p306_p9 = scmp.lt.s32.totalorder (!%p266_p8), %s1011_s10, 1  ;;  %v348_v36 = vlaneseq (!%p266_p8) }
  0x16   : > { %269 = sbr.rel (%p266_p8) target bundleno = 819 (0x333), region = 48  ;;  %476 = vmatprep.mubr.bf16.mxu0 (!%p266_p8), %v1022_v2  ;;  %444 = vmatprep.subr.bf16.mxu0 (!%p266_p8), %v938_v0  ;;  %v941_v3 = vld [vmem:[%s1236_s2 + $0x14] ss:$8 sps:$4 sm:$0xff] (!%p266_p8)   ;;  %v943_v4 = vld [vmem:[%s1236_s2 + $0x10] ss:$8 sps:$4 sm:$0xff] (!%p266_p8)   ;;  %v963_v10 = vld [vmem:[%s1238_s4 + $0x40] sm:$0xff] (!%p266_p8)  }
  0x17   : > { %445 = vmatpush1.bf16.msra.mxu0 (!%p266_p8), %v940_v1  ;;  %v944_v5 = vld [vmem:[%s1236_s2 + $0x24] ss:$8 sps:$4 sm:$0xff] (!%p266_p8)   ;;  %v946_v6 = vld [vmem:[%s1236_s2 + $0x20] ss:$8 sps:$4 sm:$0xff] (!%p266_p8)   ;;  %v947_v7 = vld [vmem:[%s1236_s2 + $0x34] ss:$8 sps:$4 sm:$0xff] (!%p266_p8)   ;;  %889 = vmatprep.subr.bf16.mxu1 (!%p266_p8), %v963_v10 }
  0x18   : > { %446 = vmatprep.subr.bf16.mxu0 (!%p266_p8), %v941_v3  ;;  %v949_v8 = vld [vmem:[%s1236_s2 + $0x30] ss:$8 sps:$4 sm:$0xff] (!%p266_p8)   ;;  %v950_v9 = vld [vmem:[%s1236_s2 + $0x44] ss:$8 sps:$4 sm:$0xff] (!%p266_p8)   ;;  %v952_v11 = vld [vmem:[%s1236_s2 + $0x40] ss:$8 sps:$4 sm:$0xff] (!%p266_p8)  }
  0x19   : > { %v964_v12 = vld [vmem:[%s1238_s4] sm:$0xff] (!%p266_p8)   ;;  %v953_v13 = vld [vmem:[%s1236_s2 + $0x54] ss:$8 sps:$4 sm:$0xff] (!%p266_p8)   ;;  %v965_v14 = vld [vmem:[%s1238_s4 + $0x48] sm:$0xff] (!%p266_p8)   ;;  %v1198_v37 = vshrl.u32 (!%p266_p8), %v348_v36, 7  ;;  %vm675_vm0 = vcmask (!%p266_p8), 1040384  }
  0x1a   : > { %890 = vmatpush3.bf16.msra.mxu1 (!%p266_p8), %v964_v12  ;;  %v966_v15 = vld [vmem:[%s1238_s4 + $0x8] sm:$0xff] (!%p266_p8)   ;;  %v967_v16 = vld [vmem:[%s1238_s4 + $0x50] sm:$0xff] (!%p266_p8)   ;;  %v969_v20 = vld [vmem:[%s1238_s4 + $0x58] sm:$0xff] (!%p266_p8)   ;;  %s722_s13 = sld [smem:[#allocation3 + %s1011_s10]] (!%p266_p8)  ;;  %vm742_vm2 = vsmask.f32 (!%p266_p8), 256 }
  0x1b   : > { %447 = vmatpush1.bf16.msra.mxu0 (!%p266_p8), %v943_v4  ;;  %891 = vmatprep.subr.bf16.mxu1 (!%p266_p8), %v965_v14  ;;  %v955_v17 = vld [vmem:[%s1236_s2 + $0x50] ss:$8 sps:$4 sm:$0xff] (!%p266_p8)   ;;  %v956_v18 = vld [vmem:[%s1236_s2 + $0x64] ss:$8 sps:$4 sm:$0xff] (!%p266_p8)   ;;  %v958_v21 = vld [vmem:[%s1236_s2 + $0x60] ss:$8 sps:$4 sm:$0xff] (!%p266_p8)  }
  0x1c   : > { %448 = vmatprep.subr.bf16.mxu0 (!%p266_p8), %v944_v5  ;;  %v968_v19 = vld [vmem:[%s1238_s4 + $0x10] sm:$0xff] (!%p266_p8)   ;;  %v970_v23 = vld [vmem:[%s1238_s4 + $0x18] sm:$0xff] (!%p266_p8)   ;;  %v971_v24 = vld [vmem:[%s1238_s4 + $0x60] sm:$0xff] (!%p266_p8)   ;;  %v350_v38 = vsub.s32 (!%p266_p8), 0, %v1198_v37  ;;  %v354_v40 = vsub.s32 (!%p266_p8), 1, %v1198_v37 }
  0x1d   : > { %s1139_s24 = scalar_select %p306_p9, %s1011_s10, 1  ;;  %v959_v22 = vld [vmem:[%s1236_s2 + $0x74] ss:$8 sps:$4 sm:$0xff]   ;;  %v961_v25 = vld [vmem:[%s1236_s2 + $0x70] ss:$8 sps:$4 sm:$0xff]   ;;  %v972_v28 = vld [vmem:[%s1238_s4 + $0x20] sm:$0xff]  }
  0x1e   : > { %892 = vmatpush3.bf16.msra.mxu1 %v966_v15  ;;  %v973_v29 = vld [vmem:[%s1238_s4 + $0x68] sm:$0xff]   ;;  %v975_v32 = vld [vmem:[%s1238_s4 + $0x70] sm:$0xff]   ;;  %v977_v34 = vld [vmem:[%s1238_s4 + $0x78] sm:$0xff]  }
  0x1f   : > { %449 = vmatpush1.bf16.msra.mxu0 %v946_v6  ;;  %s885_s14 = sshll.u32 %s1139_s24, 3  ;;  %893 = vmatprep.subr.bf16.mxu1 %v967_v16  ;;  %v974_v31 = vld [vmem:[%s1238_s4 + $0x28] sm:$0xff]   ;;  %v976_v33 = vld [vmem:[%s1238_s4 + $0x30] sm:$0xff]   ;;  %v978_v35 = vld [vmem:[%s1238_s4 + $0x38] sm:$0xff]  }
  0x20   : > { %450 = vmatprep.subr.bf16.mxu0 %v947_v7  ;;  %s313_s28 = scalar_lea.vmem %s1235_s1, %s885_s14  ;;  %v346_v39 = vld [vmem:[%s1237_s3] sm:$0x3]  ;;  %s323_s20 = scalar_lea.vmem %s1242_s8, %s885_s14  ;;  %vm743_vm4 = vmand %vm675_vm0, %vm742_vm2 }
  0x21   : > { %v326_v26 = vld [vmem:[%s313_s28] sm:$0xf]  ;;  %v327_v27 = vld [vmem:[%s313_s28 + $0x4] sm:$0x1]  ;;  %v351_v41 = vrot.slane %v346_v39, %v350_v38  ;;  %v355_v42 = vrot.slane %v346_v39, %v354_v40 }
  0x22   : > { %894 = vmatpush3.bf16.msra.mxu1 %v968_v19  ;;  %v843_v30 = vcombine.low %v326_v26, %v327_v27  ;;  %v329_v63 = vunpack.c.l.bf16 %v327_v27  ;;  %v860_v0 = vld [vmem:[%s1239_s5] ss:$0 sm:$0xff]  ;;  %v328_v4 = vunpack.c.l.bf16 %v326_v26  ;;  %v744_v36 = vld [vmem:[%s323_s20 + $0x4] sm:$0x1] }
  0x23   : > { %451 = vmatpush1.bf16.msra.mxu0 %v949_v8  ;;  %895 = vmatprep.subr.bf16.mxu1 %v969_v20  ;;  %v878_v27 = vld [vmem:[%s1241_s7] ss:$0 sm:$0xff] }
  0x24   : > { %452 = vmatprep.subr.bf16.mxu0 %v950_v9 }
  0x26   : > { %896 = vmatpush3.bf16.msra.mxu1 %v970_v23  ;;  %v723_v23 = vstv %s722_s13 }
  0x27   : > { %453 = vmatpush1.bf16.msra.mxu0 %v952_v11  ;;  %897 = vmatprep.subr.bf16.mxu1 %v971_v24  ;;  %vm724_vm3 = vcmp.lt.s32.totalorder %v1198_v37, %v723_v23 }
  0x28   : > { %454 = vmatprep.subr.bf16.mxu0 %v953_v13 }
  0x2a   : > { %898 = vmatpush3.bf16.msra.mxu1 %v972_v28 }
  0x2b   : > { %455 = vmatpush1.bf16.msra.mxu0 %v955_v17  ;;  %899 = vmatprep.subr.bf16.mxu1 %v973_v29 }
  0x2c   : > { %456 = vmatprep.subr.bf16.mxu0 %v956_v18 }
  0x2e   : > { %900 = vmatpush3.bf16.msra.mxu1 %v974_v31 }
  0x2f   : > { %457 = vmatpush1.bf16.msra.mxu0 %v958_v21  ;;  %901 = vmatprep.subr.bf16.mxu1 %v975_v32 }
  0x30   : > { %458 = vmatprep.subr.bf16.mxu0 %v959_v22  ;;  %v718_v22 = vadd.s32 8, %v1198_v37 }
  0x32   : > { %902 = vmatpush3.bf16.msra.mxu1 %v976_v33  ;;  %vm725_vm1 = vcmp.lt.s32.totalorder %v718_v22, %v723_v23 }
  0x33   : > { %459 = vmatpush1.bf16.msra.mxu0 %v961_v25  ;;  %903 = vmatprep.subr.bf16.mxu1 %v977_v34  ;;  %v877_v25 = vld [vmem:[%s1240_s6] ss:$0 sm:$0xff] }
  0x36   : > { %477 = vmatmul.mubr.bf16.vlgmr.msra.gmra.mrb[0].mxu0 %v843_v30  ;;  %904 = vmatpush3.bf16.msra.mxu1 %v978_v35  ;;  %v1023_v30 = vmov 0.0  }
  0x37   : > { %v880_v31 = vsel %vm725_vm1, 1.0, %v1023_v30  ;;  %v879_v38 = vsel %vm724_vm3, 1.0, %v1023_v30 }
 0x109   : > { %v478_v43 = vpop.f32.mrb[0].mxu0 }
 0x10a   : > { %v479_v44 = vadd.f32 %v478_v43, %v351_v41  ;;  %v480_v45 = vpop.f32.mrb[1].mxu0 }
 0x10b   : > { %v481_v46 = vadd.f32 %v480_v45, %v355_v42  ;;  %v482_v47 = vpop.f32.mrb[2].mxu0 }
 0x10c   : > { %v483_v48 = vadd.f32 %v482_v47, %v351_v41  ;;  %v484_v49 = vpop.f32.mrb[3].mxu0  ;;  %v487_v51 = vmax.f32 %v479_v44, 0.0 }
 0x10d   : > { %v485_v50 = vadd.f32 %v484_v49, %v355_v42  ;;  %v488_v53 = vmax.f32 %v481_v46, 0.0 }
 0x10e   : > { %v489_v52 = vmax.f32 %v483_v48, 0.0 }
 0x10f   : > { %v490_v54 = vmax.f32 %v485_v50, 0.0 }
 0x110   : > { %v491_v55 = vpack.c.bf16 %v489_v52, %v487_v51 }
 0x111   : > { %v492_v56 = vpack.c.bf16 %v490_v54, %v488_v53 }
 0x113   : > { %660 = vmatprep.mubr.bf16.mxu1 %v492_v56 }
 0x114   : > { %661 = vmatmul.mubr.bf16.vlgmr.msra.gmra.mrb[0].mxu1 %v491_v55 }
 0x1e7   : > { %v905_v57 = vpop.f32.mrb[0].mxu1 }
 0x1e8   : > { %v906_v58 = vpop.f32.mrb[1].mxu1 }
 0x1e9   : > { %v907_v59 = vadd.f32 %v906_v58, %v905_v57  ;;  %v908_v60 = vpop.f32.mrb[2].mxu1 }
 0x1ea   : > { %v909_v61 = vpop.f32.mrb[3].mxu1 }
 0x1eb   : > { %v910_v62 = vadd.f32 %v909_v61, %v908_v60  ;;  %v663_v3 = vadd.f32 %v907_v59, %v860_v0 }
 0x1ed   : > { %v666_v1 = vadd.f32 %v910_v62, %v860_v0  ;;  %v669_v6 = vadd.f32 %v663_v3, %v328_v4 }
 0x1ef   : > { %v670_v2 = vadd.f32 %v666_v1, %v329_v63 }
 0x1f1   : > { %v676_v5 = vsel %vm675_vm0, %v670_v2, 0.0 }
 0x1f2   : > { %677 = vadd.xlane.f32.xlu0 %v676_v5 }
 0x1f6   : > { %673 = vadd.xlane.f32.xlu0 %v669_v6 }
 0x27f   : > { %v678_v7 = vpop.xlane.xlu0 %677 }
 0x280   : > { %v681_v8 = vmul.f32 0.0078125, %v678_v7 }
 0x282   : > { %v683_v9 = vsub.f32 %v670_v2, %v681_v8 }
 0x283   : > { %v674_v10 = vpop.xlane.xlu0 %673 }
 0x284   : > { %v680_v11 = vmul.f32 0.0078125, %v674_v10  ;;  %v685_v12 = vmul.f32 %v683_v9, %v683_v9 }
 0x286   : > { %v682_v13 = vsub.f32 %v669_v6, %v680_v11  ;;  %v688_v14 = vsel %vm675_vm0, %v685_v12, 0.0 }
 0x287   : > { %689 = vadd.xlane.f32.xlu1 %v688_v14 }
 0x288   : > { %v684_v15 = vmul.f32 %v682_v13, %v682_v13 }
 0x28b   : > { %686 = vadd.xlane.f32.xlu1 %v684_v15 }
 0x314   : > { %v690_v16 = vpop.xlane.xlu1 %689 }
 0x315   : > { %v692_v17 = vmul.f32 0.0078125, %v690_v16 }
 0x317   : > { %v694_v18 = vadd.f32 1e-05, %v692_v17 }
 0x318   : > { %v687_v19 = vpop.xlane.xlu1 %686 }
 0x319   : > { %979 = vrsqrt.f32 %v694_v18  ;;  %v691_v20 = vmul.f32 0.0078125, %v687_v19 }
 0x31b   : > { %v693_v21 = vadd.f32 1e-05, %v691_v20 }
 0x31d   : > { %981 = vrsqrt.f32 %v693_v21 }
 0x323   : > { %v980_v24 = vpop.eup %979 }
 0x324   : > { %v698_v26 = vmul.f32 %v980_v24, %v683_v9 }
 0x326   : > { %v706_v28 = vmul.f32 %v877_v25, %v698_v26 }
 0x327   : > { %v982_v29 = vpop.eup %981 }
 0x328   : > { %v714_v32 = vadd.f32 %v878_v27, %v706_v28  ;;  %v697_v33 = vmul.f32 %v982_v29, %v682_v13 }
 0x32a   : > { %v731_v34 = vmul.f32 %v880_v31, %v714_v32  ;;  %v705_v35 = vmul.f32 %v877_v25, %v697_v33 }
 0x32c   : > { %v888_v39 = vpack.c.bf16 %v731_v34, %v731_v34  ;;  %v713_v40 = vadd.f32 %v878_v27, %v705_v35 }
 0x32e   : > { %v745_v41 = vsel %vm743_vm4, %v888_v39, %v744_v36  ;;  %v730_v42 = vmul.f32 %v879_v38, %v713_v40 }
 0x32f   : > { %746 = vst [vmem:[%s323_s20 + $0x4] sm:$0x1] %v745_v41 }
 0x330   : > { %v887_v43 = vpack.c.bf16 %v730_v42, %v730_v42 }
 0x332   : > { %740 = vst [vmem:[%s323_s20] sm:$0xf] %v887_v43 }
 0x333 PF: > { %s24_s12 = sadd.s32 1, %s1019_s12   ;;  %s1243_s10 = smov %s1015_s11 }
 0x334   : > { %p21_p10 = scmp.ge.s32.totalorder %s24_s12, 4   ;;  %s1244_s11 = smov %s1246_s0 }
 0x336   :  { %23 = sbr.rel (!%p21_p10) target bundleno = 17 (0x11), region = 78 }

// kernel: _lambda_.17
= control target key start
LH: loop header
LB: loop body
LE: loop exit
PB: predicated region body
PF: predicated region fallthrough
CT: control target
= control target key end

     0   :  { %s5256_s0 = inlined_call_operand.vmem [shape: s32[2], index: 0, kind: input, shape index: {}, may-alias: {0,1}]   ;;  %s5257_s2 = inlined_call_operand.vmem [shape: bf16[2,9,128], index: 2, kind: input, shape index: {}, may-alias: {2,3}]   ;;  %s5258_s3 = inlined_call_operand.vmem [shape: bf16[2,9,128], index: 3, kind: input, shape index: {}, may-alias: {2,3}]   ;;  %s5259_s4 = inlined_call_operand.vmem [shape: bf16[4,128,32], index: 4, kind: input, shape index: {}]   ;;  %s5260_s5 = inlined_call_operand.vmem [shape: f32[4,1,32], index: 5, kind: input, shape index: {}]   ;;  %s5261_s6 = inlined_call_operand.vmem [shape: bf16[4,128,32], index: 6, kind: input, shape index: {}]   ;;  %s5262_s7 = inlined_call_operand.vmem [shape: f32[4,1,32], index: 7, kind: input, shape index: {}]   ;;  %s5263_s8 = inlined_call_operand.vmem [shape: bf16[4,128,32], index: 8, kind: input, shape index: {}]   ;;  %s5264_s9 = inlined_call_operand.vmem [shape: f32[4,1,32], index: 9, kind: input, shape index: {}]   ;;  %s5265_s10 = inlined_call_operand.vmem [shape: bf16[4,32,128], index: 10, kind: input, shape index: {}]   ;;  %s5266_s11 = inlined_call_operand.vmem [shape: f32[1,128], index: 11, kind: input, shape index: {}]   ;;  %s5267_s12 = inlined_call_operand.vmem [shape: f32[1,128], index: 12, kind: input, shape index: {}]   ;;  %s5268_s13 = inlined_call_operand.vmem [shape: f32[1,128], index: 13, kind: input, shape index: {}]   ;;  %s5269_s14 = inlined_call_operand.vmem [shape: bf16[2,9,128], index: 14, kind: output, shape index: {}]   ;;  %s5270_s1 = inlined_call_operand.vmem [shape: s32[2], index: 1, kind: input, shape index: {}, may-alias: {0,1}]  }
   0x1   :  { %s19_s15 = sshll.u32 %s5256_s0, 4  ;;  %s23_s18 = sshll.u32 %s5270_s1, 4  ;;  %s20_s15 = int_to_ptr.vmem [resolvable:$true] %s19_s15  ;;  %s24_s18 = int_to_ptr.vmem [resolvable:$true] %s23_s18 }
   0x2   :  { %s4217_s19 = scalar_lea.vmem %s20_s15, 16  ;;  %p4222_p1 = scmp.lt.s32.totalorder %s20_s15, %s20_s15 }
   0x3   :  { %p4218_p0 = scmp.ne.s32.totalorder %s20_s15, %s4217_s19  ;;  %p4223_p2 = scmp.lt.s32.totalorder %s4217_s19, %s4217_s19 }
   0x5   :  { %p4224_p3 = por %p4223_p2, %p4222_p1 }
   0x7   :  { %p4225_p4 = pnand %p4224_p3, %p4218_p0 }
   0x9   :  { %4228 = shalt.err (!%p4225_p4)  }
   0xa   :  { %s4267_s20 = smov [#allocation7]   ;;  %s4229_s21 = scalar_lea.vmem %s24_s18, 16 }
   0xb   :  { %22 = dma.vmem_to_smem %s20_s15, 16, %s4267_s20, [#allocation6] }
   0xc   :  { %p4230_p5 = scmp.ne.s32.totalorder %s24_s18, %s4229_s21  ;;  %p4234_p6 = scmp.lt.s32.totalorder %s24_s18, %s24_s18 }
   0xd   :  { %p4235_p7 = scmp.lt.s32.totalorder %s4229_s21, %s4229_s21 }
   0xf   :  { %p4236_p8 = por %p4235_p7, %p4234_p6 }
  0x11   :  { %p4237_p9 = pnand %p4236_p8, %p4230_p5 }
  0x13   :  { %4240 = shalt.err (!%p4237_p9)  }
  0x14   :  { %s4268_s0 = smov [#allocation8]  }
  0x15   :  { %26 = dma.vmem_to_smem %s24_s18, 16, %s4268_s0, [#allocation6] }
  0x16   :  { %4253 = dma.done.wait [#allocation6], 32 }
  0x17   :  { %4254 = vsyncadd [#allocation6], 4294967264 }
  0x18   :  { %28 = sfence }
  0x19   :  { %s4355_s1 = smov 0   ;;  %s4357_s22 = smov 0  }
  0x1a   :  { %s4359_s23 = smov 0  }
  0x1b LB: > { %s53_s24 = sadd.s32 1, %s4261_s22  ;;  %p3229_p10 = scmp.ge.s32.totalorder %s4265_s23, 1  ;;  %s4265_s23 = sphi %s4359_s23, %s34_s23   ;;  %s4261_s22 = sphi %s4357_s22, %s5274_s22   ;;  %s4257_s1 = sphi %s4355_s1, %s5273_s1  }
  0x1c   : > { %p55_p11 = scmp.ge.s32.totalorder %s53_s24, 2  ;;  %p419_p12 = scmp.lt.s32.totalorder %s4265_s23, 3 }
  0x1e   : > { %s5276_s24 = smov (%p55_p11, %s53_s24), 0  ;;  %p420_p13 = pnand %p3229_p10, %p419_p12 }
  0x1f   : > { %v4054_v0 = vld [vmem:[%s5259_s4] sm:$0xff] (!%p420_p13)   ;;  %v4269_v1 = vmov (!%p420_p13), 0.0   ;;  %v4055_v2 = vld [vmem:[%s5259_s4 + $0x8] sm:$0xff] (!%p420_p13)   ;;  %vm4270_vm0 = vmmov (!%p420_p13), 0   ;;  %p479_p0 = scmp.lt.s32.totalorder (!%p420_p13), %s4257_s1, 1  ;;  %v4056_v3 = vld [vmem:[%s5259_s4 + $0x10] sm:$0xff] (!%p420_p13)  }
  0x20   : > { %423 = sbr.rel (%p420_p13) target bundleno = 2465 (0x9a1), region = 68  ;;  %3701 = vmatprep.subr.bf16.mxu0 (!%p420_p13), %v4269_v1  ;;  %3721 = vmatprep.subr.bf16.mxu1 (!%p420_p13), %v4269_v1  ;;  %v4057_v4 = vld [vmem:[%s5259_s4 + $0x18] sm:$0xff] (!%p420_p13)   ;;  %v4058_v5 = vld [vmem:[%s5259_s4 + $0x20] sm:$0xff] (!%p420_p13)   ;;  %v4059_v6 = vld [vmem:[%s5259_s4 + $0x28] sm:$0xff] (!%p420_p13)   ;;  %vm645_vm1 = vcmask (!%p420_p13), 253952   ;;  %vm1056_vm2 = vcmask (!%p420_p13), 261120  }
  0x21   : > { %3702 = vmatpush3.bf16.msra.mxu0 (!%p420_p13), %v4054_v0  ;;  %3717 = vmatprep.mubr.msk.bf16.mxu0 (!%p420_p13), %vm4270_vm0, %v4269_v1  ;;  %v4060_v7 = vld [vmem:[%s5259_s4 + $0x30] sm:$0xff] (!%p420_p13)   ;;  %v4061_v8 = vld [vmem:[%s5259_s4 + $0x38] sm:$0xff] (!%p420_p13)   ;;  %v4064_v10 = vld [vmem:[%s5259_s4 + $0x80] sm:$0xff] (!%p420_p13)   ;;  %1059 = vst.msk [vmem:[#allocation5 + $0x8] sm:$0x1] (!%p420_p13), %vm645_vm1, %v4269_v1  ;;  %vm643_vm4 = vcmask (!%p420_p13), 257024  }
  0x22   : > { %3703 = vmatprep.subr.bf16.mxu0 (!%p420_p13), %v4269_v1  ;;  %3737 = vmatprep.mubr.msk.bf16.mxu1 (!%p420_p13), %vm4270_vm0, %v4269_v1  ;;  %v4065_v11 = vld [vmem:[%s5259_s4 + $0x88] sm:$0xff] (!%p420_p13)   ;;  %v4066_v12 = vld [vmem:[%s5259_s4 + $0x90] sm:$0xff] (!%p420_p13)   ;;  %v4067_v13 = vld [vmem:[%s5259_s4 + $0x98] sm:$0xff] (!%p420_p13)   ;;  %1061 = vst.msk [vmem:[#allocation5 + $0x18] sm:$0x1] (!%p420_p13), %vm645_vm1, %v4269_v1  ;;  %vm1038_vm6 = vcmask (!%p420_p13), 7168  }
  0x23   : > { %v4068_v14 = vld [vmem:[%s5259_s4 + $0xa0] sm:$0xff] (!%p420_p13)   ;;  %v4069_v15 = vld [vmem:[%s5259_s4 + $0xa8] sm:$0xff] (!%p420_p13)   ;;  %v4070_v16 = vld [vmem:[%s5259_s4 + $0xb0] sm:$0xff] (!%p420_p13)   ;;  %1063 = vst.msk [vmem:[#allocation5 + $0x28] sm:$0x1] (!%p420_p13), %vm645_vm1, %v4269_v1  ;;  %vm1378_vm12 = vcmask (!%p420_p13), 72704  }
  0x24   : > { %v4071_v17 = vld [vmem:[%s5259_s4 + $0xb8] sm:$0xff] (!%p420_p13)   ;;  %v4072_v18 = vld [vmem:[%s5261_s6] sm:$0xff] (!%p420_p13)   ;;  %v4073_v19 = vld [vmem:[%s5261_s6 + $0x8] sm:$0xff] (!%p420_p13)   ;;  %1065 = vst.msk [vmem:[#allocation5 + $0x38] sm:$0x1] (!%p420_p13), %vm645_vm1, %v4269_v1  ;;  %vm1382_vm13 = vcmask (!%p420_p13), 65536  }
  0x25   : > { %3704 = vmatpush3.bf16.msra.mxu0 (!%p420_p13), %v4055_v2  ;;  %v4074_v20 = vld [vmem:[%s5261_s6 + $0x10] sm:$0xff] (!%p420_p13)   ;;  %v4075_v21 = vld [vmem:[%s5261_s6 + $0x18] sm:$0xff] (!%p420_p13)   ;;  %v4076_v22 = vld [vmem:[%s5261_s6 + $0x20] sm:$0xff] (!%p420_p13)   ;;  %1057 = vst.msk [vmem:[#allocation5] sm:$0xff] (!%p420_p13), %vm1056_vm2, %v4269_v1  ;;  %vm646_vm3 = vsmask.f32 (!%p420_p13), 256 }
  0x26   : > { %3705 = vmatprep.subr.bf16.mxu0 (!%p420_p13), %v4269_v1  ;;  %v4077_v23 = vld [vmem:[%s5261_s6 + $0x28] sm:$0xff] (!%p420_p13)   ;;  %v4078_v24 = vld [vmem:[%s5261_s6 + $0x30] sm:$0xff] (!%p420_p13)   ;;  %v4079_v25 = vld [vmem:[%s5261_s6 + $0x38] sm:$0xff] (!%p420_p13)   ;;  %1060 = vst.msk [vmem:[#allocation5 + $0x10] sm:$0xff] (!%p420_p13), %vm1056_vm2, %v4269_v1  ;;  %vm1040_vm14 = vcmask (!%p420_p13), 0   ;;  %vm1444_vm15 = vcmask (!%p420_p13), 1043456  }
  0x27   : > { %s480_s29 = scalar_select %p479_p0, %s4257_s1, 1  ;;  %1062 = vst.msk [vmem:[#allocation5 + $0x20] sm:$0xff] %vm1056_vm2, %v4269_v1  ;;  %1064 = vst.msk [vmem:[#allocation5 + $0x30] sm:$0xff] %vm1056_vm2, %v4269_v1  ;;  %v4080_v27 = vld [vmem:[%s5259_s4 + $0x40] sm:$0xff]   ;;  %v4081_v28 = vld [vmem:[%s5259_s4 + $0x48] sm:$0xff]  }
  0x28   : > { %3722 = vmatpush3.bf16.msra.mxu1 %v4080_v27  ;;  %v4084_v29 = vld [vmem:[%s5259_s4 + $0x50] sm:$0xff]   ;;  %v4086_v30 = vld [vmem:[%s5259_s4 + $0x58] sm:$0xff]   ;;  %v4088_v31 = vld [vmem:[%s5259_s4 + $0x60] sm:$0xff]   ;;  %1048 = vst.msk [vmem:[#allocation4] sm:$0xff] %vm1038_vm6, %v4269_v1 }
  0x29   : > { %s4393_s16 = sshll.u32 %s480_s29, 3  ;;  %3706 = vmatpush3.bf16.msra.mxu0 %v4056_v3  ;;  %3723 = vmatprep.subr.bf16.mxu1 %v4269_v1  ;;  %v4090_v32 = vld [vmem:[%s5259_s4 + $0x68] sm:$0xff]   ;;  %v4092_v33 = vld [vmem:[%s5259_s4 + $0x70] sm:$0xff]   ;;  %v4094_v34 = vld [vmem:[%s5259_s4 + $0x78] sm:$0xff]   ;;  %1050 = vst.msk [vmem:[#allocation4 + $0x10] sm:$0xff] %vm1038_vm6, %v4269_v1  ;;  %s1078_s29 = sld [smem:[#allocation8 + %s4257_s1]] }
  0x2a   : > { %s4400_s19 = scalar_lea.vmem %s5257_s2, %s4393_s16  ;;  %s4406_s0 = scalar_lea.vmem %s5258_s3, %s4393_s16  ;;  %3707 = vmatprep.subr.bf16.mxu0 %v4269_v1  ;;  %v3236_v35 = vld [vmem:[%s5260_s5] ss:$0 sm:$0xff]  ;;  %vm4564_vm5 = vmand %vm645_vm1, %vm646_vm3  ;;  %v648_v46 = vld [vmem:[#allocation2 + $0x4] sm:$0x1]  ;;  %1052 = vst.msk [vmem:[#allocation4 + $0x20] sm:$0xff] %vm1038_vm6, %v4269_v1 }
  0x2b   : > { %v4429_v9 = vld [vmem:[%s4400_s19] sm:$0x1f]   ;;  %v906_v59 = vld [vmem:[#allocation2 + $0x14] sm:$0x1]  ;;  %1054 = vst.msk [vmem:[#allocation4 + $0x30] sm:$0xff] %vm1038_vm6, %v4269_v1  ;;  %s506_s25 = scalar_lea.vmem %s5269_s14, %s4393_s16 }
  0x2c   : > { %v4502_v26 = vld [vmem:[%s4406_s0] sm:$0x1f]   ;;  %3724 = vmatpush3.bf16.msra.mxu1 %v4081_v28  ;;  %1049 = vst.msk [vmem:[#allocation4 + $0x8] sm:$0x1] %vm1040_vm14, %v4269_v1  ;;  %1051 = vst.msk [vmem:[#allocation4 + $0x18] sm:$0x1] %vm1040_vm14, %v4269_v1 }
  0x2d   : > { %3708 = vmatpush3.bf16.msra.mxu0 %v4057_v4  ;;  %3725 = vmatprep.subr.bf16.mxu1 %v4269_v1  ;;  %v3293_v49 = vld [vmem:[%s5260_s5 + $0x2] ss:$0 sm:$0xff]  ;;  %v3332_v62 = vld [vmem:[%s5262_s7] ss:$0 sm:$0xff]  ;;  %1053 = vst.msk [vmem:[#allocation4 + $0x28] sm:$0x1] %vm1040_vm14, %v4269_v1 }
  0x2e   : > { %3709 = vmatprep.subr.bf16.mxu0 %v4269_v1  ;;  %1055 = vst.msk [vmem:[#allocation4 + $0x38] sm:$0x1] %vm1040_vm14, %v4269_v1 }
  0x30   : > { %3726 = vmatpush3.bf16.msra.mxu1 %v4084_v29 }
  0x31   : > { %3710 = vmatpush3.bf16.msra.mxu0 %v4058_v5  ;;  %3727 = vmatprep.subr.bf16.mxu1 %v4269_v1 }
  0x32   : > { %3711 = vmatprep.subr.bf16.mxu0 %v4269_v1 }
  0x34   : > { %3728 = vmatpush3.bf16.msra.mxu1 %v4086_v30 }
  0x35   : > { %3712 = vmatpush3.bf16.msra.mxu0 %v4059_v6  ;;  %3729 = vmatprep.subr.bf16.mxu1 %v4269_v1 }
  0x36   : > { %3713 = vmatprep.subr.bf16.mxu0 %v4269_v1 }
  0x38   : > { %3730 = vmatpush3.bf16.msra.mxu1 %v4088_v31 }
  0x39   : > { %3714 = vmatpush3.bf16.msra.mxu0 %v4060_v7  ;;  %3731 = vmatprep.subr.bf16.mxu1 %v4269_v1 }
  0x3a   : > { %3715 = vmatprep.subr.bf16.mxu0 %v4269_v1 }
  0x3c   : > { %3732 = vmatpush3.bf16.msra.mxu1 %v4090_v32 }
  0x3d   : > { %3716 = vmatpush3.bf16.msra.mxu0 %v4061_v8  ;;  %3733 = vmatprep.subr.bf16.mxu1 %v4269_v1  ;;  %v4083_v8 = vld [vmem:[%s5261_s6 + $0x40] sm:$0xff]  }
  0x3e   : > { %3741 = vmatprep.subr.bf16.mxu0 %v4269_v1 }
  0x40   : > { %3718 = vmatmul.mubr.bf16.vlgmr.msra.gmra.mrb[0].mxu0 %v4429_v9  ;;  %3734 = vmatpush3.bf16.msra.mxu1 %v4092_v33 }
  0x41   : > { %3742 = vmatpush3.bf16.msra.mxu0 %v4064_v10  ;;  %3757 = vmatprep.mubr.msk.bf16.mxu0 %vm4270_vm0, %v4269_v1 }
  0x42   : > { %3743 = vmatprep.subr.bf16.mxu0 %v4269_v1  ;;  %3735 = vmatprep.subr.bf16.mxu1 %v4269_v1 }
  0x44   : > { %3736 = vmatpush3.bf16.msra.mxu1 %v4094_v34 }
  0x45   : > { %3744 = vmatpush3.bf16.msra.mxu0 %v4065_v11  ;;  %3761 = vmatprep.subr.bf16.mxu1 %v4269_v1  ;;  %v4085_v11 = vld [vmem:[%s5261_s6 + $0x48] sm:$0xff]  }
  0x46   : > { %3745 = vmatprep.subr.bf16.mxu0 %v4269_v1 }
  0x47   : > { %3738 = vmatmul.mubr.bf16.vlgmr.msra.gmra.mrb[0].mxu1 %v4429_v9 }
  0x48   : > { %3777 = vmatprep.mubr.msk.bf16.mxu1 %vm4270_vm0, %v4269_v1 }
  0x49   : > { %3746 = vmatpush3.bf16.msra.mxu0 %v4066_v12  ;;  %v4087_v12 = vld [vmem:[%s5261_s6 + $0x50] sm:$0xff]  }
  0x4a   : > { %3747 = vmatprep.subr.bf16.mxu0 %v4269_v1 }
  0x4d   : > { %3748 = vmatpush3.bf16.msra.mxu0 %v4067_v13  ;;  %v4089_v13 = vld [vmem:[%s5261_s6 + $0x58] sm:$0xff]  }
  0x4e   : > { %3749 = vmatprep.subr.bf16.mxu0 %v4269_v1 }
  0x51   : > { %3750 = vmatpush3.bf16.msra.mxu0 %v4068_v14  ;;  %v4091_v14 = vld [vmem:[%s5261_s6 + $0x60] sm:$0xff]  }
  0x52   : > { %3751 = vmatprep.subr.bf16.mxu0 %v4269_v1 }
  0x55   : > { %3752 = vmatpush3.bf16.msra.mxu0 %v4069_v15  ;;  %v4093_v15 = vld [vmem:[%s5261_s6 + $0x68] sm:$0xff]  }
  0x56   : > { %3753 = vmatprep.subr.bf16.mxu0 %v4269_v1 }
  0x59   : > { %3754 = vmatpush3.bf16.msra.mxu0 %v4070_v16  ;;  %v4095_v16 = vld [vmem:[%s5261_s6 + $0x70] sm:$0xff]  }
  0x5a   : > { %3755 = vmatprep.subr.bf16.mxu0 %v4269_v1 }
  0x5d   : > { %3756 = vmatpush3.bf16.msra.mxu0 %v4071_v17  ;;  %v4096_v17 = vld [vmem:[%s5261_s6 + $0x78] sm:$0xff]  }
  0x5e   : > { %3781 = vmatprep.subr.bf16.mxu0 %v4269_v1 }
  0x60   : > { %3758 = vmatmul.mubr.bf16.vlgmr.msra.gmra.mrb[4].mxu0 %v4429_v9 }
  0x61   : > { %3782 = vmatpush3.bf16.msra.mxu0 %v4072_v18  ;;  %3797 = vmatprep.mubr.msk.bf16.mxu0 %vm4270_vm0, %v4269_v1  ;;  %v4097_v18 = vld [vmem:[%s5259_s4 + $0xc0] sm:$0xff]  }
  0x62   : > { %3783 = vmatprep.subr.bf16.mxu0 %v4269_v1  ;;  %3762 = vmatpush3.bf16.msra.mxu1 %v4097_v18  ;;  %v4118_v18 = vld [vmem:[%s5261_s6 + $0xa8] sm:$0xff]  }
  0x63   : > { %3763 = vmatprep.subr.bf16.mxu1 %v4269_v1 }
  0x65   : > { %3784 = vmatpush3.bf16.msra.mxu0 %v4073_v19  ;;  %v4098_v19 = vld [vmem:[%s5259_s4 + $0xc8] sm:$0xff]  }
  0x66   : > { %3785 = vmatprep.subr.bf16.mxu0 %v4269_v1  ;;  %3764 = vmatpush3.bf16.msra.mxu1 %v4098_v19  ;;  %v4120_v19 = vld [vmem:[%s5261_s6 + $0xb0] sm:$0xff]  }
  0x67   : > { %3765 = vmatprep.subr.bf16.mxu1 %v4269_v1 }
  0x69   : > { %3786 = vmatpush3.bf16.msra.mxu0 %v4074_v20  ;;  %v4099_v20 = vld [vmem:[%s5259_s4 + $0xd0] sm:$0xff]  }
  0x6a   : > { %3787 = vmatprep.subr.bf16.mxu0 %v4269_v1  ;;  %3766 = vmatpush3.bf16.msra.mxu1 %v4099_v20  ;;  %v4121_v20 = vld [vmem:[%s5261_s6 + $0xb8] sm:$0xff]  }
  0x6b   : > { %3767 = vmatprep.subr.bf16.mxu1 %v4269_v1 }
  0x6d   : > { %3788 = vmatpush3.bf16.msra.mxu0 %v4075_v21  ;;  %v4100_v21 = vld [vmem:[%s5259_s4 + $0xd8] sm:$0xff]  }
  0x6e   : > { %3789 = vmatprep.subr.bf16.mxu0 %v4269_v1  ;;  %3768 = vmatpush3.bf16.msra.mxu1 %v4100_v21 }
  0x6f   : > { %3769 = vmatprep.subr.bf16.mxu1 %v4269_v1 }
  0x71   : > { %3790 = vmatpush3.bf16.msra.mxu0 %v4076_v22  ;;  %v4101_v22 = vld [vmem:[%s5259_s4 + $0xe0] sm:$0xff]  }
  0x72   : > { %3791 = vmatprep.subr.bf16.mxu0 %v4269_v1  ;;  %3770 = vmatpush3.bf16.msra.mxu1 %v4101_v22 }
  0x73   : > { %3771 = vmatprep.subr.bf16.mxu1 %v4269_v1 }
  0x75   : > { %3792 = vmatpush3.bf16.msra.mxu0 %v4077_v23  ;;  %v3265_v23 = vld [vmem:[%s5260_s5 + $0x1] ss:$0 sm:$0xff] }
  0x76   : > { %3793 = vmatprep.subr.bf16.mxu0 %v4269_v1 }
  0x79   : > { %3794 = vmatpush3.bf16.msra.mxu0 %v4078_v24 }
  0x7a   : > { %3795 = vmatprep.subr.bf16.mxu0 %v4269_v1 }
  0x7d   : > { %3796 = vmatpush3.bf16.msra.mxu0 %v4079_v25  ;;  %v4102_v25 = vld [vmem:[%s5259_s4 + $0xe8] sm:$0xff]  }
  0x7e   : > { %3821 = vmatprep.subr.bf16.mxu0 %v4269_v1  ;;  %3772 = vmatpush3.bf16.msra.mxu1 %v4102_v25 }
  0x7f   : > { %3773 = vmatprep.subr.bf16.mxu1 %v4269_v1 }
  0x80   : > { %3798 = vmatmul.mubr.bf16.vlgmr.msra.gmra.mrb[8].mxu0 %v4502_v26 }
  0x81   : > { %3823 = vmatprep.mubr.msk.bf16.mxu0 %vm4270_vm0, %v4269_v1 }
 0x113   : > { %v626_v36 = vpop.f32.mrb[0].mxu0 }
 0x114   : > { %v627_v37 = vadd.f32 %v3236_v35, %v626_v36  ;;  %v3719_v38 = vpop.f32.mrb[1].mxu0 }
 0x115   : > { %v629_v39 = vpop.f32.mrb[2].mxu0 }
 0x116   : > { %v633_v40 = vmul.f32 0.17677669, %v627_v37  ;;  %v630_v41 = vadd.f32 %v3236_v35, %v629_v39  ;;  %v3720_v42 = vpop.f32.mrb[3].mxu0  ;;  %v777_v35 = vld [vmem:[#allocation2 + $0xc] sm:$0x1]  ;;  %v4103_v37 = vld [vmem:[%s5259_s4 + $0xf0] sm:$0xff]  }
 0x117   : > { %3774 = vmatpush3.bf16.msra.mxu1 %v4103_v37  ;;  %v4104_v39 = vld [vmem:[%s5259_s4 + $0xf8] sm:$0xff]   ;;  %v4109_v42 = vld [vmem:[%s5263_s8 + $0x10] sm:$0xff]   ;;  %v3342_v37 = vld [vmem:[%s5264_s9] ss:$0 sm:$0xff] }
 0x118   : > { %v3555_v43 = vpack.c.bf16 %v633_v40, %v633_v40  ;;  %v634_v44 = vmul.f32 0.17677669, %v630_v41  ;;  %3775 = vmatprep.subr.bf16.mxu1 %v4269_v1  ;;  %v4105_v40 = vld [vmem:[%s5263_s8] sm:$0xff]   ;;  %v4106_v41 = vld [vmem:[%s5263_s8 + $0x8] sm:$0xff]  }
 0x11a   : > { %644 = vst.msk [vmem:[#allocation2] sm:$0xf] %vm643_vm4, %v3555_v43  ;;  %v3556_v47 = vpack.c.bf16 %v634_v44, %v634_v44  ;;  %v758_v24 = vpop.f32.mrb[0].mxu1  ;;  %v4113_v43 = vld [vmem:[%s5263_s8 + $0x20] sm:$0xff]   ;;  %v4115_v44 = vld [vmem:[%s5263_s8 + $0x28] sm:$0xff]  }
 0x11b   : > { %v759_v27 = vadd.f32 %v3265_v23, %v758_v24  ;;  %v3739_v28 = vpop.f32.mrb[1].mxu1  ;;  %3776 = vmatpush3.bf16.msra.mxu1 %v4104_v39 }
 0x11c   : > { %v649_v48 = vsel %vm4564_vm5, %v3556_v47, %v648_v46  ;;  %v761_v29 = vpop.f32.mrb[2].mxu1  ;;  %3801 = vmatprep.subr.bf16.mxu1 %v4269_v1  ;;  %v4117_v46 = vld [vmem:[%s5263_s8 + $0x30] sm:$0xff]   ;;  %v4119_v47 = vld [vmem:[%s5263_s8 + $0x38] sm:$0xff]  }
 0x11d   : > { %650 = vst [vmem:[#allocation2 + $0x4] sm:$0x1] %v649_v48  ;;  %v765_v30 = vmul.f32 0.17677669, %v759_v27  ;;  %v762_v31 = vadd.f32 %v3265_v23, %v761_v29  ;;  %v3740_v32 = vpop.f32.mrb[3].mxu1  ;;  %v4271_v48 = vmov -inf  }
 0x11e   : > { %3778 = vmatmul.mubr.bf16.vlgmr.msra.gmra.mrb[4].mxu1 %v4429_v9  ;;  %v4111_v9 = vld [vmem:[%s5263_s8 + $0x18] sm:$0xff]   ;;  %1039 = vst.msk [vmem:[#allocation3] sm:$0xff] %vm1038_vm6, %v4271_v48  ;;  %1042 = vst.msk [vmem:[#allocation3 + $0x10] sm:$0xff] %vm1038_vm6, %v4271_v48 }
 0x11f   : > { %v3557_v33 = vpack.c.bf16 %v765_v30, %v765_v30  ;;  %v766_v34 = vmul.f32 0.17677669, %v762_v31  ;;  %3802 = vmatpush3.bf16.msra.mxu1 %v4105_v40  ;;  %3817 = vmatprep.mubr.msk.bf16.mxu1 %vm4270_vm0, %v4269_v1  ;;  %1044 = vst.msk [vmem:[#allocation3 + $0x20] sm:$0xff] %vm1038_vm6, %v4271_v48  ;;  %1046 = vst.msk [vmem:[#allocation3 + $0x30] sm:$0xff] %vm1038_vm6, %v4271_v48 }
 0x120   : > { %3803 = vmatprep.subr.bf16.mxu1 %v4269_v1  ;;  %1041 = vst.msk [vmem:[#allocation3 + $0x8] sm:$0x1] %vm1040_vm14, %v4271_v48  ;;  %1043 = vst.msk [vmem:[#allocation3 + $0x18] sm:$0x1] %vm1040_vm14, %v4271_v48 }
 0x121   : > { %776 = vst.msk [vmem:[#allocation2 + $0x8] sm:$0xf] %vm643_vm4, %v3557_v33  ;;  %v3558_v36 = vpack.c.bf16 %v766_v34, %v766_v34  ;;  %v3321_v33 = vld [vmem:[%s5260_s5 + $0x3] ss:$0 sm:$0xff] }
 0x122   : > { %1045 = vst.msk [vmem:[#allocation3 + $0x28] sm:$0x1] %vm1040_vm14, %v4271_v48  ;;  %1047 = vst.msk [vmem:[#allocation3 + $0x38] sm:$0x1] %vm1040_vm14, %v4271_v48 }
 0x123   : > { %v778_v38 = vsel %vm4564_vm5, %v3558_v36, %v777_v35  ;;  %3804 = vmatpush3.bf16.msra.mxu1 %v4106_v41  ;;  %v4273_v41 = vmov 65535  }
 0x124   : > { %v4082_v10 = vld [vmem:[#allocation2] sm:$0x1f]   ;;  %779 = vst [vmem:[#allocation2 + $0xc] sm:$0x1] %v778_v38  ;;  %3805 = vmatprep.subr.bf16.mxu1 %v4269_v1 }
 0x125   : > { %v4787_v21 = vld [vmem:[#allocation3] sm:$0xff] }
 0x127   : > { %3806 = vmatpush3.bf16.msra.mxu1 %v4109_v42  ;;  %v4792_v24 = vld [vmem:[#allocation3 + $0x8] sm:$0x1]  ;;  %v1446_v42 = vsel %vm1444_vm15, 4294967295, %v4273_v41  ;;  %v4134_v41 = vld [vmem:[%s5263_s8 + $0x70] sm:$0xff]  }
 0x128   : > { %3807 = vmatprep.subr.bf16.mxu1 %v4269_v1 }
 0x12b   : > { %3808 = vmatpush3.bf16.msra.mxu1 %v4111_v9 }
 0x12c   : > { %3809 = vmatprep.subr.bf16.mxu1 %v4269_v1 }
 0x12f   : > { %3810 = vmatpush3.bf16.msra.mxu1 %v4113_v43 }
 0x130   : > { %3811 = vmatprep.subr.bf16.mxu1 %v4269_v1 }
 0x133   : > { %v887_v50 = vpop.f32.mrb[4].mxu0  ;;  %3812 = vmatpush3.bf16.msra.mxu1 %v4115_v44 }
 0x134   : > { %v888_v51 = vadd.f32 %v3293_v49, %v887_v50  ;;  %v3759_v52 = vpop.f32.mrb[5].mxu0  ;;  %3813 = vmatprep.subr.bf16.mxu1 %v4269_v1 }
 0x135   : > { %v890_v53 = vpop.f32.mrb[6].mxu0  ;;  %v1079_v52 = vstv %s1078_s29 }
 0x136   : > { %v894_v54 = vmul.f32 0.17677669, %v888_v51  ;;  %v891_v55 = vadd.f32 %v3293_v49, %v890_v53  ;;  %v3760_v56 = vpop.f32.mrb[7].mxu0  ;;  %v1067_v49 = vlaneseq }
 0x137   : > { %3814 = vmatpush3.bf16.msra.mxu1 %v4117_v46  ;;  %v1035_v46 = vld [vmem:[#allocation2 + $0x1c] sm:$0x1] }
 0x138   : > { %v3559_v57 = vpack.c.bf16 %v894_v54, %v894_v54  ;;  %v895_v58 = vmul.f32 0.17677669, %v891_v55  ;;  %3815 = vmatprep.subr.bf16.mxu1 %v4269_v1  ;;  %v4709_v50 = vshrl.u32 %v1067_v49, 7  ;;  %v1075_v51 = vand.u32 127, %v1067_v49 }
 0x13a   : > { %905 = vst.msk [vmem:[#allocation2 + $0x10] sm:$0xf] %vm643_vm4, %v3559_v57  ;;  %v3560_v60 = vpack.c.bf16 %v895_v58, %v895_v58  ;;  %v4712_v53 = vadd.s32 8, %v4709_v50  ;;  %vm1080_vm7 = vcmp.ge.s32.totalorder %v1075_v51, %v1079_v52  ;;  %vm1081_vm8 = vcmp.gt.s32.totalorder %v1075_v51, %v4709_v50 }
 0x13b   : > { %3816 = vmatpush3.bf16.msra.mxu1 %v4119_v47  ;;  %vm1083_vm10 = vmor %vm1080_vm7, %vm1081_vm8 }
 0x13c   : > { %v907_v61 = vsel %vm4564_vm5, %v3560_v60, %v906_v59  ;;  %3827 = vmatprep.subr.bf16.mxu1 %v4269_v1  ;;  %vm1082_vm9 = vcmp.gt.s32.totalorder %v1075_v51, %v4712_v53  ;;  %v4717_v54 = vsel %vm1083_vm10, -1e+30, %v4269_v1 }
 0x13d   : > { %908 = vst [vmem:[#allocation2 + $0x14] sm:$0x1] %v907_v61  ;;  %vm1084_vm11 = vmor %vm1080_vm7, %vm1082_vm9  ;;  %vm1445_vm7 = vcmask 1044480  }
 0x13e   : > { %3818 = vmatmul.mubr.bf16.vlgmr.msra.gmra.mrb[8].mxu1 %v4502_v26  ;;  %v4720_v56 = vsel %vm1084_vm11, -1e+30, %v4269_v1  ;;  %v4813_v52 = vsel %vm1445_vm7, %v1446_v42, 0  ;;  %v4135_v42 = vld [vmem:[%s5261_s6 + $0xe8] sm:$0xff]  }
 0x13f   : > { %3829 = vmatprep.mubr.msk.bf16.mxu1 %vm4270_vm0, %v4269_v1 }
 0x153   : > { %v1200_v63 = vpop.f32.mrb[8].mxu0 }
 0x154   : > { %v3799_v0 = vpop.f32.mrb[9].mxu0  ;;  %v1201_v3 = vadd.f32 %v3332_v62, %v1200_v63 }
 0x155   : > { %v1203_v2 = vpop.f32.mrb[10].mxu0  ;;  %v4272_v0 = vmov 0  }
 0x156   : > { %v1204_v4 = vadd.f32 %v3332_v62, %v1203_v2  ;;  %v3800_v5 = vpop.f32.mrb[11].mxu0  ;;  %4052 = vset.pattern.permute.xlu1 %v4272_v0  ;;  %4053 = vset.pattern.permute.xlu0 %v4272_v0  ;;  %v3371_v2 = vld [vmem:[%s5262_s7 + $0x1] ss:$0 sm:$0xff] }
 0x158   : > { %v1207_v6 = vpack.c.bf16 %v1204_v4, %v1201_v3 }
 0x15a   : > { %v1333_v7 = vsel %vm1056_vm2, %v1207_v6, 0 }
 0x15b   : > { %3822 = vmatpush3.bf16.xpose.msra.mxu0 %v1333_v7 }
 0x15c   : > { %3833 = vmatprep.subr.bf16.mxu0 %v4269_v1 }
 0x162   : > { %3824 = vmatmul.mubr.msk.bf16.vlgmr.msra.gmra.mrb[12].mxu0 %vm1056_vm2, %v4082_v10 }
 0x163   : > { %3834 = vmatpush3.bf16.msra.mxu0 %v4083_v8  ;;  %3849 = vmatprep.mubr.msk.bf16.mxu0 %vm4270_vm0, %v4269_v1 }
 0x164   : > { %3835 = vmatprep.subr.bf16.mxu0 %v4269_v1 }
 0x167   : > { %3836 = vmatpush3.bf16.msra.mxu0 %v4085_v11 }
 0x168   : > { %3837 = vmatprep.subr.bf16.mxu0 %v4269_v1 }
 0x16b   : > { %3838 = vmatpush3.bf16.msra.mxu0 %v4087_v12  ;;  %v4108_v12 = vld [vmem:[%s5261_s6 + $0x80] sm:$0xff]  }
 0x16c   : > { %3839 = vmatprep.subr.bf16.mxu0 %v4269_v1 }
 0x16f   : > { %3840 = vmatpush3.bf16.msra.mxu0 %v4089_v13  ;;  %v4107_v13 = vld [vmem:[#allocation2 + $0x8] sm:$0x1f]  }
 0x170   : > { %3841 = vmatprep.subr.bf16.mxu0 %v4269_v1 }
 0x173   : > { %3842 = vmatpush3.bf16.msra.mxu0 %v4091_v14  ;;  %v4110_v14 = vld [vmem:[%s5261_s6 + $0x88] sm:$0xff]  }
 0x174   : > { %3843 = vmatprep.subr.bf16.mxu0 %v4269_v1 }
 0x177   : > { %3844 = vmatpush3.bf16.msra.mxu0 %v4093_v15  ;;  %v4112_v15 = vld [vmem:[%s5261_s6 + $0x90] sm:$0xff]  }
 0x178   : > { %3845 = vmatprep.subr.bf16.mxu0 %v4269_v1 }
 0x17b   : > { %3846 = vmatpush3.bf16.msra.mxu0 %v4095_v16  ;;  %v4114_v16 = vld [vmem:[%s5261_s6 + $0x98] sm:$0xff]  }
 0x17c   : > { %3847 = vmatprep.subr.bf16.mxu0 %v4269_v1 }
 0x17f   : > { %3848 = vmatpush3.bf16.msra.mxu0 %v4096_v17  ;;  %v4116_v17 = vld [vmem:[%s5261_s6 + $0xa0] sm:$0xff]  }
 0x180   : > { %3873 = vmatprep.subr.bf16.mxu0 %v4269_v1 }
 0x182   : > { %3850 = vmatmul.mubr.bf16.vlgmr.msra.gmra.mrb[16].mxu0 %v4502_v26 }
 0x183   : > { %3875 = vmatprep.mubr.msk.bf16.mxu0 %vm4270_vm0, %v4269_v1 }
 0x1f1   : > { %v1016_v30 = vpop.f32.mrb[4].mxu1 }
 0x1f2   : > { %v3779_v31 = vpop.f32.mrb[5].mxu1  ;;  %v1017_v35 = vadd.f32 %v3321_v33, %v1016_v30  ;;  %v4123_v30 = vld [vmem:[%s5263_s8 + $0x48] sm:$0xff]  }
 0x1f3   : > { %v1019_v32 = vpop.f32.mrb[6].mxu1  ;;  %v4125_v31 = vld [vmem:[%s5261_s6 + $0xc0] sm:$0xff]  }
 0x1f4   : > { %v3780_v34 = vpop.f32.mrb[7].mxu1  ;;  %v1020_v36 = vadd.f32 %v3321_v33, %v1019_v32  ;;  %v1023_v9 = vmul.f32 0.17677669, %v1017_v35  ;;  %v4126_v32 = vld [vmem:[%s5263_s8 + $0x50] sm:$0xff]   ;;  %v4128_v35 = vld [vmem:[%s5263_s8 + $0x58] sm:$0xff]  }
 0x1f5   : > { %v4124_v33 = vld [vmem:[#allocation2 + $0x10] sm:$0x1f]   ;;  %v4127_v34 = vld [vmem:[%s5261_s6 + $0xc8] sm:$0xff]  }
 0x1f6   : > { %v1024_v43 = vmul.f32 0.17677669, %v1020_v36  ;;  %v3561_v49 = vpack.c.bf16 %v1023_v9, %v1023_v9  ;;  %v4129_v36 = vld [vmem:[%s5261_s6 + $0xd0] sm:$0xff]   ;;  %v4136_v9 = vld [vmem:[%s5263_s8 + $0x78] sm:$0xff]  }
 0x1f8   : > { %v3562_v51 = vpack.c.bf16 %v1024_v43, %v1024_v43  ;;  %1034 = vst.msk [vmem:[#allocation2 + $0x18] sm:$0xf] %vm643_vm4, %v3561_v49  ;;  %v4137_v43 = vld [vmem:[%s5261_s6 + $0xf0] sm:$0xff]  }
 0x211   : > { %v1313_v38 = vpop.f32.mrb[8].mxu1 }
 0x212   : > { %v1314_v39 = vadd.f32 %v3342_v37, %v1313_v38  ;;  %v3819_v40 = vpop.f32.mrb[9].mxu1  ;;  %v4131_v38 = vld [vmem:[%s5261_s6 + $0xd8] sm:$0xff]  }
 0x213   : > { %v1316_v44 = vpop.f32.mrb[10].mxu1  ;;  %v4133_v40 = vld [vmem:[%s5261_s6 + $0xe0] sm:$0xff]  }
 0x214   : > { %v1317_v47 = vadd.f32 %v3342_v37, %v1316_v44  ;;  %v3820_v48 = vpop.f32.mrb[11].mxu1  ;;  %v4130_v37 = vld [vmem:[%s5263_s8 + $0x60] sm:$0xff]   ;;  %v4138_v44 = vld [vmem:[%s5261_s6 + $0xf8] sm:$0xff]  }
 0x215   : > { %v4921_v48 = vld [vmem:[#allocation3 + $0x18] sm:$0x1] }
 0x235   : > { %v1369_v55 = vpop.f32.mrb[12].mxu0 }
 0x236   : > { %v4723_v57 = vadd.f32 %v1369_v55, %v4717_v54  ;;  %v3825_v58 = vpop.f32.mrb[13].mxu0  ;;  %v1320_v55 = vpack.c.bf16 %v1317_v47, %v1314_v39  ;;  %v4132_v39 = vld [vmem:[%s5263_s8 + $0x68] sm:$0xff]  }
 0x237   : > { %v1372_v59 = vpop.f32.mrb[14].mxu0  ;;  %v1036_v58 = vsel %vm4564_vm5, %v3562_v51, %v1035_v46  ;;  %v4919_v46 = vld [vmem:[#allocation3 + $0x10] sm:$0xff] }
 0x238   : > { %v4726_v60 = vadd.f32 %v1372_v59, %v4720_v56  ;;  %v3826_v61 = vpop.f32.mrb[15].mxu0  ;;  %v1379_v62 = vsel %vm1378_vm12, %v4723_v57, -inf  ;;  %1037 = vst [vmem:[#allocation2 + $0x1c] sm:$0x1] %v1036_v58  ;;  %v1449_v59 = vand.u32 %v4813_v52, %v1320_v55 }
 0x239   : > { %1380 = vmax.xlane.f32.xlu0 %v1379_v62 }
 0x23a   : > { %v1383_v63 = vsel %vm1382_vm13, %v4726_v60, -inf  ;;  %3828 = vmatpush3.bf16.msra.mxu1 %v1449_v59 }
 0x23b   : > { %3853 = vmatprep.subr.bf16.mxu1 %v4269_v1 }
 0x23d   : > { %1384 = vmax.xlane.f32.xlu0 %v1383_v63 }
 0x255   : > { %v1606_v3 = vpop.f32.mrb[16].mxu0 }
 0x256   : > { %v3851_v4 = vpop.f32.mrb[17].mxu0  ;;  %v1607_v6 = vadd.f32 %v3371_v2, %v1606_v3 }
 0x257   : > { %v1609_v5 = vpop.f32.mrb[18].mxu0 }
 0x258   : > { %v1610_v7 = vadd.f32 %v3371_v2, %v1609_v5  ;;  %v3852_v8 = vpop.f32.mrb[19].mxu0 }
 0x25a   : > { %v1613_v10 = vpack.c.bf16 %v1610_v7, %v1607_v6 }
 0x25c   : > { %v1741_v11 = vsel %vm1056_vm2, %v1613_v10, 0 }
 0x25d   : > { %3874 = vmatpush3.bf16.xpose.msra.mxu0 %v1741_v11 }
 0x25e   : > { %3885 = vmatprep.subr.bf16.mxu0 %v4269_v1 }
 0x264   : > { %3876 = vmatmul.mubr.msk.bf16.vlgmr.msra.gmra.mrb[20].mxu0 %vm1056_vm2, %v4107_v13 }
 0x265   : > { %3886 = vmatpush3.bf16.msra.mxu0 %v4108_v12  ;;  %3901 = vmatprep.mubr.msk.bf16.mxu0 %vm4270_vm0, %v4269_v1  ;;  %v3426_v12 = vld [vmem:[%s5262_s7 + $0x2] ss:$0 sm:$0xff] }
 0x266   : > { %3887 = vmatprep.subr.bf16.mxu0 %v4269_v1 }
 0x269   : > { %3888 = vmatpush3.bf16.msra.mxu0 %v4110_v14 }
 0x26a   : > { %3889 = vmatprep.subr.bf16.mxu0 %v4269_v1 }
 0x26d   : > { %3890 = vmatpush3.bf16.msra.mxu0 %v4112_v15 }
 0x26e   : > { %3891 = vmatprep.subr.bf16.mxu0 %v4269_v1 }
 0x271   : > { %3892 = vmatpush3.bf16.msra.mxu0 %v4114_v16 }
 0x272   : > { %3893 = vmatprep.subr.bf16.mxu0 %v4269_v1 }
 0x275   : > { %3894 = vmatpush3.bf16.msra.mxu0 %v4116_v17 }
 0x276   : > { %3895 = vmatprep.subr.bf16.mxu0 %v4269_v1 }
 0x279   : > { %3896 = vmatpush3.bf16.msra.mxu0 %v4118_v18 }
 0x27a   : > { %3897 = vmatprep.subr.bf16.mxu0 %v4269_v1 }
 0x27d   : > { %3898 = vmatpush3.bf16.msra.mxu0 %v4120_v19 }
 0x27e   : > { %3899 = vmatprep.subr.bf16.mxu0 %v4269_v1 }
 0x281   : > { %3900 = vmatpush3.bf16.msra.mxu0 %v4121_v20 }
 0x282   : > { %3925 = vmatprep.subr.bf16.mxu0 %v4269_v1 }
 0x284   : > { %3902 = vmatmul.mubr.bf16.vlgmr.msra.gmra.mrb[24].mxu0 %v4502_v26 }
 0x285   : > { %3927 = vmatprep.mubr.msk.bf16.mxu0 %vm4270_vm0, %v4269_v1 }
 0x2c6   : > { %v1381_v22 = vpop.xlane.xlu0 %1380 }
 0x2c7   : > { %v4790_v23 = vmax.f32 %v4787_v21, %v1381_v22 }
 0x2c9   : > { %v1388_v25 = vsub.f32 %v4787_v21, %v4790_v23  ;;  %1497 = vst.msk [vmem:[#allocation3] sm:$0xff] %vm1038_vm6, %v4790_v23  ;;  %1396 = vperm.xlu1 %4052, %v4790_v23  }
 0x2ca   : > { %v1385_v27 = vpop.xlane.xlu0 %1384 }
 0x2cb   : > { %v4800_v28 = vmax.f32 %v4792_v24, %v1385_v27 }
 0x2cd   : > { %v1389_v29 = vsub.f32 %v4792_v24, %v4800_v28  ;;  %1498 = vst.msk [vmem:[#allocation3 + $0x8] sm:$0x1] %vm1040_vm14, %v4800_v28  ;;  %1401 = vperm.xlu1 %4052, %v4800_v28  }
 0x337   : > { %v1777_v61 = vpop.f32.mrb[20].mxu0 }
 0x338   : > { %v4821_v62 = vadd.f32 %v1777_v61, %v4717_v54  ;;  %v3877_v63 = vpop.f32.mrb[21].mxu0 }
 0x339   : > { %v1780_v0 = vpop.f32.mrb[22].mxu0 }
 0x33a   : > { %v4824_v2 = vadd.f32 %v1780_v0, %v4720_v56  ;;  %v3878_v3 = vpop.f32.mrb[23].mxu0  ;;  %v1787_v45 = vsel %vm1378_vm12, %v4821_v62, -inf }
 0x33b   : > { %1788 = vmax.xlane.f32.xlu0 %v1787_v45 }
 0x33c   : > { %v1790_v4 = vsel %vm1382_vm13, %v4824_v2, -inf }
 0x33d   : > { %1791 = vmax.xlane.f32.xlu1 %v1790_v4 }
 0x348   : > { %v1397_v5 = vpop.permute.xlu1 %1396 }
 0x349   : > { %v1404_v6 = vsub.f32 %v4723_v57, %v1397_v5 }
 0x34b   : > { %v1406_v7 = vmul.f32 1.442695, %v1404_v6 }
 0x34c   : > { %v1402_v8 = vpop.permute.xlu1 %1401 }
 0x34d   : > { %v1405_v10 = vsub.f32 %v4726_v60, %v1402_v8  ;;  %4164 = vpow2.f32 %v1406_v7  ;;  %v4122_v60 = vld [vmem:[%s5263_s8 + $0x40] sm:$0xff]  }
 0x34f   : > { %v1408_v11 = vmul.f32 1.442695, %v1405_v10 }
 0x351   : > { %4166 = vpow2.f32 %v1408_v11 }
 0x357   : > { %v2008_v13 = vpop.f32.mrb[24].mxu0  ;;  %v4835_v16 = vpop.eup %4164 }
 0x358   : > { %v3903_v14 = vpop.f32.mrb[25].mxu0  ;;  %v2009_v17 = vadd.f32 %v3426_v12, %v2008_v13 }
 0x359   : > { %v2011_v15 = vpop.f32.mrb[26].mxu0 }
 0x35a   : > { %v2012_v18 = vadd.f32 %v3426_v12, %v2011_v15  ;;  %v3904_v19 = vpop.f32.mrb[27].mxu0 }
 0x35b   : > { %v4837_v57 = vpop.eup %4166  ;;  %v3397_v19 = vld [vmem:[%s5264_s9 + $0x1] ss:$0 sm:$0xff] }
 0x35c   : > { %v2015_v20 = vpack.c.bf16 %v2012_v18, %v2009_v17  ;;  %v1440_v22 = vpack.c.bf16 %v4837_v57, %v4835_v16 }
 0x35e   : > { %3830 = vmatmul.mubr.msk.bf16.vlgmr.msra.gmra.mrb[12].mxu1 %vm1378_vm12, %v1440_v22  ;;  %v2143_v27 = vsel %vm1056_vm2, %v2015_v20, 0 }
 0x35f   : > { %3926 = vmatpush3.bf16.xpose.msra.mxu0 %v2143_v27  ;;  %3854 = vmatpush3.bf16.msra.mxu1 %v4122_v60 }
 0x360   : > { %3855 = vmatprep.subr.bf16.mxu1 %v4269_v1  ;;  %3937 = vmatprep.subr.bf16.mxu0 %v4269_v1 }
 0x361   : > { %3869 = vmatprep.mubr.msk.bf16.mxu1 %vm4270_vm0, %v4269_v1 }
 0x363   : > { %3856 = vmatpush3.bf16.msra.mxu1 %v4123_v30 }
 0x364   : > { %3857 = vmatprep.subr.bf16.mxu1 %v4269_v1 }
 0x366   : > { %3928 = vmatmul.mubr.msk.bf16.vlgmr.msra.gmra.mrb[28].mxu0 %vm1056_vm2, %v4124_v33 }
 0x367   : > { %3938 = vmatpush3.bf16.msra.mxu0 %v4125_v31  ;;  %3858 = vmatpush3.bf16.msra.mxu1 %v4126_v32 }
 0x368   : > { %3939 = vmatprep.subr.bf16.mxu0 %v4269_v1  ;;  %3859 = vmatprep.subr.bf16.mxu1 %v4269_v1 }
 0x369   : > { %3953 = vmatprep.mubr.msk.bf16.mxu0 %vm4270_vm0, %v4269_v1 }
 0x36b   : > { %3940 = vmatpush3.bf16.msra.mxu0 %v4127_v34  ;;  %3860 = vmatpush3.bf16.msra.mxu1 %v4128_v35 }
 0x36c   : > { %3941 = vmatprep.subr.bf16.mxu0 %v4269_v1  ;;  %3861 = vmatprep.subr.bf16.mxu1 %v4269_v1 }
 0x36f   : > { %3942 = vmatpush3.bf16.msra.mxu0 %v4129_v36  ;;  %3862 = vmatpush3.bf16.msra.mxu1 %v4130_v37 }
 0x370   : > { %3943 = vmatprep.subr.bf16.mxu0 %v4269_v1  ;;  %3863 = vmatprep.subr.bf16.mxu1 %v4269_v1 }
 0x373   : > { %3944 = vmatpush3.bf16.msra.mxu0 %v4131_v38  ;;  %3864 = vmatpush3.bf16.msra.mxu1 %v4132_v39  ;;  %v4139_v38 = vld [vmem:[%s5263_s8 + $0x80] sm:$0xff]  }
 0x374   : > { %3945 = vmatprep.subr.bf16.mxu0 %v4269_v1  ;;  %3865 = vmatprep.subr.bf16.mxu1 %v4269_v1 }
 0x377   : > { %3946 = vmatpush3.bf16.msra.mxu0 %v4133_v40  ;;  %3866 = vmatpush3.bf16.msra.mxu1 %v4134_v41 }
 0x378   : > { %3947 = vmatprep.subr.bf16.mxu0 %v4269_v1  ;;  %3867 = vmatprep.subr.bf16.mxu1 %v4269_v1 }
 0x37b   : > { %3948 = vmatpush3.bf16.msra.mxu0 %v4135_v42  ;;  %3868 = vmatpush3.bf16.msra.mxu1 %v4136_v9 }
 0x37c   : > { %3949 = vmatprep.subr.bf16.mxu0 %v4269_v1  ;;  %3879 = vmatprep.subr.bf16.mxu1 %v4269_v1 }
 0x37e   : > { %3870 = vmatmul.mubr.bf16.vlgmr.msra.gmra.mrb[16].mxu1 %v4502_v26 }
 0x37f   : > { %3950 = vmatpush3.bf16.msra.mxu0 %v4137_v43  ;;  %3881 = vmatprep.mubr.msk.bf16.mxu1 %vm4270_vm0, %v4269_v1  ;;  %v4140_v43 = vld [vmem:[%s5263_s8 + $0x88] sm:$0xff]  }
 0x380   : > { %3951 = vmatprep.subr.bf16.mxu0 %v4269_v1 }
 0x383   : > { %3952 = vmatpush3.bf16.msra.mxu0 %v4138_v44 }
 0x384   : > { %3977 = vmatprep.subr.bf16.mxu0 %v4269_v1 }
 0x386   : > { %3954 = vmatmul.mubr.bf16.vlgmr.msra.gmra.mrb[32].mxu0 %v4502_v26 }
 0x387   : > { %3979 = vmatprep.mubr.msk.bf16.mxu0 %vm4270_vm0, %v4269_v1 }
 0x3c8   : > { %v1789_v47 = vpop.xlane.xlu0 %1788 }
 0x3c9   : > { %v4924_v49 = vmax.f32 %v4919_v46, %v1789_v47  ;;  %v4142_v47 = vld [vmem:[%s5263_s8 + $0x90] sm:$0xff]  }
 0x3ca   : > { %v1792_v51 = vpop.xlane.xlu1 %1791 }
 0x3cb   : > { %v1795_v55 = vsub.f32 %v4919_v46, %v4924_v49  ;;  %1899 = vst.msk [vmem:[#allocation3 + $0x10] sm:$0xff] %vm1038_vm6, %v4924_v49  ;;  %v4931_v58 = vmax.f32 %v4921_v48, %v1792_v51  ;;  %1803 = vperm.xlu0 %4053, %v4924_v49   ;;  %v4141_v51 = vld [vmem:[#allocation2 + $0x18] sm:$0x1f]  }
 0x3cd   : > { %v1796_v59 = vsub.f32 %v4921_v48, %v4931_v58  ;;  %1900 = vst.msk [vmem:[#allocation3 + $0x18] sm:$0x1] %vm1040_vm14, %v4931_v58  ;;  %1808 = vperm.xlu1 %4052, %v4931_v58   ;;  %v1410_v48 = vld [vmem:[#allocation4] sm:$0xff] }
 0x431   : > { %v4939_v61 = vpop.f32.mrb[12].mxu1 }
 0x432   : > { %v3831_v63 = vpop.f32.mrb[13].mxu1 }
 0x433   : > { %v4941_v0 = vpop.f32.mrb[14].mxu1  ;;  %v4143_v63 = vld [vmem:[%s5263_s8 + $0x98] sm:$0xff]  }
 0x434   : > { %v3832_v3 = vpop.f32.mrb[15].mxu1 }
 0x435   : > { %v4144_v3 = vld [vmem:[%s5263_s8 + $0xa0] sm:$0xff]  }
 0x439   : > { %v2179_v45 = vpop.f32.mrb[28].mxu0 }
 0x43a   : > { %v4944_v4 = vadd.f32 %v2179_v45, %v4717_v54  ;;  %v3929_v5 = vpop.f32.mrb[29].mxu0  ;;  %v4145_v45 = vld [vmem:[%s5263_s8 + $0xa8] sm:$0xff]  }
 0x43b   : > { %v2182_v6 = vpop.f32.mrb[30].mxu0  ;;  %v4146_v5 = vld [vmem:[%s5263_s8 + $0xb0] sm:$0xff]  }
 0x43c   : > { %v4947_v7 = vadd.f32 %v2182_v6, %v4720_v56  ;;  %v3930_v8 = vpop.f32.mrb[31].mxu0  ;;  %v2189_v10 = vsel %vm1378_vm12, %v4944_v4, -inf  ;;  %v4147_v6 = vld [vmem:[%s5263_s8 + $0xb8] sm:$0xff]  }
 0x43d   : > { %2190 = vmax.xlane.f32.xlu0 %v2189_v10  ;;  %v5012_v8 = vld [vmem:[#allocation3 + $0x20] sm:$0xff] }
 0x43e   : > { %v2192_v11 = vsel %vm1382_vm13, %v4947_v7, -inf }
 0x43f   : > { %2193 = vmax.xlane.f32.xlu1 %v2192_v11  ;;  %v5014_v11 = vld [vmem:[#allocation3 + $0x28] sm:$0x1] }
 0x44a   : > { %v1804_v12 = vpop.permute.xlu0 %1803 }
 0x44b   : > { %v1811_v13 = vsub.f32 %v4821_v62, %v1804_v12 }
 0x44c   : > { %v1809_v14 = vpop.permute.xlu1 %1808 }
 0x44d   : > { %v1813_v15 = vmul.f32 1.442695, %v1811_v13  ;;  %v1812_v17 = vsub.f32 %v4824_v2, %v1809_v14  ;;  %v3481_v2 = vld [vmem:[%s5262_s7 + $0x3] ss:$0 sm:$0xff] }
 0x44f   : > { %v1815_v18 = vmul.f32 1.442695, %v1812_v17  ;;  %4168 = vpow2.f32 %v1813_v15 }
 0x451   : > { %4170 = vpow2.f32 %v1815_v18  ;;  %v1721_v60 = vpop.f32.mrb[16].mxu1 }
 0x452   : > { %v1722_v20 = vadd.f32 %v3397_v19, %v1721_v60  ;;  %v3871_v22 = vpop.f32.mrb[17].mxu1 }
 0x453   : > { %v1724_v27 = vpop.f32.mrb[18].mxu1 }
 0x454   : > { %v1725_v30 = vadd.f32 %v3397_v19, %v1724_v27  ;;  %v3872_v31 = vpop.f32.mrb[19].mxu1 }
 0x456   : > { %v1728_v32 = vpack.c.bf16 %v1725_v30, %v1722_v20 }
 0x458   : > { %v1852_v62 = vand.u32 %v1728_v32, %v4813_v52 }
 0x459   : > { %v2410_v33 = vpop.f32.mrb[32].mxu0  ;;  %v4962_v34 = vpop.eup %4168 }
 0x45a   : > { %v3955_v35 = vpop.f32.mrb[33].mxu0  ;;  %3880 = vmatpush3.bf16.msra.mxu1 %v1852_v62  ;;  %v2411_v39 = vadd.f32 %v3481_v2, %v2410_v33 }
 0x45b   : > { %v4964_v36 = vpop.eup %4170  ;;  %v2413_v37 = vpop.f32.mrb[34].mxu0  ;;  %3905 = vmatprep.subr.bf16.mxu1 %v4269_v1 }
 0x45c   : > { %v2414_v40 = vadd.f32 %v3481_v2, %v2413_v37  ;;  %v3956_v41 = vpop.f32.mrb[35].mxu0  ;;  %v1847_v42 = vpack.c.bf16 %v4964_v36, %v4962_v34 }
 0x45e   : > { %v2417_v9 = vpack.c.bf16 %v2414_v40, %v2411_v39  ;;  %3882 = vmatmul.mubr.msk.bf16.vlgmr.msra.gmra.mrb[20].mxu1 %vm1378_vm12, %v1847_v42 }
 0x45f   : > { %3906 = vmatpush3.bf16.msra.mxu1 %v4139_v38  ;;  %3921 = vmatprep.mubr.msk.bf16.mxu1 %vm4270_vm0, %v4269_v1 }
 0x460   : > { %v2545_v44 = vsel %vm1056_vm2, %v2417_v9, 0  ;;  %3907 = vmatprep.subr.bf16.mxu1 %v4269_v1 }
 0x461   : > { %3978 = vmatpush3.bf16.xpose.msra.mxu0 %v2545_v44 }
 0x462   : > { %3989 = vmatprep.subr.bf16.mxu0 %v4269_v1 }
 0x463   : > { %3908 = vmatpush3.bf16.msra.mxu1 %v4140_v43 }
 0x464   : > { %3909 = vmatprep.subr.bf16.mxu1 %v4269_v1 }
 0x467   : > { %3910 = vmatpush3.bf16.msra.mxu1 %v4142_v47 }
 0x468   : > { %3980 = vmatmul.mubr.msk.bf16.vlgmr.msra.gmra.mrb[36].mxu0 %vm1056_vm2, %v4141_v51  ;;  %3911 = vmatprep.subr.bf16.mxu1 %v4269_v1 }
 0x469   : > { %3993 = vmatprep.mubr.msk.bf16.mxu0 %vm4270_vm0, %v4269_v1 }
 0x46b   : > { %3912 = vmatpush3.bf16.msra.mxu1 %v4143_v63  ;;  %v4148_v63 = vld [vmem:[%s5263_s8 + $0xc0] sm:$0xff]  }
 0x46c   : > { %3913 = vmatprep.subr.bf16.mxu1 %v4269_v1 }
 0x46f   : > { %3914 = vmatpush3.bf16.msra.mxu1 %v4144_v3 }
 0x470   : > { %3915 = vmatprep.subr.bf16.mxu1 %v4269_v1 }
 0x473   : > { %3916 = vmatpush3.bf16.msra.mxu1 %v4145_v45  ;;  %v4149_v45 = vld [vmem:[%s5263_s8 + $0xc8] sm:$0xff]  }
 0x474   : > { %3917 = vmatprep.subr.bf16.mxu1 %v4269_v1 }
 0x477   : > { %3918 = vmatpush3.bf16.msra.mxu1 %v4146_v5  ;;  %v4150_v5 = vld [vmem:[%s5263_s8 + $0xd0] sm:$0xff]  }
 0x478   : > { %3919 = vmatprep.subr.bf16.mxu1 %v4269_v1 }
 0x47b   : > { %3920 = vmatpush3.bf16.msra.mxu1 %v4147_v6  ;;  %v4151_v6 = vld [vmem:[%s5263_s8 + $0xd8] sm:$0xff]  }
 0x47c   : > { %3931 = vmatprep.subr.bf16.mxu1 %v4269_v1 }
 0x47e   : > { %3922 = vmatmul.mubr.bf16.vlgmr.msra.gmra.mrb[24].mxu1 %v4502_v26 }
 0x47f   : > { %3933 = vmatprep.mubr.msk.bf16.mxu1 %vm4270_vm0, %v4269_v1 }
 0x4ca   : > { %v2191_v10 = vpop.xlane.xlu0 %2190 }
 0x4cb   : > { %v5017_v12 = vmax.f32 %v5012_v8, %v2191_v10  ;;  %v4152_v10 = vld [vmem:[%s5263_s8 + $0xe0] sm:$0xff]  }
 0x4cc   : > { %v2194_v13 = vpop.xlane.xlu1 %2193 }
 0x4cd   : > { %v2197_v14 = vsub.f32 %v5012_v8, %v5017_v12  ;;  %2301 = vst.msk [vmem:[#allocation3 + $0x20] sm:$0xff] %vm1038_vm6, %v5017_v12  ;;  %v5024_v26 = vmax.f32 %v5014_v11, %v2194_v13  ;;  %2205 = vperm.xlu0 %4053, %v5017_v12   ;;  %v4153_v13 = vld [vmem:[%s5263_s8 + $0xe8] sm:$0xff]   ;;  %v1818_v8 = vld [vmem:[#allocation4 + $0x10] sm:$0xff] }
 0x4cf   : > { %v2198_v15 = vsub.f32 %v5014_v11, %v5024_v26  ;;  %2302 = vst.msk [vmem:[#allocation3 + $0x28] sm:$0x1] %vm1040_vm14, %v5024_v26  ;;  %2210 = vperm.xlu1 %4052, %v5024_v26   ;;  %v2199_v24 = vmul.f32 1.442695, %v2197_v14 }
 0x4d1   : > { %v2201_v21 = vmul.f32 1.442695, %v2198_v15  ;;  %v1411_v15 = vld [vmem:[#allocation4 + $0x8] sm:$0x1] }
 0x531   : > { %v5032_v17 = vpop.f32.mrb[20].mxu1 }
 0x532   : > { %v3883_v18 = vpop.f32.mrb[21].mxu1 }
 0x533   : > { %v5034_v19 = vpop.f32.mrb[22].mxu1  ;;  %v4154_v18 = vld [vmem:[%s5263_s8 + $0xf0] sm:$0xff]  }
 0x534   : > { %v3884_v60 = vpop.f32.mrb[23].mxu1 }
 0x535   : > { %v4155_v60 = vld [vmem:[%s5263_s8 + $0xf8] sm:$0xff]  }
 0x53b   : > { %v2581_v20 = vpop.f32.mrb[36].mxu0 }
 0x53c   : > { %v5037_v22 = vadd.f32 %v2581_v20, %v4717_v54  ;;  %v3981_v27 = vpop.f32.mrb[37].mxu0  ;;  %v4216_v20 = vld [vmem:[%s4406_s0] sm:$0x1f]  }
 0x53d   : > { %v2584_v30 = vpop.f32.mrb[38].mxu0  ;;  %v5091_v27 = vld [vmem:[#allocation3 + $0x30] sm:$0xff] }
 0x53e   : > { %v5040_v31 = vadd.f32 %v2584_v30, %v4720_v56  ;;  %v3982_v32 = vpop.f32.mrb[39].mxu0  ;;  %v2591_v62 = vsel %vm1378_vm12, %v5037_v22, -inf  ;;  %v3452_v56 = vld [vmem:[%s5264_s9 + $0x2] ss:$0 sm:$0xff] }
 0x53f   : > { %2592 = vmax.xlane.f32.xlu0 %v2591_v62  ;;  %v5093_v32 = vld [vmem:[#allocation3 + $0x38] sm:$0x1] }
 0x540   : > { %v2594_v2 = vsel %vm1382_vm13, %v5040_v31, -inf }
 0x541   : > { %2595 = vmax.xlane.f32.xlu1 %v2594_v2 }
 0x54c   : > { %v2206_v33 = vpop.permute.xlu0 %2205 }
 0x54d   : > { %v2213_v35 = vsub.f32 %v4944_v4, %v2206_v33 }
 0x54e   : > { %v2211_v37 = vpop.permute.xlu1 %2210 }
 0x54f   : > { %v2215_v54 = vmul.f32 1.442695, %v2213_v35  ;;  %v2214_v38 = vsub.f32 %v4947_v7, %v2211_v37 }
 0x551   : > { %v2217_v39 = vmul.f32 1.442695, %v2214_v38  ;;  %v2123_v40 = vpop.f32.mrb[24].mxu1  ;;  %4172 = vpow2.f32 %v2215_v54  ;;  %v1414_v54 = vsel %vm1378_vm12, %v4835_v16, 0.0  ;;  %v1822_v38 = vsel %vm1378_vm12, %v4962_v34, 0.0 }
 0x552   : > { %v2124_v41 = vadd.f32 %v3452_v56, %v2123_v40  ;;  %v3923_v42 = vpop.f32.mrb[25].mxu1 }
 0x553   : > { %4174 = vpow2.f32 %v2217_v39  ;;  %v2126_v9 = vpop.f32.mrb[26].mxu1  ;;  %v1825_v39 = vsel %vm1382_vm13, %v4964_v36, 0.0 }
 0x554   : > { %v2127_v43 = vadd.f32 %v3452_v56, %v2126_v9  ;;  %v3924_v44 = vpop.f32.mrb[27].mxu1  ;;  %v1417_v56 = vsel %vm1382_vm13, %v4837_v57, 0.0 }
 0x556   : > { %v2130_v47 = vpack.c.bf16 %v2127_v43, %v2124_v41 }
 0x558   : > { %v2254_v4 = vand.u32 %v2130_v47, %v4813_v52 }
 0x55a   : > { %3932 = vmatpush3.bf16.msra.mxu1 %v2254_v4  ;;  %v3507_v4 = vld [vmem:[%s5264_s9 + $0x3] ss:$0 sm:$0xff] }
 0x55b   : > { %3957 = vmatprep.subr.bf16.mxu1 %v4269_v1  ;;  %v4173_v7 = vpop.eup %4172 }
 0x55c   : > { %v2224_v41 = vsel %vm1378_vm12, %v4173_v7, 0.0 }
 0x55d   : > { %v4175_v51 = vpop.eup %4174 }
 0x55e   : > { %v2249_v3 = vpack.c.bf16 %v4175_v51, %v4173_v7  ;;  %v2227_v40 = vsel %vm1382_vm13, %v4175_v51, 0.0 }
 0x560   : > { %3934 = vmatmul.mubr.msk.bf16.vlgmr.msra.gmra.mrb[28].mxu1 %vm1378_vm12, %v2249_v3 }
 0x561   : > { %3958 = vmatpush3.bf16.msra.mxu1 %v4148_v63  ;;  %3973 = vmatprep.mubr.msk.bf16.mxu1 %vm4270_vm0, %v4269_v1 }
 0x562   : > { %3959 = vmatprep.subr.bf16.mxu1 %v4269_v1 }
 0x565   : > { %3960 = vmatpush3.bf16.msra.mxu1 %v4149_v45 }
 0x566   : > { %3961 = vmatprep.subr.bf16.mxu1 %v4269_v1 }
 0x569   : > { %3962 = vmatpush3.bf16.msra.mxu1 %v4150_v5 }
 0x56a   : > { %3963 = vmatprep.subr.bf16.mxu1 %v4269_v1 }
 0x56d   : > { %3964 = vmatpush3.bf16.msra.mxu1 %v4151_v6 }
 0x56e   : > { %3965 = vmatprep.subr.bf16.mxu1 %v4269_v1 }
 0x571   : > { %3966 = vmatpush3.bf16.msra.mxu1 %v4152_v10 }
 0x572   : > { %3967 = vmatprep.subr.bf16.mxu1 %v4269_v1 }
 0x575   : > { %3968 = vmatpush3.bf16.msra.mxu1 %v4153_v13 }
 0x576   : > { %3969 = vmatprep.subr.bf16.mxu1 %v4269_v1 }
 0x579   : > { %3970 = vmatpush3.bf16.msra.mxu1 %v4154_v18 }
 0x57a   : > { %3971 = vmatprep.subr.bf16.mxu1 %v4269_v1 }
 0x57d   : > { %3972 = vmatpush3.bf16.msra.mxu1 %v4155_v60 }
 0x57e   : > { %3983 = vmatprep.subr.bf16.mxu1 %v4269_v1 }
 0x580   : > { %3974 = vmatmul.mubr.bf16.vlgmr.msra.gmra.mrb[32].mxu1 %v4216_v20 }
 0x581   : > { %3985 = vmatprep.mubr.msk.bf16.mxu1 %vm4270_vm0, %v4269_v1 }
 0x5cc   : > { %v2593_v30 = vpop.xlane.xlu0 %2592 }
 0x5cd   : > { %v5096_v62 = vmax.f32 %v5091_v27, %v2593_v30  ;;  %v1797_v30 = vmul.f32 1.442695, %v1795_v55 }
 0x5ce   : > { %v2596_v2 = vpop.xlane.xlu1 %2595 }
 0x5cf   : > { %v2599_v33 = vsub.f32 %v5091_v27, %v5096_v62  ;;  %2703 = vst.msk [vmem:[#allocation3 + $0x30] sm:$0xff] %vm1038_vm6, %v5096_v62  ;;  %v5103_v35 = vmax.f32 %v5093_v32, %v2596_v2  ;;  %2607 = vperm.xlu0 %4053, %v5096_v62   ;;  %v1392_v27 = vmul.f32 1.442695, %v1389_v29  ;;  %v1819_v2 = vld [vmem:[#allocation4 + $0x18] sm:$0x1] }
 0x5d1   : > { %v2600_v37 = vsub.f32 %v5093_v32, %v5103_v35  ;;  %2704 = vst.msk [vmem:[#allocation3 + $0x38] sm:$0x1] %vm1040_vm14, %v5103_v35  ;;  %2612 = vperm.xlu1 %4052, %v5103_v35   ;;  %v1799_v32 = vmul.f32 1.442695, %v1796_v59  ;;  %v2601_v23 = vmul.f32 1.442695, %v2599_v33 }
 0x5d3   : > { %v2603_v28 = vmul.f32 1.442695, %v2600_v37 }
 0x5ee   : > { %1415 = vadd.xlane.f32.xlu0 %v1414_v54 }
 0x5f2   : > { %1823 = vadd.xlane.f32.xlu0 %v1822_v38 }
 0x5f5   : > { %1418 = vadd.xlane.f32.xlu1 %v1417_v56  ;;  %v2221_v56 = vld [vmem:[#allocation4 + $0x28] sm:$0x1] }
 0x5f6   : > { %1826 = vadd.xlane.f32.xlu0 %v1825_v39 }
 0x5f9   : > { %2228 = vadd.xlane.f32.xlu1 %v2227_v40 }
 0x5fa   : > { %2225 = vadd.xlane.f32.xlu0 %v2224_v41  ;;  %v2220_v41 = vld [vmem:[#allocation4 + $0x20] sm:$0xff] }
 0x633   : > { %v5121_v16 = vpop.f32.mrb[28].mxu1 }
 0x634   : > { %v3935_v42 = vpop.f32.mrb[29].mxu1 }
 0x635   : > { %v5123_v9 = vpop.f32.mrb[30].mxu1 }
 0x636   : > { %v3936_v34 = vpop.f32.mrb[31].mxu1 }
 0x64e   : > { %v2608_v43 = vpop.permute.xlu0 %2607 }
 0x64f   : > { %v2615_v57 = vsub.f32 %v5037_v22, %v2608_v43 }
 0x650   : > { %v2613_v44 = vpop.permute.xlu1 %2612 }
 0x651   : > { %v2617_v47 = vmul.f32 1.442695, %v2615_v57  ;;  %v2616_v36 = vsub.f32 %v5040_v31, %v2613_v44 }
 0x653   : > { %4176 = vpow2.f32 %v2617_v47  ;;  %v2619_v7 = vmul.f32 1.442695, %v2616_v36  ;;  %v2525_v51 = vpop.f32.mrb[32].mxu1 }
 0x654   : > { %v2526_v63 = vadd.f32 %v3507_v4, %v2525_v51  ;;  %v3975_v3 = vpop.f32.mrb[33].mxu1 }
 0x655   : > { %4178 = vpow2.f32 %v2619_v7  ;;  %v2528_v45 = vpop.f32.mrb[34].mxu1 }
 0x656   : > { %v2529_v5 = vadd.f32 %v3507_v4, %v2528_v45  ;;  %v3976_v6 = vpop.f32.mrb[35].mxu1  ;;  %4180 = vpow2.f32 %v1392_v27 }
 0x657   : > { %v4156_v6 = vld [vmem:[%s5265_s10] sm:$0xff]  }
 0x658   : > { %v2532_v10 = vpack.c.bf16 %v2529_v5, %v2526_v63  ;;  %3990 = vmatpush3.bf16.msra.mxu0 %v4156_v6 }
 0x659   : > { %3991 = vmatprep.subr.bf16.mxu0 %v4269_v1 }
 0x65a   : > { %v2656_v22 = vand.u32 %v2532_v10, %v4813_v52  ;;  %v1390_v52 = vmul.f32 1.442695, %v1388_v25 }
 0x65c   : > { %3984 = vmatpush3.bf16.msra.mxu1 %v2656_v22  ;;  %4182 = vpow2.f32 %v1390_v52  ;;  %v2622_v52 = vld [vmem:[#allocation4 + $0x30] sm:$0xff] }
 0x65d   : > { %v4177_v13 = vpop.eup %4176  ;;  %3997 = vmatprep.subr.bf16.mxu1 %v4269_v1  ;;  %4184 = vpow2.f32 %v1797_v30  ;;  %v2623_v30 = vld [vmem:[#allocation4 + $0x38] sm:$0x1] }
 0x65e   : > { %v2626_v31 = vsel %vm1378_vm12, %v4177_v13, 0.0  ;;  %4186 = vpow2.f32 %v1799_v32 }
 0x65f   : > { %v4179_v18 = vpop.eup %4178  ;;  %2627 = vadd.xlane.f32.xlu0 %v2626_v31  ;;  %4188 = vpow2.f32 %v2199_v24  ;;  %v4158_v31 = vld [vmem:[%s5265_s10 + $0x10] sm:$0xff]  }
 0x660   : > { %v2629_v60 = vsel %vm1382_vm13, %v4179_v18, 0.0  ;;  %v2651_v20 = vpack.c.bf16 %v4179_v18, %v4177_v13  ;;  %v4181_v25 = vpop.eup %4180  ;;  %4190 = vpow2.f32 %v2201_v21  ;;  %v4157_v13 = vld [vmem:[%s5265_s10 + $0x8] sm:$0xff]  }
 0x661   : > { %2630 = vadd.xlane.f32.xlu1 %v2629_v60  ;;  %4192 = vpow2.f32 %v2601_v23  ;;  %v1413_v37 = vmul.f32 %v4181_v25, %v1411_v15  ;;  %3992 = vmatpush3.bf16.msra.mxu0 %v4157_v13  ;;  %v4159_v60 = vld [vmem:[%s5265_s10 + $0x18] sm:$0xff]  }
 0x662   : > { %3986 = vmatmul.mubr.msk.bf16.vlgmr.msra.gmra.mrb[36].mxu1 %vm1378_vm12, %v2651_v20  ;;  %4194 = vpow2.f32 %v2603_v28  ;;  %4005 = vmatprep.subr.bf16.mxu0 %v4269_v1 }
 0x663   : > { %4001 = vmatprep.mubr.msk.bf16.mxu1 %vm4270_vm0, %v4269_v1  ;;  %3998 = vmatpush3.bf16.msra.mxu1 %v4158_v31 }
 0x664   : > { %3999 = vmatprep.subr.bf16.mxu1 %v4269_v1 }
 0x666   : > { %v4183_v29 = vpop.eup %4182 }
 0x667   : > { %v4185_v46 = vpop.eup %4184  ;;  %v1412_v58 = vmul.f32 %v4183_v29, %v1410_v48  ;;  %4000 = vmatpush3.bf16.msra.mxu1 %v4159_v60  ;;  %v1426_v48 = vld [vmem:[#allocation5] sm:$0xff] }
 0x668   : > { %v4187_v49 = vpop.eup %4186  ;;  %v1820_v26 = vmul.f32 %v4185_v46, %v1818_v8  ;;  %4013 = vmatprep.subr.bf16.mxu1 %v4269_v1 }
 0x669   : > { %v4189_v55 = vpop.eup %4188  ;;  %v1821_v38 = vmul.f32 %v4187_v49, %v1819_v2  ;;  %v2235_v2 = vld [vmem:[#allocation5 + $0x20] sm:$0xff] }
 0x66a   : > { %v4191_v11 = vpop.eup %4190  ;;  %v2222_v44 = vmul.f32 %v4189_v55, %v2220_v41 }
 0x66b   : > { %v5155_v14 = vpop.eup %4192  ;;  %v2223_v34 = vmul.f32 %v4191_v11, %v2221_v56 }
 0x66c   : > { %v5159_v33 = vpop.eup %4194  ;;  %v2624_v32 = vmul.f32 %v5155_v14, %v2622_v52  ;;  %v4163_v52 = vld [vmem:[%s5265_s10 + $0x38] sm:$0xff]  }
 0x66d   : > { %v2625_v23 = vmul.f32 %v5159_v33, %v2623_v30 }
 0x672   : > { %1435 = vperm.xlu1 %4052, %v4181_v25  }
 0x675   : > { %1430 = vperm.xlu0 %4053, %v4183_v29   ;;  %v1427_v29 = vld [vmem:[#allocation5 + $0x8] sm:$0x1] }
 0x676   : > { %1837 = vperm.xlu1 %4052, %v4185_v46  }
 0x679   : > { %1842 = vperm.xlu0 %4053, %v4187_v49  }
 0x67a   : > { %2239 = vperm.xlu1 %4052, %v4189_v55  }
 0x67b   : > { %v1416_v59 = vpop.xlane.xlu0 %1415 }
 0x67c   : > { %v1420_v12 = vadd.f32 %v1416_v59, %v1412_v58  ;;  %v1833_v58 = vld [vmem:[#allocation5 + $0x10] sm:$0xff] }
 0x67d   : > { %2244 = vperm.xlu0 %4053, %v4191_v11  }
 0x67e   : > { %1423 = vst.msk [vmem:[#allocation4] sm:$0xff] %vm1038_vm6, %v1420_v12  ;;  %2641 = vperm.xlu1 %4052, %v5155_v14   ;;  %v1834_v12 = vld [vmem:[#allocation5 + $0x18] sm:$0x1] }
 0x67f   : > { %v1824_v62 = vpop.xlane.xlu0 %1823 }
 0x680   : > { %v1828_v35 = vadd.f32 %v1824_v62, %v1820_v26 }
 0x681   : > { %2646 = vperm.xlu0 %4053, %v5159_v33  }
 0x682   : > { %1830 = vst.msk [vmem:[#allocation4 + $0x10] sm:$0xff] %vm1038_vm6, %v1828_v35  ;;  %v1419_v54 = vpop.xlane.xlu1 %1418 }
 0x683   : > { %v1421_v39 = vadd.f32 %v1419_v54, %v1413_v37  ;;  %v1827_v40 = vpop.xlane.xlu0 %1826  ;;  %v2236_v54 = vld [vmem:[#allocation5 + $0x28] sm:$0x1] }
 0x684   : > { %v1829_v42 = vadd.f32 %v1827_v40, %v1821_v38 }
 0x685   : > { %1425 = vst.msk [vmem:[#allocation4 + $0x8] sm:$0x1] %vm1040_vm14, %v1421_v39  ;;  %v2711_v43 = vld [vmem:[#allocation4] sm:$0xff] }
 0x686   : > { %1831 = vst.msk [vmem:[#allocation4 + $0x18] sm:$0x1] %vm1040_vm14, %v1829_v42  ;;  %v2229_v57 = vpop.xlane.xlu1 %2228  ;;  %4196 = vrcp.f32 %v2711_v43 }
 0x687   : > { %v2231_v47 = vadd.f32 %v2229_v57, %v2223_v34  ;;  %v2226_v36 = vpop.xlane.xlu0 %2225 }
 0x688   : > { %v2230_v4 = vadd.f32 %v2226_v36, %v2222_v44 }
 0x689   : > { %2233 = vst.msk [vmem:[#allocation4 + $0x28] sm:$0x1] %vm1040_vm14, %v2231_v47  ;;  %v2798_v7 = vld [vmem:[#allocation4 + $0x10] sm:$0xff] }
 0x68a   : > { %2232 = vst.msk [vmem:[#allocation4 + $0x20] sm:$0xff] %vm1038_vm6, %v2230_v4  ;;  %4198 = vrcp.f32 %v2798_v7  ;;  %v4160_v7 = vld [vmem:[%s5265_s10 + $0x20] sm:$0xff]  }
 0x68c   : > { %v2712_v51 = vld [vmem:[#allocation4 + $0x8] sm:$0x1] }
 0x68d   : > { %4200 = vrcp.f32 %v2712_v51  ;;  %v2799_v63 = vld [vmem:[#allocation4 + $0x18] sm:$0x1] }
 0x68e   : > { %4202 = vrcp.f32 %v2799_v63 }
 0x690   : > { %v4197_v3 = vpop.eup %4196  ;;  %v2881_v5 = vld [vmem:[#allocation4 + $0x28] sm:$0x1] }
 0x691   : > { %2717 = vperm.xlu1 %4052, %v4197_v3   ;;  %v2880_v45 = vld [vmem:[#allocation4 + $0x20] sm:$0xff] }
 0x692   : > { %4204 = vrcp.f32 %v2880_v45 }
 0x693   : > { %4206 = vrcp.f32 %v2881_v5 }
 0x694   : > { %v4199_v10 = vpop.eup %4198 }
 0x695   : > { %2804 = vperm.xlu1 %4052, %v4199_v10   ;;  %v4161_v10 = vld [vmem:[%s5265_s10 + $0x28] sm:$0xff]  }
 0x697   : > { %v4201_v22 = vpop.eup %4200 }
 0x698   : > { %2722 = vperm.xlu0 %4053, %v4201_v22   ;;  %v4203_v18 = vpop.eup %4202  ;;  %v4162_v22 = vld [vmem:[%s5265_s10 + $0x30] sm:$0xff]  }
 0x69c   : > { %v4205_v20 = vpop.eup %4204  ;;  %2809 = vperm.xlu0 %4053, %v4203_v18  }
 0x69d   : > { %2886 = vperm.xlu1 %4052, %v4205_v20   ;;  %v4207_v27 = vpop.eup %4206 }
 0x6a0   : > { %2891 = vperm.xlu0 %4053, %v4207_v27  }
 0x6ec   : > { %v2628_v24 = vpop.xlane.xlu0 %2627 }
 0x6ed   : > { %v2632_v21 = vadd.f32 %v2628_v24, %v2624_v32  ;;  %v2637_v32 = vld [vmem:[#allocation5 + $0x30] sm:$0xff]  ;;  %v2638_v24 = vld [vmem:[#allocation5 + $0x38] sm:$0x1] }
 0x6ee   : > { %v2631_v25 = vpop.xlane.xlu1 %2630 }
 0x6ef   : > { %2634 = vst.msk [vmem:[#allocation4 + $0x30] sm:$0xff] %vm1038_vm6, %v2632_v21  ;;  %v2633_v28 = vadd.f32 %v2631_v25, %v2625_v23 }
 0x6f1   : > { %2635 = vst.msk [vmem:[#allocation4 + $0x38] sm:$0x1] %vm1040_vm14, %v2633_v28 }
 0x6f2   : > { %v1436_v46 = vpop.permute.xlu1 %1435 }
 0x6f3   : > { %v1439_v49 = vmul.f32 %v1436_v46, %v1427_v29 }
 0x6f4   : > { %v1431_v55 = vpop.permute.xlu0 %1430 }
 0x6f5   : > { %v1493_v59 = vadd.f32 %v4941_v0, %v1439_v49  ;;  %v1438_v8 = vmul.f32 %v1431_v55, %v1426_v48 }
 0x6f6   : > { %v1838_v11 = vpop.permute.xlu1 %1837  ;;  %v2962_v14 = vld [vmem:[#allocation4 + $0x30] sm:$0xff] }
 0x6f7   : > { %1496 = vst.msk [vmem:[#allocation5 + $0x8] sm:$0x1] %vm645_vm1, %v1493_v59  ;;  %v1492_v26 = vadd.f32 %v4939_v61, %v1438_v8  ;;  %v1845_v15 = vmul.f32 %v1838_v11, %v1833_v58  ;;  %4208 = vrcp.f32 %v2962_v14 }
 0x6f8   : > { %v1843_v62 = vpop.permute.xlu0 %1842  ;;  %v2963_v33 = vld [vmem:[#allocation4 + $0x38] sm:$0x1] }
 0x6f9   : > { %1494 = vst.msk [vmem:[#allocation5] sm:$0xff] %vm1056_vm2, %v1492_v26  ;;  %v1895_v35 = vadd.f32 %v5032_v17, %v1845_v15  ;;  %v1846_v37 = vmul.f32 %v1843_v62, %v1834_v12  ;;  %4210 = vrcp.f32 %v2963_v33  ;;  %v3522_v26 = vld [vmem:[%s5266_s11] ss:$0 sm:$0xff] }
 0x6fa   : > { %v2240_v0 = vpop.permute.xlu1 %2239 }
 0x6fb   : > { %1897 = vst.msk [vmem:[#allocation5 + $0x10] sm:$0xff] %vm1056_vm2, %v1895_v35  ;;  %v1896_v38 = vadd.f32 %v5034_v19, %v1846_v37  ;;  %v2247_v56 = vmul.f32 %v2240_v0, %v2235_v2 }
 0x6fc   : > { %v2245_v39 = vpop.permute.xlu0 %2244 }
 0x6fd   : > { %1898 = vst.msk [vmem:[#allocation5 + $0x18] sm:$0x1] %vm645_vm1, %v1896_v38  ;;  %v2297_v61 = vadd.f32 %v5121_v16, %v2247_v56  ;;  %v2248_v40 = vmul.f32 %v2245_v39, %v2236_v54 }
 0x6fe   : > { %v2642_v34 = vpop.permute.xlu1 %2641  ;;  %v2710_v44 = vld [vmem:[#allocation5 + $0x8] sm:$0x1] }
 0x6ff   : > { %2299 = vst.msk [vmem:[#allocation5 + $0x20] sm:$0xff] %vm1056_vm2, %v2297_v61  ;;  %v2298_v41 = vadd.f32 %v5123_v9, %v2248_v40  ;;  %v2649_v21 = vmul.f32 %v2642_v34, %v2637_v32 }
 0x700   : > { %v2647_v43 = vpop.permute.xlu0 %2646  ;;  %v2709_v57 = vld [vmem:[#allocation5] sm:$0xff] }
 0x701   : > { %v4209_v17 = vpop.eup %4208  ;;  %2300 = vst.msk [vmem:[#allocation5 + $0x28] sm:$0x1] %vm645_vm1, %v2298_v41  ;;  %v2650_v25 = vmul.f32 %v2647_v43, %v2638_v24 }
 0x702   : > { %2968 = vperm.xlu1 %4052, %v4209_v17   ;;  %v2796_v51 = vld [vmem:[#allocation5 + $0x10] sm:$0xff] }
 0x703   : > { %v4211_v42 = vpop.eup %4210 }
 0x704   : > { %2973 = vperm.xlu0 %4053, %v4211_v42   ;;  %v2797_v63 = vld [vmem:[#allocation5 + $0x18] sm:$0x1] }
 0x706   : > { %v2878_v31 = vld [vmem:[#allocation5 + $0x20] sm:$0xff] }
 0x708   : > { %v2879_v18 = vld [vmem:[#allocation5 + $0x28] sm:$0x1] }
 0x710   : > { %v2718_v19 = vpop.permute.xlu1 %2717 }
 0x711   : > { %v2725_v36 = vmul.f32 %v2718_v19, %v2709_v57  ;;  %v3042_v19 = vld [vmem:[%s4400_s19] sm:$0xf]  ;;  %v3043_v57 = vld [vmem:[%s4400_s19 + $0x4] sm:$0x1]  ;;  %s3092_s19 = sld [smem:[#allocation7 + %s4257_s1]] }
 0x714   : > { %v2805_v16 = vpop.permute.xlu1 %2804 }
 0x715   : > { %v2812_v45 = vmul.f32 %v2805_v16, %v2796_v51  ;;  %v3045_v16 = vunpack.c.l.bf16 %v3043_v57 }
 0x717   : > { %v2723_v47 = vpop.permute.xlu0 %2722 }
 0x718   : > { %v2726_v4 = vmul.f32 %v2723_v47, %v2710_v44  ;;  %v3044_v44 = vunpack.c.l.bf16 %v3042_v19 }
 0x71a   : > { %v2727_v9 = vpack.c.bf16 %v2726_v4, %v2725_v36 }
 0x71b   : > { %v2810_v3 = vpop.permute.xlu0 %2809 }
 0x71c   : > { %v2813_v5 = vmul.f32 %v2810_v3, %v2797_v63  ;;  %3994 = vmatmul.mubr.msk.bf16.vlgmr.msra.gmra.mrb[40].mxu0 %vm1056_vm2, %v2727_v9  ;;  %v2887_v6 = vpop.permute.xlu1 %2886 }
 0x71d   : > { %4006 = vmatpush3.bf16.msra.mxu0 %v4160_v7  ;;  %4009 = vmatprep.mubr.msk.bf16.mxu0 %vm4270_vm0, %v4269_v1  ;;  %v2894_v20 = vmul.f32 %v2887_v6, %v2878_v31 }
 0x71e   : > { %v2814_v13 = vpack.c.bf16 %v2813_v5, %v2812_v45  ;;  %4007 = vmatprep.subr.bf16.mxu0 %v4269_v1 }
 0x71f   : > { %v2892_v60 = vpop.permute.xlu0 %2891 }
 0x720   : > { %v2895_v27 = vmul.f32 %v2892_v60, %v2879_v18  ;;  %4002 = vmatmul.mubr.msk.bf16.vlgmr.msra.gmra.mrb[40].mxu1 %vm1056_vm2, %v2814_v13 }
 0x721   : > { %4008 = vmatpush3.bf16.msra.mxu0 %v4161_v10  ;;  %4014 = vmatpush3.bf16.msra.mxu1 %v4162_v22 }
 0x722   : > { %v2896_v30 = vpack.c.bf16 %v2895_v27, %v2894_v20  ;;  %4015 = vmatprep.subr.bf16.mxu1 %v4269_v1  ;;  %4017 = vmatprep.mubr.msk.bf16.mxu1 %vm4270_vm0, %v4269_v1  ;;  %vm3052_vm0 = vcmask 1040384  }
 0x723   : > { %vm3113_vm4 = vmand %vm3052_vm0, %vm646_vm3 }
 0x724   : > { %4010 = vmatmul.mubr.msk.bf16.vlgmr.msra.gmra.mrb[44].mxu0 %vm1056_vm2, %v2896_v30 }
 0x725   : > { %4016 = vmatpush3.bf16.msra.mxu1 %v4163_v52 }
 0x735   : > { %v2692_v23 = vpop.f32.mrb[36].mxu1 }
 0x736   : > { %v2699_v28 = vadd.f32 %v2692_v23, %v2649_v21  ;;  %v3987_v29 = vpop.f32.mrb[37].mxu1  ;;  %v3093_v23 = vstv %s3092_s19 }
 0x737   : > { %v2695_v46 = vpop.f32.mrb[38].mxu1 }
 0x738   : > { %2701 = vst.msk [vmem:[#allocation5 + $0x30] sm:$0xff] %vm1056_vm2, %v2699_v28  ;;  %v2700_v48 = vadd.f32 %v2695_v46, %v2650_v25  ;;  %v3988_v49 = vpop.f32.mrb[39].mxu1  ;;  %v3544_v28 = vld [vmem:[%s5267_s12] ss:$0 sm:$0xff] }
 0x739   : > { %v3545_v46 = vld [vmem:[%s5268_s13] ss:$0 sm:$0xff] }
 0x73a   : > { %2702 = vst.msk [vmem:[#allocation5 + $0x38] sm:$0x1] %vm645_vm1, %v2700_v48  ;;  %vm3094_vm1 = vcmp.lt.s32.totalorder %v4709_v50, %v3093_v23 }
 0x73f   : > { %v2960_v58 = vld [vmem:[#allocation5 + $0x30] sm:$0xff] }
 0x741   : > { %v2961_v59 = vld [vmem:[#allocation5 + $0x38] sm:$0x1] }
 0x781   : > { %v2969_v55 = vpop.permute.xlu1 %2968 }
 0x782   : > { %v2976_v11 = vmul.f32 %v2969_v55, %v2960_v58  ;;  %v3546_v55 = vsel %vm3094_vm1, 1.0, %v4269_v1 }
 0x783   : > { %v2974_v8 = vpop.permute.xlu0 %2973 }
 0x784   : > { %v2977_v12 = vmul.f32 %v2974_v8, %v2961_v59 }
 0x786   : > { %v2978_v14 = vpack.c.bf16 %v2977_v12, %v2976_v11 }
 0x788   : > { %4018 = vmatmul.mubr.msk.bf16.vlgmr.msra.gmra.mrb[44].mxu1 %vm1056_vm2, %v2978_v14  ;;  %vm3095_vm2 = vcmp.lt.s32.totalorder %v4712_v53, %v3093_v23 }
 0x789   : > { %v3547_v50 = vsel %vm3095_vm2, 1.0, %v4269_v1 }
 0x7ef   : > { %v2781_v15 = vpop.f32.mrb[40].mxu0 }
 0x7f0   : > { %v3995_v62 = vpop.f32.mrb[41].mxu0  ;;  %v2794_v33 = vadd.f32 %v3522_v26, %v2781_v15  ;;  %v3114_v15 = vld [vmem:[%s506_s25 + $0x4] sm:$0x1] }
 0x7f1   : > { %v2784_v2 = vpop.f32.mrb[42].mxu0 }
 0x7f2   : > { %v3996_v35 = vpop.f32.mrb[43].mxu0  ;;  %v2795_v0 = vadd.f32 %v3522_v26, %v2784_v2 }
 0x7f3   : > { %v2869_v37 = vpop.f32.mrb[40].mxu1 }
 0x7f4   : > { %v2876_v54 = vadd.f32 %v2869_v37, %v2794_v33  ;;  %v4003_v38 = vpop.f32.mrb[41].mxu1 }
 0x7f5   : > { %v2872_v56 = vpop.f32.mrb[42].mxu1 }
 0x7f6   : > { %v2877_v39 = vadd.f32 %v2872_v56, %v2795_v0  ;;  %v4004_v61 = vpop.f32.mrb[43].mxu1 }
 0x7f7   : > { %v2951_v40 = vpop.f32.mrb[44].mxu0 }
 0x7f8   : > { %v2958_v41 = vadd.f32 %v2951_v40, %v2876_v54  ;;  %v4011_v17 = vpop.f32.mrb[45].mxu0 }
 0x7f9   : > { %v2954_v42 = vpop.f32.mrb[46].mxu0 }
 0x7fa   : > { %v2959_v34 = vadd.f32 %v2954_v42, %v2877_v39  ;;  %v4012_v43 = vpop.f32.mrb[47].mxu0 }
 0x85b   : > { %v3033_v47 = vpop.f32.mrb[44].mxu1 }
 0x85c   : > { %v3040_v36 = vadd.f32 %v3033_v47, %v2958_v41  ;;  %v4019_v4 = vpop.f32.mrb[45].mxu1 }
 0x85d   : > { %v3036_v7 = vpop.f32.mrb[46].mxu1 }
 0x85e   : > { %v3041_v9 = vadd.f32 %v3036_v7, %v2959_v34  ;;  %v4020_v51 = vpop.f32.mrb[47].mxu1  ;;  %v3046_v63 = vadd.f32 %v3044_v44, %v3040_v36 }
 0x860   : > { %3050 = vadd.xlane.f32.xlu0 %v3046_v63  ;;  %v3047_v3 = vadd.f32 %v3045_v16, %v3041_v9 }
 0x862   : > { %v3053_v45 = vsel %vm3052_vm0, %v3047_v3, 0.0 }
 0x863   : > { %3054 = vadd.xlane.f32.xlu1 %v3053_v45 }
 0x8ed   : > { %v3051_v5 = vpop.xlane.xlu0 %3050 }
 0x8ee   : > { %v3057_v6 = vmul.f32 0.0078125, %v3051_v5 }
 0x8f0   : > { %v3059_v10 = vsub.f32 %v3046_v63, %v3057_v6  ;;  %v3055_v22 = vpop.xlane.xlu1 %3054 }
 0x8f1   : > { %v3058_v13 = vmul.f32 0.0078125, %v3055_v22 }
 0x8f2   : > { %v3061_v31 = vmul.f32 %v3059_v10, %v3059_v10 }
 0x8f3   : > { %v3060_v18 = vsub.f32 %v3047_v3, %v3058_v13 }
 0x8f4   : > { %3063 = vadd.xlane.f32.xlu0 %v3061_v31 }
 0x8f5   : > { %v3062_v60 = vmul.f32 %v3060_v18, %v3060_v18 }
 0x8f7   : > { %v3065_v20 = vsel %vm3052_vm0, %v3062_v60, 0.0 }
 0x8f8   : > { %3066 = vadd.xlane.f32.xlu1 %v3065_v20 }
 0x981   : > { %v3064_v27 = vpop.xlane.xlu0 %3063 }
 0x982   : > { %v3068_v52 = vmul.f32 0.0078125, %v3064_v27 }
 0x984   : > { %v3070_v30 = vadd.f32 1e-05, %v3068_v52 }
 0x985   : > { %v3067_v32 = vpop.xlane.xlu1 %3066 }
 0x986   : > { %4212 = vrsqrt.f32 %v3070_v30  ;;  %v3069_v24 = vmul.f32 0.0078125, %v3067_v32 }
 0x988   : > { %v3071_v21 = vadd.f32 1e-05, %v3069_v24 }
 0x98a   : > { %4214 = vrsqrt.f32 %v3071_v21 }
 0x990   : > { %v4213_v25 = vpop.eup %4212 }
 0x991   : > { %v3074_v29 = vmul.f32 %v4213_v25, %v3059_v10 }
 0x993   : > { %v3082_v48 = vmul.f32 %v3544_v28, %v3074_v29 }
 0x994   : > { %v4215_v49 = vpop.eup %4214 }
 0x995   : > { %v3090_v58 = vadd.f32 %v3545_v46, %v3082_v48  ;;  %v3075_v59 = vmul.f32 %v4215_v49, %v3060_v18 }
 0x997   : > { %v3100_v8 = vmul.f32 %v3546_v55, %v3090_v58  ;;  %v3083_v11 = vmul.f32 %v3544_v28, %v3075_v59 }
 0x999   : > { %v3563_v12 = vpack.c.bf16 %v3100_v8, %v3100_v8  ;;  %v3091_v14 = vadd.f32 %v3545_v46, %v3083_v11 }
 0x99b   : > { %3110 = vst [vmem:[%s506_s25] sm:$0xf] %v3563_v12  ;;  %v3101_v26 = vmul.f32 %v3547_v50, %v3091_v14 }
 0x99d   : > { %v3564_v62 = vpack.c.bf16 %v3101_v26, %v3101_v26 }
 0x99f   : > { %v3115_v53 = vsel %vm3113_vm4, %v3564_v62, %v3114_v15 }
 0x9a0   : > { %3116 = vst [vmem:[%s506_s25 + $0x4] sm:$0x1] %v3115_v53 }
 0x9a1 PF: > { %s34_s23 = sadd.s32 1, %s4265_s23   ;;  %s5273_s1 = smov %s4261_s22 }
 0x9a2   : > { %p31_p1 = scmp.ge.s32.totalorder %s34_s23, 4   ;;  %s5274_s22 = smov %s5276_s24 }
 0x9a4   :  { %33 = sbr.rel (!%p31_p1) target bundleno = 27 (0x1b), region = 145 }

// kernel: _lambda_.13
= control target key start
LH: loop header
LB: loop body
LE: loop exit
PB: predicated region body
PF: predicated region fallthrough
CT: control target
= control target key end

     0   :  { %s5097_s0 = inlined_call_operand.vmem [shape: s32[2], index: 0, kind: input, shape index: {}, may-alias: {0,1}]   ;;  %s5098_s2 = inlined_call_operand.vmem [shape: bf16[2,16,128], index: 2, kind: input, shape index: {}, may-alias: {2,3}]   ;;  %s5099_s3 = inlined_call_operand.vmem [shape: bf16[2,16,128], index: 3, kind: input, shape index: {}, may-alias: {2,3}]   ;;  %s5100_s4 = inlined_call_operand.vmem [shape: bf16[4,128,32], index: 4, kind: input, shape index: {}]   ;;  %s5101_s5 = inlined_call_operand.vmem [shape: f32[4,1,32], index: 5, kind: input, shape index: {}]   ;;  %s5102_s6 = inlined_call_operand.vmem [shape: bf16[4,128,32], index: 6, kind: input, shape index: {}]   ;;  %s5103_s7 = inlined_call_operand.vmem [shape: f32[4,1,32], index: 7, kind: input, shape index: {}]   ;;  %s5104_s8 = inlined_call_operand.vmem [shape: bf16[4,128,32], index: 8, kind: input, shape index: {}]   ;;  %s5105_s9 = inlined_call_operand.vmem [shape: f32[4,1,32], index: 9, kind: input, shape index: {}]   ;;  %s5106_s10 = inlined_call_operand.vmem [shape: bf16[4,32,128], index: 10, kind: input, shape index: {}]   ;;  %s5107_s11 = inlined_call_operand.vmem [shape: f32[1,128], index: 11, kind: input, shape index: {}]   ;;  %s5108_s12 = inlined_call_operand.vmem [shape: f32[1,128], index: 12, kind: input, shape index: {}]   ;;  %s5109_s13 = inlined_call_operand.vmem [shape: f32[1,128], index: 13, kind: input, shape index: {}]   ;;  %s5110_s14 = inlined_call_operand.vmem [shape: bf16[2,16,128], index: 14, kind: output, shape index: {}]   ;;  %s5111_s1 = inlined_call_operand.vmem [shape: s32[2], index: 1, kind: input, shape index: {}, may-alias: {0,1}]  }
   0x1   :  { %s19_s15 = sshll.u32 %s5097_s0, 4  ;;  %s23_s18 = sshll.u32 %s5111_s1, 4  ;;  %s20_s15 = int_to_ptr.vmem [resolvable:$true] %s19_s15  ;;  %s24_s18 = int_to_ptr.vmem [resolvable:$true] %s23_s18 }
   0x2   :  { %s4099_s19 = scalar_lea.vmem %s20_s15, 16  ;;  %p4104_p1 = scmp.lt.s32.totalorder %s20_s15, %s20_s15 }
   0x3   :  { %p4100_p0 = scmp.ne.s32.totalorder %s20_s15, %s4099_s19  ;;  %p4105_p2 = scmp.lt.s32.totalorder %s4099_s19, %s4099_s19 }
   0x5   :  { %p4106_p3 = por %p4105_p2, %p4104_p1 }
   0x7   :  { %p4107_p4 = pnand %p4106_p3, %p4100_p0 }
   0x9   :  { %4110 = shalt.err (!%p4107_p4)  }
   0xa   :  { %s4149_s20 = smov [#allocation7]   ;;  %s4111_s21 = scalar_lea.vmem %s24_s18, 16 }
   0xb   :  { %22 = dma.vmem_to_smem %s20_s15, 16, %s4149_s20, [#allocation6] }
   0xc   :  { %p4112_p5 = scmp.ne.s32.totalorder %s24_s18, %s4111_s21  ;;  %p4116_p6 = scmp.lt.s32.totalorder %s24_s18, %s24_s18 }
   0xd   :  { %p4117_p7 = scmp.lt.s32.totalorder %s4111_s21, %s4111_s21 }
   0xf   :  { %p4118_p8 = por %p4117_p7, %p4116_p6 }
  0x11   :  { %p4119_p9 = pnand %p4118_p8, %p4112_p5 }
  0x13   :  { %4122 = shalt.err (!%p4119_p9)  }
  0x14   :  { %s4150_s0 = smov [#allocation8]  }
  0x15   :  { %26 = dma.vmem_to_smem %s24_s18, 16, %s4150_s0, [#allocation6] }
  0x16   :  { %4135 = dma.done.wait [#allocation6], 32 }
  0x17   :  { %4136 = vsyncadd [#allocation6], 4294967264 }
  0x18   :  { %28 = sfence }
  0x19   :  { %s4236_s1 = smov 0   ;;  %s4238_s22 = smov 0  }
  0x1a   :  { %s4240_s23 = smov 0  }
  0x1b LB: > { %s53_s24 = sadd.s32 1, %s4143_s22  ;;  %p3127_p10 = scmp.ge.s32.totalorder %s4147_s23, 1  ;;  %s4147_s23 = sphi %s4240_s23, %s34_s23   ;;  %s4143_s22 = sphi %s4238_s22, %s5113_s22   ;;  %s4139_s1 = sphi %s4236_s1, %s5112_s1  }
  0x1c   : > { %p55_p11 = scmp.ge.s32.totalorder %s53_s24, 2  ;;  %p419_p12 = scmp.lt.s32.totalorder %s4147_s23, 3 }
  0x1e   : > { %s5115_s24 = smov (%p55_p11, %s53_s24), 0  ;;  %p420_p13 = pnand %p3127_p10, %p419_p12 }
  0x1f   : > { %v3940_v0 = vld [vmem:[%s5100_s4] sm:$0xff] (!%p420_p13)   ;;  %v4151_v1 = vmov (!%p420_p13), 0.0   ;;  %v3941_v2 = vld [vmem:[%s5100_s4 + $0x8] sm:$0xff] (!%p420_p13)   ;;  %vm4152_vm0 = vmmov (!%p420_p13), 0   ;;  %p479_p0 = scmp.lt.s32.totalorder (!%p420_p13), %s4139_s1, 1  ;;  %v3942_v3 = vld [vmem:[%s5100_s4 + $0x10] sm:$0xff] (!%p420_p13)  }
  0x20   : > { %423 = sbr.rel (%p420_p13) target bundleno = 2462 (0x99e), region = 68  ;;  %3588 = vmatprep.subr.bf16.mxu0 (!%p420_p13), %v4151_v1  ;;  %3608 = vmatprep.subr.bf16.mxu1 (!%p420_p13), %v4151_v1  ;;  %v3943_v4 = vld [vmem:[%s5100_s4 + $0x18] sm:$0xff] (!%p420_p13)   ;;  %v3944_v5 = vld [vmem:[%s5100_s4 + $0x20] sm:$0xff] (!%p420_p13)   ;;  %v3945_v6 = vld [vmem:[%s5100_s4 + $0x28] sm:$0xff] (!%p420_p13)   ;;  %vm636_vm1 = vcmask (!%p420_p13), 261120   ;;  %vm995_vm2 = vcmask (!%p420_p13), 7168  }
  0x21   : > { %3589 = vmatpush3.bf16.msra.mxu0 (!%p420_p13), %v3940_v0  ;;  %3604 = vmatprep.mubr.msk.bf16.mxu0 (!%p420_p13), %vm4152_vm0, %v4151_v1  ;;  %v3946_v7 = vld [vmem:[%s5100_s4 + $0x30] sm:$0xff] (!%p420_p13)   ;;  %v3947_v8 = vld [vmem:[%s5100_s4 + $0x38] sm:$0xff] (!%p420_p13)   ;;  %v3950_v10 = vld [vmem:[%s5100_s4 + $0x80] sm:$0xff] (!%p420_p13)   ;;  %1012 = vst.msk [vmem:[#allocation5] sm:$0xff] (!%p420_p13), %vm636_vm1, %v4151_v1  ;;  %vm1314_vm4 = vcmask (!%p420_p13), 130048  }
  0x22   : > { %3590 = vmatprep.subr.bf16.mxu0 (!%p420_p13), %v4151_v1  ;;  %3624 = vmatprep.mubr.msk.bf16.mxu1 (!%p420_p13), %vm4152_vm0, %v4151_v1  ;;  %v3951_v11 = vld [vmem:[%s5100_s4 + $0x88] sm:$0xff] (!%p420_p13)   ;;  %v3952_v12 = vld [vmem:[%s5100_s4 + $0x90] sm:$0xff] (!%p420_p13)   ;;  %v3953_v13 = vld [vmem:[%s5100_s4 + $0x98] sm:$0xff] (!%p420_p13)   ;;  %1013 = vst.msk [vmem:[#allocation5 + $0x8] sm:$0xff] (!%p420_p13), %vm636_vm1, %v4151_v1 }
  0x23   : > { %v3954_v14 = vld [vmem:[%s5100_s4 + $0xa0] sm:$0xff] (!%p420_p13)   ;;  %v3955_v15 = vld [vmem:[%s5100_s4 + $0xa8] sm:$0xff] (!%p420_p13)   ;;  %v3956_v16 = vld [vmem:[%s5100_s4 + $0xb0] sm:$0xff] (!%p420_p13)   ;;  %1014 = vst.msk [vmem:[#allocation5 + $0x10] sm:$0xff] (!%p420_p13), %vm636_vm1, %v4151_v1 }
  0x24   : > { %v3957_v17 = vld [vmem:[%s5100_s4 + $0xb8] sm:$0xff] (!%p420_p13)   ;;  %v3958_v18 = vld [vmem:[%s5102_s6] sm:$0xff] (!%p420_p13)   ;;  %v3959_v19 = vld [vmem:[%s5102_s6 + $0x8] sm:$0xff] (!%p420_p13)   ;;  %1015 = vst.msk [vmem:[#allocation5 + $0x18] sm:$0xff] (!%p420_p13), %vm636_vm1, %v4151_v1 }
  0x25   : > { %3591 = vmatpush3.bf16.msra.mxu0 (!%p420_p13), %v3941_v2  ;;  %v3960_v20 = vld [vmem:[%s5102_s6 + $0x10] sm:$0xff] (!%p420_p13)   ;;  %v3961_v21 = vld [vmem:[%s5102_s6 + $0x18] sm:$0xff] (!%p420_p13)   ;;  %v3962_v22 = vld [vmem:[%s5102_s6 + $0x20] sm:$0xff] (!%p420_p13)   ;;  %1016 = vst.msk [vmem:[#allocation5 + $0x20] sm:$0xff] (!%p420_p13), %vm636_vm1, %v4151_v1 }
  0x26   : > { %3592 = vmatprep.subr.bf16.mxu0 (!%p420_p13), %v4151_v1  ;;  %v3963_v23 = vld [vmem:[%s5102_s6 + $0x28] sm:$0xff] (!%p420_p13)   ;;  %v3964_v24 = vld [vmem:[%s5102_s6 + $0x30] sm:$0xff] (!%p420_p13)   ;;  %v3965_v25 = vld [vmem:[%s5102_s6 + $0x38] sm:$0xff] (!%p420_p13)   ;;  %1017 = vst.msk [vmem:[#allocation5 + $0x28] sm:$0xff] (!%p420_p13), %vm636_vm1, %v4151_v1 }
  0x27   : > { %s480_s29 = scalar_select %p479_p0, %s4139_s1, 1  ;;  %1018 = vst.msk [vmem:[#allocation5 + $0x30] sm:$0xff] %vm636_vm1, %v4151_v1  ;;  %1019 = vst.msk [vmem:[#allocation5 + $0x38] sm:$0xff] %vm636_vm1, %v4151_v1  ;;  %v3966_v27 = vld [vmem:[%s5100_s4 + $0x40] sm:$0xff]   ;;  %v3967_v28 = vld [vmem:[%s5100_s4 + $0x48] sm:$0xff]  }
  0x28   : > { %3609 = vmatpush3.bf16.msra.mxu1 %v3966_v27  ;;  %v3969_v29 = vld [vmem:[%s5100_s4 + $0x50] sm:$0xff]   ;;  %v3971_v30 = vld [vmem:[%s5100_s4 + $0x58] sm:$0xff]   ;;  %v3973_v31 = vld [vmem:[%s5100_s4 + $0x60] sm:$0xff]   ;;  %1004 = vst.msk [vmem:[#allocation4] sm:$0xff] %vm995_vm2, %v4151_v1 }
  0x29   : > { %s4274_s16 = sshll.u32 %s480_s29, 3  ;;  %3593 = vmatpush3.bf16.msra.mxu0 %v3942_v3  ;;  %3610 = vmatprep.subr.bf16.mxu1 %v4151_v1  ;;  %v3975_v32 = vld [vmem:[%s5100_s4 + $0x68] sm:$0xff]   ;;  %v3977_v33 = vld [vmem:[%s5100_s4 + $0x70] sm:$0xff]   ;;  %v3979_v34 = vld [vmem:[%s5100_s4 + $0x78] sm:$0xff]   ;;  %1005 = vst.msk [vmem:[#allocation4 + $0x8] sm:$0xff] %vm995_vm2, %v4151_v1  ;;  %s1025_s29 = sld [smem:[#allocation8 + %s4139_s1]] }
  0x2a   : > { %s4281_s19 = scalar_lea.vmem %s5098_s2, %s4274_s16  ;;  %s4287_s0 = scalar_lea.vmem %s5099_s3, %s4274_s16  ;;  %3594 = vmatprep.subr.bf16.mxu0 %v4151_v1  ;;  %v3134_v35 = vld [vmem:[%s5101_s5] ss:$0 sm:$0xff]  ;;  %v3187_v45 = vld [vmem:[%s5101_s5 + $0x2] ss:$0 sm:$0xff]  ;;  %v3970_v3 = vld [vmem:[%s5102_s6 + $0x48] sm:$0xff]   ;;  %1006 = vst.msk [vmem:[#allocation4 + $0x10] sm:$0xff] %vm995_vm2, %v4151_v1 }
  0x2b   : > { %v4310_v9 = vld [vmem:[%s4281_s19] sm:$0xff]   ;;  %1007 = vst.msk [vmem:[#allocation4 + $0x18] sm:$0xff] %vm995_vm2, %v4151_v1  ;;  %1008 = vst.msk [vmem:[#allocation4 + $0x20] sm:$0xff] %vm995_vm2, %v4151_v1  ;;  %s506_s25 = scalar_lea.vmem %s5110_s14, %s4274_s16 }
  0x2c   : > { %v4383_v26 = vld [vmem:[%s4287_s0] sm:$0xff]   ;;  %3611 = vmatpush3.bf16.msra.mxu1 %v3967_v28  ;;  %v3988_v28 = vld [vmem:[%s5100_s4 + $0xf0] sm:$0xff]   ;;  %1009 = vst.msk [vmem:[#allocation4 + $0x28] sm:$0xff] %vm995_vm2, %v4151_v1  ;;  %1010 = vst.msk [vmem:[#allocation4 + $0x30] sm:$0xff] %vm995_vm2, %v4151_v1 }
  0x2d   : > { %3595 = vmatpush3.bf16.msra.mxu0 %v3943_v4  ;;  %3612 = vmatprep.subr.bf16.mxu1 %v4151_v1  ;;  %v3222_v55 = vld [vmem:[%s5103_s7] ss:$0 sm:$0xff]  ;;  %v3972_v4 = vld [vmem:[%s5102_s6 + $0x50] sm:$0xff]   ;;  %1011 = vst.msk [vmem:[#allocation4 + $0x38] sm:$0xff] %vm995_vm2, %v4151_v1 }
  0x2e   : > { %3596 = vmatprep.subr.bf16.mxu0 %v4151_v1  ;;  %v3968_v0 = vld [vmem:[%s5102_s6 + $0x40] sm:$0xff]  }
  0x30   : > { %3613 = vmatpush3.bf16.msra.mxu1 %v3969_v29  ;;  %v3989_v29 = vld [vmem:[%s5100_s4 + $0xf8] sm:$0xff]  }
  0x31   : > { %3597 = vmatpush3.bf16.msra.mxu0 %v3944_v5  ;;  %3614 = vmatprep.subr.bf16.mxu1 %v4151_v1  ;;  %v3974_v5 = vld [vmem:[%s5102_s6 + $0x58] sm:$0xff]  }
  0x32   : > { %3598 = vmatprep.subr.bf16.mxu0 %v4151_v1 }
  0x34   : > { %3615 = vmatpush3.bf16.msra.mxu1 %v3971_v30  ;;  %v3990_v30 = vld [vmem:[%s5104_s8] sm:$0xff]  }
  0x35   : > { %3599 = vmatpush3.bf16.msra.mxu0 %v3945_v6  ;;  %3616 = vmatprep.subr.bf16.mxu1 %v4151_v1  ;;  %v3976_v6 = vld [vmem:[%s5102_s6 + $0x60] sm:$0xff]  }
  0x36   : > { %3600 = vmatprep.subr.bf16.mxu0 %v4151_v1 }
  0x38   : > { %3617 = vmatpush3.bf16.msra.mxu1 %v3973_v31  ;;  %v3992_v31 = vld [vmem:[%s5104_s8 + $0x8] sm:$0xff]  }
  0x39   : > { %3601 = vmatpush3.bf16.msra.mxu0 %v3946_v7  ;;  %3618 = vmatprep.subr.bf16.mxu1 %v4151_v1  ;;  %v3978_v7 = vld [vmem:[%s5102_s6 + $0x68] sm:$0xff]  }
  0x3a   : > { %3602 = vmatprep.subr.bf16.mxu0 %v4151_v1 }
  0x3c   : > { %3619 = vmatpush3.bf16.msra.mxu1 %v3975_v32  ;;  %v3994_v32 = vld [vmem:[%s5104_s8 + $0x10] sm:$0xff]  }
  0x3d   : > { %3603 = vmatpush3.bf16.msra.mxu0 %v3947_v8  ;;  %3620 = vmatprep.subr.bf16.mxu1 %v4151_v1  ;;  %v3980_v8 = vld [vmem:[%s5102_s6 + $0x70] sm:$0xff]  }
  0x3e   : > { %3628 = vmatprep.subr.bf16.mxu0 %v4151_v1 }
  0x40   : > { %3605 = vmatmul.mubr.bf16.vlgmr.msra.gmra.mrb[0].mxu0 %v4310_v9  ;;  %3621 = vmatpush3.bf16.msra.mxu1 %v3977_v33  ;;  %v3998_v33 = vld [vmem:[%s5104_s8 + $0x20] sm:$0xff]  }
  0x41   : > { %3629 = vmatpush3.bf16.msra.mxu0 %v3950_v10  ;;  %3644 = vmatprep.mubr.msk.bf16.mxu0 %vm4152_vm0, %v4151_v1  ;;  %v3981_v10 = vld [vmem:[%s5102_s6 + $0x78] sm:$0xff]  }
  0x42   : > { %3630 = vmatprep.subr.bf16.mxu0 %v4151_v1  ;;  %3622 = vmatprep.subr.bf16.mxu1 %v4151_v1 }
  0x44   : > { %3623 = vmatpush3.bf16.msra.mxu1 %v3979_v34  ;;  %v4000_v34 = vld [vmem:[%s5104_s8 + $0x28] sm:$0xff]  }
  0x45   : > { %3631 = vmatpush3.bf16.msra.mxu0 %v3951_v11  ;;  %3648 = vmatprep.subr.bf16.mxu1 %v4151_v1  ;;  %v3982_v11 = vld [vmem:[%s5100_s4 + $0xc0] sm:$0xff]  }
  0x46   : > { %3632 = vmatprep.subr.bf16.mxu0 %v4151_v1 }
  0x47   : > { %3625 = vmatmul.mubr.bf16.vlgmr.msra.gmra.mrb[0].mxu1 %v4310_v9 }
  0x48   : > { %3664 = vmatprep.mubr.msk.bf16.mxu1 %vm4152_vm0, %v4151_v1  ;;  %3649 = vmatpush3.bf16.msra.mxu1 %v3982_v11 }
  0x49   : > { %3633 = vmatpush3.bf16.msra.mxu0 %v3952_v12  ;;  %v3983_v12 = vld [vmem:[%s5100_s4 + $0xc8] sm:$0xff]   ;;  %3650 = vmatprep.subr.bf16.mxu1 %v4151_v1 }
  0x4a   : > { %3634 = vmatprep.subr.bf16.mxu0 %v4151_v1 }
  0x4c   : > { %3651 = vmatpush3.bf16.msra.mxu1 %v3983_v12 }
  0x4d   : > { %3635 = vmatpush3.bf16.msra.mxu0 %v3953_v13  ;;  %v3984_v13 = vld [vmem:[%s5100_s4 + $0xd0] sm:$0xff]   ;;  %3652 = vmatprep.subr.bf16.mxu1 %v4151_v1 }
  0x4e   : > { %3636 = vmatprep.subr.bf16.mxu0 %v4151_v1 }
  0x50   : > { %3653 = vmatpush3.bf16.msra.mxu1 %v3984_v13 }
  0x51   : > { %3637 = vmatpush3.bf16.msra.mxu0 %v3954_v14  ;;  %v3985_v14 = vld [vmem:[%s5100_s4 + $0xd8] sm:$0xff]   ;;  %3654 = vmatprep.subr.bf16.mxu1 %v4151_v1 }
  0x52   : > { %3638 = vmatprep.subr.bf16.mxu0 %v4151_v1 }
  0x54   : > { %3655 = vmatpush3.bf16.msra.mxu1 %v3985_v14 }
  0x55   : > { %3639 = vmatpush3.bf16.msra.mxu0 %v3955_v15  ;;  %v3986_v15 = vld [vmem:[%s5100_s4 + $0xe0] sm:$0xff]   ;;  %3656 = vmatprep.subr.bf16.mxu1 %v4151_v1 }
  0x56   : > { %3640 = vmatprep.subr.bf16.mxu0 %v4151_v1 }
  0x58   : > { %3657 = vmatpush3.bf16.msra.mxu1 %v3986_v15 }
  0x59   : > { %3641 = vmatpush3.bf16.msra.mxu0 %v3956_v16  ;;  %v3161_v16 = vld [vmem:[%s5101_s5 + $0x1] ss:$0 sm:$0xff]  ;;  %3658 = vmatprep.subr.bf16.mxu1 %v4151_v1 }
  0x5a   : > { %3642 = vmatprep.subr.bf16.mxu0 %v4151_v1 }
  0x5d   : > { %3643 = vmatpush3.bf16.msra.mxu0 %v3957_v17 }
  0x5e   : > { %3668 = vmatprep.subr.bf16.mxu0 %v4151_v1 }
  0x60   : > { %3645 = vmatmul.mubr.bf16.vlgmr.msra.gmra.mrb[4].mxu0 %v4310_v9 }
  0x61   : > { %3669 = vmatpush3.bf16.msra.mxu0 %v3958_v18  ;;  %3684 = vmatprep.mubr.msk.bf16.mxu0 %vm4152_vm0, %v4151_v1 }
  0x62   : > { %3670 = vmatprep.subr.bf16.mxu0 %v4151_v1 }
  0x65   : > { %3671 = vmatpush3.bf16.msra.mxu0 %v3959_v19 }
  0x66   : > { %3672 = vmatprep.subr.bf16.mxu0 %v4151_v1 }
  0x69   : > { %3673 = vmatpush3.bf16.msra.mxu0 %v3960_v20 }
  0x6a   : > { %3674 = vmatprep.subr.bf16.mxu0 %v4151_v1 }
  0x6d   : > { %3675 = vmatpush3.bf16.msra.mxu0 %v3961_v21 }
  0x6e   : > { %3676 = vmatprep.subr.bf16.mxu0 %v4151_v1 }
  0x71   : > { %3677 = vmatpush3.bf16.msra.mxu0 %v3962_v22 }
  0x72   : > { %3678 = vmatprep.subr.bf16.mxu0 %v4151_v1 }
  0x75   : > { %3679 = vmatpush3.bf16.msra.mxu0 %v3963_v23 }
  0x76   : > { %3680 = vmatprep.subr.bf16.mxu0 %v4151_v1 }
  0x79   : > { %3681 = vmatpush3.bf16.msra.mxu0 %v3964_v24  ;;  %v3987_v24 = vld [vmem:[%s5100_s4 + $0xe8] sm:$0xff]  }
  0x7a   : > { %3682 = vmatprep.subr.bf16.mxu0 %v4151_v1  ;;  %3659 = vmatpush3.bf16.msra.mxu1 %v3987_v24 }
  0x7b   : > { %3660 = vmatprep.subr.bf16.mxu1 %v4151_v1 }
  0x7d   : > { %3683 = vmatpush3.bf16.msra.mxu0 %v3965_v25 }
  0x7e   : > { %3708 = vmatprep.subr.bf16.mxu0 %v4151_v1  ;;  %3661 = vmatpush3.bf16.msra.mxu1 %v3988_v28 }
  0x7f   : > { %3662 = vmatprep.subr.bf16.mxu1 %v4151_v1 }
  0x80   : > { %3685 = vmatmul.mubr.bf16.vlgmr.msra.gmra.mrb[8].mxu0 %v4383_v26 }
  0x81   : > { %3710 = vmatprep.mubr.msk.bf16.mxu0 %vm4152_vm0, %v4151_v1 }
  0x82   : > { %3663 = vmatpush3.bf16.msra.mxu1 %v3989_v29 }
  0x83   : > { %3688 = vmatprep.subr.bf16.mxu1 %v4151_v1 }
  0x85   : > { %3665 = vmatmul.mubr.bf16.vlgmr.msra.gmra.mrb[4].mxu1 %v4310_v9  ;;  %v3996_v9 = vld [vmem:[%s5104_s8 + $0x18] sm:$0xff]  }
  0x86   : > { %3689 = vmatpush3.bf16.msra.mxu1 %v3990_v30  ;;  %3704 = vmatprep.mubr.msk.bf16.mxu1 %vm4152_vm0, %v4151_v1 }
  0x87   : > { %3690 = vmatprep.subr.bf16.mxu1 %v4151_v1 }
  0x8a   : > { %3691 = vmatpush3.bf16.msra.mxu1 %v3992_v31 }
  0x8b   : > { %3692 = vmatprep.subr.bf16.mxu1 %v4151_v1 }
  0x8e   : > { %3693 = vmatpush3.bf16.msra.mxu1 %v3994_v32 }
  0x8f   : > { %3694 = vmatprep.subr.bf16.mxu1 %v4151_v1 }
  0x92   : > { %3695 = vmatpush3.bf16.msra.mxu1 %v3996_v9 }
  0x93   : > { %3696 = vmatprep.subr.bf16.mxu1 %v4151_v1 }
  0x96   : > { %3697 = vmatpush3.bf16.msra.mxu1 %v3998_v33 }
  0x97   : > { %3698 = vmatprep.subr.bf16.mxu1 %v4151_v1 }
  0x9a   : > { %3699 = vmatpush3.bf16.msra.mxu1 %v4000_v34 }
  0x9b   : > { %3700 = vmatprep.subr.bf16.mxu1 %v4151_v1 }
 0x113   : > { %v626_v36 = vpop.f32.mrb[0].mxu0 }
 0x114   : > { %v627_v37 = vadd.f32 %v3134_v35, %v626_v36  ;;  %v3606_v38 = vpop.f32.mrb[1].mxu0  ;;  %v4004_v36 = vld [vmem:[%s5104_s8 + $0x38] sm:$0xff]  }
 0x115   : > { %v629_v39 = vpop.f32.mrb[2].mxu0  ;;  %v1021_v38 = vlaneseq }
 0x116   : > { %v633_v40 = vmul.f32 0.17677669, %v627_v37  ;;  %v630_v41 = vadd.f32 %v3134_v35, %v629_v39  ;;  %v3607_v42 = vpop.f32.mrb[3].mxu0  ;;  %v4002_v35 = vld [vmem:[%s5104_s8 + $0x30] sm:$0xff]   ;;  %v4153_v37 = vmov -inf  }
 0x117   : > { %3701 = vmatpush3.bf16.msra.mxu1 %v4002_v35  ;;  %996 = vst.msk [vmem:[#allocation3] sm:$0xff] %vm995_vm2, %v4153_v37  ;;  %997 = vst.msk [vmem:[#allocation3 + $0x8] sm:$0xff] %vm995_vm2, %v4153_v37  ;;  %v1022_v39 = vand.u32 127, %v1021_v38 }
 0x118   : > { %v634_v43 = vmul.f32 0.17677669, %v630_v41  ;;  %3702 = vmatprep.subr.bf16.mxu1 %v4151_v1  ;;  %998 = vst.msk [vmem:[#allocation3 + $0x10] sm:$0xff] %vm995_vm2, %v4153_v37  ;;  %999 = vst.msk [vmem:[#allocation3 + $0x18] sm:$0xff] %vm995_vm2, %v4153_v37 }
 0x119   : > { %1000 = vst.msk [vmem:[#allocation3 + $0x20] sm:$0xff] %vm995_vm2, %v4153_v37  ;;  %1001 = vst.msk [vmem:[#allocation3 + $0x28] sm:$0xff] %vm995_vm2, %v4153_v37 }
 0x11a   : > { %v635_v44 = vpack.c.bf16 %v634_v43, %v633_v40  ;;  %v745_v17 = vpop.f32.mrb[0].mxu1  ;;  %1002 = vst.msk [vmem:[#allocation3 + $0x30] sm:$0xff] %vm995_vm2, %v4153_v37  ;;  %1003 = vst.msk [vmem:[#allocation3 + $0x38] sm:$0xff] %vm995_vm2, %v4153_v37  ;;  %v1026_v40 = vstv %s1025_s29 }
 0x11b   : > { %v746_v18 = vadd.f32 %v3161_v16, %v745_v17  ;;  %v3626_v19 = vpop.f32.mrb[1].mxu1  ;;  %3703 = vmatpush3.bf16.msra.mxu1 %v4004_v36  ;;  %vm1027_vm3 = vcmp.ge.s32.totalorder %v1022_v39, %v1026_v40 }
 0x11c   : > { %637 = vst.msk [vmem:[#allocation2] sm:$0xff] %vm636_vm1, %v635_v44  ;;  %v748_v20 = vpop.f32.mrb[2].mxu1  ;;  %3714 = vmatprep.subr.bf16.mxu1 %v4151_v1  ;;  %v4592_v41 = vsel %vm1027_vm3, -1e+30, %v4151_v1 }
 0x11d   : > { %v752_v21 = vmul.f32 0.17677669, %v746_v18  ;;  %v749_v22 = vadd.f32 %v3161_v16, %v748_v20  ;;  %v3627_v23 = vpop.f32.mrb[3].mxu1  ;;  %v3213_v16 = vld [vmem:[%s5101_s5 + $0x3] ss:$0 sm:$0xff] }
 0x11e   : > { %3705 = vmatmul.mubr.bf16.vlgmr.msra.gmra.mrb[8].mxu1 %v4383_v26  ;;  %v3232_v20 = vld [vmem:[%s5105_s9] ss:$0 sm:$0xff] }
 0x11f   : > { %v753_v25 = vmul.f32 0.17677669, %v749_v22  ;;  %3716 = vmatprep.mubr.msk.bf16.mxu1 %vm4152_vm0, %v4151_v1 }
 0x121   : > { %v754_v27 = vpack.c.bf16 %v753_v25, %v752_v21 }
 0x123   : > { %v1263_v2 = vld [vmem:[#allocation2] sm:$0xff]  ;;  %756 = vst.msk [vmem:[#allocation2 + $0x8] sm:$0xff] %vm636_vm1, %v754_v27 }
 0x133   : > { %v864_v46 = vpop.f32.mrb[4].mxu0 }
 0x134   : > { %v865_v47 = vadd.f32 %v3187_v45, %v864_v46  ;;  %v3646_v48 = vpop.f32.mrb[5].mxu0 }
 0x135   : > { %v867_v49 = vpop.f32.mrb[6].mxu0 }
 0x136   : > { %v871_v50 = vmul.f32 0.17677669, %v865_v47  ;;  %v868_v51 = vadd.f32 %v3187_v45, %v867_v49  ;;  %v3647_v52 = vpop.f32.mrb[7].mxu0 }
 0x138   : > { %v872_v53 = vmul.f32 0.17677669, %v868_v51  ;;  %v3260_v51 = vld [vmem:[%s5103_s7 + $0x1] ss:$0 sm:$0xff] }
 0x13a   : > { %v873_v54 = vpack.c.bf16 %v872_v53, %v871_v50  ;;  %v4154_v50 = vmov 0  }
 0x13b   : > { %3938 = vset.pattern.permute.xlu1 %v4154_v50  ;;  %3939 = vset.pattern.permute.xlu0 %v4154_v50 }
 0x13c   : > { %875 = vst.msk [vmem:[#allocation2 + $0x10] sm:$0xff] %vm636_vm1, %v873_v54 }
 0x153   : > { %v1142_v56 = vpop.f32.mrb[8].mxu0 }
 0x154   : > { %v3686_v57 = vpop.f32.mrb[9].mxu0  ;;  %v1143_v59 = vadd.f32 %v3222_v55, %v1142_v56 }
 0x155   : > { %v1145_v58 = vpop.f32.mrb[10].mxu0 }
 0x156   : > { %v1146_v60 = vadd.f32 %v3222_v55, %v1145_v58  ;;  %v3687_v61 = vpop.f32.mrb[11].mxu0 }
 0x157   : > { %v3991_v61 = vld [vmem:[%s5102_s6 + $0x80] sm:$0xff]  }
 0x158   : > { %v1149_v62 = vpack.c.bf16 %v1146_v60, %v1143_v59  ;;  %v1656_v60 = vld [vmem:[#allocation2 + $0x8] sm:$0xff]  ;;  %v983_v15 = vpop.f32.mrb[4].mxu1 }
 0x159   : > { %v3666_v17 = vpop.f32.mrb[5].mxu1  ;;  %v984_v18 = vadd.f32 %v3213_v16, %v983_v15  ;;  %v4015_v15 = vld [vmem:[%s5104_s8 + $0x68] sm:$0xff]  }
 0x15a   : > { %v1269_v63 = vsel %vm636_vm1, %v1149_v62, 0  ;;  %v3993_v62 = vld [vmem:[%s5102_s6 + $0x88] sm:$0xff]   ;;  %v986_v19 = vpop.f32.mrb[6].mxu1  ;;  %v4017_v17 = vld [vmem:[%s5104_s8 + $0x70] sm:$0xff]  }
 0x15b   : > { %3709 = vmatpush3.bf16.xpose.msra.mxu0 %v1269_v63  ;;  %v3995_v63 = vld [vmem:[%s5102_s6 + $0x90] sm:$0xff]   ;;  %v987_v21 = vadd.f32 %v3213_v16, %v986_v19  ;;  %v3667_v22 = vpop.f32.mrb[7].mxu1  ;;  %v990_v23 = vmul.f32 0.17677669, %v984_v18  ;;  %v4016_v16 = vld [vmem:[%s5102_s6 + $0xe0] sm:$0xff]   ;;  %v4018_v18 = vld [vmem:[%s5102_s6 + $0xe8] sm:$0xff]  }
 0x15c   : > { %3720 = vmatprep.subr.bf16.mxu0 %v4151_v1  ;;  %v4019_v19 = vld [vmem:[%s5104_s8 + $0x78] sm:$0xff]   ;;  %v4774_v22 = vld [vmem:[#allocation3 + $0x10] sm:$0xff] }
 0x15d   : > { %v991_v25 = vmul.f32 0.17677669, %v987_v21  ;;  %v4021_v21 = vld [vmem:[%s5102_s6 + $0xf8] sm:$0xff]  }
 0x15f   : > { %v992_v30 = vpack.c.bf16 %v991_v25, %v990_v23 }
 0x161   : > { %994 = vst.msk [vmem:[#allocation2 + $0x18] sm:$0xff] %vm636_vm1, %v992_v30 }
 0x162   : > { %3711 = vmatmul.mubr.msk.bf16.vlgmr.msra.gmra.mrb[12].mxu0 %vm636_vm1, %v1263_v2  ;;  %v3999_v2 = vld [vmem:[%s5102_s6 + $0xa0] sm:$0xff]  }
 0x163   : > { %3721 = vmatpush3.bf16.msra.mxu0 %v3968_v0  ;;  %3736 = vmatprep.mubr.msk.bf16.mxu0 %vm4152_vm0, %v4151_v1  ;;  %v3997_v0 = vld [vmem:[%s5102_s6 + $0x98] sm:$0xff]  }
 0x164   : > { %3722 = vmatprep.subr.bf16.mxu0 %v4151_v1 }
 0x167   : > { %3723 = vmatpush3.bf16.msra.mxu0 %v3970_v3  ;;  %v4001_v3 = vld [vmem:[%s5102_s6 + $0xa8] sm:$0xff]  }
 0x168   : > { %3724 = vmatprep.subr.bf16.mxu0 %v4151_v1 }
 0x16b   : > { %3725 = vmatpush3.bf16.msra.mxu0 %v3972_v4  ;;  %v4003_v4 = vld [vmem:[%s5102_s6 + $0xb0] sm:$0xff]  }
 0x16c   : > { %3726 = vmatprep.subr.bf16.mxu0 %v4151_v1 }
 0x16f   : > { %3727 = vmatpush3.bf16.msra.mxu0 %v3974_v5  ;;  %v4005_v5 = vld [vmem:[%s5102_s6 + $0xb8] sm:$0xff]  }
 0x170   : > { %3728 = vmatprep.subr.bf16.mxu0 %v4151_v1 }
 0x173   : > { %3729 = vmatpush3.bf16.msra.mxu0 %v3976_v6  ;;  %v4647_v6 = vld [vmem:[#allocation3] sm:$0xff] }
 0x174   : > { %3730 = vmatprep.subr.bf16.mxu0 %v4151_v1 }
 0x177   : > { %3731 = vmatpush3.bf16.msra.mxu0 %v3978_v7 }
 0x178   : > { %3732 = vmatprep.subr.bf16.mxu0 %v4151_v1 }
 0x17b   : > { %3733 = vmatpush3.bf16.msra.mxu0 %v3980_v8 }
 0x17c   : > { %3734 = vmatprep.subr.bf16.mxu0 %v4151_v1 }
 0x17f   : > { %3735 = vmatpush3.bf16.msra.mxu0 %v3981_v10  ;;  %v4652_v10 = vld [vmem:[#allocation3 + $0x8] sm:$0xff] }
 0x180   : > { %3760 = vmatprep.subr.bf16.mxu0 %v4151_v1 }
 0x182   : > { %3737 = vmatmul.mubr.bf16.vlgmr.msra.gmra.mrb[16].mxu0 %v4383_v26 }
 0x183   : > { %3762 = vmatprep.mubr.msk.bf16.mxu0 %vm4152_vm0, %v4151_v1 }
 0x1f1   : > { %v1255_v24 = vpop.f32.mrb[8].mxu1 }
 0x1f2   : > { %v1256_v27 = vadd.f32 %v3232_v20, %v1255_v24  ;;  %v3706_v28 = vpop.f32.mrb[9].mxu1  ;;  %v4776_v24 = vld [vmem:[#allocation3 + $0x18] sm:$0xff] }
 0x1f3   : > { %v1258_v29 = vpop.f32.mrb[10].mxu1 }
 0x1f4   : > { %v1259_v31 = vadd.f32 %v3232_v20, %v1258_v29  ;;  %v3707_v32 = vpop.f32.mrb[11].mxu1  ;;  %v4020_v20 = vld [vmem:[%s5102_s6 + $0xf0] sm:$0xff]  }
 0x1f6   : > { %v1262_v9 = vpack.c.bf16 %v1259_v31, %v1256_v27 }
 0x1f8   : > { %3715 = vmatpush3.bf16.msra.mxu1 %v1262_v9 }
 0x1f9   : > { %3740 = vmatprep.subr.bf16.mxu1 %v4151_v1 }
 0x235   : > { %v1305_v42 = vpop.f32.mrb[12].mxu0 }
 0x236   : > { %v4595_v43 = vadd.f32 %v1305_v42, %v4592_v41  ;;  %v3712_v44 = vpop.f32.mrb[13].mxu0 }
 0x237   : > { %v1308_v45 = vpop.f32.mrb[14].mxu0 }
 0x238   : > { %v4598_v46 = vadd.f32 %v1308_v45, %v4592_v41  ;;  %v3713_v47 = vpop.f32.mrb[15].mxu0  ;;  %v1315_v48 = vsel %vm1314_vm4, %v4595_v43, -inf }
 0x239   : > { %1316 = vmax.xlane.f32.xlu0 %v1315_v48 }
 0x23a   : > { %v1318_v49 = vsel %vm1314_vm4, %v4598_v46, -inf }
 0x23d   : > { %1319 = vmax.xlane.f32.xlu0 %v1318_v49 }
 0x255   : > { %v1532_v52 = vpop.f32.mrb[16].mxu0 }
 0x256   : > { %v3738_v53 = vpop.f32.mrb[17].mxu0  ;;  %v1533_v55 = vadd.f32 %v3260_v51, %v1532_v52 }
 0x257   : > { %v1535_v54 = vpop.f32.mrb[18].mxu0 }
 0x258   : > { %v1536_v56 = vadd.f32 %v3260_v51, %v1535_v54  ;;  %v3739_v57 = vpop.f32.mrb[19].mxu0  ;;  %v3314_v51 = vld [vmem:[%s5103_s7 + $0x2] ss:$0 sm:$0xff] }
 0x25a   : > { %v1539_v58 = vpack.c.bf16 %v1536_v56, %v1533_v55 }
 0x25c   : > { %v1661_v59 = vsel %vm636_vm1, %v1539_v58, 0 }
 0x25d   : > { %3761 = vmatpush3.bf16.xpose.msra.mxu0 %v1661_v59 }
 0x25e   : > { %3772 = vmatprep.subr.bf16.mxu0 %v4151_v1 }
 0x264   : > { %3763 = vmatmul.mubr.msk.bf16.vlgmr.msra.gmra.mrb[20].mxu0 %vm636_vm1, %v1656_v60 }
 0x265   : > { %3773 = vmatpush3.bf16.msra.mxu0 %v3991_v61  ;;  %3788 = vmatprep.mubr.msk.bf16.mxu0 %vm4152_vm0, %v4151_v1 }
 0x266   : > { %3774 = vmatprep.subr.bf16.mxu0 %v4151_v1 }
 0x269   : > { %3775 = vmatpush3.bf16.msra.mxu0 %v3993_v62  ;;  %v4007_v62 = vld [vmem:[%s5104_s8 + $0x48] sm:$0xff]  }
 0x26a   : > { %3776 = vmatprep.subr.bf16.mxu0 %v4151_v1 }
 0x26d   : > { %3777 = vmatpush3.bf16.msra.mxu0 %v3995_v63  ;;  %v4008_v63 = vld [vmem:[%s5102_s6 + $0xc0] sm:$0xff]  }
 0x26e   : > { %3778 = vmatprep.subr.bf16.mxu0 %v4151_v1 }
 0x271   : > { %3779 = vmatpush3.bf16.msra.mxu0 %v3997_v0  ;;  %v4009_v0 = vld [vmem:[%s5104_s8 + $0x50] sm:$0xff]  }
 0x272   : > { %3780 = vmatprep.subr.bf16.mxu0 %v4151_v1 }
 0x275   : > { %3781 = vmatpush3.bf16.msra.mxu0 %v3999_v2  ;;  %v2049_v2 = vld [vmem:[#allocation2 + $0x10] sm:$0xff] }
 0x276   : > { %3782 = vmatprep.subr.bf16.mxu0 %v4151_v1 }
 0x279   : > { %3783 = vmatpush3.bf16.msra.mxu0 %v4001_v3  ;;  %v4010_v3 = vld [vmem:[%s5102_s6 + $0xc8] sm:$0xff]  }
 0x27a   : > { %3784 = vmatprep.subr.bf16.mxu0 %v4151_v1 }
 0x27d   : > { %3785 = vmatpush3.bf16.msra.mxu0 %v4003_v4  ;;  %v4011_v4 = vld [vmem:[%s5104_s8 + $0x58] sm:$0xff]  }
 0x27e   : > { %3786 = vmatprep.subr.bf16.mxu0 %v4151_v1 }
 0x281   : > { %3787 = vmatpush3.bf16.msra.mxu0 %v4005_v5  ;;  %v4012_v5 = vld [vmem:[%s5102_s6 + $0xd0] sm:$0xff]  }
 0x282   : > { %3812 = vmatprep.subr.bf16.mxu0 %v4151_v1 }
 0x284   : > { %3789 = vmatmul.mubr.bf16.vlgmr.msra.gmra.mrb[24].mxu0 %v4383_v26 }
 0x285   : > { %3814 = vmatprep.mubr.msk.bf16.mxu0 %vm4152_vm0, %v4151_v1 }
 0x2c6   : > { %v1317_v7 = vpop.xlane.xlu0 %1316 }
 0x2c7   : > { %v4650_v8 = vmax.f32 %v4647_v6, %v1317_v7  ;;  %v4013_v7 = vld [vmem:[%s5104_s8 + $0x60] sm:$0xff]  }
 0x2c9   : > { %v1323_v11 = vsub.f32 %v4647_v6, %v4650_v8  ;;  %1423 = vst.msk [vmem:[#allocation3] sm:$0xff] %vm995_vm2, %v4650_v8  ;;  %1331 = vperm.xlu1 %3938, %v4650_v8  }
 0x2ca   : > { %v1320_v12 = vpop.xlane.xlu0 %1319 }
 0x2cb   : > { %v4660_v13 = vmax.f32 %v4652_v10, %v1320_v12  ;;  %v4014_v12 = vld [vmem:[%s5102_s6 + $0xd8] sm:$0xff]  }
 0x2cd   : > { %v1324_v14 = vsub.f32 %v4652_v10, %v4660_v13  ;;  %1424 = vst.msk [vmem:[#allocation3 + $0x8] sm:$0xff] %vm995_vm2, %v4660_v13  ;;  %1336 = vperm.xlu1 %3938, %v4660_v13  }
 0x337   : > { %v1697_v33 = vpop.f32.mrb[20].mxu0 }
 0x338   : > { %v4676_v34 = vadd.f32 %v1697_v33, %v4592_v41  ;;  %v3764_v35 = vpop.f32.mrb[21].mxu0 }
 0x339   : > { %v1700_v36 = vpop.f32.mrb[22].mxu0 }
 0x33a   : > { %v4679_v37 = vadd.f32 %v1700_v36, %v4592_v41  ;;  %v3765_v39 = vpop.f32.mrb[23].mxu0  ;;  %v1707_v40 = vsel %vm1314_vm4, %v4676_v34, -inf }
 0x33b   : > { %1708 = vmax.xlane.f32.xlu0 %v1707_v40 }
 0x33c   : > { %v1710_v42 = vsel %vm1314_vm4, %v4679_v37, -inf }
 0x33d   : > { %1711 = vmax.xlane.f32.xlu1 %v1710_v42 }
 0x348   : > { %v1332_v44 = vpop.permute.xlu1 %1331 }
 0x349   : > { %v1339_v45 = vsub.f32 %v4595_v43, %v1332_v44 }
 0x34b   : > { %v1341_v47 = vmul.f32 1.442695, %v1339_v45 }
 0x34c   : > { %v1337_v48 = vpop.permute.xlu1 %1336 }
 0x34d   : > { %v1340_v49 = vsub.f32 %v4598_v46, %v1337_v48  ;;  %4046 = vpow2.f32 %v1341_v47  ;;  %v4006_v46 = vld [vmem:[%s5104_s8 + $0x40] sm:$0xff]  }
 0x34f   : > { %v1343_v50 = vmul.f32 1.442695, %v1340_v49 }
 0x351   : > { %4048 = vpow2.f32 %v1343_v50 }
 0x357   : > { %v1925_v52 = vpop.f32.mrb[24].mxu0  ;;  %v4690_v55 = vpop.eup %4046 }
 0x358   : > { %v3790_v53 = vpop.f32.mrb[25].mxu0  ;;  %v1926_v56 = vadd.f32 %v3314_v51, %v1925_v52 }
 0x359   : > { %v1928_v54 = vpop.f32.mrb[26].mxu0 }
 0x35a   : > { %v1929_v57 = vadd.f32 %v3314_v51, %v1928_v54  ;;  %v3791_v58 = vpop.f32.mrb[27].mxu0  ;;  %v3286_v54 = vld [vmem:[%s5105_s9 + $0x1] ss:$0 sm:$0xff] }
 0x35b   : > { %v4692_v43 = vpop.eup %4048 }
 0x35c   : > { %v1932_v59 = vpack.c.bf16 %v1929_v57, %v1926_v56  ;;  %v1374_v60 = vpack.c.bf16 %v4692_v43, %v4690_v55 }
 0x35e   : > { %3717 = vmatmul.mubr.msk.bf16.vlgmr.msra.gmra.mrb[12].mxu1 %vm1314_vm4, %v1374_v60  ;;  %v2054_v61 = vsel %vm636_vm1, %v1932_v59, 0 }
 0x35f   : > { %3813 = vmatpush3.bf16.xpose.msra.mxu0 %v2054_v61  ;;  %3741 = vmatpush3.bf16.msra.mxu1 %v4006_v46 }
 0x360   : > { %3742 = vmatprep.subr.bf16.mxu1 %v4151_v1  ;;  %3824 = vmatprep.subr.bf16.mxu0 %v4151_v1 }
 0x361   : > { %3756 = vmatprep.mubr.msk.bf16.mxu1 %vm4152_vm0, %v4151_v1 }
 0x363   : > { %3743 = vmatpush3.bf16.msra.mxu1 %v4007_v62 }
 0x364   : > { %3744 = vmatprep.subr.bf16.mxu1 %v4151_v1 }
 0x366   : > { %3815 = vmatmul.mubr.msk.bf16.vlgmr.msra.gmra.mrb[28].mxu0 %vm636_vm1, %v2049_v2 }
 0x367   : > { %3825 = vmatpush3.bf16.msra.mxu0 %v4008_v63  ;;  %3745 = vmatpush3.bf16.msra.mxu1 %v4009_v0 }
 0x368   : > { %3826 = vmatprep.subr.bf16.mxu0 %v4151_v1  ;;  %3746 = vmatprep.subr.bf16.mxu1 %v4151_v1 }
 0x369   : > { %3840 = vmatprep.mubr.msk.bf16.mxu0 %vm4152_vm0, %v4151_v1 }
 0x36b   : > { %3827 = vmatpush3.bf16.msra.mxu0 %v4010_v3  ;;  %3747 = vmatpush3.bf16.msra.mxu1 %v4011_v4  ;;  %v4022_v3 = vld [vmem:[%s5104_s8 + $0x80] sm:$0xff]  }
 0x36c   : > { %3828 = vmatprep.subr.bf16.mxu0 %v4151_v1  ;;  %3748 = vmatprep.subr.bf16.mxu1 %v4151_v1 }
 0x36f   : > { %3829 = vmatpush3.bf16.msra.mxu0 %v4012_v5  ;;  %3749 = vmatpush3.bf16.msra.mxu1 %v4013_v7 }
 0x370   : > { %3830 = vmatprep.subr.bf16.mxu0 %v4151_v1  ;;  %3750 = vmatprep.subr.bf16.mxu1 %v4151_v1 }
 0x373   : > { %3831 = vmatpush3.bf16.msra.mxu0 %v4014_v12  ;;  %3751 = vmatpush3.bf16.msra.mxu1 %v4015_v15 }
 0x374   : > { %3832 = vmatprep.subr.bf16.mxu0 %v4151_v1  ;;  %3752 = vmatprep.subr.bf16.mxu1 %v4151_v1 }
 0x377   : > { %3833 = vmatpush3.bf16.msra.mxu0 %v4016_v16  ;;  %3753 = vmatpush3.bf16.msra.mxu1 %v4017_v17  ;;  %v4023_v16 = vld [vmem:[%s5104_s8 + $0x88] sm:$0xff]  }
 0x378   : > { %3834 = vmatprep.subr.bf16.mxu0 %v4151_v1  ;;  %3754 = vmatprep.subr.bf16.mxu1 %v4151_v1 }
 0x37b   : > { %3835 = vmatpush3.bf16.msra.mxu0 %v4018_v18  ;;  %3755 = vmatpush3.bf16.msra.mxu1 %v4019_v19  ;;  %v4024_v18 = vld [vmem:[%s5104_s8 + $0x90] sm:$0xff]   ;;  %v2442_v19 = vld [vmem:[#allocation2 + $0x18] sm:$0xff] }
 0x37c   : > { %3836 = vmatprep.subr.bf16.mxu0 %v4151_v1  ;;  %3766 = vmatprep.subr.bf16.mxu1 %v4151_v1 }
 0x37e   : > { %3757 = vmatmul.mubr.bf16.vlgmr.msra.gmra.mrb[16].mxu1 %v4383_v26 }
 0x37f   : > { %3837 = vmatpush3.bf16.msra.mxu0 %v4020_v20  ;;  %3768 = vmatprep.mubr.msk.bf16.mxu1 %vm4152_vm0, %v4151_v1  ;;  %v4025_v20 = vld [vmem:[%s5104_s8 + $0x98] sm:$0xff]  }
 0x380   : > { %3838 = vmatprep.subr.bf16.mxu0 %v4151_v1 }
 0x383   : > { %3839 = vmatpush3.bf16.msra.mxu0 %v4021_v21  ;;  %v4026_v21 = vld [vmem:[%s5104_s8 + $0xa0] sm:$0xff]  }
 0x384   : > { %3864 = vmatprep.subr.bf16.mxu0 %v4151_v1 }
 0x386   : > { %3841 = vmatmul.mubr.bf16.vlgmr.msra.gmra.mrb[32].mxu0 %v4383_v26 }
 0x387   : > { %3866 = vmatprep.mubr.msk.bf16.mxu0 %vm4152_vm0, %v4151_v1 }
 0x3c8   : > { %v1709_v23 = vpop.xlane.xlu0 %1708 }
 0x3c9   : > { %v4779_v25 = vmax.f32 %v4774_v22, %v1709_v23  ;;  %v4027_v23 = vld [vmem:[%s5104_s8 + $0xa8] sm:$0xff]  }
 0x3ca   : > { %v1712_v27 = vpop.xlane.xlu1 %1711 }
 0x3cb   : > { %v1715_v28 = vsub.f32 %v4774_v22, %v4779_v25  ;;  %1816 = vst.msk [vmem:[#allocation3 + $0x10] sm:$0xff] %vm995_vm2, %v4779_v25  ;;  %v4786_v29 = vmax.f32 %v4776_v24, %v1712_v27  ;;  %1723 = vperm.xlu0 %3939, %v4779_v25   ;;  %v4028_v27 = vld [vmem:[%s5104_s8 + $0xb0] sm:$0xff]  }
 0x3cd   : > { %v1716_v30 = vsub.f32 %v4776_v24, %v4786_v29  ;;  %1817 = vst.msk [vmem:[#allocation3 + $0x18] sm:$0xff] %vm995_vm2, %v4786_v29  ;;  %1728 = vperm.xlu1 %3938, %v4786_v29   ;;  %v1345_v24 = vld [vmem:[#allocation4] sm:$0xff] }
 0x431   : > { %v4794_v31 = vpop.f32.mrb[12].mxu1 }
 0x432   : > { %v3718_v32 = vpop.f32.mrb[13].mxu1 }
 0x433   : > { %v4796_v9 = vpop.f32.mrb[14].mxu1  ;;  %v4029_v32 = vld [vmem:[%s5104_s8 + $0xb8] sm:$0xff]  }
 0x434   : > { %v3719_v33 = vpop.f32.mrb[15].mxu1 }
 0x435   : > { %v4866_v33 = vld [vmem:[#allocation3 + $0x20] sm:$0xff] }
 0x439   : > { %v2090_v35 = vpop.f32.mrb[28].mxu0 }
 0x43a   : > { %v4799_v36 = vadd.f32 %v2090_v35, %v4592_v41  ;;  %v3816_v39 = vpop.f32.mrb[29].mxu0 }
 0x43b   : > { %v2093_v40 = vpop.f32.mrb[30].mxu0  ;;  %v4868_v39 = vld [vmem:[#allocation3 + $0x28] sm:$0xff] }
 0x43c   : > { %v4802_v42 = vadd.f32 %v2093_v40, %v4592_v41  ;;  %v3817_v44 = vpop.f32.mrb[31].mxu0  ;;  %v2100_v45 = vsel %vm1314_vm4, %v4799_v36, -inf }
 0x43d   : > { %2101 = vmax.xlane.f32.xlu0 %v2100_v45 }
 0x43e   : > { %v2103_v47 = vsel %vm1314_vm4, %v4802_v42, -inf }
 0x43f   : > { %2104 = vmax.xlane.f32.xlu1 %v2103_v47 }
 0x44a   : > { %v1724_v48 = vpop.permute.xlu0 %1723 }
 0x44b   : > { %v1731_v49 = vsub.f32 %v4676_v34, %v1724_v48  ;;  %v3368_v34 = vld [vmem:[%s5103_s7 + $0x3] ss:$0 sm:$0xff] }
 0x44c   : > { %v1729_v50 = vpop.permute.xlu1 %1728 }
 0x44d   : > { %v1733_v51 = vmul.f32 1.442695, %v1731_v49  ;;  %v1732_v52 = vsub.f32 %v4679_v37, %v1729_v50 }
 0x44f   : > { %v1735_v53 = vmul.f32 1.442695, %v1732_v52  ;;  %4050 = vpow2.f32 %v1733_v51 }
 0x451   : > { %4052 = vpow2.f32 %v1735_v53  ;;  %v1647_v56 = vpop.f32.mrb[16].mxu1 }
 0x452   : > { %v1648_v57 = vadd.f32 %v3286_v54, %v1647_v56  ;;  %v3758_v58 = vpop.f32.mrb[17].mxu1 }
 0x453   : > { %v1650_v46 = vpop.f32.mrb[18].mxu1 }
 0x454   : > { %v1651_v59 = vadd.f32 %v3286_v54, %v1650_v46  ;;  %v3759_v60 = vpop.f32.mrb[19].mxu1 }
 0x456   : > { %v1654_v61 = vpack.c.bf16 %v1651_v59, %v1648_v57 }
 0x458   : > { %3767 = vmatpush3.bf16.msra.mxu1 %v1654_v61 }
 0x459   : > { %v2318_v37 = vpop.f32.mrb[32].mxu0  ;;  %3792 = vmatprep.subr.bf16.mxu1 %v4151_v1  ;;  %v4817_v62 = vpop.eup %4050 }
 0x45a   : > { %v3842_v63 = vpop.f32.mrb[33].mxu0  ;;  %v2319_v4 = vadd.f32 %v3368_v34, %v2318_v37 }
 0x45b   : > { %v4819_v0 = vpop.eup %4052  ;;  %v2321_v2 = vpop.f32.mrb[34].mxu0 }
 0x45c   : > { %v2322_v5 = vadd.f32 %v3368_v34, %v2321_v2  ;;  %v3843_v7 = vpop.f32.mrb[35].mxu0  ;;  %v1767_v12 = vpack.c.bf16 %v4819_v0, %v4817_v62 }
 0x45e   : > { %v2325_v15 = vpack.c.bf16 %v2322_v5, %v2319_v4  ;;  %3769 = vmatmul.mubr.msk.bf16.vlgmr.msra.gmra.mrb[20].mxu1 %vm1314_vm4, %v1767_v12 }
 0x45f   : > { %3793 = vmatpush3.bf16.msra.mxu1 %v4022_v3  ;;  %3808 = vmatprep.mubr.msk.bf16.mxu1 %vm4152_vm0, %v4151_v1 }
 0x460   : > { %v2447_v17 = vsel %vm636_vm1, %v2325_v15, 0  ;;  %3794 = vmatprep.subr.bf16.mxu1 %v4151_v1 }
 0x461   : > { %3865 = vmatpush3.bf16.xpose.msra.mxu0 %v2447_v17 }
 0x462   : > { %3876 = vmatprep.subr.bf16.mxu0 %v4151_v1 }
 0x463   : > { %3795 = vmatpush3.bf16.msra.mxu1 %v4023_v16 }
 0x464   : > { %3796 = vmatprep.subr.bf16.mxu1 %v4151_v1 }
 0x467   : > { %3797 = vmatpush3.bf16.msra.mxu1 %v4024_v18 }
 0x468   : > { %3867 = vmatmul.mubr.msk.bf16.vlgmr.msra.gmra.mrb[36].mxu0 %vm636_vm1, %v2442_v19  ;;  %3798 = vmatprep.subr.bf16.mxu1 %v4151_v1  ;;  %v4031_v19 = vld [vmem:[%s5104_s8 + $0xc8] sm:$0xff]  }
 0x469   : > { %3880 = vmatprep.mubr.msk.bf16.mxu0 %vm4152_vm0, %v4151_v1 }
 0x46b   : > { %3799 = vmatpush3.bf16.msra.mxu1 %v4025_v20  ;;  %v4032_v20 = vld [vmem:[%s5104_s8 + $0xd0] sm:$0xff]  }
 0x46c   : > { %3800 = vmatprep.subr.bf16.mxu1 %v4151_v1 }
 0x46f   : > { %3801 = vmatpush3.bf16.msra.mxu1 %v4026_v21  ;;  %v4033_v21 = vld [vmem:[%s5104_s8 + $0xd8] sm:$0xff]  }
 0x470   : > { %3802 = vmatprep.subr.bf16.mxu1 %v4151_v1 }
 0x473   : > { %3803 = vmatpush3.bf16.msra.mxu1 %v4027_v23  ;;  %v4034_v23 = vld [vmem:[%s5104_s8 + $0xe0] sm:$0xff]  }
 0x474   : > { %3804 = vmatprep.subr.bf16.mxu1 %v4151_v1 }
 0x477   : > { %3805 = vmatpush3.bf16.msra.mxu1 %v4028_v27  ;;  %v4035_v27 = vld [vmem:[%s5104_s8 + $0xe8] sm:$0xff]  }
 0x478   : > { %3806 = vmatprep.subr.bf16.mxu1 %v4151_v1 }
 0x47b   : > { %3807 = vmatpush3.bf16.msra.mxu1 %v4029_v32  ;;  %v4036_v32 = vld [vmem:[%s5104_s8 + $0xf0] sm:$0xff]  }
 0x47c   : > { %3818 = vmatprep.subr.bf16.mxu1 %v4151_v1 }
 0x47e   : > { %3809 = vmatmul.mubr.bf16.vlgmr.msra.gmra.mrb[24].mxu1 %v4383_v26 }
 0x47f   : > { %3820 = vmatprep.mubr.msk.bf16.mxu1 %vm4152_vm0, %v4151_v1 }
 0x4ca   : > { %v2102_v35 = vpop.xlane.xlu0 %2101 }
 0x4cb   : > { %v4871_v40 = vmax.f32 %v4866_v33, %v2102_v35  ;;  %v4037_v35 = vld [vmem:[%s5104_s8 + $0xf8] sm:$0xff]  }
 0x4cc   : > { %v2105_v44 = vpop.xlane.xlu1 %2104 }
 0x4cd   : > { %v2108_v45 = vsub.f32 %v4866_v33, %v4871_v40  ;;  %2209 = vst.msk [vmem:[#allocation3 + $0x20] sm:$0xff] %vm995_vm2, %v4871_v40  ;;  %v4878_v26 = vmax.f32 %v4868_v39, %v2105_v44  ;;  %2116 = vperm.xlu0 %3939, %v4871_v40   ;;  %v4098_v44 = vld [vmem:[%s4287_s0] sm:$0xff]   ;;  %v1738_v33 = vld [vmem:[#allocation4 + $0x10] sm:$0xff] }
 0x4cf   : > { %v2109_v47 = vsub.f32 %v4868_v39, %v4878_v26  ;;  %2210 = vst.msk [vmem:[#allocation3 + $0x28] sm:$0xff] %vm995_vm2, %v4878_v26  ;;  %2121 = vperm.xlu1 %3938, %v4878_v26   ;;  %v2110_v10 = vmul.f32 1.442695, %v2108_v45 }
 0x4d1   : > { %v2112_v6 = vmul.f32 1.442695, %v2109_v47  ;;  %v1346_v47 = vld [vmem:[#allocation4 + $0x8] sm:$0xff] }
 0x531   : > { %v4886_v48 = vpop.f32.mrb[20].mxu1 }
 0x532   : > { %v3770_v49 = vpop.f32.mrb[21].mxu1 }
 0x533   : > { %v4888_v50 = vpop.f32.mrb[22].mxu1  ;;  %v4944_v49 = vld [vmem:[#allocation3 + $0x30] sm:$0xff] }
 0x534   : > { %v3771_v51 = vpop.f32.mrb[23].mxu1 }
 0x53b   : > { %v2483_v52 = vpop.f32.mrb[36].mxu0 }
 0x53c   : > { %v4891_v53 = vadd.f32 %v2483_v52, %v4592_v41  ;;  %v3868_v54 = vpop.f32.mrb[37].mxu0  ;;  %v4946_v52 = vld [vmem:[#allocation3 + $0x38] sm:$0xff] }
 0x53d   : > { %v2486_v56 = vpop.f32.mrb[38].mxu0 }
 0x53e   : > { %v4894_v57 = vadd.f32 %v2486_v56, %v4592_v41  ;;  %v3869_v58 = vpop.f32.mrb[39].mxu0  ;;  %v2493_v46 = vsel %vm1314_vm4, %v4891_v53, -inf  ;;  %v3340_v41 = vld [vmem:[%s5105_s9 + $0x2] ss:$0 sm:$0xff] }
 0x53f   : > { %2494 = vmax.xlane.f32.xlu0 %v2493_v46 }
 0x540   : > { %v2496_v59 = vsel %vm1314_vm4, %v4894_v57, -inf }
 0x541   : > { %2497 = vmax.xlane.f32.xlu1 %v2496_v59 }
 0x54c   : > { %v2117_v60 = vpop.permute.xlu0 %2116 }
 0x54d   : > { %v2124_v61 = vsub.f32 %v4799_v36, %v2117_v60  ;;  %v1349_v60 = vsel %vm1314_vm4, %v4690_v55, 0.0 }
 0x54e   : > { %v2122_v34 = vpop.permute.xlu1 %2121 }
 0x54f   : > { %v2126_v37 = vmul.f32 1.442695, %v2124_v61  ;;  %v2125_v63 = vsub.f32 %v4802_v42, %v2122_v34  ;;  %v4030_v42 = vld [vmem:[%s5104_s8 + $0xc0] sm:$0xff]   ;;  %v1742_v61 = vsel %vm1314_vm4, %v4817_v62, 0.0  ;;  %v1352_v34 = vsel %vm1314_vm4, %v4692_v43, 0.0 }
 0x551   : > { %v2128_v2 = vmul.f32 1.442695, %v2125_v63  ;;  %v2040_v3 = vpop.f32.mrb[24].mxu1  ;;  %4054 = vpow2.f32 %v2126_v37  ;;  %v1745_v37 = vsel %vm1314_vm4, %v4819_v0, 0.0 }
 0x552   : > { %v2041_v4 = vadd.f32 %v3340_v41, %v2040_v3  ;;  %v3810_v5 = vpop.f32.mrb[25].mxu1 }
 0x553   : > { %4056 = vpow2.f32 %v2128_v2  ;;  %v2043_v7 = vpop.f32.mrb[26].mxu1 }
 0x554   : > { %v2044_v12 = vadd.f32 %v3340_v41, %v2043_v7  ;;  %v3811_v15 = vpop.f32.mrb[27].mxu1 }
 0x556   : > { %v2047_v16 = vpack.c.bf16 %v2044_v12, %v2041_v4  ;;  %v3394_v12 = vld [vmem:[%s5105_s9 + $0x3] ss:$0 sm:$0xff] }
 0x558   : > { %3819 = vmatpush3.bf16.msra.mxu1 %v2047_v16 }
 0x559   : > { %3844 = vmatprep.subr.bf16.mxu1 %v4151_v1 }
 0x55b   : > { %v4055_v36 = vpop.eup %4054 }
 0x55c   : > { %v2135_v41 = vsel %vm1314_vm4, %v4055_v36, 0.0 }
 0x55d   : > { %v4057_v17 = vpop.eup %4056 }
 0x55e   : > { %v2160_v18 = vpack.c.bf16 %v4057_v17, %v4055_v36  ;;  %v2138_v63 = vsel %vm1314_vm4, %v4057_v17, 0.0 }
 0x560   : > { %3821 = vmatmul.mubr.msk.bf16.vlgmr.msra.gmra.mrb[28].mxu1 %vm1314_vm4, %v2160_v18 }
 0x561   : > { %3845 = vmatpush3.bf16.msra.mxu1 %v4030_v42  ;;  %3860 = vmatprep.mubr.msk.bf16.mxu1 %vm4152_vm0, %v4151_v1 }
 0x562   : > { %3846 = vmatprep.subr.bf16.mxu1 %v4151_v1 }
 0x565   : > { %3847 = vmatpush3.bf16.msra.mxu1 %v4031_v19 }
 0x566   : > { %3848 = vmatprep.subr.bf16.mxu1 %v4151_v1 }
 0x569   : > { %3849 = vmatpush3.bf16.msra.mxu1 %v4032_v20 }
 0x56a   : > { %3850 = vmatprep.subr.bf16.mxu1 %v4151_v1 }
 0x56d   : > { %3851 = vmatpush3.bf16.msra.mxu1 %v4033_v21 }
 0x56e   : > { %3852 = vmatprep.subr.bf16.mxu1 %v4151_v1 }
 0x571   : > { %3853 = vmatpush3.bf16.msra.mxu1 %v4034_v23 }
 0x572   : > { %3854 = vmatprep.subr.bf16.mxu1 %v4151_v1 }
 0x575   : > { %3855 = vmatpush3.bf16.msra.mxu1 %v4035_v27 }
 0x576   : > { %3856 = vmatprep.subr.bf16.mxu1 %v4151_v1 }
 0x579   : > { %3857 = vmatpush3.bf16.msra.mxu1 %v4036_v32  ;;  %v1327_v32 = vmul.f32 1.442695, %v1324_v14 }
 0x57a   : > { %3858 = vmatprep.subr.bf16.mxu1 %v4151_v1 }
 0x57d   : > { %3859 = vmatpush3.bf16.msra.mxu1 %v4037_v35  ;;  %v1325_v35 = vmul.f32 1.442695, %v1323_v11 }
 0x57e   : > { %3870 = vmatprep.subr.bf16.mxu1 %v4151_v1 }
 0x580   : > { %3861 = vmatmul.mubr.bf16.vlgmr.msra.gmra.mrb[32].mxu1 %v4098_v44  ;;  %v1717_v44 = vmul.f32 1.442695, %v1715_v28 }
 0x581   : > { %3872 = vmatprep.mubr.msk.bf16.mxu1 %vm4152_vm0, %v4151_v1 }
 0x5cc   : > { %v2495_v51 = vpop.xlane.xlu0 %2494 }
 0x5cd   : > { %v4949_v54 = vmax.f32 %v4944_v49, %v2495_v51 }
 0x5ce   : > { %v2498_v56 = vpop.xlane.xlu1 %2497 }
 0x5cf   : > { %v2501_v58 = vsub.f32 %v4944_v49, %v4949_v54  ;;  %2602 = vst.msk [vmem:[#allocation3 + $0x30] sm:$0xff] %vm995_vm2, %v4949_v54  ;;  %v2500_v46 = vmax.f32 %v4946_v52, %v2498_v56  ;;  %2509 = vperm.xlu0 %3939, %v4949_v54   ;;  %v1719_v49 = vmul.f32 1.442695, %v1716_v30 }
 0x5d1   : > { %v2502_v59 = vsub.f32 %v4946_v52, %v2500_v46  ;;  %2603 = vst.msk [vmem:[#allocation3 + $0x38] sm:$0xff] %vm995_vm2, %v2500_v46  ;;  %2514 = vperm.xlu1 %3938, %v2500_v46   ;;  %v2503_v8 = vmul.f32 1.442695, %v2501_v58  ;;  %v1739_v52 = vld [vmem:[#allocation4 + $0x18] sm:$0xff] }
 0x5d3   : > { %v2505_v13 = vmul.f32 1.442695, %v2502_v59 }
 0x5ee   : > { %1350 = vadd.xlane.f32.xlu0 %v1349_v60  ;;  %v2132_v60 = vld [vmem:[#allocation4 + $0x28] sm:$0xff] }
 0x5f2   : > { %1743 = vadd.xlane.f32.xlu0 %v1742_v61 }
 0x5f5   : > { %1353 = vadd.xlane.f32.xlu1 %v1352_v34 }
 0x5f6   : > { %1746 = vadd.xlane.f32.xlu0 %v1745_v37  ;;  %v2131_v37 = vld [vmem:[#allocation4 + $0x20] sm:$0xff] }
 0x5f9   : > { %2139 = vadd.xlane.f32.xlu1 %v2138_v63 }
 0x5fa   : > { %2136 = vadd.xlane.f32.xlu0 %v2135_v41 }
 0x633   : > { %v4969_v55 = vpop.f32.mrb[28].mxu1 }
 0x634   : > { %v3822_v2 = vpop.f32.mrb[29].mxu1 }
 0x635   : > { %v4971_v3 = vpop.f32.mrb[30].mxu1 }
 0x636   : > { %v3823_v62 = vpop.f32.mrb[31].mxu1 }
 0x64e   : > { %v2510_v4 = vpop.permute.xlu0 %2509 }
 0x64f   : > { %v2517_v43 = vsub.f32 %v4891_v53, %v2510_v4 }
 0x650   : > { %v2515_v5 = vpop.permute.xlu1 %2514 }
 0x651   : > { %v2519_v7 = vmul.f32 1.442695, %v2517_v43  ;;  %v2518_v0 = vsub.f32 %v4894_v57, %v2515_v5 }
 0x653   : > { %4058 = vpow2.f32 %v2519_v7  ;;  %v2521_v15 = vmul.f32 1.442695, %v2518_v0  ;;  %v2433_v16 = vpop.f32.mrb[32].mxu1 }
 0x654   : > { %v2434_v36 = vadd.f32 %v3394_v12, %v2433_v16  ;;  %v3862_v17 = vpop.f32.mrb[33].mxu1 }
 0x655   : > { %4060 = vpow2.f32 %v2521_v15  ;;  %v2436_v42 = vpop.f32.mrb[34].mxu1 }
 0x656   : > { %v2437_v18 = vadd.f32 %v3394_v12, %v2436_v42  ;;  %v3863_v19 = vpop.f32.mrb[35].mxu1  ;;  %4062 = vpow2.f32 %v1327_v32  ;;  %v4038_v42 = vld [vmem:[%s5106_s10] sm:$0xff]   ;;  %v2524_v32 = vld [vmem:[#allocation4 + $0x30] sm:$0xff] }
 0x657   : > { %4064 = vpow2.f32 %v1325_v35  ;;  %3877 = vmatpush3.bf16.msra.mxu0 %v4038_v42  ;;  %v2525_v35 = vld [vmem:[#allocation4 + $0x38] sm:$0xff]  ;;  %v4043_v42 = vld [vmem:[%s5106_s10 + $0x28] sm:$0xff]  }
 0x658   : > { %v2440_v20 = vpack.c.bf16 %v2437_v18, %v2434_v36  ;;  %4066 = vpow2.f32 %v1717_v44  ;;  %3878 = vmatprep.subr.bf16.mxu0 %v4151_v1 }
 0x659   : > { %4068 = vpow2.f32 %v1719_v49 }
 0x65a   : > { %3871 = vmatpush3.bf16.msra.mxu1 %v2440_v20  ;;  %4070 = vpow2.f32 %v2110_v10  ;;  %v4039_v20 = vld [vmem:[%s5106_s10 + $0x8] sm:$0xff]  }
 0x65b   : > { %3884 = vmatprep.subr.bf16.mxu1 %v4151_v1  ;;  %4072 = vpow2.f32 %v2112_v6  ;;  %3879 = vmatpush3.bf16.msra.mxu0 %v4039_v20 }
 0x65c   : > { %4074 = vpow2.f32 %v2503_v8  ;;  %3892 = vmatprep.subr.bf16.mxu0 %v4151_v1 }
 0x65d   : > { %v4059_v53 = vpop.eup %4058  ;;  %4076 = vpow2.f32 %v2505_v13  ;;  %v1361_v13 = vld [vmem:[#allocation5 + $0x8] sm:$0xff] }
 0x65e   : > { %v2528_v57 = vsel %vm1314_vm4, %v4059_v53, 0.0 }
 0x65f   : > { %v4061_v21 = vpop.eup %4060  ;;  %2529 = vadd.xlane.f32.xlu0 %v2528_v57 }
 0x660   : > { %v2531_v23 = vsel %vm1314_vm4, %v4061_v21, 0.0  ;;  %v2553_v27 = vpack.c.bf16 %v4061_v21, %v4059_v53  ;;  %v4063_v11 = vpop.eup %4062  ;;  %v4040_v53 = vld [vmem:[%s5106_s10 + $0x10] sm:$0xff]   ;;  %v4041_v21 = vld [vmem:[%s5106_s10 + $0x18] sm:$0xff]  }
 0x661   : > { %2532 = vadd.xlane.f32.xlu1 %v2531_v23  ;;  %v4065_v14 = vpop.eup %4064  ;;  %v1348_v58 = vmul.f32 %v4063_v11, %v1346_v47 }
 0x662   : > { %3873 = vmatmul.mubr.msk.bf16.vlgmr.msra.gmra.mrb[36].mxu1 %vm1314_vm4, %v2553_v27  ;;  %v4067_v22 = vpop.eup %4066  ;;  %v1347_v29 = vmul.f32 %v4065_v14, %v1345_v24 }
 0x663   : > { %3888 = vmatprep.mubr.msk.bf16.mxu1 %vm4152_vm0, %v4151_v1  ;;  %v4069_v25 = vpop.eup %4068  ;;  %v1740_v26 = vmul.f32 %v4067_v22, %v1738_v33  ;;  %3885 = vmatpush3.bf16.msra.mxu1 %v4040_v53 }
 0x664   : > { %v4071_v28 = vpop.eup %4070  ;;  %v1741_v59 = vmul.f32 %v4069_v25, %v1739_v52  ;;  %3886 = vmatprep.subr.bf16.mxu1 %v4151_v1 }
 0x665   : > { %v4073_v39 = vpop.eup %4072  ;;  %v2133_v4 = vmul.f32 %v4071_v28, %v2131_v37 }
 0x666   : > { %v5002_v45 = vpop.eup %4074  ;;  %v2134_v41 = vmul.f32 %v4073_v39, %v2132_v60 }
 0x667   : > { %v5006_v54 = vpop.eup %4076  ;;  %3887 = vmatpush3.bf16.msra.mxu1 %v4041_v21  ;;  %v2526_v44 = vmul.f32 %v5002_v45, %v2524_v32 }
 0x668   : > { %3900 = vmatprep.subr.bf16.mxu1 %v4151_v1  ;;  %v2527_v6 = vmul.f32 %v5006_v54, %v2525_v35  ;;  %v2539_v35 = vld [vmem:[#allocation5 + $0x30] sm:$0xff] }
 0x672   : > { %1369 = vperm.xlu1 %3938, %v4063_v11  }
 0x675   : > { %1364 = vperm.xlu0 %3939, %v4065_v14  }
 0x676   : > { %1757 = vperm.xlu1 %3938, %v4067_v22   ;;  %v1360_v22 = vld [vmem:[#allocation5] sm:$0xff] }
 0x679   : > { %1762 = vperm.xlu0 %3939, %v4069_v25  }
 0x67a   : > { %2150 = vperm.xlu1 %3938, %v4071_v28   ;;  %v1753_v28 = vld [vmem:[#allocation5 + $0x10] sm:$0xff] }
 0x67b   : > { %v1351_v30 = vpop.xlane.xlu0 %1350 }
 0x67c   : > { %v1355_v40 = vadd.f32 %v1351_v30, %v1347_v29 }
 0x67d   : > { %2155 = vperm.xlu0 %3939, %v4073_v39   ;;  %v1754_v39 = vld [vmem:[#allocation5 + $0x18] sm:$0xff] }
 0x67e   : > { %1358 = vst.msk [vmem:[#allocation4] sm:$0xff] %vm995_vm2, %v1355_v40  ;;  %2543 = vperm.xlu1 %3938, %v5002_v45  }
 0x67f   : > { %v1744_v51 = vpop.xlane.xlu0 %1743 }
 0x680   : > { %v1748_v56 = vadd.f32 %v1744_v51, %v1740_v26  ;;  %v2146_v51 = vld [vmem:[#allocation5 + $0x20] sm:$0xff] }
 0x681   : > { %2548 = vperm.xlu0 %3939, %v5006_v54  }
 0x682   : > { %1750 = vst.msk [vmem:[#allocation4 + $0x10] sm:$0xff] %vm995_vm2, %v1748_v56  ;;  %v1354_v46 = vpop.xlane.xlu1 %1353 }
 0x683   : > { %v1356_v61 = vadd.f32 %v1354_v46, %v1348_v58  ;;  %v1747_v34 = vpop.xlane.xlu0 %1746  ;;  %v2147_v58 = vld [vmem:[#allocation5 + $0x28] sm:$0xff] }
 0x684   : > { %v1749_v63 = vadd.f32 %v1747_v34, %v1741_v59 }
 0x685   : > { %1359 = vst.msk [vmem:[#allocation4 + $0x8] sm:$0xff] %vm995_vm2, %v1356_v61  ;;  %v2610_v2 = vld [vmem:[#allocation4] sm:$0xff] }
 0x686   : > { %1751 = vst.msk [vmem:[#allocation4 + $0x18] sm:$0xff] %vm995_vm2, %v1749_v63  ;;  %v2140_v62 = vpop.xlane.xlu1 %2139  ;;  %4078 = vrcp.f32 %v2610_v2 }
 0x687   : > { %v2142_v43 = vadd.f32 %v2140_v62, %v2134_v41  ;;  %v2137_v5 = vpop.xlane.xlu0 %2136 }
 0x688   : > { %v2141_v7 = vadd.f32 %v2137_v5, %v2133_v4 }
 0x689   : > { %2144 = vst.msk [vmem:[#allocation4 + $0x28] sm:$0xff] %vm995_vm2, %v2142_v43  ;;  %v2697_v0 = vld [vmem:[#allocation4 + $0x10] sm:$0xff] }
 0x68a   : > { %2143 = vst.msk [vmem:[#allocation4 + $0x20] sm:$0xff] %vm995_vm2, %v2141_v7  ;;  %4080 = vrcp.f32 %v2697_v0  ;;  %v4042_v7 = vld [vmem:[%s5106_s10 + $0x20] sm:$0xff]  }
 0x68c   : > { %v2611_v12 = vld [vmem:[#allocation4 + $0x8] sm:$0xff] }
 0x68d   : > { %4082 = vrcp.f32 %v2611_v12  ;;  %v2698_v15 = vld [vmem:[#allocation4 + $0x18] sm:$0xff] }
 0x68e   : > { %4084 = vrcp.f32 %v2698_v15 }
 0x690   : > { %v4079_v16 = vpop.eup %4078  ;;  %v2780_v17 = vld [vmem:[#allocation4 + $0x28] sm:$0xff] }
 0x691   : > { %2616 = vperm.xlu1 %3938, %v4079_v16   ;;  %v2779_v36 = vld [vmem:[#allocation4 + $0x20] sm:$0xff] }
 0x692   : > { %4086 = vrcp.f32 %v2779_v36 }
 0x693   : > { %4088 = vrcp.f32 %v2780_v17 }
 0x694   : > { %v4081_v18 = vpop.eup %4080 }
 0x695   : > { %2703 = vperm.xlu1 %3938, %v4081_v18   ;;  %v4044_v18 = vld [vmem:[%s5106_s10 + $0x30] sm:$0xff]  }
 0x697   : > { %v4083_v19 = vpop.eup %4082 }
 0x698   : > { %2621 = vperm.xlu0 %3939, %v4083_v19   ;;  %v4085_v57 = vpop.eup %4084 }
 0x69c   : > { %v4087_v23 = vpop.eup %4086  ;;  %2708 = vperm.xlu0 %3939, %v4085_v57  }
 0x69d   : > { %2785 = vperm.xlu1 %3938, %v4087_v23   ;;  %v4089_v27 = vpop.eup %4088 }
 0x6a0   : > { %2790 = vperm.xlu0 %3939, %v4089_v27   ;;  %v4045_v27 = vld [vmem:[%s5106_s10 + $0x38] sm:$0xff]  }
 0x6ec   : > { %v2530_v49 = vpop.xlane.xlu0 %2529 }
 0x6ed   : > { %v2534_v10 = vadd.f32 %v2530_v49, %v2526_v44  ;;  %v2540_v44 = vld [vmem:[#allocation5 + $0x38] sm:$0xff] }
 0x6ee   : > { %v2533_v8 = vpop.xlane.xlu1 %2532 }
 0x6ef   : > { %2536 = vst.msk [vmem:[#allocation4 + $0x30] sm:$0xff] %vm995_vm2, %v2534_v10  ;;  %v2535_v11 = vadd.f32 %v2533_v8, %v2527_v6 }
 0x6f1   : > { %2537 = vst.msk [vmem:[#allocation4 + $0x38] sm:$0xff] %vm995_vm2, %v2535_v11 }
 0x6f2   : > { %v1370_v14 = vpop.permute.xlu1 %1369 }
 0x6f3   : > { %v1373_v24 = vmul.f32 %v1370_v14, %v1361_v13 }
 0x6f4   : > { %v1365_v25 = vpop.permute.xlu0 %1364 }
 0x6f5   : > { %v1420_v29 = vadd.f32 %v4796_v9, %v1373_v24  ;;  %v1372_v30 = vmul.f32 %v1365_v25, %v1360_v22 }
 0x6f6   : > { %v1758_v33 = vpop.permute.xlu1 %1757  ;;  %v2861_v40 = vld [vmem:[#allocation4 + $0x30] sm:$0xff] }
 0x6f7   : > { %1422 = vst.msk [vmem:[#allocation5 + $0x8] sm:$0xff] %vm636_vm1, %v1420_v29  ;;  %v1419_v45 = vadd.f32 %v4794_v31, %v1372_v30  ;;  %v1765_v26 = vmul.f32 %v1758_v33, %v1753_v28  ;;  %4090 = vrcp.f32 %v2861_v40  ;;  %v3408_v40 = vld [vmem:[%s5107_s11] ss:$0 sm:$0xff] }
 0x6f8   : > { %v1763_v47 = vpop.permute.xlu0 %1762  ;;  %v2862_v52 = vld [vmem:[#allocation4 + $0x38] sm:$0xff] }
 0x6f9   : > { %1421 = vst.msk [vmem:[#allocation5] sm:$0xff] %vm636_vm1, %v1419_v45  ;;  %v1812_v54 = vadd.f32 %v4886_v48, %v1765_v26  ;;  %v1766_v56 = vmul.f32 %v1763_v47, %v1754_v39  ;;  %4092 = vrcp.f32 %v2862_v52 }
 0x6fa   : > { %v2151_v9 = vpop.permute.xlu1 %2150 }
 0x6fb   : > { %1814 = vst.msk [vmem:[#allocation5 + $0x10] sm:$0xff] %vm636_vm1, %v1812_v54  ;;  %v1813_v46 = vadd.f32 %v4888_v50, %v1766_v56  ;;  %v2158_v59 = vmul.f32 %v2151_v9, %v2146_v51 }
 0x6fc   : > { %v2156_v60 = vpop.permute.xlu0 %2155 }
 0x6fd   : > { %1815 = vst.msk [vmem:[#allocation5 + $0x18] sm:$0xff] %vm636_vm1, %v1813_v46  ;;  %v2205_v31 = vadd.f32 %v4969_v55, %v2158_v59  ;;  %v2159_v61 = vmul.f32 %v2156_v60, %v2147_v58 }
 0x6fe   : > { %v2544_v63 = vpop.permute.xlu1 %2543  ;;  %v2609_v62 = vld [vmem:[#allocation5 + $0x8] sm:$0xff] }
 0x6ff   : > { %2207 = vst.msk [vmem:[#allocation5 + $0x20] sm:$0xff] %vm636_vm1, %v2205_v31  ;;  %v2206_v34 = vadd.f32 %v4971_v3, %v2159_v61  ;;  %v2551_v49 = vmul.f32 %v2544_v63, %v2539_v35 }
 0x700   : > { %v2549_v41 = vpop.permute.xlu0 %2548  ;;  %v2608_v2 = vld [vmem:[#allocation5] sm:$0xff] }
 0x701   : > { %v4091_v48 = vpop.eup %4090  ;;  %2208 = vst.msk [vmem:[#allocation5 + $0x28] sm:$0xff] %vm636_vm1, %v2206_v34  ;;  %v2552_v6 = vmul.f32 %v2549_v41, %v2540_v44  ;;  %v3444_v41 = vld [vmem:[%s4281_s19] sm:$0xff]   ;;  %s2995_s19 = sld [smem:[#allocation7 + %s4139_s1]] }
 0x702   : > { %2867 = vperm.xlu1 %3938, %v4091_v48   ;;  %v2695_v0 = vld [vmem:[#allocation5 + $0x10] sm:$0xff] }
 0x703   : > { %v4093_v37 = vpop.eup %4092 }
 0x704   : > { %2872 = vperm.xlu0 %3939, %v4093_v37   ;;  %v2696_v12 = vld [vmem:[#allocation5 + $0x18] sm:$0xff] }
 0x706   : > { %v2777_v20 = vld [vmem:[#allocation5 + $0x20] sm:$0xff] }
 0x708   : > { %v2778_v53 = vld [vmem:[#allocation5 + $0x28] sm:$0xff] }
 0x710   : > { %v2617_v50 = vpop.permute.xlu1 %2616 }
 0x711   : > { %v2624_v43 = vmul.f32 %v2617_v50, %v2608_v2  ;;  %v3445_v50 = vunpack.c.l.bf16 %v3444_v41 }
 0x714   : > { %v2704_v55 = vpop.permute.xlu1 %2703 }
 0x715   : > { %v2711_v16 = vmul.f32 %v2704_v55, %v2695_v0 }
 0x717   : > { %v2622_v4 = vpop.permute.xlu0 %2621 }
 0x718   : > { %v2625_v5 = vmul.f32 %v2622_v4, %v2609_v62 }
 0x71a   : > { %v2626_v3 = vpack.c.bf16 %v2625_v5, %v2624_v43  ;;  %v3446_v43 = vunpack.c.h.bf16 %v3444_v41 }
 0x71b   : > { %v2709_v15 = vpop.permute.xlu0 %2708 }
 0x71c   : > { %v2712_v36 = vmul.f32 %v2709_v15, %v2696_v12  ;;  %3881 = vmatmul.mubr.msk.bf16.vlgmr.msra.gmra.mrb[40].mxu0 %vm636_vm1, %v2626_v3  ;;  %v2786_v17 = vpop.permute.xlu1 %2785 }
 0x71d   : > { %3893 = vmatpush3.bf16.msra.mxu0 %v4042_v7  ;;  %3896 = vmatprep.mubr.msk.bf16.mxu0 %vm4152_vm0, %v4151_v1  ;;  %v2793_v21 = vmul.f32 %v2786_v17, %v2777_v20 }
 0x71e   : > { %v2713_v19 = vpack.c.bf16 %v2712_v36, %v2711_v16  ;;  %3894 = vmatprep.subr.bf16.mxu0 %v4151_v1 }
 0x71f   : > { %v2791_v57 = vpop.permute.xlu0 %2790 }
 0x720   : > { %v2794_v23 = vmul.f32 %v2791_v57, %v2778_v53  ;;  %3889 = vmatmul.mubr.msk.bf16.vlgmr.msra.gmra.mrb[40].mxu1 %vm636_vm1, %v2713_v19 }
 0x721   : > { %3895 = vmatpush3.bf16.msra.mxu0 %v4043_v42  ;;  %3901 = vmatpush3.bf16.msra.mxu1 %v4044_v18 }
 0x722   : > { %v2795_v32 = vpack.c.bf16 %v2794_v23, %v2793_v21  ;;  %3902 = vmatprep.subr.bf16.mxu1 %v4151_v1  ;;  %3904 = vmatprep.mubr.msk.bf16.mxu1 %vm4152_vm0, %v4151_v1 }
 0x724   : > { %3897 = vmatmul.mubr.msk.bf16.vlgmr.msra.gmra.mrb[44].mxu0 %vm636_vm1, %v2795_v32  ;;  %v2990_v32 = vshrl.u32 %v1021_v38, 7 }
 0x725   : > { %3903 = vmatpush3.bf16.msra.mxu1 %v4045_v27 }
 0x726   : > { %v2991_v35 = vadd.s32 8, %v2990_v32 }
 0x735   : > { %v2591_v10 = vpop.f32.mrb[36].mxu1 }
 0x736   : > { %v2598_v8 = vadd.f32 %v2591_v10, %v2551_v49  ;;  %v3874_v11 = vpop.f32.mrb[37].mxu1  ;;  %v3430_v49 = vld [vmem:[%s5108_s12] ss:$0 sm:$0xff]  ;;  %v2996_v10 = vstv %s2995_s19 }
 0x737   : > { %v2594_v13 = vpop.f32.mrb[38].mxu1  ;;  %v3431_v11 = vld [vmem:[%s5109_s13] ss:$0 sm:$0xff]  ;;  %vm2997_vm5 = vcmp.lt.s32.totalorder %v2990_v32, %v2996_v10  ;;  %vm2998_vm6 = vcmp.lt.s32.totalorder %v2991_v35, %v2996_v10 }
 0x738   : > { %2600 = vst.msk [vmem:[#allocation5 + $0x30] sm:$0xff] %vm636_vm1, %v2598_v8  ;;  %v2599_v14 = vadd.f32 %v2594_v13, %v2552_v6  ;;  %v3875_v22 = vpop.f32.mrb[39].mxu1 }
 0x73a   : > { %2601 = vst.msk [vmem:[#allocation5 + $0x38] sm:$0xff] %vm636_vm1, %v2599_v14 }
 0x73f   : > { %v2859_v25 = vld [vmem:[#allocation5 + $0x30] sm:$0xff] }
 0x741   : > { %v2860_v28 = vld [vmem:[#allocation5 + $0x38] sm:$0xff] }
 0x781   : > { %v2868_v24 = vpop.permute.xlu1 %2867 }
 0x782   : > { %v2875_v30 = vmul.f32 %v2868_v24, %v2859_v25  ;;  %v3432_v24 = vsel %vm2997_vm5, 1.0, %v4151_v1  ;;  %v3433_v25 = vsel %vm2998_vm6, 1.0, %v4151_v1 }
 0x783   : > { %v2873_v29 = vpop.permute.xlu0 %2872 }
 0x784   : > { %v2876_v33 = vmul.f32 %v2873_v29, %v2860_v28 }
 0x786   : > { %v2877_v39 = vpack.c.bf16 %v2876_v33, %v2875_v30 }
 0x788   : > { %3905 = vmatmul.mubr.msk.bf16.vlgmr.msra.gmra.mrb[44].mxu1 %vm636_vm1, %v2877_v39 }
 0x7ef   : > { %v2680_v45 = vpop.f32.mrb[40].mxu0 }
 0x7f0   : > { %v3882_v26 = vpop.f32.mrb[41].mxu0  ;;  %v2693_v51 = vadd.f32 %v3408_v40, %v2680_v45 }
 0x7f1   : > { %v2683_v47 = vpop.f32.mrb[42].mxu0 }
 0x7f2   : > { %v3883_v52 = vpop.f32.mrb[43].mxu0  ;;  %v2694_v56 = vadd.f32 %v3408_v40, %v2683_v47 }
 0x7f3   : > { %v2768_v54 = vpop.f32.mrb[40].mxu1 }
 0x7f4   : > { %v2775_v9 = vadd.f32 %v2768_v54, %v2693_v51  ;;  %v3890_v58 = vpop.f32.mrb[41].mxu1 }
 0x7f5   : > { %v2771_v46 = vpop.f32.mrb[42].mxu1 }
 0x7f6   : > { %v2776_v59 = vadd.f32 %v2771_v46, %v2694_v56  ;;  %v3891_v60 = vpop.f32.mrb[43].mxu1 }
 0x7f7   : > { %v2850_v31 = vpop.f32.mrb[44].mxu0 }
 0x7f8   : > { %v2857_v61 = vadd.f32 %v2850_v31, %v2775_v9  ;;  %v3898_v34 = vpop.f32.mrb[45].mxu0 }
 0x7f9   : > { %v2853_v48 = vpop.f32.mrb[46].mxu0 }
 0x7fa   : > { %v2858_v37 = vadd.f32 %v2853_v48, %v2776_v59  ;;  %v3899_v63 = vpop.f32.mrb[47].mxu0 }
 0x85b   : > { %v2932_v2 = vpop.f32.mrb[44].mxu1 }
 0x85c   : > { %v2939_v62 = vadd.f32 %v2932_v2, %v2857_v61  ;;  %v3906_v4 = vpop.f32.mrb[45].mxu1 }
 0x85d   : > { %v2935_v5 = vpop.f32.mrb[46].mxu1 }
 0x85e   : > { %v2940_v55 = vadd.f32 %v2935_v5, %v2858_v37  ;;  %v3907_v7 = vpop.f32.mrb[47].mxu1  ;;  %v2945_v3 = vadd.f32 %v3445_v50, %v2939_v62 }
 0x860   : > { %2949 = vadd.xlane.f32.xlu1 %v2945_v3  ;;  %v2946_v0 = vadd.f32 %v3446_v43, %v2940_v55 }
 0x862   : > { %2951 = vadd.xlane.f32.xlu0 %v2946_v0 }
 0x8ed   : > { %v2950_v12 = vpop.xlane.xlu1 %2949 }
 0x8ee   : > { %v2954_v15 = vmul.f32 0.0078125, %v2950_v12 }
 0x8ef   : > { %v2952_v16 = vpop.xlane.xlu0 %2951 }
 0x8f0   : > { %v2956_v36 = vsub.f32 %v2945_v3, %v2954_v15  ;;  %v2955_v17 = vmul.f32 0.0078125, %v2952_v16 }
 0x8f2   : > { %v2957_v42 = vsub.f32 %v2946_v0, %v2955_v17  ;;  %v2958_v18 = vmul.f32 %v2956_v36, %v2956_v36 }
 0x8f4   : > { %2960 = vadd.xlane.f32.xlu0 %v2958_v18  ;;  %v2959_v19 = vmul.f32 %v2957_v42, %v2957_v42 }
 0x8f6   : > { %2962 = vadd.xlane.f32.xlu1 %v2959_v19 }
 0x981   : > { %v2961_v20 = vpop.xlane.xlu0 %2960 }
 0x982   : > { %v2964_v53 = vmul.f32 0.0078125, %v2961_v20 }
 0x983   : > { %v2963_v57 = vpop.xlane.xlu1 %2962 }
 0x984   : > { %v2966_v21 = vadd.f32 1e-05, %v2964_v53  ;;  %v2965_v23 = vmul.f32 0.0078125, %v2963_v57 }
 0x986   : > { %4094 = vrsqrt.f32 %v2966_v21  ;;  %v2967_v27 = vadd.f32 1e-05, %v2965_v23 }
 0x988   : > { %4096 = vrsqrt.f32 %v2967_v27 }
 0x990   : > { %v4095_v44 = vpop.eup %4094 }
 0x991   : > { %v2970_v6 = vmul.f32 %v4095_v44, %v2956_v36 }
 0x992   : > { %v4097_v8 = vpop.eup %4096 }
 0x993   : > { %v2978_v13 = vmul.f32 %v3430_v49, %v2970_v6  ;;  %v2971_v14 = vmul.f32 %v4097_v8, %v2957_v42 }
 0x995   : > { %v2986_v22 = vadd.f32 %v3431_v11, %v2978_v13  ;;  %v2979_v38 = vmul.f32 %v3430_v49, %v2971_v14 }
 0x997   : > { %v2987_v28 = vadd.f32 %v3431_v11, %v2979_v38  ;;  %v3003_v29 = vmul.f32 %v3432_v24, %v2986_v22 }
 0x999   : > { %v3004_v30 = vmul.f32 %v3433_v25, %v2987_v28 }
 0x99b   : > { %v3450_v33 = vpack.c.bf16 %v3004_v30, %v3003_v29 }
 0x99d   : > { %3451 = vst [vmem:[%s506_s25] sm:$0xff] %v3450_v33  }
 0x99e PF: > { %s34_s23 = sadd.s32 1, %s4147_s23   ;;  %s5112_s1 = smov %s4143_s22 }
 0x99f   : > { %p31_p1 = scmp.ge.s32.totalorder %s34_s23, 4   ;;  %s5113_s22 = smov %s5115_s24 }
 0x9a1   :  { %33 = sbr.rel (!%p31_p1) target bundleno = 27 (0x1b), region = 145 }

// kernel: _lambda_.23
= control target key start
LH: loop header
LB: loop body
LE: loop exit
PB: predicated region body
PF: predicated region fallthrough
CT: control target
= control target key end

     0   :  { %s248_s1 = inlined_call_operand.vmem [shape: bf16[128,128], index: 1, kind: input, shape index: {}]   ;;  %s249_s0 = inlined_call_operand.vmem [shape: bf16[24,128], index: 0, kind: input, shape index: {}]   ;;  %s250_s2 = inlined_call_operand.vmem [shape: f32[24,128], index: 2, kind: output, shape index: {}]  }
   0x1   :  { %v184_v0 = vld [vmem:[%s248_s1] sm:$0xff]   ;;  %v185_v1 = vld [vmem:[%s248_s1 + $0x8] sm:$0xff]   ;;  %v186_v2 = vld [vmem:[%s248_s1 + $0x10] sm:$0xff]  }
   0x2   :  { %164 = vmatprep.subr.bf16.mxu0 %v184_v0  ;;  %v187_v3 = vld [vmem:[%s248_s1 + $0x18] sm:$0xff]   ;;  %v192_v4 = vld [vmem:[%s249_s0] sm:$0xff]   ;;  %v189_v6 = vld [vmem:[%s248_s1 + $0x28] sm:$0xff]  }
   0x3   :  { %165 = vmatpush3.bf16.msra.mxu0 %v184_v0  ;;  %180 = vmatprep.mubr.bf16.mxu0 %v192_v4  ;;  %v188_v5 = vld [vmem:[%s248_s1 + $0x20] sm:$0xff]   ;;  %v190_v7 = vld [vmem:[%s248_s1 + $0x30] sm:$0xff]   ;;  %v191_v8 = vld [vmem:[%s248_s1 + $0x38] sm:$0xff]  }
   0x4   :  { %166 = vmatprep.subr.bf16.mxu0 %v185_v1  ;;  %v193_v9 = vld [vmem:[%s249_s0 + $0x8] ss:$0 sps:$4 sm:$0xff]  }
   0x7   :  { %167 = vmatpush3.bf16.msra.mxu0 %v185_v1 }
   0x8   :  { %168 = vmatprep.subr.bf16.mxu0 %v186_v2 }
   0xb   :  { %169 = vmatpush3.bf16.msra.mxu0 %v186_v2 }
   0xc   :  { %170 = vmatprep.subr.bf16.mxu0 %v187_v3 }
   0xf   :  { %171 = vmatpush3.bf16.msra.mxu0 %v187_v3 }
  0x10   :  { %172 = vmatprep.subr.bf16.mxu0 %v188_v5 }
  0x13   :  { %173 = vmatpush3.bf16.msra.mxu0 %v188_v5 }
  0x14   :  { %174 = vmatprep.subr.bf16.mxu0 %v189_v6 }
  0x17   :  { %175 = vmatpush3.bf16.msra.mxu0 %v189_v6 }
  0x18   :  { %176 = vmatprep.subr.bf16.mxu0 %v190_v7 }
  0x1b   :  { %177 = vmatpush3.bf16.msra.mxu0 %v190_v7 }
  0x1c   :  { %178 = vmatprep.subr.bf16.mxu0 %v191_v8 }
  0x1f   :  { %179 = vmatpush3.bf16.msra.mxu0 %v191_v8 }
  0x22   :  { %181 = vmatmul.mubr.bf16.vlgmr.msra.gmra.mrb[0].mxu0 %v193_v9 }
  0xf5   :  { %v182_v10 = vpop.f32.mrb[0].mxu0 }
  0xf6   :  { %139 = vst [vmem:[%s250_s2 + $0x10] sm:$0xff] %v182_v10  ;;  %v123_v11 = vpop.f32.mrb[1].mxu0 }
  0xf7   :  { %137 = vst [vmem:[%s250_s2] sm:$0xff] %v123_v11  ;;  %v183_v12 = vpop.f32.mrb[2].mxu0 }
  0xf8   :  { %v126_v13 = vpop.f32.mrb[3].mxu0 }
  0xf9   :  { %138 = vst [vmem:[%s250_s2 + $0x8] sm:$0xff] %v126_v13 }

// kernel: _lambda_.18
= control target key start
LH: loop header
LB: loop body
LE: loop exit
PB: predicated region body
PF: predicated region fallthrough
CT: control target
= control target key end

     0   :  { %s5212_s0 = inlined_call_operand.vmem [shape: s32[2], index: 0, kind: input, shape index: {}]   ;;  %s5213_s2 = inlined_call_operand.vmem [shape: bf16[2,9,128], index: 2, kind: input, shape index: {}]   ;;  %s5214_s3 = inlined_call_operand.vmem [shape: bf16[2,16,128], index: 3, kind: input, shape index: {}]   ;;  %s5215_s4 = inlined_call_operand.vmem [shape: bf16[4,128,32], index: 4, kind: input, shape index: {}]   ;;  %s5216_s5 = inlined_call_operand.vmem [shape: f32[4,1,32], index: 5, kind: input, shape index: {}]   ;;  %s5217_s6 = inlined_call_operand.vmem [shape: bf16[4,128,32], index: 6, kind: input, shape index: {}]   ;;  %s5218_s7 = inlined_call_operand.vmem [shape: f32[4,1,32], index: 7, kind: input, shape index: {}]   ;;  %s5219_s8 = inlined_call_operand.vmem [shape: bf16[4,128,32], index: 8, kind: input, shape index: {}]   ;;  %s5220_s9 = inlined_call_operand.vmem [shape: f32[4,1,32], index: 9, kind: input, shape index: {}]   ;;  %s5221_s10 = inlined_call_operand.vmem [shape: bf16[4,32,128], index: 10, kind: input, shape index: {}]   ;;  %s5222_s11 = inlined_call_operand.vmem [shape: f32[1,128], index: 11, kind: input, shape index: {}]   ;;  %s5223_s12 = inlined_call_operand.vmem [shape: f32[1,128], index: 12, kind: input, shape index: {}]   ;;  %s5224_s13 = inlined_call_operand.vmem [shape: f32[1,128], index: 13, kind: input, shape index: {}]   ;;  %s5225_s14 = inlined_call_operand.vmem [shape: bf16[2,9,128], index: 14, kind: output, shape index: {}]   ;;  %s5226_s1 = inlined_call_operand.vmem [shape: s32[2], index: 1, kind: input, shape index: {}]  }
   0x1   :  { %s19_s15 = sshll.u32 %s5212_s0, 4  ;;  %s23_s18 = sshll.u32 %s5226_s1, 4  ;;  %s20_s15 = int_to_ptr.vmem [resolvable:$true] %s19_s15  ;;  %s24_s18 = int_to_ptr.vmem [resolvable:$true] %s23_s18 }
   0x2   :  { %s4195_s19 = scalar_lea.vmem %s20_s15, 16  ;;  %p4200_p1 = scmp.lt.s32.totalorder %s20_s15, %s20_s15 }
   0x3   :  { %p4196_p0 = scmp.ne.s32.totalorder %s20_s15, %s4195_s19  ;;  %p4201_p2 = scmp.lt.s32.totalorder %s4195_s19, %s4195_s19 }
   0x5   :  { %p4202_p3 = por %p4201_p2, %p4200_p1 }
   0x7   :  { %p4203_p4 = pnand %p4202_p3, %p4196_p0 }
   0x9   :  { %4206 = shalt.err (!%p4203_p4)  }
   0xa   :  { %s4245_s20 = smov [#allocation7]   ;;  %s4207_s21 = scalar_lea.vmem %s24_s18, 16 }
   0xb   :  { %22 = dma.vmem_to_smem %s20_s15, 16, %s4245_s20, [#allocation6] }
   0xc   :  { %p4208_p5 = scmp.ne.s32.totalorder %s24_s18, %s4207_s21  ;;  %p4212_p6 = scmp.lt.s32.totalorder %s24_s18, %s24_s18 }
   0xd   :  { %p4213_p7 = scmp.lt.s32.totalorder %s4207_s21, %s4207_s21 }
   0xf   :  { %p4214_p8 = por %p4213_p7, %p4212_p6 }
  0x11   :  { %p4215_p9 = pnand %p4214_p8, %p4208_p5 }
  0x13   :  { %4218 = shalt.err (!%p4215_p9)  }
  0x14   :  { %s4246_s0 = smov [#allocation8]  }
  0x15   :  { %26 = dma.vmem_to_smem %s24_s18, 16, %s4246_s0, [#allocation6] }
  0x16   :  { %4231 = dma.done.wait [#allocation6], 32 }
  0x17   :  { %4232 = vsyncadd [#allocation6], 4294967264 }
  0x18   :  { %28 = sfence }
  0x19   :  { %s4332_s1 = smov 0   ;;  %s4334_s22 = smov 0  }
  0x1a   :  { %s4336_s23 = smov 0  }
  0x1b LB: > { %s53_s24 = sadd.s32 1, %s4239_s22  ;;  %p3208_p10 = scmp.ge.s32.totalorder %s4243_s23, 1  ;;  %s4243_s23 = sphi %s4336_s23, %s34_s23   ;;  %s4239_s22 = sphi %s4334_s22, %s5230_s22   ;;  %s4235_s1 = sphi %s4332_s1, %s5229_s1  }
  0x1c   : > { %p55_p11 = scmp.ge.s32.totalorder %s53_s24, 2  ;;  %p419_p12 = scmp.lt.s32.totalorder %s4243_s23, 3 }
  0x1e   : > { %s5232_s24 = smov (%p55_p11, %s53_s24), 0  ;;  %p420_p13 = pnand %p3208_p10, %p419_p12 }
  0x1f   : > { %v4032_v0 = vld [vmem:[%s5215_s4] sm:$0xff] (!%p420_p13)   ;;  %v4247_v1 = vmov (!%p420_p13), 0.0   ;;  %v4033_v2 = vld [vmem:[%s5215_s4 + $0x8] sm:$0xff] (!%p420_p13)   ;;  %vm4248_vm0 = vmmov (!%p420_p13), 0   ;;  %p479_p0 = scmp.lt.s32.totalorder (!%p420_p13), %s4235_s1, 1  ;;  %v4034_v3 = vld [vmem:[%s5215_s4 + $0x10] sm:$0xff] (!%p420_p13)  }
  0x20   : > { %423 = sbr.rel (%p420_p13) target bundleno = 2465 (0x9a1), region = 68  ;;  %3680 = vmatprep.subr.bf16.mxu0 (!%p420_p13), %v4247_v1  ;;  %3700 = vmatprep.subr.bf16.mxu1 (!%p420_p13), %v4247_v1  ;;  %v4035_v4 = vld [vmem:[%s5215_s4 + $0x18] sm:$0xff] (!%p420_p13)   ;;  %v4036_v5 = vld [vmem:[%s5215_s4 + $0x20] sm:$0xff] (!%p420_p13)   ;;  %v4037_v6 = vld [vmem:[%s5215_s4 + $0x28] sm:$0xff] (!%p420_p13)   ;;  %vm645_vm1 = vcmask (!%p420_p13), 253952   ;;  %vm1056_vm2 = vcmask (!%p420_p13), 261120  }
  0x21   : > { %3681 = vmatpush3.bf16.msra.mxu0 (!%p420_p13), %v4032_v0  ;;  %3696 = vmatprep.mubr.msk.bf16.mxu0 (!%p420_p13), %vm4248_vm0, %v4247_v1  ;;  %v4038_v7 = vld [vmem:[%s5215_s4 + $0x30] sm:$0xff] (!%p420_p13)   ;;  %v4039_v8 = vld [vmem:[%s5215_s4 + $0x38] sm:$0xff] (!%p420_p13)   ;;  %v4042_v10 = vld [vmem:[%s5215_s4 + $0x80] sm:$0xff] (!%p420_p13)   ;;  %1059 = vst.msk [vmem:[#allocation5 + $0x8] sm:$0x1] (!%p420_p13), %vm645_vm1, %v4247_v1  ;;  %vm643_vm4 = vcmask (!%p420_p13), 257024  }
  0x22   : > { %3682 = vmatprep.subr.bf16.mxu0 (!%p420_p13), %v4247_v1  ;;  %3716 = vmatprep.mubr.msk.bf16.mxu1 (!%p420_p13), %vm4248_vm0, %v4247_v1  ;;  %v4043_v11 = vld [vmem:[%s5215_s4 + $0x88] sm:$0xff] (!%p420_p13)   ;;  %v4044_v12 = vld [vmem:[%s5215_s4 + $0x90] sm:$0xff] (!%p420_p13)   ;;  %v4045_v13 = vld [vmem:[%s5215_s4 + $0x98] sm:$0xff] (!%p420_p13)   ;;  %1061 = vst.msk [vmem:[#allocation5 + $0x18] sm:$0x1] (!%p420_p13), %vm645_vm1, %v4247_v1  ;;  %vm1038_vm6 = vcmask (!%p420_p13), 7168  }
  0x23   : > { %v4046_v14 = vld [vmem:[%s5215_s4 + $0xa0] sm:$0xff] (!%p420_p13)   ;;  %v4047_v15 = vld [vmem:[%s5215_s4 + $0xa8] sm:$0xff] (!%p420_p13)   ;;  %v4048_v16 = vld [vmem:[%s5215_s4 + $0xb0] sm:$0xff] (!%p420_p13)   ;;  %1063 = vst.msk [vmem:[#allocation5 + $0x28] sm:$0x1] (!%p420_p13), %vm645_vm1, %v4247_v1  ;;  %vm1366_vm8 = vcmask (!%p420_p13), 130048  }
  0x24   : > { %v4049_v17 = vld [vmem:[%s5215_s4 + $0xb8] sm:$0xff] (!%p420_p13)   ;;  %v4050_v18 = vld [vmem:[%s5217_s6] sm:$0xff] (!%p420_p13)   ;;  %v4051_v19 = vld [vmem:[%s5217_s6 + $0x8] sm:$0xff] (!%p420_p13)   ;;  %1065 = vst.msk [vmem:[#allocation5 + $0x38] sm:$0x1] (!%p420_p13), %vm645_vm1, %v4247_v1  ;;  %vm1370_vm9 = vcmask (!%p420_p13), 122880  }
  0x25   : > { %3683 = vmatpush3.bf16.msra.mxu0 (!%p420_p13), %v4033_v2  ;;  %v4052_v20 = vld [vmem:[%s5217_s6 + $0x10] sm:$0xff] (!%p420_p13)   ;;  %v4053_v21 = vld [vmem:[%s5217_s6 + $0x18] sm:$0xff] (!%p420_p13)   ;;  %v4054_v22 = vld [vmem:[%s5217_s6 + $0x20] sm:$0xff] (!%p420_p13)   ;;  %1057 = vst.msk [vmem:[#allocation5] sm:$0xff] (!%p420_p13), %vm1056_vm2, %v4247_v1  ;;  %vm646_vm3 = vsmask.f32 (!%p420_p13), 256 }
  0x26   : > { %3684 = vmatprep.subr.bf16.mxu0 (!%p420_p13), %v4247_v1  ;;  %v4055_v23 = vld [vmem:[%s5217_s6 + $0x28] sm:$0xff] (!%p420_p13)   ;;  %v4056_v24 = vld [vmem:[%s5217_s6 + $0x30] sm:$0xff] (!%p420_p13)   ;;  %v4057_v25 = vld [vmem:[%s5217_s6 + $0x38] sm:$0xff] (!%p420_p13)   ;;  %1060 = vst.msk [vmem:[#allocation5 + $0x10] sm:$0xff] (!%p420_p13), %vm1056_vm2, %v4247_v1  ;;  %vm1040_vm10 = vcmask (!%p420_p13), 0   ;;  %vm3024_vm11 = vcmask (!%p420_p13), 1040384  }
  0x27   : > { %s480_s29 = scalar_select %p479_p0, %s4235_s1, 1  ;;  %1062 = vst.msk [vmem:[#allocation5 + $0x20] sm:$0xff] %vm1056_vm2, %v4247_v1  ;;  %1064 = vst.msk [vmem:[#allocation5 + $0x30] sm:$0xff] %vm1056_vm2, %v4247_v1  ;;  %v4058_v27 = vld [vmem:[%s5215_s4 + $0x40] sm:$0xff]   ;;  %v4059_v28 = vld [vmem:[%s5215_s4 + $0x48] sm:$0xff]  }
  0x28   : > { %3701 = vmatpush3.bf16.msra.mxu1 %v4058_v27  ;;  %v4062_v29 = vld [vmem:[%s5215_s4 + $0x50] sm:$0xff]   ;;  %v4064_v30 = vld [vmem:[%s5215_s4 + $0x58] sm:$0xff]   ;;  %v4066_v31 = vld [vmem:[%s5215_s4 + $0x60] sm:$0xff]   ;;  %1048 = vst.msk [vmem:[#allocation4] sm:$0xff] %vm1038_vm6, %v4247_v1 }
  0x29   : > { %s4370_s16 = sshll.u32 %s480_s29, 3  ;;  %3685 = vmatpush3.bf16.msra.mxu0 %v4034_v3  ;;  %3702 = vmatprep.subr.bf16.mxu1 %v4247_v1  ;;  %v4068_v32 = vld [vmem:[%s5215_s4 + $0x68] sm:$0xff]   ;;  %v4070_v33 = vld [vmem:[%s5215_s4 + $0x70] sm:$0xff]   ;;  %v4072_v34 = vld [vmem:[%s5215_s4 + $0x78] sm:$0xff]   ;;  %1050 = vst.msk [vmem:[#allocation4 + $0x10] sm:$0xff] %vm1038_vm6, %v4247_v1  ;;  %s1071_s29 = sld [smem:[#allocation8 + %s4235_s1]] }
  0x2a   : > { %s4377_s19 = scalar_lea.vmem %s5213_s2, %s4370_s16  ;;  %s4383_s0 = scalar_lea.vmem %s5214_s3, %s4370_s16  ;;  %3686 = vmatprep.subr.bf16.mxu0 %v4247_v1  ;;  %v3215_v35 = vld [vmem:[%s5216_s5] ss:$0 sm:$0xff]  ;;  %vm4541_vm5 = vmand %vm645_vm1, %vm646_vm3  ;;  %v648_v46 = vld [vmem:[#allocation2 + $0x4] sm:$0x1]  ;;  %1052 = vst.msk [vmem:[#allocation4 + $0x20] sm:$0xff] %vm1038_vm6, %v4247_v1 }
  0x2b   : > { %v4406_v9 = vld [vmem:[%s4377_s19] sm:$0x1f]   ;;  %v906_v59 = vld [vmem:[#allocation2 + $0x14] sm:$0x1]  ;;  %1054 = vst.msk [vmem:[#allocation4 + $0x30] sm:$0xff] %vm1038_vm6, %v4247_v1  ;;  %s506_s25 = scalar_lea.vmem %s5225_s14, %s4370_s16  ;;  %vm3092_vm14 = vmand %vm3024_vm11, %vm646_vm3 }
  0x2c   : > { %v4479_v26 = vld [vmem:[%s4383_s0] sm:$0xff]   ;;  %3703 = vmatpush3.bf16.msra.mxu1 %v4059_v28  ;;  %1049 = vst.msk [vmem:[#allocation4 + $0x8] sm:$0x1] %vm1040_vm10, %v4247_v1  ;;  %1051 = vst.msk [vmem:[#allocation4 + $0x18] sm:$0x1] %vm1040_vm10, %v4247_v1 }
  0x2d   : > { %3687 = vmatpush3.bf16.msra.mxu0 %v4035_v4  ;;  %3704 = vmatprep.subr.bf16.mxu1 %v4247_v1  ;;  %v3272_v49 = vld [vmem:[%s5216_s5 + $0x2] ss:$0 sm:$0xff]  ;;  %v3311_v62 = vld [vmem:[%s5218_s7] ss:$0 sm:$0xff]  ;;  %1053 = vst.msk [vmem:[#allocation4 + $0x28] sm:$0x1] %vm1040_vm10, %v4247_v1 }
  0x2e   : > { %3688 = vmatprep.subr.bf16.mxu0 %v4247_v1  ;;  %1055 = vst.msk [vmem:[#allocation4 + $0x38] sm:$0x1] %vm1040_vm10, %v4247_v1 }
  0x30   : > { %3705 = vmatpush3.bf16.msra.mxu1 %v4062_v29 }
  0x31   : > { %3689 = vmatpush3.bf16.msra.mxu0 %v4036_v5  ;;  %3706 = vmatprep.subr.bf16.mxu1 %v4247_v1 }
  0x32   : > { %3690 = vmatprep.subr.bf16.mxu0 %v4247_v1 }
  0x34   : > { %3707 = vmatpush3.bf16.msra.mxu1 %v4064_v30 }
  0x35   : > { %3691 = vmatpush3.bf16.msra.mxu0 %v4037_v6  ;;  %3708 = vmatprep.subr.bf16.mxu1 %v4247_v1 }
  0x36   : > { %3692 = vmatprep.subr.bf16.mxu0 %v4247_v1 }
  0x38   : > { %3709 = vmatpush3.bf16.msra.mxu1 %v4066_v31 }
  0x39   : > { %3693 = vmatpush3.bf16.msra.mxu0 %v4038_v7  ;;  %3710 = vmatprep.subr.bf16.mxu1 %v4247_v1 }
  0x3a   : > { %3694 = vmatprep.subr.bf16.mxu0 %v4247_v1 }
  0x3c   : > { %3711 = vmatpush3.bf16.msra.mxu1 %v4068_v32 }
  0x3d   : > { %3695 = vmatpush3.bf16.msra.mxu0 %v4039_v8  ;;  %3712 = vmatprep.subr.bf16.mxu1 %v4247_v1  ;;  %v4061_v8 = vld [vmem:[%s5217_s6 + $0x40] sm:$0xff]  }
  0x3e   : > { %3720 = vmatprep.subr.bf16.mxu0 %v4247_v1 }
  0x40   : > { %3697 = vmatmul.mubr.bf16.vlgmr.msra.gmra.mrb[0].mxu0 %v4406_v9  ;;  %3713 = vmatpush3.bf16.msra.mxu1 %v4070_v33 }
  0x41   : > { %3721 = vmatpush3.bf16.msra.mxu0 %v4042_v10  ;;  %3736 = vmatprep.mubr.msk.bf16.mxu0 %vm4248_vm0, %v4247_v1 }
  0x42   : > { %3722 = vmatprep.subr.bf16.mxu0 %v4247_v1  ;;  %3714 = vmatprep.subr.bf16.mxu1 %v4247_v1 }
  0x44   : > { %3715 = vmatpush3.bf16.msra.mxu1 %v4072_v34  ;;  %v4080_v34 = vld [vmem:[%s5215_s4 + $0xe8] sm:$0xff]  }
  0x45   : > { %3723 = vmatpush3.bf16.msra.mxu0 %v4043_v11  ;;  %3740 = vmatprep.subr.bf16.mxu1 %v4247_v1  ;;  %v4063_v11 = vld [vmem:[%s5217_s6 + $0x48] sm:$0xff]  }
  0x46   : > { %3724 = vmatprep.subr.bf16.mxu0 %v4247_v1 }
  0x47   : > { %3717 = vmatmul.mubr.bf16.vlgmr.msra.gmra.mrb[0].mxu1 %v4406_v9 }
  0x48   : > { %3756 = vmatprep.mubr.msk.bf16.mxu1 %vm4248_vm0, %v4247_v1 }
  0x49   : > { %3725 = vmatpush3.bf16.msra.mxu0 %v4044_v12  ;;  %v4065_v12 = vld [vmem:[%s5217_s6 + $0x50] sm:$0xff]  }
  0x4a   : > { %3726 = vmatprep.subr.bf16.mxu0 %v4247_v1 }
  0x4d   : > { %3727 = vmatpush3.bf16.msra.mxu0 %v4045_v13  ;;  %v4067_v13 = vld [vmem:[%s5217_s6 + $0x58] sm:$0xff]  }
  0x4e   : > { %3728 = vmatprep.subr.bf16.mxu0 %v4247_v1 }
  0x51   : > { %3729 = vmatpush3.bf16.msra.mxu0 %v4046_v14  ;;  %v4069_v14 = vld [vmem:[%s5217_s6 + $0x60] sm:$0xff]  }
  0x52   : > { %3730 = vmatprep.subr.bf16.mxu0 %v4247_v1 }
  0x55   : > { %3731 = vmatpush3.bf16.msra.mxu0 %v4047_v15  ;;  %v4071_v15 = vld [vmem:[%s5217_s6 + $0x68] sm:$0xff]  }
  0x56   : > { %3732 = vmatprep.subr.bf16.mxu0 %v4247_v1 }
  0x59   : > { %3733 = vmatpush3.bf16.msra.mxu0 %v4048_v16  ;;  %v4073_v16 = vld [vmem:[%s5217_s6 + $0x70] sm:$0xff]  }
  0x5a   : > { %3734 = vmatprep.subr.bf16.mxu0 %v4247_v1 }
  0x5d   : > { %3735 = vmatpush3.bf16.msra.mxu0 %v4049_v17  ;;  %v4074_v17 = vld [vmem:[%s5217_s6 + $0x78] sm:$0xff]  }
  0x5e   : > { %3760 = vmatprep.subr.bf16.mxu0 %v4247_v1 }
  0x60   : > { %3737 = vmatmul.mubr.bf16.vlgmr.msra.gmra.mrb[4].mxu0 %v4406_v9 }
  0x61   : > { %3761 = vmatpush3.bf16.msra.mxu0 %v4050_v18  ;;  %3776 = vmatprep.mubr.msk.bf16.mxu0 %vm4248_vm0, %v4247_v1  ;;  %v4075_v18 = vld [vmem:[%s5215_s4 + $0xc0] sm:$0xff]  }
  0x62   : > { %3762 = vmatprep.subr.bf16.mxu0 %v4247_v1  ;;  %3741 = vmatpush3.bf16.msra.mxu1 %v4075_v18 }
  0x63   : > { %3742 = vmatprep.subr.bf16.mxu1 %v4247_v1 }
  0x65   : > { %3763 = vmatpush3.bf16.msra.mxu0 %v4051_v19  ;;  %v4076_v19 = vld [vmem:[%s5215_s4 + $0xc8] sm:$0xff]  }
  0x66   : > { %3764 = vmatprep.subr.bf16.mxu0 %v4247_v1  ;;  %3743 = vmatpush3.bf16.msra.mxu1 %v4076_v19 }
  0x67   : > { %3744 = vmatprep.subr.bf16.mxu1 %v4247_v1 }
  0x69   : > { %3765 = vmatpush3.bf16.msra.mxu0 %v4052_v20  ;;  %v4077_v20 = vld [vmem:[%s5215_s4 + $0xd0] sm:$0xff]  }
  0x6a   : > { %3766 = vmatprep.subr.bf16.mxu0 %v4247_v1  ;;  %3745 = vmatpush3.bf16.msra.mxu1 %v4077_v20 }
  0x6b   : > { %3746 = vmatprep.subr.bf16.mxu1 %v4247_v1 }
  0x6d   : > { %3767 = vmatpush3.bf16.msra.mxu0 %v4053_v21  ;;  %v4078_v21 = vld [vmem:[%s5215_s4 + $0xd8] sm:$0xff]  }
  0x6e   : > { %3768 = vmatprep.subr.bf16.mxu0 %v4247_v1  ;;  %3747 = vmatpush3.bf16.msra.mxu1 %v4078_v21 }
  0x6f   : > { %3748 = vmatprep.subr.bf16.mxu1 %v4247_v1 }
  0x71   : > { %3769 = vmatpush3.bf16.msra.mxu0 %v4054_v22  ;;  %v4079_v22 = vld [vmem:[%s5215_s4 + $0xe0] sm:$0xff]  }
  0x72   : > { %3770 = vmatprep.subr.bf16.mxu0 %v4247_v1  ;;  %3749 = vmatpush3.bf16.msra.mxu1 %v4079_v22 }
  0x73   : > { %3750 = vmatprep.subr.bf16.mxu1 %v4247_v1 }
  0x75   : > { %3771 = vmatpush3.bf16.msra.mxu0 %v4055_v23  ;;  %v3244_v23 = vld [vmem:[%s5216_s5 + $0x1] ss:$0 sm:$0xff] }
  0x76   : > { %3772 = vmatprep.subr.bf16.mxu0 %v4247_v1  ;;  %3751 = vmatpush3.bf16.msra.mxu1 %v4080_v34 }
  0x77   : > { %3752 = vmatprep.subr.bf16.mxu1 %v4247_v1 }
  0x79   : > { %3773 = vmatpush3.bf16.msra.mxu0 %v4056_v24 }
  0x7a   : > { %3774 = vmatprep.subr.bf16.mxu0 %v4247_v1 }
  0x7d   : > { %3775 = vmatpush3.bf16.msra.mxu0 %v4057_v25 }
  0x7e   : > { %3800 = vmatprep.subr.bf16.mxu0 %v4247_v1 }
  0x80   : > { %3777 = vmatmul.mubr.bf16.vlgmr.msra.gmra.mrb[8].mxu0 %v4479_v26 }
  0x81   : > { %3802 = vmatprep.mubr.msk.bf16.mxu0 %vm4248_vm0, %v4247_v1 }
 0x113   : > { %v626_v36 = vpop.f32.mrb[0].mxu0 }
 0x114   : > { %v627_v37 = vadd.f32 %v3215_v35, %v626_v36  ;;  %v3698_v38 = vpop.f32.mrb[1].mxu0 }
 0x115   : > { %v629_v39 = vpop.f32.mrb[2].mxu0  ;;  %v4081_v38 = vld [vmem:[%s5215_s4 + $0xf0] sm:$0xff]  }
 0x116   : > { %v633_v40 = vmul.f32 0.17677669, %v627_v37  ;;  %v630_v41 = vadd.f32 %v3215_v35, %v629_v39  ;;  %v3699_v42 = vpop.f32.mrb[3].mxu0  ;;  %v777_v35 = vld [vmem:[#allocation2 + $0xc] sm:$0x1]  ;;  %3753 = vmatpush3.bf16.msra.mxu1 %v4081_v38  ;;  %v4082_v39 = vld [vmem:[%s5215_s4 + $0xf8] sm:$0xff]  }
 0x117   : > { %3754 = vmatprep.subr.bf16.mxu1 %v4247_v1  ;;  %v4088_v42 = vld [vmem:[%s5219_s8 + $0x10] sm:$0xff]  }
 0x118   : > { %v3534_v43 = vpack.c.bf16 %v633_v40, %v633_v40  ;;  %v634_v44 = vmul.f32 0.17677669, %v630_v41  ;;  %v4083_v40 = vld [vmem:[%s5219_s8] sm:$0xff]   ;;  %v4086_v41 = vld [vmem:[%s5219_s8 + $0x8] sm:$0xff]  }
 0x11a   : > { %644 = vst.msk [vmem:[#allocation2] sm:$0xf] %vm643_vm4, %v3534_v43  ;;  %v3535_v47 = vpack.c.bf16 %v634_v44, %v634_v44  ;;  %v758_v24 = vpop.f32.mrb[0].mxu1  ;;  %3755 = vmatpush3.bf16.msra.mxu1 %v4082_v39  ;;  %v4092_v43 = vld [vmem:[%s5219_s8 + $0x20] sm:$0xff]   ;;  %v4094_v44 = vld [vmem:[%s5219_s8 + $0x28] sm:$0xff]  }
 0x11b   : > { %v759_v25 = vadd.f32 %v3244_v23, %v758_v24  ;;  %v3718_v27 = vpop.f32.mrb[1].mxu1  ;;  %3780 = vmatprep.subr.bf16.mxu1 %v4247_v1 }
 0x11c   : > { %v649_v48 = vsel %vm4541_vm5, %v3535_v47, %v648_v46  ;;  %v761_v28 = vpop.f32.mrb[2].mxu1  ;;  %v4096_v46 = vld [vmem:[%s5219_s8 + $0x30] sm:$0xff]   ;;  %v4098_v47 = vld [vmem:[%s5219_s8 + $0x38] sm:$0xff]  }
 0x11d   : > { %650 = vst [vmem:[#allocation2 + $0x4] sm:$0x1] %v649_v48  ;;  %v765_v29 = vmul.f32 0.17677669, %v759_v25  ;;  %v762_v30 = vadd.f32 %v3244_v23, %v761_v28  ;;  %v3719_v31 = vpop.f32.mrb[3].mxu1  ;;  %3757 = vmatmul.mubr.bf16.vlgmr.msra.gmra.mrb[4].mxu1 %v4406_v9  ;;  %v4090_v9 = vld [vmem:[%s5219_s8 + $0x18] sm:$0xff]  }
 0x11e   : > { %3781 = vmatpush3.bf16.msra.mxu1 %v4083_v40  ;;  %3796 = vmatprep.mubr.msk.bf16.mxu1 %vm4248_vm0, %v4247_v1  ;;  %v4249_v48 = vmov -inf   ;;  %v3300_v28 = vld [vmem:[%s5216_s5 + $0x3] ss:$0 sm:$0xff] }
 0x11f   : > { %v3536_v32 = vpack.c.bf16 %v765_v29, %v765_v29  ;;  %v766_v33 = vmul.f32 0.17677669, %v762_v30  ;;  %3782 = vmatprep.subr.bf16.mxu1 %v4247_v1  ;;  %1039 = vst.msk [vmem:[#allocation3] sm:$0xff] %vm1038_vm6, %v4249_v48  ;;  %1042 = vst.msk [vmem:[#allocation3 + $0x10] sm:$0xff] %vm1038_vm6, %v4249_v48 }
 0x120   : > { %1044 = vst.msk [vmem:[#allocation3 + $0x20] sm:$0xff] %vm1038_vm6, %v4249_v48  ;;  %1046 = vst.msk [vmem:[#allocation3 + $0x30] sm:$0xff] %vm1038_vm6, %v4249_v48 }
 0x121   : > { %776 = vst.msk [vmem:[#allocation2 + $0x8] sm:$0xf] %vm643_vm4, %v3536_v32  ;;  %v3537_v36 = vpack.c.bf16 %v766_v33, %v766_v33  ;;  %v3321_v32 = vld [vmem:[%s5220_s9] ss:$0 sm:$0xff] }
 0x122   : > { %3783 = vmatpush3.bf16.msra.mxu1 %v4086_v41  ;;  %1041 = vst.msk [vmem:[#allocation3 + $0x8] sm:$0x1] %vm1040_vm10, %v4249_v48  ;;  %1043 = vst.msk [vmem:[#allocation3 + $0x18] sm:$0x1] %vm1040_vm10, %v4249_v48  ;;  %v1035_v41 = vld [vmem:[#allocation2 + $0x1c] sm:$0x1] }
 0x123   : > { %v778_v37 = vsel %vm4541_vm5, %v3537_v36, %v777_v35  ;;  %3784 = vmatprep.subr.bf16.mxu1 %v4247_v1  ;;  %1045 = vst.msk [vmem:[#allocation3 + $0x28] sm:$0x1] %vm1040_vm10, %v4249_v48  ;;  %1047 = vst.msk [vmem:[#allocation3 + $0x38] sm:$0x1] %vm1040_vm10, %v4249_v48 }
 0x124   : > { %v4060_v10 = vld [vmem:[#allocation2] sm:$0x1f]   ;;  %779 = vst [vmem:[#allocation2 + $0xc] sm:$0x1] %v778_v37 }
 0x126   : > { %3785 = vmatpush3.bf16.msra.mxu1 %v4088_v42  ;;  %v4755_v18 = vld [vmem:[#allocation3] sm:$0xff] }
 0x127   : > { %3786 = vmatprep.subr.bf16.mxu1 %v4247_v1 }
 0x129   : > { %v4760_v21 = vld [vmem:[#allocation3 + $0x8] sm:$0x1] }
 0x12a   : > { %3787 = vmatpush3.bf16.msra.mxu1 %v4090_v9 }
 0x12b   : > { %3788 = vmatprep.subr.bf16.mxu1 %v4247_v1 }
 0x12e   : > { %3789 = vmatpush3.bf16.msra.mxu1 %v4092_v43 }
 0x12f   : > { %3790 = vmatprep.subr.bf16.mxu1 %v4247_v1 }
 0x132   : > { %3791 = vmatpush3.bf16.msra.mxu1 %v4094_v44 }
 0x133   : > { %v887_v50 = vpop.f32.mrb[4].mxu0  ;;  %3792 = vmatprep.subr.bf16.mxu1 %v4247_v1 }
 0x134   : > { %v888_v51 = vadd.f32 %v3272_v49, %v887_v50  ;;  %v3738_v52 = vpop.f32.mrb[5].mxu0 }
 0x135   : > { %v890_v53 = vpop.f32.mrb[6].mxu0 }
 0x136   : > { %v894_v54 = vmul.f32 0.17677669, %v888_v51  ;;  %v891_v55 = vadd.f32 %v3272_v49, %v890_v53  ;;  %v3739_v56 = vpop.f32.mrb[7].mxu0  ;;  %3793 = vmatpush3.bf16.msra.mxu1 %v4096_v46  ;;  %v1067_v49 = vlaneseq  ;;  %v1072_v51 = vstv %s1071_s29 }
 0x137   : > { %3794 = vmatprep.subr.bf16.mxu1 %v4247_v1 }
 0x138   : > { %v3538_v57 = vpack.c.bf16 %v894_v54, %v894_v54  ;;  %v895_v58 = vmul.f32 0.17677669, %v891_v55  ;;  %v1068_v50 = vand.u32 127, %v1067_v49 }
 0x13a   : > { %905 = vst.msk [vmem:[#allocation2 + $0x10] sm:$0xf] %vm643_vm4, %v3538_v57  ;;  %v3539_v60 = vpack.c.bf16 %v895_v58, %v895_v58  ;;  %3795 = vmatpush3.bf16.msra.mxu1 %v4098_v47  ;;  %vm1073_vm7 = vcmp.ge.s32.totalorder %v1068_v50, %v1072_v51 }
 0x13b   : > { %3806 = vmatprep.subr.bf16.mxu1 %v4247_v1  ;;  %v4688_v52 = vsel %vm1073_vm7, -1e+30, %v4247_v1 }
 0x13c   : > { %v907_v61 = vsel %vm4541_vm5, %v3539_v60, %v906_v59 }
 0x13d   : > { %908 = vst [vmem:[#allocation2 + $0x14] sm:$0x1] %v907_v61  ;;  %3797 = vmatmul.mubr.bf16.vlgmr.msra.gmra.mrb[8].mxu1 %v4479_v26  ;;  %v4250_v61 = vmov 0  }
 0x13e   : > { %3808 = vmatprep.mubr.msk.bf16.mxu1 %vm4248_vm0, %v4247_v1  ;;  %4030 = vset.pattern.permute.xlu1 %v4250_v61 }
 0x13f   : > { %4031 = vset.pattern.permute.xlu0 %v4250_v61 }
 0x153   : > { %v1188_v63 = vpop.f32.mrb[8].mxu0 }
 0x154   : > { %v3778_v0 = vpop.f32.mrb[9].mxu0  ;;  %v1189_v3 = vadd.f32 %v3311_v62, %v1188_v63 }
 0x155   : > { %v1191_v2 = vpop.f32.mrb[10].mxu0 }
 0x156   : > { %v1192_v4 = vadd.f32 %v3311_v62, %v1191_v2  ;;  %v3779_v5 = vpop.f32.mrb[11].mxu0  ;;  %v3350_v62 = vld [vmem:[%s5218_s7 + $0x1] ss:$0 sm:$0xff] }
 0x158   : > { %v1195_v6 = vpack.c.bf16 %v1192_v4, %v1189_v3 }
 0x15a   : > { %v1321_v7 = vsel %vm1056_vm2, %v1195_v6, 0 }
 0x15b   : > { %3801 = vmatpush3.bf16.xpose.msra.mxu0 %v1321_v7 }
 0x15c   : > { %3812 = vmatprep.subr.bf16.mxu0 %v4247_v1 }
 0x162   : > { %3803 = vmatmul.mubr.msk.bf16.vlgmr.msra.gmra.mrb[12].mxu0 %vm1056_vm2, %v4060_v10  ;;  %v4084_v10 = vld [vmem:[#allocation2 + $0x8] sm:$0x1f]  }
 0x163   : > { %3813 = vmatpush3.bf16.msra.mxu0 %v4061_v8  ;;  %3828 = vmatprep.mubr.msk.bf16.mxu0 %vm4248_vm0, %v4247_v1  ;;  %v4085_v8 = vld [vmem:[%s5217_s6 + $0x80] sm:$0xff]  }
 0x164   : > { %3814 = vmatprep.subr.bf16.mxu0 %v4247_v1 }
 0x167   : > { %3815 = vmatpush3.bf16.msra.mxu0 %v4063_v11  ;;  %v4087_v11 = vld [vmem:[%s5217_s6 + $0x88] sm:$0xff]  }
 0x168   : > { %3816 = vmatprep.subr.bf16.mxu0 %v4247_v1 }
 0x16b   : > { %3817 = vmatpush3.bf16.msra.mxu0 %v4065_v12  ;;  %v4089_v12 = vld [vmem:[%s5217_s6 + $0x90] sm:$0xff]  }
 0x16c   : > { %3818 = vmatprep.subr.bf16.mxu0 %v4247_v1 }
 0x16f   : > { %3819 = vmatpush3.bf16.msra.mxu0 %v4067_v13  ;;  %v4091_v13 = vld [vmem:[%s5217_s6 + $0x98] sm:$0xff]  }
 0x170   : > { %3820 = vmatprep.subr.bf16.mxu0 %v4247_v1 }
 0x173   : > { %3821 = vmatpush3.bf16.msra.mxu0 %v4069_v14  ;;  %v4093_v14 = vld [vmem:[%s5217_s6 + $0xa0] sm:$0xff]  }
 0x174   : > { %3822 = vmatprep.subr.bf16.mxu0 %v4247_v1 }
 0x177   : > { %3823 = vmatpush3.bf16.msra.mxu0 %v4071_v15  ;;  %v4095_v15 = vld [vmem:[%s5217_s6 + $0xa8] sm:$0xff]  }
 0x178   : > { %3824 = vmatprep.subr.bf16.mxu0 %v4247_v1 }
 0x17b   : > { %3825 = vmatpush3.bf16.msra.mxu0 %v4073_v16  ;;  %v4097_v16 = vld [vmem:[%s5217_s6 + $0xb0] sm:$0xff]  }
 0x17c   : > { %3826 = vmatprep.subr.bf16.mxu0 %v4247_v1 }
 0x17f   : > { %3827 = vmatpush3.bf16.msra.mxu0 %v4074_v17  ;;  %v4099_v17 = vld [vmem:[%s5217_s6 + $0xb8] sm:$0xff]  }
 0x180   : > { %3852 = vmatprep.subr.bf16.mxu0 %v4247_v1 }
 0x182   : > { %3829 = vmatmul.mubr.bf16.vlgmr.msra.gmra.mrb[16].mxu0 %v4479_v26 }
 0x183   : > { %3854 = vmatprep.mubr.msk.bf16.mxu0 %vm4248_vm0, %v4247_v1 }
 0x1f0   : > { %v1016_v27 = vpop.f32.mrb[4].mxu1 }
 0x1f1   : > { %v3758_v29 = vpop.f32.mrb[5].mxu1  ;;  %v1017_v30 = vadd.f32 %v3300_v28, %v1016_v27  ;;  %v4107_v27 = vld [vmem:[%s5217_s6 + $0xd0] sm:$0xff]  }
 0x1f2   : > { %v1019_v31 = vpop.f32.mrb[6].mxu1  ;;  %v4109_v29 = vld [vmem:[%s5217_s6 + $0xd8] sm:$0xff]  }
 0x1f3   : > { %v1020_v33 = vadd.f32 %v3300_v28, %v1019_v31  ;;  %v3759_v34 = vpop.f32.mrb[7].mxu1  ;;  %v1023_v35 = vmul.f32 0.17677669, %v1017_v30  ;;  %v4108_v28 = vld [vmem:[%s5219_s8 + $0x60] sm:$0xff]   ;;  %v4110_v30 = vld [vmem:[%s5219_s8 + $0x68] sm:$0xff]  }
 0x1f4   : > { %v4111_v31 = vld [vmem:[%s5217_s6 + $0xe0] sm:$0xff]   ;;  %v4114_v34 = vld [vmem:[%s5219_s8 + $0x78] sm:$0xff]  }
 0x1f5   : > { %v1024_v37 = vmul.f32 0.17677669, %v1020_v33  ;;  %v3540_v40 = vpack.c.bf16 %v1023_v35, %v1023_v35  ;;  %v4113_v33 = vld [vmem:[%s5217_s6 + $0xe8] sm:$0xff]   ;;  %v4115_v35 = vld [vmem:[%s5217_s6 + $0xf0] sm:$0xff]  }
 0x1f7   : > { %v3541_v9 = vpack.c.bf16 %v1024_v37, %v1024_v37  ;;  %1034 = vst.msk [vmem:[#allocation2 + $0x18] sm:$0xf] %vm643_vm4, %v3540_v40  ;;  %v4884_v37 = vld [vmem:[#allocation3 + $0x10] sm:$0xff] }
 0x1f9   : > { %v1036_v46 = vsel %vm4541_vm5, %v3541_v9, %v1035_v41 }
 0x1fa   : > { %1037 = vst [vmem:[#allocation2 + $0x1c] sm:$0x1] %v1036_v46 }
 0x210   : > { %v1301_v36 = vpop.f32.mrb[8].mxu1 }
 0x211   : > { %v1302_v38 = vadd.f32 %v3321_v32, %v1301_v36  ;;  %v3798_v39 = vpop.f32.mrb[9].mxu1  ;;  %v4116_v36 = vld [vmem:[%s5217_s6 + $0xf8] sm:$0xff]  }
 0x212   : > { %v1304_v42 = vpop.f32.mrb[10].mxu1  ;;  %v4886_v39 = vld [vmem:[#allocation3 + $0x18] sm:$0x1] }
 0x213   : > { %v1305_v43 = vadd.f32 %v3321_v32, %v1304_v42  ;;  %v3799_v44 = vpop.f32.mrb[11].mxu1  ;;  %v4112_v32 = vld [vmem:[%s5219_s8 + $0x70] sm:$0xff]  }
 0x215   : > { %v1308_v47 = vpack.c.bf16 %v1305_v43, %v1302_v38 }
 0x217   : > { %3807 = vmatpush3.bf16.msra.mxu1 %v1308_v47 }
 0x218   : > { %3832 = vmatprep.subr.bf16.mxu1 %v4247_v1 }
 0x235   : > { %v1357_v53 = vpop.f32.mrb[12].mxu0 }
 0x236   : > { %v4691_v54 = vadd.f32 %v1357_v53, %v4688_v52  ;;  %v3804_v55 = vpop.f32.mrb[13].mxu0 }
 0x237   : > { %v1360_v56 = vpop.f32.mrb[14].mxu0 }
 0x238   : > { %v4694_v57 = vadd.f32 %v1360_v56, %v4688_v52  ;;  %v3805_v58 = vpop.f32.mrb[15].mxu0  ;;  %v1367_v59 = vsel %vm1366_vm8, %v4691_v54, -inf }
 0x239   : > { %1368 = vmax.xlane.f32.xlu0 %v1367_v59 }
 0x23a   : > { %v1371_v60 = vsel %vm1370_vm9, %v4694_v57, -inf }
 0x23d   : > { %1372 = vmax.xlane.f32.xlu0 %v1371_v60 }
 0x255   : > { %v1587_v63 = vpop.f32.mrb[16].mxu0 }
 0x256   : > { %v3830_v0 = vpop.f32.mrb[17].mxu0  ;;  %v1588_v3 = vadd.f32 %v3350_v62, %v1587_v63 }
 0x257   : > { %v1590_v2 = vpop.f32.mrb[18].mxu0 }
 0x258   : > { %v1591_v4 = vadd.f32 %v3350_v62, %v1590_v2  ;;  %v3831_v5 = vpop.f32.mrb[19].mxu0  ;;  %v3405_v2 = vld [vmem:[%s5218_s7 + $0x2] ss:$0 sm:$0xff] }
 0x25a   : > { %v1594_v6 = vpack.c.bf16 %v1591_v4, %v1588_v3 }
 0x25c   : > { %v1722_v7 = vsel %vm1056_vm2, %v1594_v6, 0 }
 0x25d   : > { %3853 = vmatpush3.bf16.xpose.msra.mxu0 %v1722_v7 }
 0x25e   : > { %3864 = vmatprep.subr.bf16.mxu0 %v4247_v1 }
 0x264   : > { %3855 = vmatmul.mubr.msk.bf16.vlgmr.msra.gmra.mrb[20].mxu0 %vm1056_vm2, %v4084_v10 }
 0x265   : > { %3865 = vmatpush3.bf16.msra.mxu0 %v4085_v8  ;;  %3880 = vmatprep.mubr.msk.bf16.mxu0 %vm4248_vm0, %v4247_v1 }
 0x266   : > { %3866 = vmatprep.subr.bf16.mxu0 %v4247_v1 }
 0x269   : > { %3867 = vmatpush3.bf16.msra.mxu0 %v4087_v11 }
 0x26a   : > { %3868 = vmatprep.subr.bf16.mxu0 %v4247_v1 }
 0x26d   : > { %3869 = vmatpush3.bf16.msra.mxu0 %v4089_v12 }
 0x26e   : > { %3870 = vmatprep.subr.bf16.mxu0 %v4247_v1 }
 0x271   : > { %3871 = vmatpush3.bf16.msra.mxu0 %v4091_v13 }
 0x272   : > { %3872 = vmatprep.subr.bf16.mxu0 %v4247_v1 }
 0x275   : > { %3873 = vmatpush3.bf16.msra.mxu0 %v4093_v14  ;;  %v4101_v14 = vld [vmem:[%s5219_s8 + $0x48] sm:$0xff]  }
 0x276   : > { %3874 = vmatprep.subr.bf16.mxu0 %v4247_v1 }
 0x279   : > { %3875 = vmatpush3.bf16.msra.mxu0 %v4095_v15  ;;  %v4103_v15 = vld [vmem:[%s5217_s6 + $0xc0] sm:$0xff]  }
 0x27a   : > { %3876 = vmatprep.subr.bf16.mxu0 %v4247_v1 }
 0x27d   : > { %3877 = vmatpush3.bf16.msra.mxu0 %v4097_v16  ;;  %v4104_v16 = vld [vmem:[%s5219_s8 + $0x50] sm:$0xff]  }
 0x27e   : > { %3878 = vmatprep.subr.bf16.mxu0 %v4247_v1 }
 0x281   : > { %3879 = vmatpush3.bf16.msra.mxu0 %v4099_v17  ;;  %v4102_v17 = vld [vmem:[#allocation2 + $0x10] sm:$0x1f]  }
 0x282   : > { %3904 = vmatprep.subr.bf16.mxu0 %v4247_v1 }
 0x284   : > { %3881 = vmatmul.mubr.bf16.vlgmr.msra.gmra.mrb[24].mxu0 %v4479_v26 }
 0x285   : > { %3906 = vmatprep.mubr.msk.bf16.mxu0 %vm4248_vm0, %v4247_v1 }
 0x2c6   : > { %v1369_v19 = vpop.xlane.xlu0 %1368 }
 0x2c7   : > { %v4758_v20 = vmax.f32 %v4755_v18, %v1369_v19  ;;  %v4105_v19 = vld [vmem:[%s5217_s6 + $0xc8] sm:$0xff]  }
 0x2c9   : > { %v1376_v22 = vsub.f32 %v4755_v18, %v4758_v20  ;;  %1478 = vst.msk [vmem:[#allocation3] sm:$0xff] %vm1038_vm6, %v4758_v20  ;;  %1384 = vperm.xlu1 %4030, %v4758_v20  }
 0x2ca   : > { %v1373_v23 = vpop.xlane.xlu0 %1372 }
 0x2cb   : > { %v4768_v24 = vmax.f32 %v4760_v21, %v1373_v23  ;;  %v4106_v23 = vld [vmem:[%s5219_s8 + $0x58] sm:$0xff]  }
 0x2cd   : > { %v1377_v25 = vsub.f32 %v4760_v21, %v4768_v24  ;;  %1479 = vst.msk [vmem:[#allocation3 + $0x8] sm:$0x1] %vm1040_vm10, %v4768_v24  ;;  %1389 = vperm.xlu1 %4030, %v4768_v24  }
 0x337   : > { %v1758_v48 = vpop.f32.mrb[20].mxu0 }
 0x338   : > { %v4786_v50 = vadd.f32 %v1758_v48, %v4688_v52  ;;  %v3856_v51 = vpop.f32.mrb[21].mxu0 }
 0x339   : > { %v1761_v53 = vpop.f32.mrb[22].mxu0 }
 0x33a   : > { %v4789_v55 = vadd.f32 %v1761_v53, %v4688_v52  ;;  %v3857_v56 = vpop.f32.mrb[23].mxu0  ;;  %v1768_v58 = vsel %vm1366_vm8, %v4786_v50, -inf }
 0x33b   : > { %1769 = vmax.xlane.f32.xlu0 %v1768_v58 }
 0x33c   : > { %v1771_v45 = vsel %vm1370_vm9, %v4789_v55, -inf }
 0x33d   : > { %1772 = vmax.xlane.f32.xlu1 %v1771_v45 }
 0x348   : > { %v1385_v59 = vpop.permute.xlu1 %1384 }
 0x349   : > { %v1392_v60 = vsub.f32 %v4691_v54, %v1385_v59 }
 0x34b   : > { %v1394_v61 = vmul.f32 1.442695, %v1392_v60 }
 0x34c   : > { %v1390_v62 = vpop.permute.xlu1 %1389 }
 0x34d   : > { %v1393_v63 = vsub.f32 %v4694_v57, %v1390_v62  ;;  %4142 = vpow2.f32 %v1394_v61  ;;  %v4100_v57 = vld [vmem:[%s5219_s8 + $0x40] sm:$0xff]  }
 0x34f   : > { %v1396_v0 = vmul.f32 1.442695, %v1393_v63 }
 0x351   : > { %4144 = vpow2.f32 %v1396_v0 }
 0x357   : > { %v1986_v3 = vpop.f32.mrb[24].mxu0  ;;  %v4800_v6 = vpop.eup %4142 }
 0x358   : > { %v3882_v4 = vpop.f32.mrb[25].mxu0  ;;  %v1987_v7 = vadd.f32 %v3405_v2, %v1986_v3 }
 0x359   : > { %v1989_v5 = vpop.f32.mrb[26].mxu0 }
 0x35a   : > { %v1990_v8 = vadd.f32 %v3405_v2, %v1989_v5  ;;  %v3883_v10 = vpop.f32.mrb[27].mxu0  ;;  %v3376_v5 = vld [vmem:[%s5220_s9 + $0x1] ss:$0 sm:$0xff] }
 0x35b   : > { %v4802_v54 = vpop.eup %4144 }
 0x35c   : > { %v1993_v11 = vpack.c.bf16 %v1990_v8, %v1987_v7  ;;  %v1428_v12 = vpack.c.bf16 %v4802_v54, %v4800_v6 }
 0x35e   : > { %3809 = vmatmul.mubr.msk.bf16.vlgmr.msra.gmra.mrb[12].mxu1 %vm1366_vm8, %v1428_v12  ;;  %v2121_v13 = vsel %vm1056_vm2, %v1993_v11, 0 }
 0x35f   : > { %3905 = vmatpush3.bf16.xpose.msra.mxu0 %v2121_v13  ;;  %3833 = vmatpush3.bf16.msra.mxu1 %v4100_v57 }
 0x360   : > { %3834 = vmatprep.subr.bf16.mxu1 %v4247_v1  ;;  %3916 = vmatprep.subr.bf16.mxu0 %v4247_v1 }
 0x361   : > { %3848 = vmatprep.mubr.msk.bf16.mxu1 %vm4248_vm0, %v4247_v1 }
 0x363   : > { %3835 = vmatpush3.bf16.msra.mxu1 %v4101_v14 }
 0x364   : > { %3836 = vmatprep.subr.bf16.mxu1 %v4247_v1 }
 0x366   : > { %3907 = vmatmul.mubr.msk.bf16.vlgmr.msra.gmra.mrb[28].mxu0 %vm1056_vm2, %v4102_v17 }
 0x367   : > { %3917 = vmatpush3.bf16.msra.mxu0 %v4103_v15  ;;  %3837 = vmatpush3.bf16.msra.mxu1 %v4104_v16 }
 0x368   : > { %3918 = vmatprep.subr.bf16.mxu0 %v4247_v1  ;;  %3838 = vmatprep.subr.bf16.mxu1 %v4247_v1 }
 0x369   : > { %3932 = vmatprep.mubr.msk.bf16.mxu0 %vm4248_vm0, %v4247_v1 }
 0x36b   : > { %3919 = vmatpush3.bf16.msra.mxu0 %v4105_v19  ;;  %3839 = vmatpush3.bf16.msra.mxu1 %v4106_v23  ;;  %v4117_v19 = vld [vmem:[%s5219_s8 + $0x80] sm:$0xff]  }
 0x36c   : > { %3920 = vmatprep.subr.bf16.mxu0 %v4247_v1  ;;  %3840 = vmatprep.subr.bf16.mxu1 %v4247_v1 }
 0x36f   : > { %3921 = vmatpush3.bf16.msra.mxu0 %v4107_v27  ;;  %3841 = vmatpush3.bf16.msra.mxu1 %v4108_v28 }
 0x370   : > { %3922 = vmatprep.subr.bf16.mxu0 %v4247_v1  ;;  %3842 = vmatprep.subr.bf16.mxu1 %v4247_v1 }
 0x373   : > { %3923 = vmatpush3.bf16.msra.mxu0 %v4109_v29  ;;  %3843 = vmatpush3.bf16.msra.mxu1 %v4110_v30 }
 0x374   : > { %3924 = vmatprep.subr.bf16.mxu0 %v4247_v1  ;;  %3844 = vmatprep.subr.bf16.mxu1 %v4247_v1 }
 0x377   : > { %3925 = vmatpush3.bf16.msra.mxu0 %v4111_v31  ;;  %3845 = vmatpush3.bf16.msra.mxu1 %v4112_v32  ;;  %v4118_v31 = vld [vmem:[%s5219_s8 + $0x88] sm:$0xff]  }
 0x378   : > { %3926 = vmatprep.subr.bf16.mxu0 %v4247_v1  ;;  %3846 = vmatprep.subr.bf16.mxu1 %v4247_v1 }
 0x37b   : > { %3927 = vmatpush3.bf16.msra.mxu0 %v4113_v33  ;;  %3847 = vmatpush3.bf16.msra.mxu1 %v4114_v34  ;;  %v4120_v33 = vld [vmem:[%s5219_s8 + $0x90] sm:$0xff]   ;;  %v4119_v34 = vld [vmem:[#allocation2 + $0x18] sm:$0x1f]  }
 0x37c   : > { %3928 = vmatprep.subr.bf16.mxu0 %v4247_v1  ;;  %3858 = vmatprep.subr.bf16.mxu1 %v4247_v1 }
 0x37e   : > { %3849 = vmatmul.mubr.bf16.vlgmr.msra.gmra.mrb[16].mxu1 %v4479_v26 }
 0x37f   : > { %3929 = vmatpush3.bf16.msra.mxu0 %v4115_v35  ;;  %3860 = vmatprep.mubr.msk.bf16.mxu1 %vm4248_vm0, %v4247_v1  ;;  %v4121_v35 = vld [vmem:[%s5219_s8 + $0x98] sm:$0xff]  }
 0x380   : > { %3930 = vmatprep.subr.bf16.mxu0 %v4247_v1 }
 0x383   : > { %3931 = vmatpush3.bf16.msra.mxu0 %v4116_v36  ;;  %v4122_v36 = vld [vmem:[%s5219_s8 + $0xa0] sm:$0xff]  }
 0x384   : > { %3956 = vmatprep.subr.bf16.mxu0 %v4247_v1 }
 0x386   : > { %3933 = vmatmul.mubr.bf16.vlgmr.msra.gmra.mrb[32].mxu0 %v4479_v26 }
 0x387   : > { %3958 = vmatprep.mubr.msk.bf16.mxu0 %vm4248_vm0, %v4247_v1 }
 0x3c8   : > { %v1770_v38 = vpop.xlane.xlu0 %1769 }
 0x3c9   : > { %v4889_v40 = vmax.f32 %v4884_v37, %v1770_v38  ;;  %v4123_v38 = vld [vmem:[%s5219_s8 + $0xa8] sm:$0xff]  }
 0x3ca   : > { %v1773_v41 = vpop.xlane.xlu1 %1772 }
 0x3cb   : > { %v1776_v42 = vsub.f32 %v4884_v37, %v4889_v40  ;;  %1877 = vst.msk [vmem:[#allocation3 + $0x10] sm:$0xff] %vm1038_vm6, %v4889_v40  ;;  %v4896_v9 = vmax.f32 %v4886_v39, %v1773_v41  ;;  %1784 = vperm.xlu0 %4031, %v4889_v40   ;;  %v4124_v41 = vld [vmem:[%s5219_s8 + $0xb0] sm:$0xff]  }
 0x3cd   : > { %v1777_v43 = vsub.f32 %v4886_v39, %v4896_v9  ;;  %1878 = vst.msk [vmem:[#allocation3 + $0x18] sm:$0x1] %vm1040_vm10, %v4896_v9  ;;  %1789 = vperm.xlu1 %4030, %v4896_v9   ;;  %v1398_v39 = vld [vmem:[#allocation4] sm:$0xff] }
 0x431   : > { %v4904_v44 = vpop.f32.mrb[12].mxu1 }
 0x432   : > { %v3810_v46 = vpop.f32.mrb[13].mxu1 }
 0x433   : > { %v4906_v47 = vpop.f32.mrb[14].mxu1  ;;  %v4125_v46 = vld [vmem:[%s5219_s8 + $0xb8] sm:$0xff]  }
 0x434   : > { %v3811_v48 = vpop.f32.mrb[15].mxu1 }
 0x435   : > { %v4976_v48 = vld [vmem:[#allocation3 + $0x20] sm:$0xff] }
 0x439   : > { %v2157_v51 = vpop.f32.mrb[28].mxu0 }
 0x43a   : > { %v4909_v53 = vadd.f32 %v2157_v51, %v4688_v52  ;;  %v3908_v56 = vpop.f32.mrb[29].mxu0 }
 0x43b   : > { %v2160_v58 = vpop.f32.mrb[30].mxu0  ;;  %v4978_v56 = vld [vmem:[#allocation3 + $0x28] sm:$0x1] }
 0x43c   : > { %v4912_v45 = vadd.f32 %v2160_v58, %v4688_v52  ;;  %v3909_v59 = vpop.f32.mrb[31].mxu0  ;;  %v2167_v60 = vsel %vm1366_vm8, %v4909_v53, -inf }
 0x43d   : > { %2168 = vmax.xlane.f32.xlu0 %v2167_v60 }
 0x43e   : > { %v2170_v61 = vsel %vm1370_vm9, %v4912_v45, -inf }
 0x43f   : > { %2171 = vmax.xlane.f32.xlu1 %v2170_v61 }
 0x44a   : > { %v1785_v62 = vpop.permute.xlu0 %1784 }
 0x44b   : > { %v1792_v63 = vsub.f32 %v4786_v50, %v1785_v62  ;;  %v3460_v50 = vld [vmem:[%s5218_s7 + $0x3] ss:$0 sm:$0xff] }
 0x44c   : > { %v1790_v0 = vpop.permute.xlu1 %1789 }
 0x44d   : > { %v1794_v2 = vmul.f32 1.442695, %v1792_v63  ;;  %v1793_v3 = vsub.f32 %v4789_v55, %v1790_v0 }
 0x44f   : > { %v1796_v4 = vmul.f32 1.442695, %v1793_v3  ;;  %4146 = vpow2.f32 %v1794_v2 }
 0x451   : > { %4148 = vpow2.f32 %v1796_v4  ;;  %v1702_v7 = vpop.f32.mrb[16].mxu1 }
 0x452   : > { %v1703_v8 = vadd.f32 %v3376_v5, %v1702_v7  ;;  %v3850_v10 = vpop.f32.mrb[17].mxu1 }
 0x453   : > { %v1705_v57 = vpop.f32.mrb[18].mxu1 }
 0x454   : > { %v1706_v11 = vadd.f32 %v3376_v5, %v1705_v57  ;;  %v3851_v12 = vpop.f32.mrb[19].mxu1 }
 0x456   : > { %v1709_v13 = vpack.c.bf16 %v1706_v11, %v1703_v8 }
 0x458   : > { %3859 = vmatpush3.bf16.msra.mxu1 %v1709_v13 }
 0x459   : > { %v2385_v55 = vpop.f32.mrb[32].mxu0  ;;  %3884 = vmatprep.subr.bf16.mxu1 %v4247_v1  ;;  %v4927_v14 = vpop.eup %4146 }
 0x45a   : > { %v3934_v15 = vpop.f32.mrb[33].mxu0  ;;  %v2386_v23 = vadd.f32 %v3460_v50, %v2385_v55 }
 0x45b   : > { %v4929_v16 = vpop.eup %4148  ;;  %v2388_v17 = vpop.f32.mrb[34].mxu0 }
 0x45c   : > { %v2389_v27 = vadd.f32 %v3460_v50, %v2388_v17  ;;  %v3935_v28 = vpop.f32.mrb[35].mxu0  ;;  %v1828_v29 = vpack.c.bf16 %v4929_v16, %v4927_v14 }
 0x45e   : > { %v2392_v30 = vpack.c.bf16 %v2389_v27, %v2386_v23  ;;  %3861 = vmatmul.mubr.msk.bf16.vlgmr.msra.gmra.mrb[20].mxu1 %vm1366_vm8, %v1828_v29 }
 0x45f   : > { %3885 = vmatpush3.bf16.msra.mxu1 %v4117_v19  ;;  %3900 = vmatprep.mubr.msk.bf16.mxu1 %vm4248_vm0, %v4247_v1 }
 0x460   : > { %v2520_v32 = vsel %vm1056_vm2, %v2392_v30, 0  ;;  %3886 = vmatprep.subr.bf16.mxu1 %v4247_v1 }
 0x461   : > { %3957 = vmatpush3.bf16.xpose.msra.mxu0 %v2520_v32 }
 0x462   : > { %3968 = vmatprep.subr.bf16.mxu0 %v4247_v1 }
 0x463   : > { %3887 = vmatpush3.bf16.msra.mxu1 %v4118_v31 }
 0x464   : > { %3888 = vmatprep.subr.bf16.mxu1 %v4247_v1 }
 0x467   : > { %3889 = vmatpush3.bf16.msra.mxu1 %v4120_v33 }
 0x468   : > { %3959 = vmatmul.mubr.msk.bf16.vlgmr.msra.gmra.mrb[36].mxu0 %vm1056_vm2, %v4119_v34  ;;  %3890 = vmatprep.subr.bf16.mxu1 %v4247_v1  ;;  %v4127_v34 = vld [vmem:[%s5219_s8 + $0xc8] sm:$0xff]  }
 0x469   : > { %3972 = vmatprep.mubr.msk.bf16.mxu0 %vm4248_vm0, %v4247_v1 }
 0x46b   : > { %3891 = vmatpush3.bf16.msra.mxu1 %v4121_v35  ;;  %v4128_v35 = vld [vmem:[%s5219_s8 + $0xd0] sm:$0xff]  }
 0x46c   : > { %3892 = vmatprep.subr.bf16.mxu1 %v4247_v1 }
 0x46f   : > { %3893 = vmatpush3.bf16.msra.mxu1 %v4122_v36  ;;  %v4129_v36 = vld [vmem:[%s5219_s8 + $0xd8] sm:$0xff]  }
 0x470   : > { %3894 = vmatprep.subr.bf16.mxu1 %v4247_v1 }
 0x473   : > { %3895 = vmatpush3.bf16.msra.mxu1 %v4123_v38  ;;  %v4130_v38 = vld [vmem:[%s5219_s8 + $0xe0] sm:$0xff]  }
 0x474   : > { %3896 = vmatprep.subr.bf16.mxu1 %v4247_v1 }
 0x477   : > { %3897 = vmatpush3.bf16.msra.mxu1 %v4124_v41  ;;  %v4131_v41 = vld [vmem:[%s5219_s8 + $0xe8] sm:$0xff]  }
 0x478   : > { %3898 = vmatprep.subr.bf16.mxu1 %v4247_v1 }
 0x47b   : > { %3899 = vmatpush3.bf16.msra.mxu1 %v4125_v46  ;;  %v4132_v46 = vld [vmem:[%s5219_s8 + $0xf0] sm:$0xff]  }
 0x47c   : > { %3910 = vmatprep.subr.bf16.mxu1 %v4247_v1 }
 0x47e   : > { %3901 = vmatmul.mubr.bf16.vlgmr.msra.gmra.mrb[24].mxu1 %v4479_v26 }
 0x47f   : > { %3912 = vmatprep.mubr.msk.bf16.mxu1 %vm4248_vm0, %v4247_v1 }
 0x4ca   : > { %v2169_v51 = vpop.xlane.xlu0 %2168 }
 0x4cb   : > { %v4981_v58 = vmax.f32 %v4976_v48, %v2169_v51  ;;  %v4133_v51 = vld [vmem:[%s5219_s8 + $0xf8] sm:$0xff]  }
 0x4cc   : > { %v2172_v59 = vpop.xlane.xlu1 %2171 }
 0x4cd   : > { %v2175_v60 = vsub.f32 %v4976_v48, %v4981_v58  ;;  %2276 = vst.msk [vmem:[#allocation3 + $0x20] sm:$0xff] %vm1038_vm6, %v4981_v58  ;;  %v4988_v26 = vmax.f32 %v4978_v56, %v2172_v59  ;;  %2183 = vperm.xlu0 %4031, %v4981_v58   ;;  %v4194_v59 = vld [vmem:[%s4383_s0] sm:$0xff]   ;;  %v1799_v48 = vld [vmem:[#allocation4 + $0x10] sm:$0xff] }
 0x4cf   : > { %v2176_v61 = vsub.f32 %v4978_v56, %v4988_v26  ;;  %2277 = vst.msk [vmem:[#allocation3 + $0x28] sm:$0x1] %vm1040_vm10, %v4988_v26  ;;  %2188 = vperm.xlu1 %4030, %v4988_v26   ;;  %v2177_v21 = vmul.f32 1.442695, %v2175_v60 }
 0x4d1   : > { %v2179_v18 = vmul.f32 1.442695, %v2176_v61  ;;  %v1399_v61 = vld [vmem:[#allocation4 + $0x8] sm:$0x1] }
 0x531   : > { %v4996_v62 = vpop.f32.mrb[20].mxu1 }
 0x532   : > { %v3862_v63 = vpop.f32.mrb[21].mxu1 }
 0x533   : > { %v4998_v0 = vpop.f32.mrb[22].mxu1  ;;  %v5054_v63 = vld [vmem:[#allocation3 + $0x30] sm:$0xff] }
 0x534   : > { %v3863_v2 = vpop.f32.mrb[23].mxu1 }
 0x53b   : > { %v2556_v3 = vpop.f32.mrb[36].mxu0 }
 0x53c   : > { %v5001_v4 = vadd.f32 %v2556_v3, %v4688_v52  ;;  %v3960_v5 = vpop.f32.mrb[37].mxu0  ;;  %v5056_v3 = vld [vmem:[#allocation3 + $0x38] sm:$0x1] }
 0x53d   : > { %v2559_v7 = vpop.f32.mrb[38].mxu0 }
 0x53e   : > { %v5004_v8 = vadd.f32 %v2559_v7, %v4688_v52  ;;  %v3961_v10 = vpop.f32.mrb[39].mxu0  ;;  %v2566_v57 = vsel %vm1366_vm8, %v5001_v4, -inf  ;;  %v3431_v52 = vld [vmem:[%s5220_s9 + $0x2] ss:$0 sm:$0xff] }
 0x53f   : > { %2567 = vmax.xlane.f32.xlu0 %v2566_v57 }
 0x540   : > { %v2569_v11 = vsel %vm1370_vm9, %v5004_v8, -inf }
 0x541   : > { %2570 = vmax.xlane.f32.xlu1 %v2569_v11 }
 0x54c   : > { %v2184_v12 = vpop.permute.xlu0 %2183 }
 0x54d   : > { %v2191_v13 = vsub.f32 %v4909_v53, %v2184_v12  ;;  %v1402_v12 = vsel %vm1366_vm8, %v4800_v6, 0.0 }
 0x54e   : > { %v2189_v50 = vpop.permute.xlu1 %2188 }
 0x54f   : > { %v2193_v55 = vmul.f32 1.442695, %v2191_v13  ;;  %v2192_v15 = vsub.f32 %v4912_v45, %v2189_v50  ;;  %v4126_v45 = vld [vmem:[%s5219_s8 + $0xc0] sm:$0xff]   ;;  %v1803_v13 = vsel %vm1366_vm8, %v4927_v14, 0.0  ;;  %v1405_v50 = vsel %vm1370_vm9, %v4802_v54, 0.0 }
 0x551   : > { %v2195_v17 = vmul.f32 1.442695, %v2192_v15  ;;  %v2101_v19 = vpop.f32.mrb[24].mxu1  ;;  %4150 = vpow2.f32 %v2193_v55  ;;  %v1806_v55 = vsel %vm1370_vm9, %v4929_v16, 0.0 }
 0x552   : > { %v2102_v23 = vadd.f32 %v3431_v52, %v2101_v19  ;;  %v3902_v27 = vpop.f32.mrb[25].mxu1 }
 0x553   : > { %4152 = vpow2.f32 %v2195_v17  ;;  %v2104_v28 = vpop.f32.mrb[26].mxu1 }
 0x554   : > { %v2105_v29 = vadd.f32 %v3431_v52, %v2104_v28  ;;  %v3903_v30 = vpop.f32.mrb[27].mxu1 }
 0x556   : > { %v2108_v31 = vpack.c.bf16 %v2105_v29, %v2102_v23  ;;  %v3486_v29 = vld [vmem:[%s5220_s9 + $0x3] ss:$0 sm:$0xff] }
 0x558   : > { %3911 = vmatpush3.bf16.msra.mxu1 %v2108_v31 }
 0x559   : > { %3936 = vmatprep.subr.bf16.mxu1 %v4247_v1 }
 0x55b   : > { %v4151_v53 = vpop.eup %4150 }
 0x55c   : > { %v2202_v52 = vsel %vm1366_vm8, %v4151_v53, 0.0 }
 0x55d   : > { %v4153_v32 = vpop.eup %4152 }
 0x55e   : > { %v2227_v33 = vpack.c.bf16 %v4153_v32, %v4151_v53  ;;  %v2205_v15 = vsel %vm1370_vm9, %v4153_v32, 0.0 }
 0x560   : > { %3913 = vmatmul.mubr.msk.bf16.vlgmr.msra.gmra.mrb[28].mxu1 %vm1366_vm8, %v2227_v33 }
 0x561   : > { %3937 = vmatpush3.bf16.msra.mxu1 %v4126_v45  ;;  %3952 = vmatprep.mubr.msk.bf16.mxu1 %vm4248_vm0, %v4247_v1 }
 0x562   : > { %3938 = vmatprep.subr.bf16.mxu1 %v4247_v1 }
 0x565   : > { %3939 = vmatpush3.bf16.msra.mxu1 %v4127_v34 }
 0x566   : > { %3940 = vmatprep.subr.bf16.mxu1 %v4247_v1 }
 0x569   : > { %3941 = vmatpush3.bf16.msra.mxu1 %v4128_v35 }
 0x56a   : > { %3942 = vmatprep.subr.bf16.mxu1 %v4247_v1 }
 0x56d   : > { %3943 = vmatpush3.bf16.msra.mxu1 %v4129_v36 }
 0x56e   : > { %3944 = vmatprep.subr.bf16.mxu1 %v4247_v1 }
 0x571   : > { %3945 = vmatpush3.bf16.msra.mxu1 %v4130_v38 }
 0x572   : > { %3946 = vmatprep.subr.bf16.mxu1 %v4247_v1 }
 0x575   : > { %3947 = vmatpush3.bf16.msra.mxu1 %v4131_v41 }
 0x576   : > { %3948 = vmatprep.subr.bf16.mxu1 %v4247_v1 }
 0x579   : > { %3949 = vmatpush3.bf16.msra.mxu1 %v4132_v46  ;;  %v1380_v46 = vmul.f32 1.442695, %v1377_v25 }
 0x57a   : > { %3950 = vmatprep.subr.bf16.mxu1 %v4247_v1 }
 0x57d   : > { %3951 = vmatpush3.bf16.msra.mxu1 %v4133_v51  ;;  %v1378_v51 = vmul.f32 1.442695, %v1376_v22 }
 0x57e   : > { %3962 = vmatprep.subr.bf16.mxu1 %v4247_v1 }
 0x580   : > { %3953 = vmatmul.mubr.bf16.vlgmr.msra.gmra.mrb[32].mxu1 %v4194_v59  ;;  %v1778_v59 = vmul.f32 1.442695, %v1776_v42 }
 0x581   : > { %3964 = vmatprep.mubr.msk.bf16.mxu1 %vm4248_vm0, %v4247_v1 }
 0x5cc   : > { %v2568_v2 = vpop.xlane.xlu0 %2567 }
 0x5cd   : > { %v5059_v5 = vmax.f32 %v5054_v63, %v2568_v2 }
 0x5ce   : > { %v2571_v7 = vpop.xlane.xlu1 %2570 }
 0x5cf   : > { %v2574_v10 = vsub.f32 %v5054_v63, %v5059_v5  ;;  %2675 = vst.msk [vmem:[#allocation3 + $0x30] sm:$0xff] %vm1038_vm6, %v5059_v5  ;;  %v2573_v57 = vmax.f32 %v5056_v3, %v2571_v7  ;;  %2582 = vperm.xlu0 %4031, %v5059_v5   ;;  %v1780_v63 = vmul.f32 1.442695, %v1777_v43 }
 0x5d1   : > { %v2575_v11 = vsub.f32 %v5056_v3, %v2573_v57  ;;  %2676 = vst.msk [vmem:[#allocation3 + $0x38] sm:$0x1] %vm1040_vm10, %v2573_v57  ;;  %2587 = vperm.xlu1 %4030, %v2573_v57   ;;  %v2576_v20 = vmul.f32 1.442695, %v2574_v10  ;;  %v1800_v3 = vld [vmem:[#allocation4 + $0x18] sm:$0x1] }
 0x5d3   : > { %v2578_v24 = vmul.f32 1.442695, %v2575_v11 }
 0x5ee   : > { %1403 = vadd.xlane.f32.xlu0 %v1402_v12  ;;  %v2199_v12 = vld [vmem:[#allocation4 + $0x28] sm:$0x1] }
 0x5f2   : > { %1804 = vadd.xlane.f32.xlu0 %v1803_v13 }
 0x5f5   : > { %1406 = vadd.xlane.f32.xlu1 %v1405_v50 }
 0x5f6   : > { %1807 = vadd.xlane.f32.xlu0 %v1806_v55  ;;  %v2198_v55 = vld [vmem:[#allocation4 + $0x20] sm:$0xff] }
 0x5f9   : > { %2206 = vadd.xlane.f32.xlu1 %v2205_v15 }
 0x5fa   : > { %2203 = vadd.xlane.f32.xlu0 %v2202_v52 }
 0x633   : > { %v5079_v6 = vpop.f32.mrb[28].mxu1 }
 0x634   : > { %v3914_v17 = vpop.f32.mrb[29].mxu1 }
 0x635   : > { %v5081_v19 = vpop.f32.mrb[30].mxu1 }
 0x636   : > { %v3915_v14 = vpop.f32.mrb[31].mxu1 }
 0x64e   : > { %v2583_v23 = vpop.permute.xlu0 %2582 }
 0x64f   : > { %v2590_v54 = vsub.f32 %v5001_v4, %v2583_v23 }
 0x650   : > { %v2588_v27 = vpop.permute.xlu1 %2587 }
 0x651   : > { %v2592_v28 = vmul.f32 1.442695, %v2590_v54  ;;  %v2591_v16 = vsub.f32 %v5004_v8, %v2588_v27 }
 0x653   : > { %4154 = vpow2.f32 %v2592_v28  ;;  %v2594_v30 = vmul.f32 1.442695, %v2591_v16  ;;  %v2500_v31 = vpop.f32.mrb[32].mxu1 }
 0x654   : > { %v2501_v53 = vadd.f32 %v3486_v29, %v2500_v31  ;;  %v3954_v32 = vpop.f32.mrb[33].mxu1 }
 0x655   : > { %4156 = vpow2.f32 %v2594_v30  ;;  %v2503_v45 = vpop.f32.mrb[34].mxu1 }
 0x656   : > { %v2504_v33 = vadd.f32 %v3486_v29, %v2503_v45  ;;  %v3955_v34 = vpop.f32.mrb[35].mxu1  ;;  %4158 = vpow2.f32 %v1380_v46  ;;  %v4134_v45 = vld [vmem:[%s5221_s10] sm:$0xff]   ;;  %v2597_v46 = vld [vmem:[#allocation4 + $0x30] sm:$0xff] }
 0x657   : > { %4160 = vpow2.f32 %v1378_v51  ;;  %3969 = vmatpush3.bf16.msra.mxu0 %v4134_v45  ;;  %v2598_v51 = vld [vmem:[#allocation4 + $0x38] sm:$0x1]  ;;  %v4139_v45 = vld [vmem:[%s5221_s10 + $0x28] sm:$0xff]  }
 0x658   : > { %v2507_v35 = vpack.c.bf16 %v2504_v33, %v2501_v53  ;;  %4162 = vpow2.f32 %v1778_v59  ;;  %3970 = vmatprep.subr.bf16.mxu0 %v4247_v1 }
 0x659   : > { %4164 = vpow2.f32 %v1780_v63 }
 0x65a   : > { %3963 = vmatpush3.bf16.msra.mxu1 %v2507_v35  ;;  %4166 = vpow2.f32 %v2177_v21  ;;  %v4135_v35 = vld [vmem:[%s5221_s10 + $0x8] sm:$0xff]  }
 0x65b   : > { %3976 = vmatprep.subr.bf16.mxu1 %v4247_v1  ;;  %4168 = vpow2.f32 %v2179_v18  ;;  %3971 = vmatpush3.bf16.msra.mxu0 %v4135_v35 }
 0x65c   : > { %4170 = vpow2.f32 %v2576_v20  ;;  %3984 = vmatprep.subr.bf16.mxu0 %v4247_v1 }
 0x65d   : > { %v4155_v4 = vpop.eup %4154  ;;  %4172 = vpow2.f32 %v2578_v24  ;;  %v1415_v24 = vld [vmem:[#allocation5 + $0x8] sm:$0x1] }
 0x65e   : > { %v2601_v8 = vsel %vm1366_vm8, %v4155_v4, 0.0 }
 0x65f   : > { %v4157_v36 = vpop.eup %4156  ;;  %2602 = vadd.xlane.f32.xlu0 %v2601_v8 }
 0x660   : > { %v2604_v38 = vsel %vm1370_vm9, %v4157_v36, 0.0  ;;  %v2626_v41 = vpack.c.bf16 %v4157_v36, %v4155_v4  ;;  %v4159_v22 = vpop.eup %4158  ;;  %v4136_v4 = vld [vmem:[%s5221_s10 + $0x10] sm:$0xff]   ;;  %v4137_v36 = vld [vmem:[%s5221_s10 + $0x18] sm:$0xff]  }
 0x661   : > { %2605 = vadd.xlane.f32.xlu1 %v2604_v38  ;;  %v4161_v25 = vpop.eup %4160  ;;  %v1401_v10 = vmul.f32 %v4159_v22, %v1399_v61 }
 0x662   : > { %3965 = vmatmul.mubr.msk.bf16.vlgmr.msra.gmra.mrb[36].mxu1 %vm1366_vm8, %v2626_v41  ;;  %v4163_v37 = vpop.eup %4162  ;;  %v1400_v9 = vmul.f32 %v4161_v25, %v1398_v39 }
 0x663   : > { %3980 = vmatprep.mubr.msk.bf16.mxu1 %vm4248_vm0, %v4247_v1  ;;  %v4165_v40 = vpop.eup %4164  ;;  %v1801_v26 = vmul.f32 %v4163_v37, %v1799_v48  ;;  %3977 = vmatpush3.bf16.msra.mxu1 %v4136_v4 }
 0x664   : > { %v4167_v42 = vpop.eup %4166  ;;  %v1802_v11 = vmul.f32 %v4165_v40, %v1800_v3  ;;  %3978 = vmatprep.subr.bf16.mxu1 %v4247_v1 }
 0x665   : > { %v4169_v56 = vpop.eup %4168  ;;  %v2200_v23 = vmul.f32 %v4167_v42, %v2198_v55 }
 0x666   : > { %v5112_v60 = vpop.eup %4170  ;;  %v2201_v52 = vmul.f32 %v4169_v56, %v2199_v12 }
 0x667   : > { %v5116_v5 = vpop.eup %4172  ;;  %3979 = vmatpush3.bf16.msra.mxu1 %v4137_v36  ;;  %v2599_v59 = vmul.f32 %v5112_v60, %v2597_v46 }
 0x668   : > { %3992 = vmatprep.subr.bf16.mxu1 %v4247_v1  ;;  %v2600_v18 = vmul.f32 %v5116_v5, %v2598_v51  ;;  %v2612_v51 = vld [vmem:[#allocation5 + $0x30] sm:$0xff] }
 0x672   : > { %1423 = vperm.xlu1 %4030, %v4159_v22  }
 0x675   : > { %1418 = vperm.xlu0 %4031, %v4161_v25  }
 0x676   : > { %1818 = vperm.xlu1 %4030, %v4163_v37   ;;  %v1414_v37 = vld [vmem:[#allocation5] sm:$0xff] }
 0x679   : > { %1823 = vperm.xlu0 %4031, %v4165_v40  }
 0x67a   : > { %2217 = vperm.xlu1 %4030, %v4167_v42   ;;  %v1814_v42 = vld [vmem:[#allocation5 + $0x10] sm:$0xff] }
 0x67b   : > { %v1404_v43 = vpop.xlane.xlu0 %1403 }
 0x67c   : > { %v1408_v58 = vadd.f32 %v1404_v43, %v1400_v9 }
 0x67d   : > { %2222 = vperm.xlu0 %4031, %v4169_v56   ;;  %v1815_v56 = vld [vmem:[#allocation5 + $0x18] sm:$0x1] }
 0x67e   : > { %1411 = vst.msk [vmem:[#allocation4] sm:$0xff] %vm1038_vm6, %v1408_v58  ;;  %2616 = vperm.xlu1 %4030, %v5112_v60  }
 0x67f   : > { %v1805_v2 = vpop.xlane.xlu0 %1804 }
 0x680   : > { %v1809_v7 = vadd.f32 %v1805_v2, %v1801_v26  ;;  %v2213_v2 = vld [vmem:[#allocation5 + $0x20] sm:$0xff] }
 0x681   : > { %2621 = vperm.xlu0 %4031, %v5116_v5  }
 0x682   : > { %1811 = vst.msk [vmem:[#allocation4 + $0x10] sm:$0xff] %vm1038_vm6, %v1809_v7  ;;  %v1407_v57 = vpop.xlane.xlu1 %1406 }
 0x683   : > { %v1409_v13 = vadd.f32 %v1407_v57, %v1401_v10  ;;  %v1808_v50 = vpop.xlane.xlu0 %1807  ;;  %v2214_v10 = vld [vmem:[#allocation5 + $0x28] sm:$0x1] }
 0x684   : > { %v1810_v15 = vadd.f32 %v1808_v50, %v1802_v11 }
 0x685   : > { %1413 = vst.msk [vmem:[#allocation4 + $0x8] sm:$0x1] %vm1040_vm10, %v1409_v13  ;;  %v2683_v17 = vld [vmem:[#allocation4] sm:$0xff] }
 0x686   : > { %1812 = vst.msk [vmem:[#allocation4 + $0x18] sm:$0x1] %vm1040_vm10, %v1810_v15  ;;  %v2207_v14 = vpop.xlane.xlu1 %2206  ;;  %4174 = vrcp.f32 %v2683_v17 }
 0x687   : > { %v2209_v54 = vadd.f32 %v2207_v14, %v2201_v52  ;;  %v2204_v27 = vpop.xlane.xlu0 %2203 }
 0x688   : > { %v2208_v28 = vadd.f32 %v2204_v27, %v2200_v23 }
 0x689   : > { %2211 = vst.msk [vmem:[#allocation4 + $0x28] sm:$0x1] %vm1040_vm10, %v2209_v54  ;;  %v2770_v16 = vld [vmem:[#allocation4 + $0x10] sm:$0xff] }
 0x68a   : > { %2210 = vst.msk [vmem:[#allocation4 + $0x20] sm:$0xff] %vm1038_vm6, %v2208_v28  ;;  %4176 = vrcp.f32 %v2770_v16  ;;  %v4138_v28 = vld [vmem:[%s5221_s10 + $0x20] sm:$0xff]  }
 0x68c   : > { %v2684_v29 = vld [vmem:[#allocation4 + $0x8] sm:$0x1] }
 0x68d   : > { %4178 = vrcp.f32 %v2684_v29  ;;  %v2771_v30 = vld [vmem:[#allocation4 + $0x18] sm:$0x1] }
 0x68e   : > { %4180 = vrcp.f32 %v2771_v30 }
 0x690   : > { %v4175_v31 = vpop.eup %4174  ;;  %v2853_v32 = vld [vmem:[#allocation4 + $0x28] sm:$0x1] }
 0x691   : > { %2689 = vperm.xlu1 %4030, %v4175_v31   ;;  %v2852_v53 = vld [vmem:[#allocation4 + $0x20] sm:$0xff] }
 0x692   : > { %4182 = vrcp.f32 %v2852_v53 }
 0x693   : > { %4184 = vrcp.f32 %v2853_v32 }
 0x694   : > { %v4177_v33 = vpop.eup %4176 }
 0x695   : > { %2776 = vperm.xlu1 %4030, %v4177_v33   ;;  %v4140_v33 = vld [vmem:[%s5221_s10 + $0x30] sm:$0xff]  }
 0x697   : > { %v4179_v34 = vpop.eup %4178 }
 0x698   : > { %2694 = vperm.xlu0 %4031, %v4179_v34   ;;  %v4181_v8 = vpop.eup %4180 }
 0x69c   : > { %v4183_v38 = vpop.eup %4182  ;;  %2781 = vperm.xlu0 %4031, %v4181_v8  }
 0x69d   : > { %2858 = vperm.xlu1 %4030, %v4183_v38   ;;  %v4185_v41 = vpop.eup %4184 }
 0x6a0   : > { %2863 = vperm.xlu0 %4031, %v4185_v41   ;;  %v4141_v41 = vld [vmem:[%s5221_s10 + $0x38] sm:$0xff]  }
 0x6ec   : > { %v2603_v63 = vpop.xlane.xlu0 %2602 }
 0x6ed   : > { %v2607_v21 = vadd.f32 %v2603_v63, %v2599_v59  ;;  %v2613_v59 = vld [vmem:[#allocation5 + $0x38] sm:$0x1] }
 0x6ee   : > { %v2606_v20 = vpop.xlane.xlu1 %2605 }
 0x6ef   : > { %2609 = vst.msk [vmem:[#allocation4 + $0x30] sm:$0xff] %vm1038_vm6, %v2607_v21  ;;  %v2608_v22 = vadd.f32 %v2606_v20, %v2600_v18 }
 0x6f1   : > { %2610 = vst.msk [vmem:[#allocation4 + $0x38] sm:$0x1] %vm1040_vm10, %v2608_v22 }
 0x6f2   : > { %v1424_v25 = vpop.permute.xlu1 %1423 }
 0x6f3   : > { %v1427_v39 = vmul.f32 %v1424_v25, %v1415_v24 }
 0x6f4   : > { %v1419_v40 = vpop.permute.xlu0 %1418 }
 0x6f5   : > { %v1474_v9 = vadd.f32 %v4906_v47, %v1427_v39  ;;  %v1426_v43 = vmul.f32 %v1419_v40, %v1414_v37 }
 0x6f6   : > { %v1819_v48 = vpop.permute.xlu1 %1818  ;;  %v2934_v58 = vld [vmem:[#allocation4 + $0x30] sm:$0xff] }
 0x6f7   : > { %1477 = vst.msk [vmem:[#allocation5 + $0x8] sm:$0x1] %vm645_vm1, %v1474_v9  ;;  %v1473_v60 = vadd.f32 %v4904_v44, %v1426_v43  ;;  %v1826_v26 = vmul.f32 %v1819_v48, %v1814_v42  ;;  %4186 = vrcp.f32 %v2934_v58  ;;  %v3501_v58 = vld [vmem:[%s5222_s11] ss:$0 sm:$0xff] }
 0x6f8   : > { %v1824_v61 = vpop.permute.xlu0 %1823  ;;  %v2935_v3 = vld [vmem:[#allocation4 + $0x38] sm:$0x1] }
 0x6f9   : > { %1475 = vst.msk [vmem:[#allocation5] sm:$0xff] %vm1056_vm2, %v1473_v60  ;;  %v1873_v5 = vadd.f32 %v4996_v62, %v1826_v26  ;;  %v1827_v7 = vmul.f32 %v1824_v61, %v1815_v56  ;;  %4188 = vrcp.f32 %v2935_v3 }
 0x6fa   : > { %v2218_v47 = vpop.permute.xlu1 %2217 }
 0x6fb   : > { %1875 = vst.msk [vmem:[#allocation5 + $0x10] sm:$0xff] %vm1056_vm2, %v1873_v5  ;;  %v1874_v57 = vadd.f32 %v4998_v0, %v1827_v7  ;;  %v2225_v11 = vmul.f32 %v2218_v47, %v2213_v2 }
 0x6fc   : > { %v2223_v12 = vpop.permute.xlu0 %2222 }
 0x6fd   : > { %1876 = vst.msk [vmem:[#allocation5 + $0x18] sm:$0x1] %vm645_vm1, %v1874_v57  ;;  %v2272_v44 = vadd.f32 %v5079_v6, %v2225_v11  ;;  %v2226_v13 = vmul.f32 %v2223_v12, %v2214_v10 }
 0x6fe   : > { %v2617_v15 = vpop.permute.xlu1 %2616  ;;  %v2682_v14 = vld [vmem:[#allocation5 + $0x8] sm:$0x1] }
 0x6ff   : > { %2274 = vst.msk [vmem:[#allocation5 + $0x20] sm:$0xff] %vm1056_vm2, %v2272_v44  ;;  %v2273_v50 = vadd.f32 %v5081_v19, %v2226_v13  ;;  %v2624_v63 = vmul.f32 %v2617_v15, %v2612_v51 }
 0x700   : > { %v2622_v52 = vpop.permute.xlu0 %2621  ;;  %v2681_v17 = vld [vmem:[#allocation5] sm:$0xff] }
 0x701   : > { %v4187_v62 = vpop.eup %4186  ;;  %2275 = vst.msk [vmem:[#allocation5 + $0x28] sm:$0x1] %vm645_vm1, %v2273_v50  ;;  %v2625_v18 = vmul.f32 %v2622_v52, %v2613_v59  ;;  %v3014_v52 = vld [vmem:[%s4377_s19] sm:$0xf] }
 0x702   : > { %2940 = vperm.xlu1 %4030, %v4187_v62   ;;  %v2768_v16 = vld [vmem:[#allocation5 + $0x10] sm:$0xff] }
 0x703   : > { %v4189_v55 = vpop.eup %4188 }
 0x704   : > { %2945 = vperm.xlu0 %4031, %v4189_v55   ;;  %v2769_v29 = vld [vmem:[#allocation5 + $0x18] sm:$0x1] }
 0x706   : > { %v2850_v35 = vld [vmem:[#allocation5 + $0x20] sm:$0xff] }
 0x708   : > { %v2851_v4 = vld [vmem:[#allocation5 + $0x28] sm:$0x1] }
 0x710   : > { %v2690_v0 = vpop.permute.xlu1 %2689 }
 0x711   : > { %v2697_v54 = vmul.f32 %v2690_v0, %v2681_v17  ;;  %v3015_v0 = vld [vmem:[%s4377_s19 + $0x4] sm:$0x1]  ;;  %v3016_v17 = vunpack.c.l.bf16 %v3014_v52  ;;  %s3071_s19 = sld [smem:[#allocation7 + %s4235_s1]] }
 0x714   : > { %v2777_v6 = vpop.permute.xlu1 %2776 }
 0x715   : > { %v2784_v31 = vmul.f32 %v2777_v6, %v2768_v16 }
 0x717   : > { %v2695_v23 = vpop.permute.xlu0 %2694 }
 0x718   : > { %v2698_v27 = vmul.f32 %v2695_v23, %v2682_v14 }
 0x71a   : > { %v2699_v19 = vpack.c.bf16 %v2698_v27, %v2697_v54  ;;  %v3017_v27 = vunpack.c.l.bf16 %v3015_v0 }
 0x71b   : > { %v2782_v30 = vpop.permute.xlu0 %2781 }
 0x71c   : > { %v2785_v53 = vmul.f32 %v2782_v30, %v2769_v29  ;;  %3973 = vmatmul.mubr.msk.bf16.vlgmr.msra.gmra.mrb[40].mxu0 %vm1056_vm2, %v2699_v19  ;;  %v2859_v32 = vpop.permute.xlu1 %2858 }
 0x71d   : > { %3985 = vmatpush3.bf16.msra.mxu0 %v4138_v28  ;;  %3988 = vmatprep.mubr.msk.bf16.mxu0 %vm4248_vm0, %v4247_v1  ;;  %v2866_v36 = vmul.f32 %v2859_v32, %v2850_v35 }
 0x71e   : > { %v2786_v34 = vpack.c.bf16 %v2785_v53, %v2784_v31  ;;  %3986 = vmatprep.subr.bf16.mxu0 %v4247_v1 }
 0x71f   : > { %v2864_v8 = vpop.permute.xlu0 %2863 }
 0x720   : > { %v2867_v38 = vmul.f32 %v2864_v8, %v2851_v4  ;;  %3981 = vmatmul.mubr.msk.bf16.vlgmr.msra.gmra.mrb[40].mxu1 %vm1056_vm2, %v2786_v34 }
 0x721   : > { %3987 = vmatpush3.bf16.msra.mxu0 %v4139_v45  ;;  %3993 = vmatpush3.bf16.msra.mxu1 %v4140_v33 }
 0x722   : > { %v2868_v46 = vpack.c.bf16 %v2867_v38, %v2866_v36  ;;  %3994 = vmatprep.subr.bf16.mxu1 %v4247_v1  ;;  %3996 = vmatprep.mubr.msk.bf16.mxu1 %vm4248_vm0, %v4247_v1 }
 0x724   : > { %3989 = vmatmul.mubr.msk.bf16.vlgmr.msra.gmra.mrb[44].mxu0 %vm1056_vm2, %v2868_v46 }
 0x725   : > { %3995 = vmatpush3.bf16.msra.mxu1 %v4141_v41 }
 0x735   : > { %v2664_v21 = vpop.f32.mrb[36].mxu1 }
 0x736   : > { %v2671_v20 = vadd.f32 %v2664_v21, %v2624_v63  ;;  %v3966_v22 = vpop.f32.mrb[37].mxu1  ;;  %v3066_v63 = vshrl.u32 %v1067_v49, 7  ;;  %v3072_v21 = vstv %s3071_s19 }
 0x737   : > { %v2667_v24 = vpop.f32.mrb[38].mxu1 }
 0x738   : > { %2673 = vst.msk [vmem:[#allocation5 + $0x30] sm:$0xff] %vm1056_vm2, %v2671_v20  ;;  %v2672_v25 = vadd.f32 %v2667_v24, %v2625_v18  ;;  %v3967_v37 = vpop.f32.mrb[39].mxu1  ;;  %v3523_v20 = vld [vmem:[%s5223_s12] ss:$0 sm:$0xff]  ;;  %vm3073_vm12 = vcmp.lt.s32.totalorder %v3066_v63, %v3072_v21  ;;  %v3067_v24 = vadd.s32 8, %v3066_v63 }
 0x73a   : > { %2674 = vst.msk [vmem:[#allocation5 + $0x38] sm:$0x1] %vm645_vm1, %v2672_v25  ;;  %v3524_v25 = vld [vmem:[%s5224_s13] ss:$0 sm:$0xff]  ;;  %vm3074_vm13 = vcmp.lt.s32.totalorder %v3067_v24, %v3072_v21 }
 0x73f   : > { %v2932_v40 = vld [vmem:[#allocation5 + $0x30] sm:$0xff] }
 0x741   : > { %v2933_v42 = vld [vmem:[#allocation5 + $0x38] sm:$0x1] }
 0x781   : > { %v2941_v39 = vpop.permute.xlu1 %2940 }
 0x782   : > { %v2948_v43 = vmul.f32 %v2941_v39, %v2932_v40  ;;  %v3525_v40 = vsel %vm3073_vm12, 1.0, %v4247_v1 }
 0x783   : > { %v2946_v9 = vpop.permute.xlu0 %2945 }
 0x784   : > { %v2949_v48 = vmul.f32 %v2946_v9, %v2933_v42 }
 0x786   : > { %v2950_v56 = vpack.c.bf16 %v2949_v48, %v2948_v43  ;;  %v3526_v48 = vsel %vm3074_vm13, 1.0, %v4247_v1 }
 0x788   : > { %3997 = vmatmul.mubr.msk.bf16.vlgmr.msra.gmra.mrb[44].mxu1 %vm1056_vm2, %v2950_v56 }
 0x7ef   : > { %v2753_v60 = vpop.f32.mrb[40].mxu0 }
 0x7f0   : > { %v3974_v26 = vpop.f32.mrb[41].mxu0  ;;  %v2766_v2 = vadd.f32 %v3501_v58, %v2753_v60 }
 0x7f1   : > { %v2756_v61 = vpop.f32.mrb[42].mxu0  ;;  %v3093_v26 = vld [vmem:[%s506_s25 + $0x4] sm:$0x1] }
 0x7f2   : > { %v3975_v3 = vpop.f32.mrb[43].mxu0  ;;  %v2767_v7 = vadd.f32 %v3501_v58, %v2756_v61 }
 0x7f3   : > { %v2841_v5 = vpop.f32.mrb[40].mxu1 }
 0x7f4   : > { %v2848_v47 = vadd.f32 %v2841_v5, %v2766_v2  ;;  %v3982_v10 = vpop.f32.mrb[41].mxu1 }
 0x7f5   : > { %v2844_v57 = vpop.f32.mrb[42].mxu1 }
 0x7f6   : > { %v2849_v11 = vadd.f32 %v2844_v57, %v2767_v7  ;;  %v3983_v12 = vpop.f32.mrb[43].mxu1 }
 0x7f7   : > { %v2923_v44 = vpop.f32.mrb[44].mxu0 }
 0x7f8   : > { %v2930_v13 = vadd.f32 %v2923_v44, %v2848_v47  ;;  %v3990_v50 = vpop.f32.mrb[45].mxu0 }
 0x7f9   : > { %v2926_v62 = vpop.f32.mrb[46].mxu0 }
 0x7fa   : > { %v2931_v55 = vadd.f32 %v2926_v62, %v2849_v11  ;;  %v3991_v15 = vpop.f32.mrb[47].mxu0 }
 0x85b   : > { %v3005_v14 = vpop.f32.mrb[44].mxu1 }
 0x85c   : > { %v3012_v23 = vadd.f32 %v3005_v14, %v2930_v13  ;;  %v3998_v54 = vpop.f32.mrb[45].mxu1 }
 0x85d   : > { %v3008_v6 = vpop.f32.mrb[46].mxu1 }
 0x85e   : > { %v3013_v28 = vadd.f32 %v3008_v6, %v2931_v55  ;;  %v3999_v19 = vpop.f32.mrb[47].mxu1  ;;  %v3018_v16 = vadd.f32 %v3016_v17, %v3012_v23 }
 0x860   : > { %3022 = vadd.xlane.f32.xlu0 %v3018_v16  ;;  %v3019_v29 = vadd.f32 %v3017_v27, %v3013_v28 }
 0x862   : > { %v3025_v30 = vsel %vm3024_vm11, %v3019_v29, 0.0 }
 0x863   : > { %3026 = vadd.xlane.f32.xlu1 %v3025_v30 }
 0x8ed   : > { %v3023_v31 = vpop.xlane.xlu0 %3022 }
 0x8ee   : > { %v3029_v53 = vmul.f32 0.0078125, %v3023_v31 }
 0x8f0   : > { %v3031_v32 = vsub.f32 %v3018_v16, %v3029_v53  ;;  %v3027_v45 = vpop.xlane.xlu1 %3026 }
 0x8f1   : > { %v3030_v33 = vmul.f32 0.0078125, %v3027_v45 }
 0x8f2   : > { %v3033_v34 = vmul.f32 %v3031_v32, %v3031_v32 }
 0x8f3   : > { %v3032_v35 = vsub.f32 %v3019_v29, %v3030_v33 }
 0x8f4   : > { %3035 = vadd.xlane.f32.xlu0 %v3033_v34 }
 0x8f5   : > { %v3034_v4 = vmul.f32 %v3032_v35, %v3032_v35 }
 0x8f7   : > { %v3037_v8 = vsel %vm3024_vm11, %v3034_v4, 0.0 }
 0x8f8   : > { %3038 = vadd.xlane.f32.xlu1 %v3037_v8 }
 0x981   : > { %v3036_v36 = vpop.xlane.xlu0 %3035 }
 0x982   : > { %v3040_v38 = vmul.f32 0.0078125, %v3036_v36 }
 0x984   : > { %v3042_v41 = vadd.f32 1e-05, %v3040_v38 }
 0x985   : > { %v3039_v46 = vpop.xlane.xlu1 %3038 }
 0x986   : > { %4190 = vrsqrt.f32 %v3042_v41  ;;  %v3041_v51 = vmul.f32 0.0078125, %v3039_v46 }
 0x988   : > { %v3043_v59 = vadd.f32 1e-05, %v3041_v51 }
 0x98a   : > { %4192 = vrsqrt.f32 %v3043_v59 }
 0x990   : > { %v4191_v18 = vpop.eup %4190 }
 0x991   : > { %v3046_v22 = vmul.f32 %v4191_v18, %v3031_v32 }
 0x993   : > { %v3054_v37 = vmul.f32 %v3523_v20, %v3046_v22 }
 0x994   : > { %v4193_v39 = vpop.eup %4192 }
 0x995   : > { %v3062_v42 = vadd.f32 %v3524_v25, %v3054_v37  ;;  %v3047_v49 = vmul.f32 %v4193_v39, %v3032_v35 }
 0x997   : > { %v3079_v9 = vmul.f32 %v3525_v40, %v3062_v42  ;;  %v3055_v43 = vmul.f32 %v3523_v20, %v3047_v49 }
 0x999   : > { %v3542_v56 = vpack.c.bf16 %v3079_v9, %v3079_v9  ;;  %v3063_v58 = vadd.f32 %v3524_v25, %v3055_v43 }
 0x99b   : > { %3089 = vst [vmem:[%s506_s25] sm:$0xf] %v3542_v56  ;;  %v3080_v60 = vmul.f32 %v3526_v48, %v3063_v58 }
 0x99d   : > { %v3543_v61 = vpack.c.bf16 %v3080_v60, %v3080_v60 }
 0x99f   : > { %v3094_v2 = vsel %vm3092_vm14, %v3543_v61, %v3093_v26 }
 0x9a0   : > { %3095 = vst [vmem:[%s506_s25 + $0x4] sm:$0x1] %v3094_v2 }
 0x9a1 PF: > { %s34_s23 = sadd.s32 1, %s4243_s23   ;;  %s5229_s1 = smov %s4239_s22 }
 0x9a2   : > { %p31_p1 = scmp.ge.s32.totalorder %s34_s23, 4   ;;  %s5230_s22 = smov %s5232_s24 }
 0x9a4   :  { %33 = sbr.rel (!%p31_p1) target bundleno = 27 (0x1b), region = 145 }

</bundles_post_ra>
